<compile_context>
chip_gen: v7x
topology: tpu7x:2x2x1
jax: 0.10.0
libtpu: 0.0.40
codegen_flags: <defaults>
</compile_context>

<pallas_src>
import jax
import jax.numpy as jnp
from jax.experimental import pallas as pl
from jax.experimental.pallas import tpu as pltpu

# Hyperparameters from LSTM_AE.py
BOTTLENECK = 16   # bottleneck_channel -> LSTM input size
HIDDEN = 5        # in_channel         -> LSTM hidden size
NUM_LAYERS = 4    # num_layer_de

# Kernel layout constants
LANE = 128            # one gate slot = one full vreg of lanes
GOUT = 4 * LANE       # padded gate axis: [ i | f | o | g ]
KDIM = LANE           # fused contraction: input + h_prev share ONE 128-lane slot
TILE_B = 8            # batch rows per grid step (>=8 fills sublanes; raise toward
                      # 64-128 for single-TC throughput once batch is large)
X_OFF = 16            # layer-0 input lives in lanes 16..31


def _h_off(layer):
    """Lane offset of h/c for a given layer (alternating so layers never collide)."""
    return 0 if layer % 2 == 0 else 16


def _lstm_kernel(x_ref, w_ref, b_ref, out_ref):
    """Stacked-LSTM forward over the whole sequence, one batch tile per grid step.

    x_ref   : (S, TB, 128)  layer-0 inputs, real values in lanes X_OFF..X_OFF+IN-1
    w_ref   : (L, 128, 512) fused [W_ih ; W_hh]^T, per-layer lane offsets (pack_params)
    b_ref   : (L, 1, 512)   b_ih + b_hh in the same gate columns
    out_ref : (S, TB, 128)  doubles as the inter-layer sequence buffer; after the
                            last layer it holds top-layer h at lanes _h_off(L-1)..+H-1
    """
    S = x_ref.shape[0]
    TB = x_ref.shape[1]
    L = w_ref.shape[0]

    for l in range(L):                                    # unrolled, L = 4 (layer-major)
        bias = jnp.broadcast_to(b_ref[l], (TB, GOUT))     # hoisted out of the time loop
        h = jnp.zeros((TB, LANE), jnp.float32)            # loop-carried in registers
        c = jnp.zeros((TB, LANE), jnp.float32)
        for t in range(S):                                # unrolled, S = 8
            # Previous layer's h for t was written earlier this layer? No: it was
            # written during layer l-1; we read it before overwriting below.
            seq_in = x_ref[t] if l == 0 else out_ref[t]
            # Input and h_prev occupy disjoint lanes -> one add builds the fused LHS.
            lhs = seq_in + h                              # (TB, 128)
            gates = jnp.dot(lhs, w_ref[l],
                            preferred_element_type=jnp.float32) + bias   # (TB, 512)
            # Gate slots are whole vregs; [i|f|o] contiguous -> single sigmoid stream.
            sig = jax.nn.sigmoid(gates[:, : 3 * LANE])
            i_g = sig[:, 0 * LANE:1 * LANE]
            f_g = sig[:, 1 * LANE:2 * LANE]
            o_g = sig[:, 2 * LANE:3 * LANE]
            g_g = jnp.tanh(gates[:, 3 * LANE:4 * LANE])
            # Padded lanes: gates==0 -> g==0, c starts 0 -> c/h stay exactly 0 there.
            c = f_g * c + i_g * g_g
            h = o_g * jnp.tanh(c)
            out_ref[t] = h.astype(out_ref.dtype)          # lane-dense; next layer's input


def lstm_decoder_forward(x, w_fused, b_fused):
    """x: (S, B, BOTTLENECK) f32 -> (S, B, HIDDEN) f32 (PyTorch nn.LSTM layout)."""
    S, B, IN = x.shape
    L = w_fused.shape[0]
    assert X_OFF + IN <= LANE and HIDDEN <= X_OFF

    # Pad batch to a multiple of the tile and lane-pad the input once.
    Bp = ((B + TILE_B - 1) // TILE_B) * TILE_B
    x_pad = jnp.zeros((S, Bp, LANE), jnp.float32)
    x_pad = x_pad.at[:, :B, X_OFF:X_OFF + IN].set(x.astype(jnp.float32))

    out_pad = pl.pallas_call(
        _lstm_kernel,
        out_shape=jax.ShapeDtypeStruct((S, Bp, LANE), jnp.float32),
        grid=(Bp // TILE_B,),
        in_specs=[
            pl.BlockSpec((S, TILE_B, LANE), lambda b: (0, b, 0)),
            # Constant block index -> weights stay resident across batch tiles.
            pl.BlockSpec((L, KDIM, GOUT), lambda b: (0, 0, 0)),
            pl.BlockSpec((L, 1, GOUT), lambda b: (0, 0, 0)),
        ],
        out_specs=pl.BlockSpec((S, TILE_B, LANE), lambda b: (0, b, 0)),
        compiler_params=pltpu.CompilerParams(
            dimension_semantics=("parallel",)),   # independent batch tiles (v7x 2-TC)
    )(x_pad, w_fused, b_fused)

    off = _h_off(L - 1)
    return out_pad[:, :B, off:off + HIDDEN]


def init_params(key):
    """Deterministic init mirroring PyTorch nn.LSTM parameter shapes."""
    k = 1.0 / jnp.sqrt(jnp.float32(HIDDEN))
    params = []
    for l in range(NUM_LAYERS):
        in_dim = BOTTLENECK if l == 0 else HIDDEN
        key, k1, k2, k3, k4 = jax.random.split(key, 5)
        w_ih = jax.random.uniform(k1, (4 * HIDDEN, in_dim), jnp.float32, -k, k)
        w_hh = jax.random.uniform(k2, (4 * HIDDEN, HIDDEN), jnp.float32, -k, k)
        b_ih = jax.random.uniform(k3, (4 * HIDDEN,), jnp.float32, -k, k)
        b_hh = jax.random.uniform(k4, (4 * HIDDEN,), jnp.float32, -k, k)
        params.append((w_ih, w_hh, b_ih, b_hh))
    return params


def pack_params(params):
    """Fuse + pad PyTorch-layout LSTM weights for the kernel.

    Per layer l, W[l] has shape (KDIM=128, GOUT=512):
      rows [in_off : in_off+in_dim) = W_ih^T   (lanes carrying the layer input)
      rows [h_off  : h_off+H)       = W_hh^T   (lanes carrying this layer's h)
    with in_off = X_OFF for layer 0 and _h_off(l-1) otherwise, h_off = _h_off(l).
    Gate slot s of [i, f, o, g] owns output columns [s*128+h_off, s*128+h_off+H);
    everything else is zero (keeps padded c/h lanes exactly zero).
    Bias (1, GOUT) holds b_ih + b_hh in the same columns.
    """
    H = HIDDEN
    # gate slot -> PyTorch row block, reordered to [i, f, o, g]
    slot_rows = [slice(0, H), slice(H, 2 * H), slice(3 * H, 4 * H), slice(2 * H, 3 * H)]
    w_list, b_list = [], []
    for l, (w_ih, w_hh, b_ih, b_hh) in enumerate(params):
        in_dim = w_ih.shape[1]
        in_off = X_OFF if l == 0 else _h_off(l - 1)
        h_off = _h_off(l)
        W = jnp.zeros((KDIM, GOUT), jnp.float32)
        bvec = jnp.zeros((1, GOUT), jnp.float32)
        for s, rows in enumerate(slot_rows):
            cols = slice(s * LANE + h_off, s * LANE + h_off + H)
            W = W.at[in_off:in_off + in_dim, cols].set(w_ih[rows, :].T)
            W = W.at[h_off:h_off + H, cols].set(w_hh[rows, :].T)
            bvec = bvec.at[0, cols].set(b_ih[rows] + b_hh[rows])
        w_list.append(W)
        b_list.append(bvec)
    return jnp.stack(w_list, axis=0), jnp.stack(b_list, axis=0)


def lstm_reference(x, params):
    """Pure-JAX reference matching PyTorch nn.LSTM forward semantics."""
    S, B, _ = x.shape
    H, L = HIDDEN, NUM_LAYERS
    h = [jnp.zeros((B, H), jnp.float32) for _ in range(L)]
    c = [jnp.zeros((B, H), jnp.float32) for _ in range(L)]
    outs = []
    for t in range(S):
        inp = x[t]
        for l, (w_ih, w_hh, b_ih, b_hh) in enumerate(params):
            gates = inp @ w_ih.T + b_ih + h[l] @ w_hh.T + b_hh
            i = jax.nn.sigmoid(gates[:, 0:H])
            f = jax.nn.sigmoid(gates[:, H:2 * H])
            g = jnp.tanh(gates[:, 2 * H:3 * H])
            o = jax.nn.sigmoid(gates[:, 3 * H:4 * H])
            c[l] = f * c[l] + i * g
            h[l] = o * jnp.tanh(c[l])
            inp = h[l]
        outs.append(h[-1])
    return jnp.stack(outs, axis=0)


if __name__ == "__main__":
    # B=16 fills the sublanes (2 parallel batch tiles of 8). For real throughput,
    # push B to 128 (v5e) / 256 (v6e, v7x): per-cell matmul latency is unchanged,
    # so throughput scales ~linearly with batch.
    SEQ, BATCH = 8, 16

    key = jax.random.PRNGKey(0)
    key, pkey, xkey = jax.random.split(key, 3)
    params = init_params(pkey)
    x = jax.random.normal(xkey, (SEQ, BATCH, BOTTLENECK), jnp.float32)

    w_fused, b_fused = pack_params(params)

    out = lstm_decoder_forward(x, w_fused, b_fused)
    out = jax.block_until_ready(out)

    ref = lstm_reference(x, params)
    assert out.shape == (SEQ, BATCH, HIDDEN), out.shape
    err = float(jnp.max(jnp.abs(out - ref)))
    assert err < 1e-4, err

    print("KERNEL_OK")
</pallas_src>

<mosaic_0001>
module attributes {stable_mosaic.version = 11 : i64} {
  func.func @_lstm_kernel(%arg0: i32, %arg1: memref<8x8x128xf32, #tpu.memory_space<vmem>>, %arg2: memref<4x128x512xf32, #tpu.memory_space<vmem>>, %arg3: memref<4x1x512xf32, #tpu.memory_space<vmem>>, %arg4: memref<8x8x128xf32, #tpu.memory_space<vmem>>) attributes {dimension_semantics = [#tpu.dimension_semantics<parallel>], iteration_bounds = array<i64: 2>, scalar_prefetch = 0 : i64, scratch_operands = 0 : i64, tpu.core_type = #tpu.core_type<tc>, window_params = [{transform_indices = @transform_0, window_bounds = array<i64: 8, 8, 128>}, {pipeline_mode = #tpu.pipeline_mode<synchronous>, transform_indices = @transform_1, window_bounds = array<i64: 4, 128, 512>}, {pipeline_mode = #tpu.pipeline_mode<synchronous>, transform_indices = @transform_2, window_bounds = array<i64: 4, 1, 512>}, {transform_indices = @transform_3, window_bounds = array<i64: 8, 8, 128>}]} {
    %c0 = arith.constant 0 : index
    %c0_0 = arith.constant 0 : index
    %c0_1 = arith.constant 0 : index
    %0 = vector.load %arg3[%c0, %c0_0, %c0_1] : memref<4x1x512xf32, #tpu.memory_space<vmem>>, vector<1x1x512xf32>
    %1 = vector.shape_cast %0 : vector<1x1x512xf32> to vector<1x512xf32>
    %2 = vector.shape_cast %1 : vector<1x512xf32> to vector<1x512xf32>
    %3 = vector.broadcast %2 : vector<1x512xf32> to vector<8x512xf32>
    %cst = arith.constant 0.000000e+00 : f32
    %4 = vector.broadcast %cst : f32 to vector<8x128xf32>
    %cst_2 = arith.constant 0.000000e+00 : f32
    %5 = vector.broadcast %cst_2 : f32 to vector<8x128xf32>
    %c0_3 = arith.constant 0 : index
    %c0_4 = arith.constant 0 : index
    %c0_5 = arith.constant 0 : index
    %6 = vector.load %arg1[%c0_3, %c0_4, %c0_5] : memref<8x8x128xf32, #tpu.memory_space<vmem>>, vector<1x8x128xf32>
    %7 = vector.shape_cast %6 : vector<1x8x128xf32> to vector<8x128xf32>
    %8 = arith.addf %7, %4 : vector<8x128xf32>
    %c0_6 = arith.constant 0 : index
    %c0_7 = arith.constant 0 : index
    %c0_8 = arith.constant 0 : index
    %9 = vector.load %arg2[%c0_6, %c0_7, %c0_8] : memref<4x128x512xf32, #tpu.memory_space<vmem>>, vector<1x128x512xf32>
    %10 = vector.shape_cast %9 : vector<1x128x512xf32> to vector<128x512xf32>
    %cst_9 = arith.constant dense<0.000000e+00> : vector<8x512xf32>
    %11 = tpu.matmul %8, %10, %cst_9 {dimension_numbers = #tpu.dot_dimension_numbers<[1], [0], [0], [1], [0, 0, 1, 1], [], []>} : vector<8x128xf32>, vector<128x512xf32>, vector<8x512xf32> -> vector<8x512xf32>
    %12 = arith.addf %11, %3 : vector<8x512xf32>
    %13 = vector.extract_strided_slice %12 {offsets = [0, 0], sizes = [8, 384], strides = [1, 1]} : vector<8x512xf32> to vector<8x384xf32>
    %14 = arith.negf %13 : vector<8x384xf32>
    %15 = math.exp %14 : vector<8x384xf32>
    %cst_10 = arith.constant 1.000000e+00 : f32
    %16 = vector.broadcast %cst_10 : f32 to vector<8x384xf32>
    %17 = arith.addf %16, %15 : vector<8x384xf32>
    %18 = arith.divf %16, %17 : vector<8x384xf32>
    %19 = vector.extract_strided_slice %18 {offsets = [0, 0], sizes = [8, 128], strides = [1, 1]} : vector<8x384xf32> to vector<8x128xf32>
    %20 = vector.extract_strided_slice %18 {offsets = [0, 128], sizes = [8, 128], strides = [1, 1]} : vector<8x384xf32> to vector<8x128xf32>
    %21 = vector.extract_strided_slice %18 {offsets = [0, 256], sizes = [8, 128], strides = [1, 1]} : vector<8x384xf32> to vector<8x128xf32>
    %22 = vector.extract_strided_slice %12 {offsets = [0, 384], sizes = [8, 128], strides = [1, 1]} : vector<8x512xf32> to vector<8x128xf32>
    %23 = math.tanh %22 : vector<8x128xf32>
    %24 = arith.mulf %20, %5 : vector<8x128xf32>
    %25 = arith.mulf %19, %23 : vector<8x128xf32>
    %26 = arith.addf %24, %25 : vector<8x128xf32>
    %27 = math.tanh %26 : vector<8x128xf32>
    %28 = arith.mulf %21, %27 : vector<8x128xf32>
    %c0_11 = arith.constant 0 : index
    %c0_12 = arith.constant 0 : index
    %c0_13 = arith.constant 0 : index
    %29 = vector.load %arg4[%c0_11, %c0_12, %c0_13] : memref<8x8x128xf32, #tpu.memory_space<vmem>>, vector<1x8x128xf32>
    %30 = vector.shape_cast %29 : vector<1x8x128xf32> to vector<8x128xf32>
    %31 = vector.shape_cast %28 : vector<8x128xf32> to vector<1x8x128xf32>
    tpu.vector_store %arg4[%c0_11, %c0_12, %c0_13], %31 {strides = array<i32>} : memref<8x8x128xf32, #tpu.memory_space<vmem>>, vector<1x8x128xf32>,
    %c1 = arith.constant 1 : index
    %c0_14 = arith.constant 0 : index
    %c0_15 = arith.constant 0 : index
    %32 = vector.load %arg1[%c1, %c0_14, %c0_15] : memref<8x8x128xf32, #tpu.memory_space<vmem>>, vector<1x8x128xf32>
    %33 = vector.shape_cast %32 : vector<1x8x128xf32> to vector<8x128xf32>
    %34 = arith.addf %33, %28 : vector<8x128xf32>
    %c0_16 = arith.constant 0 : index
    %c0_17 = arith.constant 0 : index
    %c0_18 = arith.constant 0 : index
    %35 = vector.load %arg2[%c0_16, %c0_17, %c0_18] : memref<4x128x512xf32, #tpu.memory_space<vmem>>, vector<1x128x512xf32>
    %36 = vector.shape_cast %35 : vector<1x128x512xf32> to vector<128x512xf32>
    %cst_19 = arith.constant dense<0.000000e+00> : vector<8x512xf32>
    %37 = tpu.matmul %34, %36, %cst_19 {dimension_numbers = #tpu.dot_dimension_numbers<[1], [0], [0], [1], [0, 0, 1, 1], [], []>} : vector<8x128xf32>, vector<128x512xf32>, vector<8x512xf32> -> vector<8x512xf32>
    %38 = arith.addf %37, %3 : vector<8x512xf32>
    %39 = vector.extract_strided_slice %38 {offsets = [0, 0], sizes = [8, 384], strides = [1, 1]} : vector<8x512xf32> to vector<8x384xf32>
    %40 = arith.negf %39 : vector<8x384xf32>
    %41 = math.exp %40 : vector<8x384xf32>
    %cst_20 = arith.constant 1.000000e+00 : f32
    %42 = vector.broadcast %cst_20 : f32 to vector<8x384xf32>
    %43 = arith.addf %42, %41 : vector<8x384xf32>
    %44 = arith.divf %42, %43 : vector<8x384xf32>
    %45 = vector.extract_strided_slice %44 {offsets = [0, 0], sizes = [8, 128], strides = [1, 1]} : vector<8x384xf32> to vector<8x128xf32>
    %46 = vector.extract_strided_slice %44 {offsets = [0, 128], sizes = [8, 128], strides = [1, 1]} : vector<8x384xf32> to vector<8x128xf32>
    %47 = vector.extract_strided_slice %44 {offsets = [0, 256], sizes = [8, 128], strides = [1, 1]} : vector<8x384xf32> to vector<8x128xf32>
    %48 = vector.extract_strided_slice %38 {offsets = [0, 384], sizes = [8, 128], strides = [1, 1]} : vector<8x512xf32> to vector<8x128xf32>
    %49 = math.tanh %48 : vector<8x128xf32>
    %50 = arith.mulf %46, %26 : vector<8x128xf32>
    %51 = arith.mulf %45, %49 : vector<8x128xf32>
    %52 = arith.addf %50, %51 : vector<8x128xf32>
    %53 = math.tanh %52 : vector<8x128xf32>
    %54 = arith.mulf %47, %53 : vector<8x128xf32>
    %c1_21 = arith.constant 1 : index
    %c0_22 = arith.constant 0 : index
    %c0_23 = arith.constant 0 : index
    %55 = vector.load %arg4[%c1_21, %c0_22, %c0_23] : memref<8x8x128xf32, #tpu.memory_space<vmem>>, vector<1x8x128xf32>
    %56 = vector.shape_cast %55 : vector<1x8x128xf32> to vector<8x128xf32>
    %57 = vector.shape_cast %54 : vector<8x128xf32> to vector<1x8x128xf32>
    tpu.vector_store %arg4[%c1_21, %c0_22, %c0_23], %57 {strides = array<i32>} : memref<8x8x128xf32, #tpu.memory_space<vmem>>, vector<1x8x128xf32>,
    %c2 = arith.constant 2 : index
    %c0_24 = arith.constant 0 : index
    %c0_25 = arith.constant 0 : index
    %58 = vector.load %arg1[%c2, %c0_24, %c0_25] : memref<8x8x128xf32, #tpu.memory_space<vmem>>, vector<1x8x128xf32>
    %59 = vector.shape_cast %58 : vector<1x8x128xf32> to vector<8x128xf32>
    %60 = arith.addf %59, %54 : vector<8x128xf32>
    %c0_26 = arith.constant 0 : index
    %c0_27 = arith.constant 0 : index
    %c0_28 = arith.constant 0 : index
    %61 = vector.load %arg2[%c0_26, %c0_27, %c0_28] : memref<4x128x512xf32, #tpu.memory_space<vmem>>, vector<1x128x512xf32>
    %62 = vector.shape_cast %61 : vector<1x128x512xf32> to vector<128x512xf32>
    %cst_29 = arith.constant dense<0.000000e+00> : vector<8x512xf32>
    %63 = tpu.matmul %60, %62, %cst_29 {dimension_numbers = #tpu.dot_dimension_numbers<[1], [0], [0], [1], [0, 0, 1, 1], [], []>} : vector<8x128xf32>, vector<128x512xf32>, vector<8x512xf32> -> vector<8x512xf32>
    %64 = arith.addf %63, %3 : vector<8x512xf32>
    %65 = vector.extract_strided_slice %64 {offsets = [0, 0], sizes = [8, 384], strides = [1, 1]} : vector<8x512xf32> to vector<8x384xf32>
    %66 = arith.negf %65 : vector<8x384xf32>
    %67 = math.exp %66 : vector<8x384xf32>
    %cst_30 = arith.constant 1.000000e+00 : f32
    %68 = vector.broadcast %cst_30 : f32 to vector<8x384xf32>
    %69 = arith.addf %68, %67 : vector<8x384xf32>
    %70 = arith.divf %68, %69 : vector<8x384xf32>
    %71 = vector.extract_strided_slice %70 {offsets = [0, 0], sizes = [8, 128], strides = [1, 1]} : vector<8x384xf32> to vector<8x128xf32>
    %72 = vector.extract_strided_slice %70 {offsets = [0, 128], sizes = [8, 128], strides = [1, 1]} : vector<8x384xf32> to vector<8x128xf32>
    %73 = vector.extract_strided_slice %70 {offsets = [0, 256], sizes = [8, 128], strides = [1, 1]} : vector<8x384xf32> to vector<8x128xf32>
    %74 = vector.extract_strided_slice %64 {offsets = [0, 384], sizes = [8, 128], strides = [1, 1]} : vector<8x512xf32> to vector<8x128xf32>
    %75 = math.tanh %74 : vector<8x128xf32>
    %76 = arith.mulf %72, %52 : vector<8x128xf32>
    %77 = arith.mulf %71, %75 : vector<8x128xf32>
    %78 = arith.addf %76, %77 : vector<8x128xf32>
    %79 = math.tanh %78 : vector<8x128xf32>
    %80 = arith.mulf %73, %79 : vector<8x128xf32>
    %c2_31 = arith.constant 2 : index
    %c0_32 = arith.constant 0 : index
    %c0_33 = arith.constant 0 : index
    %81 = vector.load %arg4[%c2_31, %c0_32, %c0_33] : memref<8x8x128xf32, #tpu.memory_space<vmem>>, vector<1x8x128xf32>
    %82 = vector.shape_cast %81 : vector<1x8x128xf32> to vector<8x128xf32>
    %83 = vector.shape_cast %80 : vector<8x128xf32> to vector<1x8x128xf32>
    tpu.vector_store %arg4[%c2_31, %c0_32, %c0_33], %83 {strides = array<i32>} : memref<8x8x128xf32, #tpu.memory_space<vmem>>, vector<1x8x128xf32>,
    %c3 = arith.constant 3 : index
    %c0_34 = arith.constant 0 : index
    %c0_35 = arith.constant 0 : index
    %84 = vector.load %arg1[%c3, %c0_34, %c0_35] : memref<8x8x128xf32, #tpu.memory_space<vmem>>, vector<1x8x128xf32>
    %85 = vector.shape_cast %84 : vector<1x8x128xf32> to vector<8x128xf32>
    %86 = arith.addf %85, %80 : vector<8x128xf32>
    %c0_36 = arith.constant 0 : index
    %c0_37 = arith.constant 0 : index
    %c0_38 = arith.constant 0 : index
    %87 = vector.load %arg2[%c0_36, %c0_37, %c0_38] : memref<4x128x512xf32, #tpu.memory_space<vmem>>, vector<1x128x512xf32>
    %88 = vector.shape_cast %87 : vector<1x128x512xf32> to vector<128x512xf32>
    %cst_39 = arith.constant dense<0.000000e+00> : vector<8x512xf32>
    %89 = tpu.matmul %86, %88, %cst_39 {dimension_numbers = #tpu.dot_dimension_numbers<[1], [0], [0], [1], [0, 0, 1, 1], [], []>} : vector<8x128xf32>, vector<128x512xf32>, vector<8x512xf32> -> vector<8x512xf32>
    %90 = arith.addf %89, %3 : vector<8x512xf32>
    %91 = vector.extract_strided_slice %90 {offsets = [0, 0], sizes = [8, 384], strides = [1, 1]} : vector<8x512xf32> to vector<8x384xf32>
    %92 = arith.negf %91 : vector<8x384xf32>
    %93 = math.exp %92 : vector<8x384xf32>
    %cst_40 = arith.constant 1.000000e+00 : f32
    %94 = vector.broadcast %cst_40 : f32 to vector<8x384xf32>
    %95 = arith.addf %94, %93 : vector<8x384xf32>
    %96 = arith.divf %94, %95 : vector<8x384xf32>
    %97 = vector.extract_strided_slice %96 {offsets = [0, 0], sizes = [8, 128], strides = [1, 1]} : vector<8x384xf32> to vector<8x128xf32>
    %98 = vector.extract_strided_slice %96 {offsets = [0, 128], sizes = [8, 128], strides = [1, 1]} : vector<8x384xf32> to vector<8x128xf32>
    %99 = vector.extract_strided_slice %96 {offsets = [0, 256], sizes = [8, 128], strides = [1, 1]} : vector<8x384xf32> to vector<8x128xf32>
    %100 = vector.extract_strided_slice %90 {offsets = [0, 384], sizes = [8, 128], strides = [1, 1]} : vector<8x512xf32> to vector<8x128xf32>
    %101 = math.tanh %100 : vector<8x128xf32>
    %102 = arith.mulf %98, %78 : vector<8x128xf32>
    %103 = arith.mulf %97, %101 : vector<8x128xf32>
    %104 = arith.addf %102, %103 : vector<8x128xf32>
    %105 = math.tanh %104 : vector<8x128xf32>
    %106 = arith.mulf %99, %105 : vector<8x128xf32>
    %c3_41 = arith.constant 3 : index
    %c0_42 = arith.constant 0 : index
    %c0_43 = arith.constant 0 : index
    %107 = vector.load %arg4[%c3_41, %c0_42, %c0_43] : memref<8x8x128xf32, #tpu.memory_space<vmem>>, vector<1x8x128xf32>
    %108 = vector.shape_cast %107 : vector<1x8x128xf32> to vector<8x128xf32>
    %109 = vector.shape_cast %106 : vector<8x128xf32> to vector<1x8x128xf32>
    tpu.vector_store %arg4[%c3_41, %c0_42, %c0_43], %109 {strides = array<i32>} : memref<8x8x128xf32, #tpu.memory_space<vmem>>, vector<1x8x128xf32>,
    %c4 = arith.constant 4 : index
    %c0_44 = arith.constant 0 : index
    %c0_45 = arith.constant 0 : index
    %110 = vector.load %arg1[%c4, %c0_44, %c0_45] : memref<8x8x128xf32, #tpu.memory_space<vmem>>, vector<1x8x128xf32>
    %111 = vector.shape_cast %110 : vector<1x8x128xf32> to vector<8x128xf32>
    %112 = arith.addf %111, %106 : vector<8x128xf32>
    %c0_46 = arith.constant 0 : index
    %c0_47 = arith.constant 0 : index
    %c0_48 = arith.constant 0 : index
    %113 = vector.load %arg2[%c0_46, %c0_47, %c0_48] : memref<4x128x512xf32, #tpu.memory_space<vmem>>, vector<1x128x512xf32>
    %114 = vector.shape_cast %113 : vector<1x128x512xf32> to vector<128x512xf32>
    %cst_49 = arith.constant dense<0.000000e+00> : vector<8x512xf32>
    %115 = tpu.matmul %112, %114, %cst_49 {dimension_numbers = #tpu.dot_dimension_numbers<[1], [0], [0], [1], [0, 0, 1, 1], [], []>} : vector<8x128xf32>, vector<128x512xf32>, vector<8x512xf32> -> vector<8x512xf32>
    %116 = arith.addf %115, %3 : vector<8x512xf32>
    %117 = vector.extract_strided_slice %116 {offsets = [0, 0], sizes = [8, 384], strides = [1, 1]} : vector<8x512xf32> to vector<8x384xf32>
    %118 = arith.negf %117 : vector<8x384xf32>
    %119 = math.exp %118 : vector<8x384xf32>
    %cst_50 = arith.constant 1.000000e+00 : f32
    %120 = vector.broadcast %cst_50 : f32 to vector<8x384xf32>
    %121 = arith.addf %120, %119 : vector<8x384xf32>
    %122 = arith.divf %120, %121 : vector<8x384xf32>
    %123 = vector.extract_strided_slice %122 {offsets = [0, 0], sizes = [8, 128], strides = [1, 1]} : vector<8x384xf32> to vector<8x128xf32>
    %124 = vector.extract_strided_slice %122 {offsets = [0, 128], sizes = [8, 128], strides = [1, 1]} : vector<8x384xf32> to vector<8x128xf32>
    %125 = vector.extract_strided_slice %122 {offsets = [0, 256], sizes = [8, 128], strides = [1, 1]} : vector<8x384xf32> to vector<8x128xf32>
    %126 = vector.extract_strided_slice %116 {offsets = [0, 384], sizes = [8, 128], strides = [1, 1]} : vector<8x512xf32> to vector<8x128xf32>
    %127 = math.tanh %126 : vector<8x128xf32>
    %128 = arith.mulf %124, %104 : vector<8x128xf32>
    %129 = arith.mulf %123, %127 : vector<8x128xf32>
    %130 = arith.addf %128, %129 : vector<8x128xf32>
    %131 = math.tanh %130 : vector<8x128xf32>
    %132 = arith.mulf %125, %131 : vector<8x128xf32>
    %c4_51 = arith.constant 4 : index
    %c0_52 = arith.constant 0 : index
    %c0_53 = arith.constant 0 : index
    %133 = vector.load %arg4[%c4_51, %c0_52, %c0_53] : memref<8x8x128xf32, #tpu.memory_space<vmem>>, vector<1x8x128xf32>
    %134 = vector.shape_cast %133 : vector<1x8x128xf32> to vector<8x128xf32>
    %135 = vector.shape_cast %132 : vector<8x128xf32> to vector<1x8x128xf32>
    tpu.vector_store %arg4[%c4_51, %c0_52, %c0_53], %135 {strides = array<i32>} : memref<8x8x128xf32, #tpu.memory_space<vmem>>, vector<1x8x128xf32>,
    %c5 = arith.constant 5 : index
    %c0_54 = arith.constant 0 : index
    %c0_55 = arith.constant 0 : index
    %136 = vector.load %arg1[%c5, %c0_54, %c0_55] : memref<8x8x128xf32, #tpu.memory_space<vmem>>, vector<1x8x128xf32>
    %137 = vector.shape_cast %136 : vector<1x8x128xf32> to vector<8x128xf32>
    %138 = arith.addf %137, %132 : vector<8x128xf32>
    %c0_56 = arith.constant 0 : index
    %c0_57 = arith.constant 0 : index
    %c0_58 = arith.constant 0 : index
    %139 = vector.load %arg2[%c0_56, %c0_57, %c0_58] : memref<4x128x512xf32, #tpu.memory_space<vmem>>, vector<1x128x512xf32>
    %140 = vector.shape_cast %139 : vector<1x128x512xf32> to vector<128x512xf32>
    %cst_59 = arith.constant dense<0.000000e+00> : vector<8x512xf32>
    %141 = tpu.matmul %138, %140, %cst_59 {dimension_numbers = #tpu.dot_dimension_numbers<[1], [0], [0], [1], [0, 0, 1, 1], [], []>} : vector<8x128xf32>, vector<128x512xf32>, vector<8x512xf32> -> vector<8x512xf32>
    %142 = arith.addf %141, %3 : vector<8x512xf32>
    %143 = vector.extract_strided_slice %142 {offsets = [0, 0], sizes = [8, 384], strides = [1, 1]} : vector<8x512xf32> to vector<8x384xf32>
    %144 = arith.negf %143 : vector<8x384xf32>
    %145 = math.exp %144 : vector<8x384xf32>
    %cst_60 = arith.constant 1.000000e+00 : f32
    %146 = vector.broadcast %cst_60 : f32 to vector<8x384xf32>
    %147 = arith.addf %146, %145 : vector<8x384xf32>
    %148 = arith.divf %146, %147 : vector<8x384xf32>
    %149 = vector.extract_strided_slice %148 {offsets = [0, 0], sizes = [8, 128], strides = [1, 1]} : vector<8x384xf32> to vector<8x128xf32>
    %150 = vector.extract_strided_slice %148 {offsets = [0, 128], sizes = [8, 128], strides = [1, 1]} : vector<8x384xf32> to vector<8x128xf32>
    %151 = vector.extract_strided_slice %148 {offsets = [0, 256], sizes = [8, 128], strides = [1, 1]} : vector<8x384xf32> to vector<8x128xf32>
    %152 = vector.extract_strided_slice %142 {offsets = [0, 384], sizes = [8, 128], strides = [1, 1]} : vector<8x512xf32> to vector<8x128xf32>
    %153 = math.tanh %152 : vector<8x128xf32>
    %154 = arith.mulf %150, %130 : vector<8x128xf32>
    %155 = arith.mulf %149, %153 : vector<8x128xf32>
    %156 = arith.addf %154, %155 : vector<8x128xf32>
    %157 = math.tanh %156 : vector<8x128xf32>
    %158 = arith.mulf %151, %157 : vector<8x128xf32>
    %c5_61 = arith.constant 5 : index
    %c0_62 = arith.constant 0 : index
    %c0_63 = arith.constant 0 : index
    %159 = vector.load %arg4[%c5_61, %c0_62, %c0_63] : memref<8x8x128xf32, #tpu.memory_space<vmem>>, vector<1x8x128xf32>
    %160 = vector.shape_cast %159 : vector<1x8x128xf32> to vector<8x128xf32>
    %161 = vector.shape_cast %158 : vector<8x128xf32> to vector<1x8x128xf32>
    tpu.vector_store %arg4[%c5_61, %c0_62, %c0_63], %161 {strides = array<i32>} : memref<8x8x128xf32, #tpu.memory_space<vmem>>, vector<1x8x128xf32>,
    %c6 = arith.constant 6 : index
    %c0_64 = arith.constant 0 : index
    %c0_65 = arith.constant 0 : index
    %162 = vector.load %arg1[%c6, %c0_64, %c0_65] : memref<8x8x128xf32, #tpu.memory_space<vmem>>, vector<1x8x128xf32>
    %163 = vector.shape_cast %162 : vector<1x8x128xf32> to vector<8x128xf32>
    %164 = arith.addf %163, %158 : vector<8x128xf32>
    %c0_66 = arith.constant 0 : index
    %c0_67 = arith.constant 0 : index
    %c0_68 = arith.constant 0 : index
    %165 = vector.load %arg2[%c0_66, %c0_67, %c0_68] : memref<4x128x512xf32, #tpu.memory_space<vmem>>, vector<1x128x512xf32>
    %166 = vector.shape_cast %165 : vector<1x128x512xf32> to vector<128x512xf32>
    %cst_69 = arith.constant dense<0.000000e+00> : vector<8x512xf32>
    %167 = tpu.matmul %164, %166, %cst_69 {dimension_numbers = #tpu.dot_dimension_numbers<[1], [0], [0], [1], [0, 0, 1, 1], [], []>} : vector<8x128xf32>, vector<128x512xf32>, vector<8x512xf32> -> vector<8x512xf32>
    %168 = arith.addf %167, %3 : vector<8x512xf32>
    %169 = vector.extract_strided_slice %168 {offsets = [0, 0], sizes = [8, 384], strides = [1, 1]} : vector<8x512xf32> to vector<8x384xf32>
    %170 = arith.negf %169 : vector<8x384xf32>
    %171 = math.exp %170 : vector<8x384xf32>
    %cst_70 = arith.constant 1.000000e+00 : f32
    %172 = vector.broadcast %cst_70 : f32 to vector<8x384xf32>
    %173 = arith.addf %172, %171 : vector<8x384xf32>
    %174 = arith.divf %172, %173 : vector<8x384xf32>
    %175 = vector.extract_strided_slice %174 {offsets = [0, 0], sizes = [8, 128], strides = [1, 1]} : vector<8x384xf32> to vector<8x128xf32>
    %176 = vector.extract_strided_slice %174 {offsets = [0, 128], sizes = [8, 128], strides = [1, 1]} : vector<8x384xf32> to vector<8x128xf32>
    %177 = vector.extract_strided_slice %174 {offsets = [0, 256], sizes = [8, 128], strides = [1, 1]} : vector<8x384xf32> to vector<8x128xf32>
    %178 = vector.extract_strided_slice %168 {offsets = [0, 384], sizes = [8, 128], strides = [1, 1]} : vector<8x512xf32> to vector<8x128xf32>
    %179 = math.tanh %178 : vector<8x128xf32>
    %180 = arith.mulf %176, %156 : vector<8x128xf32>
    %181 = arith.mulf %175, %179 : vector<8x128xf32>
    %182 = arith.addf %180, %181 : vector<8x128xf32>
    %183 = math.tanh %182 : vector<8x128xf32>
    %184 = arith.mulf %177, %183 : vector<8x128xf32>
    %c6_71 = arith.constant 6 : index
    %c0_72 = arith.constant 0 : index
    %c0_73 = arith.constant 0 : index
    %185 = vector.load %arg4[%c6_71, %c0_72, %c0_73] : memref<8x8x128xf32, #tpu.memory_space<vmem>>, vector<1x8x128xf32>
    %186 = vector.shape_cast %185 : vector<1x8x128xf32> to vector<8x128xf32>
    %187 = vector.shape_cast %184 : vector<8x128xf32> to vector<1x8x128xf32>
    tpu.vector_store %arg4[%c6_71, %c0_72, %c0_73], %187 {strides = array<i32>} : memref<8x8x128xf32, #tpu.memory_space<vmem>>, vector<1x8x128xf32>,
    %c7 = arith.constant 7 : index
    %c0_74 = arith.constant 0 : index
    %c0_75 = arith.constant 0 : index
    %188 = vector.load %arg1[%c7, %c0_74, %c0_75] : memref<8x8x128xf32, #tpu.memory_space<vmem>>, vector<1x8x128xf32>
    %189 = vector.shape_cast %188 : vector<1x8x128xf32> to vector<8x128xf32>
    %190 = arith.addf %189, %184 : vector<8x128xf32>
    %c0_76 = arith.constant 0 : index
    %c0_77 = arith.constant 0 : index
    %c0_78 = arith.constant 0 : index
    %191 = vector.load %arg2[%c0_76, %c0_77, %c0_78] : memref<4x128x512xf32, #tpu.memory_space<vmem>>, vector<1x128x512xf32>
    %192 = vector.shape_cast %191 : vector<1x128x512xf32> to vector<128x512xf32>
    %cst_79 = arith.constant dense<0.000000e+00> : vector<8x512xf32>
    %193 = tpu.matmul %190, %192, %cst_79 {dimension_numbers = #tpu.dot_dimension_numbers<[1], [0], [0], [1], [0, 0, 1, 1], [], []>} : vector<8x128xf32>, vector<128x512xf32>, vector<8x512xf32> -> vector<8x512xf32>
    %194 = arith.addf %193, %3 : vector<8x512xf32>
    %195 = vector.extract_strided_slice %194 {offsets = [0, 0], sizes = [8, 384], strides = [1, 1]} : vector<8x512xf32> to vector<8x384xf32>
    %196 = arith.negf %195 : vector<8x384xf32>
    %197 = math.exp %196 : vector<8x384xf32>
    %cst_80 = arith.constant 1.000000e+00 : f32
    %198 = vector.broadcast %cst_80 : f32 to vector<8x384xf32>
    %199 = arith.addf %198, %197 : vector<8x384xf32>
    %200 = arith.divf %198, %199 : vector<8x384xf32>
    %201 = vector.extract_strided_slice %200 {offsets = [0, 0], sizes = [8, 128], strides = [1, 1]} : vector<8x384xf32> to vector<8x128xf32>
    %202 = vector.extract_strided_slice %200 {offsets = [0, 128], sizes = [8, 128], strides = [1, 1]} : vector<8x384xf32> to vector<8x128xf32>
    %203 = vector.extract_strided_slice %200 {offsets = [0, 256], sizes = [8, 128], strides = [1, 1]} : vector<8x384xf32> to vector<8x128xf32>
    %204 = vector.extract_strided_slice %194 {offsets = [0, 384], sizes = [8, 128], strides = [1, 1]} : vector<8x512xf32> to vector<8x128xf32>
    %205 = math.tanh %204 : vector<8x128xf32>
    %206 = arith.mulf %202, %182 : vector<8x128xf32>
    %207 = arith.mulf %201, %205 : vector<8x128xf32>
    %208 = arith.addf %206, %207 : vector<8x128xf32>
    %209 = math.tanh %208 : vector<8x128xf32>
    %210 = arith.mulf %203, %209 : vector<8x128xf32>
    %c7_81 = arith.constant 7 : index
    %c0_82 = arith.constant 0 : index
    %c0_83 = arith.constant 0 : index
    %211 = vector.load %arg4[%c7_81, %c0_82, %c0_83] : memref<8x8x128xf32, #tpu.memory_space<vmem>>, vector<1x8x128xf32>
    %212 = vector.shape_cast %211 : vector<1x8x128xf32> to vector<8x128xf32>
    %213 = vector.shape_cast %210 : vector<8x128xf32> to vector<1x8x128xf32>
    tpu.vector_store %arg4[%c7_81, %c0_82, %c0_83], %213 {strides = array<i32>} : memref<8x8x128xf32, #tpu.memory_space<vmem>>, vector<1x8x128xf32>,
    %c1_84 = arith.constant 1 : index
    %c0_85 = arith.constant 0 : index
    %c0_86 = arith.constant 0 : index
    %214 = vector.load %arg3[%c1_84, %c0_85, %c0_86] : memref<4x1x512xf32, #tpu.memory_space<vmem>>, vector<1x1x512xf32>
    %215 = vector.shape_cast %214 : vector<1x1x512xf32> to vector<1x512xf32>
    %216 = vector.shape_cast %215 : vector<1x512xf32> to vector<1x512xf32>
    %217 = vector.broadcast %216 : vector<1x512xf32> to vector<8x512xf32>
    %cst_87 = arith.constant 0.000000e+00 : f32
    %218 = vector.broadcast %cst_87 : f32 to vector<8x128xf32>
    %cst_88 = arith.constant 0.000000e+00 : f32
    %219 = vector.broadcast %cst_88 : f32 to vector<8x128xf32>
    %c0_89 = arith.constant 0 : index
    %c0_90 = arith.constant 0 : index
    %c0_91 = arith.constant 0 : index
    %220 = vector.load %arg4[%c0_89, %c0_90, %c0_91] : memref<8x8x128xf32, #tpu.memory_space<vmem>>, vector<1x8x128xf32>
    %221 = vector.shape_cast %220 : vector<1x8x128xf32> to vector<8x128xf32>
    %222 = arith.addf %221, %218 : vector<8x128xf32>
    %c1_92 = arith.constant 1 : index
    %c0_93 = arith.constant 0 : index
    %c0_94 = arith.constant 0 : index
    %223 = vector.load %arg2[%c1_92, %c0_93, %c0_94] : memref<4x128x512xf32, #tpu.memory_space<vmem>>, vector<1x128x512xf32>
    %224 = vector.shape_cast %223 : vector<1x128x512xf32> to vector<128x512xf32>
    %cst_95 = arith.constant dense<0.000000e+00> : vector<8x512xf32>
    %225 = tpu.matmul %222, %224, %cst_95 {dimension_numbers = #tpu.dot_dimension_numbers<[1], [0], [0], [1], [0, 0, 1, 1], [], []>} : vector<8x128xf32>, vector<128x512xf32>, vector<8x512xf32> -> vector<8x512xf32>
    %226 = arith.addf %225, %217 : vector<8x512xf32>
    %227 = vector.extract_strided_slice %226 {offsets = [0, 0], sizes = [8, 384], strides = [1, 1]} : vector<8x512xf32> to vector<8x384xf32>
    %228 = arith.negf %227 : vector<8x384xf32>
    %229 = math.exp %228 : vector<8x384xf32>
    %cst_96 = arith.constant 1.000000e+00 : f32
    %230 = vector.broadcast %cst_96 : f32 to vector<8x384xf32>
    %231 = arith.addf %230, %229 : vector<8x384xf32>
    %232 = arith.divf %230, %231 : vector<8x384xf32>
    %233 = vector.extract_strided_slice %232 {offsets = [0, 0], sizes = [8, 128], strides = [1, 1]} : vector<8x384xf32> to vector<8x128xf32>
    %234 = vector.extract_strided_slice %232 {offsets = [0, 128], sizes = [8, 128], strides = [1, 1]} : vector<8x384xf32> to vector<8x128xf32>
    %235 = vector.extract_strided_slice %232 {offsets = [0, 256], sizes = [8, 128], strides = [1, 1]} : vector<8x384xf32> to vector<8x128xf32>
    %236 = vector.extract_strided_slice %226 {offsets = [0, 384], sizes = [8, 128], strides = [1, 1]} : vector<8x512xf32> to vector<8x128xf32>
    %237 = math.tanh %236 : vector<8x128xf32>
    %238 = arith.mulf %234, %219 : vector<8x128xf32>
    %239 = arith.mulf %233, %237 : vector<8x128xf32>
    %240 = arith.addf %238, %239 : vector<8x128xf32>
    %241 = math.tanh %240 : vector<8x128xf32>
    %242 = arith.mulf %235, %241 : vector<8x128xf32>
    %c0_97 = arith.constant 0 : index
    %c0_98 = arith.constant 0 : index
    %c0_99 = arith.constant 0 : index
    %243 = vector.load %arg4[%c0_97, %c0_98, %c0_99] : memref<8x8x128xf32, #tpu.memory_space<vmem>>, vector<1x8x128xf32>
    %244 = vector.shape_cast %243 : vector<1x8x128xf32> to vector<8x128xf32>
    %245 = vector.shape_cast %242 : vector<8x128xf32> to vector<1x8x128xf32>
    tpu.vector_store %arg4[%c0_97, %c0_98, %c0_99], %245 {strides = array<i32>} : memref<8x8x128xf32, #tpu.memory_space<vmem>>, vector<1x8x128xf32>,
    %c1_100 = arith.constant 1 : index
    %c0_101 = arith.constant 0 : index
    %c0_102 = arith.constant 0 : index
    %246 = vector.load %arg4[%c1_100, %c0_101, %c0_102] : memref<8x8x128xf32, #tpu.memory_space<vmem>>, vector<1x8x128xf32>
    %247 = vector.shape_cast %246 : vector<1x8x128xf32> to vector<8x128xf32>
    %248 = arith.addf %247, %242 : vector<8x128xf32>
    %c1_103 = arith.constant 1 : index
    %c0_104 = arith.constant 0 : index
    %c0_105 = arith.constant 0 : index
    %249 = vector.load %arg2[%c1_103, %c0_104, %c0_105] : memref<4x128x512xf32, #tpu.memory_space<vmem>>, vector<1x128x512xf32>
    %250 = vector.shape_cast %249 : vector<1x128x512xf32> to vector<128x512xf32>
    %cst_106 = arith.constant dense<0.000000e+00> : vector<8x512xf32>
    %251 = tpu.matmul %248, %250, %cst_106 {dimension_numbers = #tpu.dot_dimension_numbers<[1], [0], [0], [1], [0, 0, 1, 1], [], []>} : vector<8x128xf32>, vector<128x512xf32>, vector<8x512xf32> -> vector<8x512xf32>
    %252 = arith.addf %251, %217 : vector<8x512xf32>
    %253 = vector.extract_strided_slice %252 {offsets = [0, 0], sizes = [8, 384], strides = [1, 1]} : vector<8x512xf32> to vector<8x384xf32>
    %254 = arith.negf %253 : vector<8x384xf32>
    %255 = math.exp %254 : vector<8x384xf32>
    %cst_107 = arith.constant 1.000000e+00 : f32
    %256 = vector.broadcast %cst_107 : f32 to vector<8x384xf32>
    %257 = arith.addf %256, %255 : vector<8x384xf32>
    %258 = arith.divf %256, %257 : vector<8x384xf32>
    %259 = vector.extract_strided_slice %258 {offsets = [0, 0], sizes = [8, 128], strides = [1, 1]} : vector<8x384xf32> to vector<8x128xf32>
    %260 = vector.extract_strided_slice %258 {offsets = [0, 128], sizes = [8, 128], strides = [1, 1]} : vector<8x384xf32> to vector<8x128xf32>
    %261 = vector.extract_strided_slice %258 {offsets = [0, 256], sizes = [8, 128], strides = [1, 1]} : vector<8x384xf32> to vector<8x128xf32>
    %262 = vector.extract_strided_slice %252 {offsets = [0, 384], sizes = [8, 128], strides = [1, 1]} : vector<8x512xf32> to vector<8x128xf32>
    %263 = math.tanh %262 : vector<8x128xf32>
    %264 = arith.mulf %260, %240 : vector<8x128xf32>
    %265 = arith.mulf %259, %263 : vector<8x128xf32>
    %266 = arith.addf %264, %265 : vector<8x128xf32>
    %267 = math.tanh %266 : vector<8x128xf32>
    %268 = arith.mulf %261, %267 : vector<8x128xf32>
    %c1_108 = arith.constant 1 : index
    %c0_109 = arith.constant 0 : index
    %c0_110 = arith.constant 0 : index
    %269 = vector.load %arg4[%c1_108, %c0_109, %c0_110] : memref<8x8x128xf32, #tpu.memory_space<vmem>>, vector<1x8x128xf32>
    %270 = vector.shape_cast %269 : vector<1x8x128xf32> to vector<8x128xf32>
    %271 = vector.shape_cast %268 : vector<8x128xf32> to vector<1x8x128xf32>
    tpu.vector_store %arg4[%c1_108, %c0_109, %c0_110], %271 {strides = array<i32>} : memref<8x8x128xf32, #tpu.memory_space<vmem>>, vector<1x8x128xf32>,
    %c2_111 = arith.constant 2 : index
    %c0_112 = arith.constant 0 : index
    %c0_113 = arith.constant 0 : index
    %272 = vector.load %arg4[%c2_111, %c0_112, %c0_113] : memref<8x8x128xf32, #tpu.memory_space<vmem>>, vector<1x8x128xf32>
    %273 = vector.shape_cast %272 : vector<1x8x128xf32> to vector<8x128xf32>
    %274 = arith.addf %273, %268 : vector<8x128xf32>
    %c1_114 = arith.constant 1 : index
    %c0_115 = arith.constant 0 : index
    %c0_116 = arith.constant 0 : index
    %275 = vector.load %arg2[%c1_114, %c0_115, %c0_116] : memref<4x128x512xf32, #tpu.memory_space<vmem>>, vector<1x128x512xf32>
    %276 = vector.shape_cast %275 : vector<1x128x512xf32> to vector<128x512xf32>
    %cst_117 = arith.constant dense<0.000000e+00> : vector<8x512xf32>
    %277 = tpu.matmul %274, %276, %cst_117 {dimension_numbers = #tpu.dot_dimension_numbers<[1], [0], [0], [1], [0, 0, 1, 1], [], []>} : vector<8x128xf32>, vector<128x512xf32>, vector<8x512xf32> -> vector<8x512xf32>
    %278 = arith.addf %277, %217 : vector<8x512xf32>
    %279 = vector.extract_strided_slice %278 {offsets = [0, 0], sizes = [8, 384], strides = [1, 1]} : vector<8x512xf32> to vector<8x384xf32>
    %280 = arith.negf %279 : vector<8x384xf32>
    %281 = math.exp %280 : vector<8x384xf32>
    %cst_118 = arith.constant 1.000000e+00 : f32
    %282 = vector.broadcast %cst_118 : f32 to vector<8x384xf32>
    %283 = arith.addf %282, %281 : vector<8x384xf32>
    %284 = arith.divf %282, %283 : vector<8x384xf32>
    %285 = vector.extract_strided_slice %284 {offsets = [0, 0], sizes = [8, 128], strides = [1, 1]} : vector<8x384xf32> to vector<8x128xf32>
    %286 = vector.extract_strided_slice %284 {offsets = [0, 128], sizes = [8, 128], strides = [1, 1]} : vector<8x384xf32> to vector<8x128xf32>
    %287 = vector.extract_strided_slice %284 {offsets = [0, 256], sizes = [8, 128], strides = [1, 1]} : vector<8x384xf32> to vector<8x128xf32>
    %288 = vector.extract_strided_slice %278 {offsets = [0, 384], sizes = [8, 128], strides = [1, 1]} : vector<8x512xf32> to vector<8x128xf32>
    %289 = math.tanh %288 : vector<8x128xf32>
    %290 = arith.mulf %286, %266 : vector<8x128xf32>
    %291 = arith.mulf %285, %289 : vector<8x128xf32>
    %292 = arith.addf %290, %291 : vector<8x128xf32>
    %293 = math.tanh %292 : vector<8x128xf32>
    %294 = arith.mulf %287, %293 : vector<8x128xf32>
    %c2_119 = arith.constant 2 : index
    %c0_120 = arith.constant 0 : index
    %c0_121 = arith.constant 0 : index
    %295 = vector.load %arg4[%c2_119, %c0_120, %c0_121] : memref<8x8x128xf32, #tpu.memory_space<vmem>>, vector<1x8x128xf32>
    %296 = vector.shape_cast %295 : vector<1x8x128xf32> to vector<8x128xf32>
    %297 = vector.shape_cast %294 : vector<8x128xf32> to vector<1x8x128xf32>
    tpu.vector_store %arg4[%c2_119, %c0_120, %c0_121], %297 {strides = array<i32>} : memref<8x8x128xf32, #tpu.memory_space<vmem>>, vector<1x8x128xf32>,
    %c3_122 = arith.constant 3 : index
    %c0_123 = arith.constant 0 : index
    %c0_124 = arith.constant 0 : index
    %298 = vector.load %arg4[%c3_122, %c0_123, %c0_124] : memref<8x8x128xf32, #tpu.memory_space<vmem>>, vector<1x8x128xf32>
    %299 = vector.shape_cast %298 : vector<1x8x128xf32> to vector<8x128xf32>
    %300 = arith.addf %299, %294 : vector<8x128xf32>
    %c1_125 = arith.constant 1 : index
    %c0_126 = arith.constant 0 : index
    %c0_127 = arith.constant 0 : index
    %301 = vector.load %arg2[%c1_125, %c0_126, %c0_127] : memref<4x128x512xf32, #tpu.memory_space<vmem>>, vector<1x128x512xf32>
    %302 = vector.shape_cast %301 : vector<1x128x512xf32> to vector<128x512xf32>
    %cst_128 = arith.constant dense<0.000000e+00> : vector<8x512xf32>
    %303 = tpu.matmul %300, %302, %cst_128 {dimension_numbers = #tpu.dot_dimension_numbers<[1], [0], [0], [1], [0, 0, 1, 1], [], []>} : vector<8x128xf32>, vector<128x512xf32>, vector<8x512xf32> -> vector<8x512xf32>
    %304 = arith.addf %303, %217 : vector<8x512xf32>
    %305 = vector.extract_strided_slice %304 {offsets = [0, 0], sizes = [8, 384], strides = [1, 1]} : vector<8x512xf32> to vector<8x384xf32>
    %306 = arith.negf %305 : vector<8x384xf32>
    %307 = math.exp %306 : vector<8x384xf32>
    %cst_129 = arith.constant 1.000000e+00 : f32
    %308 = vector.broadcast %cst_129 : f32 to vector<8x384xf32>
    %309 = arith.addf %308, %307 : vector<8x384xf32>
    %310 = arith.divf %308, %309 : vector<8x384xf32>
    %311 = vector.extract_strided_slice %310 {offsets = [0, 0], sizes = [8, 128], strides = [1, 1]} : vector<8x384xf32> to vector<8x128xf32>
    %312 = vector.extract_strided_slice %310 {offsets = [0, 128], sizes = [8, 128], strides = [1, 1]} : vector<8x384xf32> to vector<8x128xf32>
    %313 = vector.extract_strided_slice %310 {offsets = [0, 256], sizes = [8, 128], strides = [1, 1]} : vector<8x384xf32> to vector<8x128xf32>
    %314 = vector.extract_strided_slice %304 {offsets = [0, 384], sizes = [8, 128], strides = [1, 1]} : vector<8x512xf32> to vector<8x128xf32>
    %315 = math.tanh %314 : vector<8x128xf32>
    %316 = arith.mulf %312, %292 : vector<8x128xf32>
    %317 = arith.mulf %311, %315 : vector<8x128xf32>
    %318 = arith.addf %316, %317 : vector<8x128xf32>
    %319 = math.tanh %318 : vector<8x128xf32>
    %320 = arith.mulf %313, %319 : vector<8x128xf32>
    %c3_130 = arith.constant 3 : index
    %c0_131 = arith.constant 0 : index
    %c0_132 = arith.constant 0 : index
    %321 = vector.load %arg4[%c3_130, %c0_131, %c0_132] : memref<8x8x128xf32, #tpu.memory_space<vmem>>, vector<1x8x128xf32>
    %322 = vector.shape_cast %321 : vector<1x8x128xf32> to vector<8x128xf32>
    %323 = vector.shape_cast %320 : vector<8x128xf32> to vector<1x8x128xf32>
    tpu.vector_store %arg4[%c3_130, %c0_131, %c0_132], %323 {strides = array<i32>} : memref<8x8x128xf32, #tpu.memory_space<vmem>>, vector<1x8x128xf32>,
    %c4_133 = arith.constant 4 : index
    %c0_134 = arith.constant 0 : index
    %c0_135 = arith.constant 0 : index
    %324 = vector.load %arg4[%c4_133, %c0_134, %c0_135] : memref<8x8x128xf32, #tpu.memory_space<vmem>>, vector<1x8x128xf32>
    %325 = vector.shape_cast %324 : vector<1x8x128xf32> to vector<8x128xf32>
    %326 = arith.addf %325, %320 : vector<8x128xf32>
    %c1_136 = arith.constant 1 : index
    %c0_137 = arith.constant 0 : index
    %c0_138 = arith.constant 0 : index
    %327 = vector.load %arg2[%c1_136, %c0_137, %c0_138] : memref<4x128x512xf32, #tpu.memory_space<vmem>>, vector<1x128x512xf32>
    %328 = vector.shape_cast %327 : vector<1x128x512xf32> to vector<128x512xf32>
    %cst_139 = arith.constant dense<0.000000e+00> : vector<8x512xf32>
    %329 = tpu.matmul %326, %328, %cst_139 {dimension_numbers = #tpu.dot_dimension_numbers<[1], [0], [0], [1], [0, 0, 1, 1], [], []>} : vector<8x128xf32>, vector<128x512xf32>, vector<8x512xf32> -> vector<8x512xf32>
    %330 = arith.addf %329, %217 : vector<8x512xf32>
    %331 = vector.extract_strided_slice %330 {offsets = [0, 0], sizes = [8, 384], strides = [1, 1]} : vector<8x512xf32> to vector<8x384xf32>
    %332 = arith.negf %331 : vector<8x384xf32>
    %333 = math.exp %332 : vector<8x384xf32>
    %cst_140 = arith.constant 1.000000e+00 : f32
    %334 = vector.broadcast %cst_140 : f32 to vector<8x384xf32>
    %335 = arith.addf %334, %333 : vector<8x384xf32>
    %336 = arith.divf %334, %335 : vector<8x384xf32>
    %337 = vector.extract_strided_slice %336 {offsets = [0, 0], sizes = [8, 128], strides = [1, 1]} : vector<8x384xf32> to vector<8x128xf32>
    %338 = vector.extract_strided_slice %336 {offsets = [0, 128], sizes = [8, 128], strides = [1, 1]} : vector<8x384xf32> to vector<8x128xf32>
    %339 = vector.extract_strided_slice %336 {offsets = [0, 256], sizes = [8, 128], strides = [1, 1]} : vector<8x384xf32> to vector<8x128xf32>
    %340 = vector.extract_strided_slice %330 {offsets = [0, 384], sizes = [8, 128], strides = [1, 1]} : vector<8x512xf32> to vector<8x128xf32>
    %341 = math.tanh %340 : vector<8x128xf32>
    %342 = arith.mulf %338, %318 : vector<8x128xf32>
    %343 = arith.mulf %337, %341 : vector<8x128xf32>
    %344 = arith.addf %342, %343 : vector<8x128xf32>
    %345 = math.tanh %344 : vector<8x128xf32>
    %346 = arith.mulf %339, %345 : vector<8x128xf32>
    %c4_141 = arith.constant 4 : index
    %c0_142 = arith.constant 0 : index
    %c0_143 = arith.constant 0 : index
    %347 = vector.load %arg4[%c4_141, %c0_142, %c0_143] : memref<8x8x128xf32, #tpu.memory_space<vmem>>, vector<1x8x128xf32>
    %348 = vector.shape_cast %347 : vector<1x8x128xf32> to vector<8x128xf32>
    %349 = vector.shape_cast %346 : vector<8x128xf32> to vector<1x8x128xf32>
    tpu.vector_store %arg4[%c4_141, %c0_142, %c0_143], %349 {strides = array<i32>} : memref<8x8x128xf32, #tpu.memory_space<vmem>>, vector<1x8x128xf32>,
    %c5_144 = arith.constant 5 : index
    %c0_145 = arith.constant 0 : index
    %c0_146 = arith.constant 0 : index
    %350 = vector.load %arg4[%c5_144, %c0_145, %c0_146] : memref<8x8x128xf32, #tpu.memory_space<vmem>>, vector<1x8x128xf32>
    %351 = vector.shape_cast %350 : vector<1x8x128xf32> to vector<8x128xf32>
    %352 = arith.addf %351, %346 : vector<8x128xf32>
    %c1_147 = arith.constant 1 : index
    %c0_148 = arith.constant 0 : index
    %c0_149 = arith.constant 0 : index
    %353 = vector.load %arg2[%c1_147, %c0_148, %c0_149] : memref<4x128x512xf32, #tpu.memory_space<vmem>>, vector<1x128x512xf32>
    %354 = vector.shape_cast %353 : vector<1x128x512xf32> to vector<128x512xf32>
    %cst_150 = arith.constant dense<0.000000e+00> : vector<8x512xf32>
    %355 = tpu.matmul %352, %354, %cst_150 {dimension_numbers = #tpu.dot_dimension_numbers<[1], [0], [0], [1], [0, 0, 1, 1], [], []>} : vector<8x128xf32>, vector<128x512xf32>, vector<8x512xf32> -> vector<8x512xf32>
    %356 = arith.addf %355, %217 : vector<8x512xf32>
    %357 = vector.extract_strided_slice %356 {offsets = [0, 0], sizes = [8, 384], strides = [1, 1]} : vector<8x512xf32> to vector<8x384xf32>
    %358 = arith.negf %357 : vector<8x384xf32>
    %359 = math.exp %358 : vector<8x384xf32>
    %cst_151 = arith.constant 1.000000e+00 : f32
    %360 = vector.broadcast %cst_151 : f32 to vector<8x384xf32>
    %361 = arith.addf %360, %359 : vector<8x384xf32>
    %362 = arith.divf %360, %361 : vector<8x384xf32>
    %363 = vector.extract_strided_slice %362 {offsets = [0, 0], sizes = [8, 128], strides = [1, 1]} : vector<8x384xf32> to vector<8x128xf32>
    %364 = vector.extract_strided_slice %362 {offsets = [0, 128], sizes = [8, 128], strides = [1, 1]} : vector<8x384xf32> to vector<8x128xf32>
    %365 = vector.extract_strided_slice %362 {offsets = [0, 256], sizes = [8, 128], strides = [1, 1]} : vector<8x384xf32> to vector<8x128xf32>
    %366 = vector.extract_strided_slice %356 {offsets = [0, 384], sizes = [8, 128], strides = [1, 1]} : vector<8x512xf32> to vector<8x128xf32>
    %367 = math.tanh %366 : vector<8x128xf32>
    %368 = arith.mulf %364, %344 : vector<8x128xf32>
    %369 = arith.mulf %363, %367 : vector<8x128xf32>
    %370 = arith.addf %368, %369 : vector<8x128xf32>
    %371 = math.tanh %370 : vector<8x128xf32>
    %372 = arith.mulf %365, %371 : vector<8x128xf32>
    %c5_152 = arith.constant 5 : index
    %c0_153 = arith.constant 0 : index
    %c0_154 = arith.constant 0 : index
    %373 = vector.load %arg4[%c5_152, %c0_153, %c0_154] : memref<8x8x128xf32, #tpu.memory_space<vmem>>, vector<1x8x128xf32>
    %374 = vector.shape_cast %373 : vector<1x8x128xf32> to vector<8x128xf32>
    %375 = vector.shape_cast %372 : vector<8x128xf32> to vector<1x8x128xf32>
    tpu.vector_store %arg4[%c5_152, %c0_153, %c0_154], %375 {strides = array<i32>} : memref<8x8x128xf32, #tpu.memory_space<vmem>>, vector<1x8x128xf32>,
    %c6_155 = arith.constant 6 : index
    %c0_156 = arith.constant 0 : index
    %c0_157 = arith.constant 0 : index
    %376 = vector.load %arg4[%c6_155, %c0_156, %c0_157] : memref<8x8x128xf32, #tpu.memory_space<vmem>>, vector<1x8x128xf32>
    %377 = vector.shape_cast %376 : vector<1x8x128xf32> to vector<8x128xf32>
    %378 = arith.addf %377, %372 : vector<8x128xf32>
    %c1_158 = arith.constant 1 : index
    %c0_159 = arith.constant 0 : index
    %c0_160 = arith.constant 0 : index
    %379 = vector.load %arg2[%c1_158, %c0_159, %c0_160] : memref<4x128x512xf32, #tpu.memory_space<vmem>>, vector<1x128x512xf32>
    %380 = vector.shape_cast %379 : vector<1x128x512xf32> to vector<128x512xf32>
    %cst_161 = arith.constant dense<0.000000e+00> : vector<8x512xf32>
    %381 = tpu.matmul %378, %380, %cst_161 {dimension_numbers = #tpu.dot_dimension_numbers<[1], [0], [0], [1], [0, 0, 1, 1], [], []>} : vector<8x128xf32>, vector<128x512xf32>, vector<8x512xf32> -> vector<8x512xf32>
    %382 = arith.addf %381, %217 : vector<8x512xf32>
    %383 = vector.extract_strided_slice %382 {offsets = [0, 0], sizes = [8, 384], strides = [1, 1]} : vector<8x512xf32> to vector<8x384xf32>
    %384 = arith.negf %383 : vector<8x384xf32>
    %385 = math.exp %384 : vector<8x384xf32>
    %cst_162 = arith.constant 1.000000e+00 : f32
    %386 = vector.broadcast %cst_162 : f32 to vector<8x384xf32>
    %387 = arith.addf %386, %385 : vector<8x384xf32>
    %388 = arith.divf %386, %387 : vector<8x384xf32>
    %389 = vector.extract_strided_slice %388 {offsets = [0, 0], sizes = [8, 128], strides = [1, 1]} : vector<8x384xf32> to vector<8x128xf32>
    %390 = vector.extract_strided_slice %388 {offsets = [0, 128], sizes = [8, 128], strides = [1, 1]} : vector<8x384xf32> to vector<8x128xf32>
    %391 = vector.extract_strided_slice %388 {offsets = [0, 256], sizes = [8, 128], strides = [1, 1]} : vector<8x384xf32> to vector<8x128xf32>
    %392 = vector.extract_strided_slice %382 {offsets = [0, 384], sizes = [8, 128], strides = [1, 1]} : vector<8x512xf32> to vector<8x128xf32>
    %393 = math.tanh %392 : vector<8x128xf32>
    %394 = arith.mulf %390, %370 : vector<8x128xf32>
    %395 = arith.mulf %389, %393 : vector<8x128xf32>
    %396 = arith.addf %394, %395 : vector<8x128xf32>
    %397 = math.tanh %396 : vector<8x128xf32>
    %398 = arith.mulf %391, %397 : vector<8x128xf32>
    %c6_163 = arith.constant 6 : index
    %c0_164 = arith.constant 0 : index
    %c0_165 = arith.constant 0 : index
    %399 = vector.load %arg4[%c6_163, %c0_164, %c0_165] : memref<8x8x128xf32, #tpu.memory_space<vmem>>, vector<1x8x128xf32>
    %400 = vector.shape_cast %399 : vector<1x8x128xf32> to vector<8x128xf32>
    %401 = vector.shape_cast %398 : vector<8x128xf32> to vector<1x8x128xf32>
    tpu.vector_store %arg4[%c6_163, %c0_164, %c0_165], %401 {strides = array<i32>} : memref<8x8x128xf32, #tpu.memory_space<vmem>>, vector<1x8x128xf32>,
    %c7_166 = arith.constant 7 : index
    %c0_167 = arith.constant 0 : index
    %c0_168 = arith.constant 0 : index
    %402 = vector.load %arg4[%c7_166, %c0_167, %c0_168] : memref<8x8x128xf32, #tpu.memory_space<vmem>>, vector<1x8x128xf32>
    %403 = vector.shape_cast %402 : vector<1x8x128xf32> to vector<8x128xf32>
    %404 = arith.addf %403, %398 : vector<8x128xf32>
    %c1_169 = arith.constant 1 : index
    %c0_170 = arith.constant 0 : index
    %c0_171 = arith.constant 0 : index
    %405 = vector.load %arg2[%c1_169, %c0_170, %c0_171] : memref<4x128x512xf32, #tpu.memory_space<vmem>>, vector<1x128x512xf32>
    %406 = vector.shape_cast %405 : vector<1x128x512xf32> to vector<128x512xf32>
    %cst_172 = arith.constant dense<0.000000e+00> : vector<8x512xf32>
    %407 = tpu.matmul %404, %406, %cst_172 {dimension_numbers = #tpu.dot_dimension_numbers<[1], [0], [0], [1], [0, 0, 1, 1], [], []>} : vector<8x128xf32>, vector<128x512xf32>, vector<8x512xf32> -> vector<8x512xf32>
    %408 = arith.addf %407, %217 : vector<8x512xf32>
    %409 = vector.extract_strided_slice %408 {offsets = [0, 0], sizes = [8, 384], strides = [1, 1]} : vector<8x512xf32> to vector<8x384xf32>
    %410 = arith.negf %409 : vector<8x384xf32>
    %411 = math.exp %410 : vector<8x384xf32>
    %cst_173 = arith.constant 1.000000e+00 : f32
    %412 = vector.broadcast %cst_173 : f32 to vector<8x384xf32>
    %413 = arith.addf %412, %411 : vector<8x384xf32>
    %414 = arith.divf %412, %413 : vector<8x384xf32>
    %415 = vector.extract_strided_slice %414 {offsets = [0, 0], sizes = [8, 128], strides = [1, 1]} : vector<8x384xf32> to vector<8x128xf32>
    %416 = vector.extract_strided_slice %414 {offsets = [0, 128], sizes = [8, 128], strides = [1, 1]} : vector<8x384xf32> to vector<8x128xf32>
    %417 = vector.extract_strided_slice %414 {offsets = [0, 256], sizes = [8, 128], strides = [1, 1]} : vector<8x384xf32> to vector<8x128xf32>
    %418 = vector.extract_strided_slice %408 {offsets = [0, 384], sizes = [8, 128], strides = [1, 1]} : vector<8x512xf32> to vector<8x128xf32>
    %419 = math.tanh %418 : vector<8x128xf32>
    %420 = arith.mulf %416, %396 : vector<8x128xf32>
    %421 = arith.mulf %415, %419 : vector<8x128xf32>
    %422 = arith.addf %420, %421 : vector<8x128xf32>
    %423 = math.tanh %422 : vector<8x128xf32>
    %424 = arith.mulf %417, %423 : vector<8x128xf32>
    %c7_174 = arith.constant 7 : index
    %c0_175 = arith.constant 0 : index
    %c0_176 = arith.constant 0 : index
    %425 = vector.load %arg4[%c7_174, %c0_175, %c0_176] : memref<8x8x128xf32, #tpu.memory_space<vmem>>, vector<1x8x128xf32>
    %426 = vector.shape_cast %425 : vector<1x8x128xf32> to vector<8x128xf32>
    %427 = vector.shape_cast %424 : vector<8x128xf32> to vector<1x8x128xf32>
    tpu.vector_store %arg4[%c7_174, %c0_175, %c0_176], %427 {strides = array<i32>} : memref<8x8x128xf32, #tpu.memory_space<vmem>>, vector<1x8x128xf32>,
    %c2_177 = arith.constant 2 : index
    %c0_178 = arith.constant 0 : index
    %c0_179 = arith.constant 0 : index
    %428 = vector.load %arg3[%c2_177, %c0_178, %c0_179] : memref<4x1x512xf32, #tpu.memory_space<vmem>>, vector<1x1x512xf32>
    %429 = vector.shape_cast %428 : vector<1x1x512xf32> to vector<1x512xf32>
    %430 = vector.shape_cast %429 : vector<1x512xf32> to vector<1x512xf32>
    %431 = vector.broadcast %430 : vector<1x512xf32> to vector<8x512xf32>
    %cst_180 = arith.constant 0.000000e+00 : f32
    %432 = vector.broadcast %cst_180 : f32 to vector<8x128xf32>
    %cst_181 = arith.constant 0.000000e+00 : f32
    %433 = vector.broadcast %cst_181 : f32 to vector<8x128xf32>
    %c0_182 = arith.constant 0 : index
    %c0_183 = arith.constant 0 : index
    %c0_184 = arith.constant 0 : index
    %434 = vector.load %arg4[%c0_182, %c0_183, %c0_184] : memref<8x8x128xf32, #tpu.memory_space<vmem>>, vector<1x8x128xf32>
    %435 = vector.shape_cast %434 : vector<1x8x128xf32> to vector<8x128xf32>
    %436 = arith.addf %435, %432 : vector<8x128xf32>
    %c2_185 = arith.constant 2 : index
    %c0_186 = arith.constant 0 : index
    %c0_187 = arith.constant 0 : index
    %437 = vector.load %arg2[%c2_185, %c0_186, %c0_187] : memref<4x128x512xf32, #tpu.memory_space<vmem>>, vector<1x128x512xf32>
    %438 = vector.shape_cast %437 : vector<1x128x512xf32> to vector<128x512xf32>
    %cst_188 = arith.constant dense<0.000000e+00> : vector<8x512xf32>
    %439 = tpu.matmul %436, %438, %cst_188 {dimension_numbers = #tpu.dot_dimension_numbers<[1], [0], [0], [1], [0, 0, 1, 1], [], []>} : vector<8x128xf32>, vector<128x512xf32>, vector<8x512xf32> -> vector<8x512xf32>
    %440 = arith.addf %439, %431 : vector<8x512xf32>
    %441 = vector.extract_strided_slice %440 {offsets = [0, 0], sizes = [8, 384], strides = [1, 1]} : vector<8x512xf32> to vector<8x384xf32>
    %442 = arith.negf %441 : vector<8x384xf32>
    %443 = math.exp %442 : vector<8x384xf32>
    %cst_189 = arith.constant 1.000000e+00 : f32
    %444 = vector.broadcast %cst_189 : f32 to vector<8x384xf32>
    %445 = arith.addf %444, %443 : vector<8x384xf32>
    %446 = arith.divf %444, %445 : vector<8x384xf32>
    %447 = vector.extract_strided_slice %446 {offsets = [0, 0], sizes = [8, 128], strides = [1, 1]} : vector<8x384xf32> to vector<8x128xf32>
    %448 = vector.extract_strided_slice %446 {offsets = [0, 128], sizes = [8, 128], strides = [1, 1]} : vector<8x384xf32> to vector<8x128xf32>
    %449 = vector.extract_strided_slice %446 {offsets = [0, 256], sizes = [8, 128], strides = [1, 1]} : vector<8x384xf32> to vector<8x128xf32>
    %450 = vector.extract_strided_slice %440 {offsets = [0, 384], sizes = [8, 128], strides = [1, 1]} : vector<8x512xf32> to vector<8x128xf32>
    %451 = math.tanh %450 : vector<8x128xf32>
    %452 = arith.mulf %448, %433 : vector<8x128xf32>
    %453 = arith.mulf %447, %451 : vector<8x128xf32>
    %454 = arith.addf %452, %453 : vector<8x128xf32>
    %455 = math.tanh %454 : vector<8x128xf32>
    %456 = arith.mulf %449, %455 : vector<8x128xf32>
    %c0_190 = arith.constant 0 : index
    %c0_191 = arith.constant 0 : index
    %c0_192 = arith.constant 0 : index
    %457 = vector.load %arg4[%c0_190, %c0_191, %c0_192] : memref<8x8x128xf32, #tpu.memory_space<vmem>>, vector<1x8x128xf32>
    %458 = vector.shape_cast %457 : vector<1x8x128xf32> to vector<8x128xf32>
    %459 = vector.shape_cast %456 : vector<8x128xf32> to vector<1x8x128xf32>
    tpu.vector_store %arg4[%c0_190, %c0_191, %c0_192], %459 {strides = array<i32>} : memref<8x8x128xf32, #tpu.memory_space<vmem>>, vector<1x8x128xf32>,
    %c1_193 = arith.constant 1 : index
    %c0_194 = arith.constant 0 : index
    %c0_195 = arith.constant 0 : index
    %460 = vector.load %arg4[%c1_193, %c0_194, %c0_195] : memref<8x8x128xf32, #tpu.memory_space<vmem>>, vector<1x8x128xf32>
    %461 = vector.shape_cast %460 : vector<1x8x128xf32> to vector<8x128xf32>
    %462 = arith.addf %461, %456 : vector<8x128xf32>
    %c2_196 = arith.constant 2 : index
    %c0_197 = arith.constant 0 : index
    %c0_198 = arith.constant 0 : index
    %463 = vector.load %arg2[%c2_196, %c0_197, %c0_198] : memref<4x128x512xf32, #tpu.memory_space<vmem>>, vector<1x128x512xf32>
    %464 = vector.shape_cast %463 : vector<1x128x512xf32> to vector<128x512xf32>
    %cst_199 = arith.constant dense<0.000000e+00> : vector<8x512xf32>
    %465 = tpu.matmul %462, %464, %cst_199 {dimension_numbers = #tpu.dot_dimension_numbers<[1], [0], [0], [1], [0, 0, 1, 1], [], []>} : vector<8x128xf32>, vector<128x512xf32>, vector<8x512xf32> -> vector<8x512xf32>
    %466 = arith.addf %465, %431 : vector<8x512xf32>
    %467 = vector.extract_strided_slice %466 {offsets = [0, 0], sizes = [8, 384], strides = [1, 1]} : vector<8x512xf32> to vector<8x384xf32>
    %468 = arith.negf %467 : vector<8x384xf32>
    %469 = math.exp %468 : vector<8x384xf32>
    %cst_200 = arith.constant 1.000000e+00 : f32
    %470 = vector.broadcast %cst_200 : f32 to vector<8x384xf32>
    %471 = arith.addf %470, %469 : vector<8x384xf32>
    %472 = arith.divf %470, %471 : vector<8x384xf32>
    %473 = vector.extract_strided_slice %472 {offsets = [0, 0], sizes = [8, 128], strides = [1, 1]} : vector<8x384xf32> to vector<8x128xf32>
    %474 = vector.extract_strided_slice %472 {offsets = [0, 128], sizes = [8, 128], strides = [1, 1]} : vector<8x384xf32> to vector<8x128xf32>
    %475 = vector.extract_strided_slice %472 {offsets = [0, 256], sizes = [8, 128], strides = [1, 1]} : vector<8x384xf32> to vector<8x128xf32>
    %476 = vector.extract_strided_slice %466 {offsets = [0, 384], sizes = [8, 128], strides = [1, 1]} : vector<8x512xf32> to vector<8x128xf32>
    %477 = math.tanh %476 : vector<8x128xf32>
    %478 = arith.mulf %474, %454 : vector<8x128xf32>
    %479 = arith.mulf %473, %477 : vector<8x128xf32>
    %480 = arith.addf %478, %479 : vector<8x128xf32>
    %481 = math.tanh %480 : vector<8x128xf32>
    %482 = arith.mulf %475, %481 : vector<8x128xf32>
    %c1_201 = arith.constant 1 : index
    %c0_202 = arith.constant 0 : index
    %c0_203 = arith.constant 0 : index
    %483 = vector.load %arg4[%c1_201, %c0_202, %c0_203] : memref<8x8x128xf32, #tpu.memory_space<vmem>>, vector<1x8x128xf32>
    %484 = vector.shape_cast %483 : vector<1x8x128xf32> to vector<8x128xf32>
    %485 = vector.shape_cast %482 : vector<8x128xf32> to vector<1x8x128xf32>
    tpu.vector_store %arg4[%c1_201, %c0_202, %c0_203], %485 {strides = array<i32>} : memref<8x8x128xf32, #tpu.memory_space<vmem>>, vector<1x8x128xf32>,
    %c2_204 = arith.constant 2 : index
    %c0_205 = arith.constant 0 : index
    %c0_206 = arith.constant 0 : index
    %486 = vector.load %arg4[%c2_204, %c0_205, %c0_206] : memref<8x8x128xf32, #tpu.memory_space<vmem>>, vector<1x8x128xf32>
    %487 = vector.shape_cast %486 : vector<1x8x128xf32> to vector<8x128xf32>
    %488 = arith.addf %487, %482 : vector<8x128xf32>
    %c2_207 = arith.constant 2 : index
    %c0_208 = arith.constant 0 : index
    %c0_209 = arith.constant 0 : index
    %489 = vector.load %arg2[%c2_207, %c0_208, %c0_209] : memref<4x128x512xf32, #tpu.memory_space<vmem>>, vector<1x128x512xf32>
    %490 = vector.shape_cast %489 : vector<1x128x512xf32> to vector<128x512xf32>
    %cst_210 = arith.constant dense<0.000000e+00> : vector<8x512xf32>
    %491 = tpu.matmul %488, %490, %cst_210 {dimension_numbers = #tpu.dot_dimension_numbers<[1], [0], [0], [1], [0, 0, 1, 1], [], []>} : vector<8x128xf32>, vector<128x512xf32>, vector<8x512xf32> -> vector<8x512xf32>
    %492 = arith.addf %491, %431 : vector<8x512xf32>
    %493 = vector.extract_strided_slice %492 {offsets = [0, 0], sizes = [8, 384], strides = [1, 1]} : vector<8x512xf32> to vector<8x384xf32>
    %494 = arith.negf %493 : vector<8x384xf32>
    %495 = math.exp %494 : vector<8x384xf32>
    %cst_211 = arith.constant 1.000000e+00 : f32
    %496 = vector.broadcast %cst_211 : f32 to vector<8x384xf32>
    %497 = arith.addf %496, %495 : vector<8x384xf32>
    %498 = arith.divf %496, %497 : vector<8x384xf32>
    %499 = vector.extract_strided_slice %498 {offsets = [0, 0], sizes = [8, 128], strides = [1, 1]} : vector<8x384xf32> to vector<8x128xf32>
    %500 = vector.extract_strided_slice %498 {offsets = [0, 128], sizes = [8, 128], strides = [1, 1]} : vector<8x384xf32> to vector<8x128xf32>
    %501 = vector.extract_strided_slice %498 {offsets = [0, 256], sizes = [8, 128], strides = [1, 1]} : vector<8x384xf32> to vector<8x128xf32>
    %502 = vector.extract_strided_slice %492 {offsets = [0, 384], sizes = [8, 128], strides = [1, 1]} : vector<8x512xf32> to vector<8x128xf32>
    %503 = math.tanh %502 : vector<8x128xf32>
    %504 = arith.mulf %500, %480 : vector<8x128xf32>
    %505 = arith.mulf %499, %503 : vector<8x128xf32>
    %506 = arith.addf %504, %505 : vector<8x128xf32>
    %507 = math.tanh %506 : vector<8x128xf32>
    %508 = arith.mulf %501, %507 : vector<8x128xf32>
    %c2_212 = arith.constant 2 : index
    %c0_213 = arith.constant 0 : index
    %c0_214 = arith.constant 0 : index
    %509 = vector.load %arg4[%c2_212, %c0_213, %c0_214] : memref<8x8x128xf32, #tpu.memory_space<vmem>>, vector<1x8x128xf32>
    %510 = vector.shape_cast %509 : vector<1x8x128xf32> to vector<8x128xf32>
    %511 = vector.shape_cast %508 : vector<8x128xf32> to vector<1x8x128xf32>
    tpu.vector_store %arg4[%c2_212, %c0_213, %c0_214], %511 {strides = array<i32>} : memref<8x8x128xf32, #tpu.memory_space<vmem>>, vector<1x8x128xf32>,
    %c3_215 = arith.constant 3 : index
    %c0_216 = arith.constant 0 : index
    %c0_217 = arith.constant 0 : index
    %512 = vector.load %arg4[%c3_215, %c0_216, %c0_217] : memref<8x8x128xf32, #tpu.memory_space<vmem>>, vector<1x8x128xf32>
    %513 = vector.shape_cast %512 : vector<1x8x128xf32> to vector<8x128xf32>
    %514 = arith.addf %513, %508 : vector<8x128xf32>
    %c2_218 = arith.constant 2 : index
    %c0_219 = arith.constant 0 : index
    %c0_220 = arith.constant 0 : index
    %515 = vector.load %arg2[%c2_218, %c0_219, %c0_220] : memref<4x128x512xf32, #tpu.memory_space<vmem>>, vector<1x128x512xf32>
    %516 = vector.shape_cast %515 : vector<1x128x512xf32> to vector<128x512xf32>
    %cst_221 = arith.constant dense<0.000000e+00> : vector<8x512xf32>
    %517 = tpu.matmul %514, %516, %cst_221 {dimension_numbers = #tpu.dot_dimension_numbers<[1], [0], [0], [1], [0, 0, 1, 1], [], []>} : vector<8x128xf32>, vector<128x512xf32>, vector<8x512xf32> -> vector<8x512xf32>
    %518 = arith.addf %517, %431 : vector<8x512xf32>
    %519 = vector.extract_strided_slice %518 {offsets = [0, 0], sizes = [8, 384], strides = [1, 1]} : vector<8x512xf32> to vector<8x384xf32>
    %520 = arith.negf %519 : vector<8x384xf32>
    %521 = math.exp %520 : vector<8x384xf32>
    %cst_222 = arith.constant 1.000000e+00 : f32
    %522 = vector.broadcast %cst_222 : f32 to vector<8x384xf32>
    %523 = arith.addf %522, %521 : vector<8x384xf32>
    %524 = arith.divf %522, %523 : vector<8x384xf32>
    %525 = vector.extract_strided_slice %524 {offsets = [0, 0], sizes = [8, 128], strides = [1, 1]} : vector<8x384xf32> to vector<8x128xf32>
    %526 = vector.extract_strided_slice %524 {offsets = [0, 128], sizes = [8, 128], strides = [1, 1]} : vector<8x384xf32> to vector<8x128xf32>
    %527 = vector.extract_strided_slice %524 {offsets = [0, 256], sizes = [8, 128], strides = [1, 1]} : vector<8x384xf32> to vector<8x128xf32>
    %528 = vector.extract_strided_slice %518 {offsets = [0, 384], sizes = [8, 128], strides = [1, 1]} : vector<8x512xf32> to vector<8x128xf32>
    %529 = math.tanh %528 : vector<8x128xf32>
    %530 = arith.mulf %526, %506 : vector<8x128xf32>
    %531 = arith.mulf %525, %529 : vector<8x128xf32>
    %532 = arith.addf %530, %531 : vector<8x128xf32>
    %533 = math.tanh %532 : vector<8x128xf32>
    %534 = arith.mulf %527, %533 : vector<8x128xf32>
    %c3_223 = arith.constant 3 : index
    %c0_224 = arith.constant 0 : index
    %c0_225 = arith.constant 0 : index
    %535 = vector.load %arg4[%c3_223, %c0_224, %c0_225] : memref<8x8x128xf32, #tpu.memory_space<vmem>>, vector<1x8x128xf32>
    %536 = vector.shape_cast %535 : vector<1x8x128xf32> to vector<8x128xf32>
    %537 = vector.shape_cast %534 : vector<8x128xf32> to vector<1x8x128xf32>
    tpu.vector_store %arg4[%c3_223, %c0_224, %c0_225], %537 {strides = array<i32>} : memref<8x8x128xf32, #tpu.memory_space<vmem>>, vector<1x8x128xf32>,
    %c4_226 = arith.constant 4 : index
    %c0_227 = arith.constant 0 : index
    %c0_228 = arith.constant 0 : index
    %538 = vector.load %arg4[%c4_226, %c0_227, %c0_228] : memref<8x8x128xf32, #tpu.memory_space<vmem>>, vector<1x8x128xf32>
    %539 = vector.shape_cast %538 : vector<1x8x128xf32> to vector<8x128xf32>
    %540 = arith.addf %539, %534 : vector<8x128xf32>
    %c2_229 = arith.constant 2 : index
    %c0_230 = arith.constant 0 : index
    %c0_231 = arith.constant 0 : index
    %541 = vector.load %arg2[%c2_229, %c0_230, %c0_231] : memref<4x128x512xf32, #tpu.memory_space<vmem>>, vector<1x128x512xf32>
    %542 = vector.shape_cast %541 : vector<1x128x512xf32> to vector<128x512xf32>
    %cst_232 = arith.constant dense<0.000000e+00> : vector<8x512xf32>
    %543 = tpu.matmul %540, %542, %cst_232 {dimension_numbers = #tpu.dot_dimension_numbers<[1], [0], [0], [1], [0, 0, 1, 1], [], []>} : vector<8x128xf32>, vector<128x512xf32>, vector<8x512xf32> -> vector<8x512xf32>
    %544 = arith.addf %543, %431 : vector<8x512xf32>
    %545 = vector.extract_strided_slice %544 {offsets = [0, 0], sizes = [8, 384], strides = [1, 1]} : vector<8x512xf32> to vector<8x384xf32>
    %546 = arith.negf %545 : vector<8x384xf32>
    %547 = math.exp %546 : vector<8x384xf32>
    %cst_233 = arith.constant 1.000000e+00 : f32
    %548 = vector.broadcast %cst_233 : f32 to vector<8x384xf32>
    %549 = arith.addf %548, %547 : vector<8x384xf32>
    %550 = arith.divf %548, %549 : vector<8x384xf32>
    %551 = vector.extract_strided_slice %550 {offsets = [0, 0], sizes = [8, 128], strides = [1, 1]} : vector<8x384xf32> to vector<8x128xf32>
    %552 = vector.extract_strided_slice %550 {offsets = [0, 128], sizes = [8, 128], strides = [1, 1]} : vector<8x384xf32> to vector<8x128xf32>
    %553 = vector.extract_strided_slice %550 {offsets = [0, 256], sizes = [8, 128], strides = [1, 1]} : vector<8x384xf32> to vector<8x128xf32>
    %554 = vector.extract_strided_slice %544 {offsets = [0, 384], sizes = [8, 128], strides = [1, 1]} : vector<8x512xf32> to vector<8x128xf32>
    %555 = math.tanh %554 : vector<8x128xf32>
    %556 = arith.mulf %552, %532 : vector<8x128xf32>
    %557 = arith.mulf %551, %555 : vector<8x128xf32>
    %558 = arith.addf %556, %557 : vector<8x128xf32>
    %559 = math.tanh %558 : vector<8x128xf32>
    %560 = arith.mulf %553, %559 : vector<8x128xf32>
    %c4_234 = arith.constant 4 : index
    %c0_235 = arith.constant 0 : index
    %c0_236 = arith.constant 0 : index
    %561 = vector.load %arg4[%c4_234, %c0_235, %c0_236] : memref<8x8x128xf32, #tpu.memory_space<vmem>>, vector<1x8x128xf32>
    %562 = vector.shape_cast %561 : vector<1x8x128xf32> to vector<8x128xf32>
    %563 = vector.shape_cast %560 : vector<8x128xf32> to vector<1x8x128xf32>
    tpu.vector_store %arg4[%c4_234, %c0_235, %c0_236], %563 {strides = array<i32>} : memref<8x8x128xf32, #tpu.memory_space<vmem>>, vector<1x8x128xf32>,
    %c5_237 = arith.constant 5 : index
    %c0_238 = arith.constant 0 : index
    %c0_239 = arith.constant 0 : index
    %564 = vector.load %arg4[%c5_237, %c0_238, %c0_239] : memref<8x8x128xf32, #tpu.memory_space<vmem>>, vector<1x8x128xf32>
    %565 = vector.shape_cast %564 : vector<1x8x128xf32> to vector<8x128xf32>
    %566 = arith.addf %565, %560 : vector<8x128xf32>
    %c2_240 = arith.constant 2 : index
    %c0_241 = arith.constant 0 : index
    %c0_242 = arith.constant 0 : index
    %567 = vector.load %arg2[%c2_240, %c0_241, %c0_242] : memref<4x128x512xf32, #tpu.memory_space<vmem>>, vector<1x128x512xf32>
    %568 = vector.shape_cast %567 : vector<1x128x512xf32> to vector<128x512xf32>
    %cst_243 = arith.constant dense<0.000000e+00> : vector<8x512xf32>
    %569 = tpu.matmul %566, %568, %cst_243 {dimension_numbers = #tpu.dot_dimension_numbers<[1], [0], [0], [1], [0, 0, 1, 1], [], []>} : vector<8x128xf32>, vector<128x512xf32>, vector<8x512xf32> -> vector<8x512xf32>
    %570 = arith.addf %569, %431 : vector<8x512xf32>
    %571 = vector.extract_strided_slice %570 {offsets = [0, 0], sizes = [8, 384], strides = [1, 1]} : vector<8x512xf32> to vector<8x384xf32>
    %572 = arith.negf %571 : vector<8x384xf32>
    %573 = math.exp %572 : vector<8x384xf32>
    %cst_244 = arith.constant 1.000000e+00 : f32
    %574 = vector.broadcast %cst_244 : f32 to vector<8x384xf32>
    %575 = arith.addf %574, %573 : vector<8x384xf32>
    %576 = arith.divf %574, %575 : vector<8x384xf32>
    %577 = vector.extract_strided_slice %576 {offsets = [0, 0], sizes = [8, 128], strides = [1, 1]} : vector<8x384xf32> to vector<8x128xf32>
    %578 = vector.extract_strided_slice %576 {offsets = [0, 128], sizes = [8, 128], strides = [1, 1]} : vector<8x384xf32> to vector<8x128xf32>
    %579 = vector.extract_strided_slice %576 {offsets = [0, 256], sizes = [8, 128], strides = [1, 1]} : vector<8x384xf32> to vector<8x128xf32>
    %580 = vector.extract_strided_slice %570 {offsets = [0, 384], sizes = [8, 128], strides = [1, 1]} : vector<8x512xf32> to vector<8x128xf32>
    %581 = math.tanh %580 : vector<8x128xf32>
    %582 = arith.mulf %578, %558 : vector<8x128xf32>
    %583 = arith.mulf %577, %581 : vector<8x128xf32>
    %584 = arith.addf %582, %583 : vector<8x128xf32>
    %585 = math.tanh %584 : vector<8x128xf32>
    %586 = arith.mulf %579, %585 : vector<8x128xf32>
    %c5_245 = arith.constant 5 : index
    %c0_246 = arith.constant 0 : index
    %c0_247 = arith.constant 0 : index
    %587 = vector.load %arg4[%c5_245, %c0_246, %c0_247] : memref<8x8x128xf32, #tpu.memory_space<vmem>>, vector<1x8x128xf32>
    %588 = vector.shape_cast %587 : vector<1x8x128xf32> to vector<8x128xf32>
    %589 = vector.shape_cast %586 : vector<8x128xf32> to vector<1x8x128xf32>
    tpu.vector_store %arg4[%c5_245, %c0_246, %c0_247], %589 {strides = array<i32>} : memref<8x8x128xf32, #tpu.memory_space<vmem>>, vector<1x8x128xf32>,
    %c6_248 = arith.constant 6 : index
    %c0_249 = arith.constant 0 : index
    %c0_250 = arith.constant 0 : index
    %590 = vector.load %arg4[%c6_248, %c0_249, %c0_250] : memref<8x8x128xf32, #tpu.memory_space<vmem>>, vector<1x8x128xf32>
    %591 = vector.shape_cast %590 : vector<1x8x128xf32> to vector<8x128xf32>
    %592 = arith.addf %591, %586 : vector<8x128xf32>
    %c2_251 = arith.constant 2 : index
    %c0_252 = arith.constant 0 : index
    %c0_253 = arith.constant 0 : index
    %593 = vector.load %arg2[%c2_251, %c0_252, %c0_253] : memref<4x128x512xf32, #tpu.memory_space<vmem>>, vector<1x128x512xf32>
    %594 = vector.shape_cast %593 : vector<1x128x512xf32> to vector<128x512xf32>
    %cst_254 = arith.constant dense<0.000000e+00> : vector<8x512xf32>
    %595 = tpu.matmul %592, %594, %cst_254 {dimension_numbers = #tpu.dot_dimension_numbers<[1], [0], [0], [1], [0, 0, 1, 1], [], []>} : vector<8x128xf32>, vector<128x512xf32>, vector<8x512xf32> -> vector<8x512xf32>
    %596 = arith.addf %595, %431 : vector<8x512xf32>
    %597 = vector.extract_strided_slice %596 {offsets = [0, 0], sizes = [8, 384], strides = [1, 1]} : vector<8x512xf32> to vector<8x384xf32>
    %598 = arith.negf %597 : vector<8x384xf32>
    %599 = math.exp %598 : vector<8x384xf32>
    %cst_255 = arith.constant 1.000000e+00 : f32
    %600 = vector.broadcast %cst_255 : f32 to vector<8x384xf32>
    %601 = arith.addf %600, %599 : vector<8x384xf32>
    %602 = arith.divf %600, %601 : vector<8x384xf32>
    %603 = vector.extract_strided_slice %602 {offsets = [0, 0], sizes = [8, 128], strides = [1, 1]} : vector<8x384xf32> to vector<8x128xf32>
    %604 = vector.extract_strided_slice %602 {offsets = [0, 128], sizes = [8, 128], strides = [1, 1]} : vector<8x384xf32> to vector<8x128xf32>
    %605 = vector.extract_strided_slice %602 {offsets = [0, 256], sizes = [8, 128], strides = [1, 1]} : vector<8x384xf32> to vector<8x128xf32>
    %606 = vector.extract_strided_slice %596 {offsets = [0, 384], sizes = [8, 128], strides = [1, 1]} : vector<8x512xf32> to vector<8x128xf32>
    %607 = math.tanh %606 : vector<8x128xf32>
    %608 = arith.mulf %604, %584 : vector<8x128xf32>
    %609 = arith.mulf %603, %607 : vector<8x128xf32>
    %610 = arith.addf %608, %609 : vector<8x128xf32>
    %611 = math.tanh %610 : vector<8x128xf32>
    %612 = arith.mulf %605, %611 : vector<8x128xf32>
    %c6_256 = arith.constant 6 : index
    %c0_257 = arith.constant 0 : index
    %c0_258 = arith.constant 0 : index
    %613 = vector.load %arg4[%c6_256, %c0_257, %c0_258] : memref<8x8x128xf32, #tpu.memory_space<vmem>>, vector<1x8x128xf32>
    %614 = vector.shape_cast %613 : vector<1x8x128xf32> to vector<8x128xf32>
    %615 = vector.shape_cast %612 : vector<8x128xf32> to vector<1x8x128xf32>
    tpu.vector_store %arg4[%c6_256, %c0_257, %c0_258], %615 {strides = array<i32>} : memref<8x8x128xf32, #tpu.memory_space<vmem>>, vector<1x8x128xf32>,
    %c7_259 = arith.constant 7 : index
    %c0_260 = arith.constant 0 : index
    %c0_261 = arith.constant 0 : index
    %616 = vector.load %arg4[%c7_259, %c0_260, %c0_261] : memref<8x8x128xf32, #tpu.memory_space<vmem>>, vector<1x8x128xf32>
    %617 = vector.shape_cast %616 : vector<1x8x128xf32> to vector<8x128xf32>
    %618 = arith.addf %617, %612 : vector<8x128xf32>
    %c2_262 = arith.constant 2 : index
    %c0_263 = arith.constant 0 : index
    %c0_264 = arith.constant 0 : index
    %619 = vector.load %arg2[%c2_262, %c0_263, %c0_264] : memref<4x128x512xf32, #tpu.memory_space<vmem>>, vector<1x128x512xf32>
    %620 = vector.shape_cast %619 : vector<1x128x512xf32> to vector<128x512xf32>
    %cst_265 = arith.constant dense<0.000000e+00> : vector<8x512xf32>
    %621 = tpu.matmul %618, %620, %cst_265 {dimension_numbers = #tpu.dot_dimension_numbers<[1], [0], [0], [1], [0, 0, 1, 1], [], []>} : vector<8x128xf32>, vector<128x512xf32>, vector<8x512xf32> -> vector<8x512xf32>
    %622 = arith.addf %621, %431 : vector<8x512xf32>
    %623 = vector.extract_strided_slice %622 {offsets = [0, 0], sizes = [8, 384], strides = [1, 1]} : vector<8x512xf32> to vector<8x384xf32>
    %624 = arith.negf %623 : vector<8x384xf32>
    %625 = math.exp %624 : vector<8x384xf32>
    %cst_266 = arith.constant 1.000000e+00 : f32
    %626 = vector.broadcast %cst_266 : f32 to vector<8x384xf32>
    %627 = arith.addf %626, %625 : vector<8x384xf32>
    %628 = arith.divf %626, %627 : vector<8x384xf32>
    %629 = vector.extract_strided_slice %628 {offsets = [0, 0], sizes = [8, 128], strides = [1, 1]} : vector<8x384xf32> to vector<8x128xf32>
    %630 = vector.extract_strided_slice %628 {offsets = [0, 128], sizes = [8, 128], strides = [1, 1]} : vector<8x384xf32> to vector<8x128xf32>
    %631 = vector.extract_strided_slice %628 {offsets = [0, 256], sizes = [8, 128], strides = [1, 1]} : vector<8x384xf32> to vector<8x128xf32>
    %632 = vector.extract_strided_slice %622 {offsets = [0, 384], sizes = [8, 128], strides = [1, 1]} : vector<8x512xf32> to vector<8x128xf32>
    %633 = math.tanh %632 : vector<8x128xf32>
    %634 = arith.mulf %630, %610 : vector<8x128xf32>
    %635 = arith.mulf %629, %633 : vector<8x128xf32>
    %636 = arith.addf %634, %635 : vector<8x128xf32>
    %637 = math.tanh %636 : vector<8x128xf32>
    %638 = arith.mulf %631, %637 : vector<8x128xf32>
    %c7_267 = arith.constant 7 : index
    %c0_268 = arith.constant 0 : index
    %c0_269 = arith.constant 0 : index
    %639 = vector.load %arg4[%c7_267, %c0_268, %c0_269] : memref<8x8x128xf32, #tpu.memory_space<vmem>>, vector<1x8x128xf32>
    %640 = vector.shape_cast %639 : vector<1x8x128xf32> to vector<8x128xf32>
    %641 = vector.shape_cast %638 : vector<8x128xf32> to vector<1x8x128xf32>
    tpu.vector_store %arg4[%c7_267, %c0_268, %c0_269], %641 {strides = array<i32>} : memref<8x8x128xf32, #tpu.memory_space<vmem>>, vector<1x8x128xf32>,
    %c3_270 = arith.constant 3 : index
    %c0_271 = arith.constant 0 : index
    %c0_272 = arith.constant 0 : index
    %642 = vector.load %arg3[%c3_270, %c0_271, %c0_272] : memref<4x1x512xf32, #tpu.memory_space<vmem>>, vector<1x1x512xf32>
    %643 = vector.shape_cast %642 : vector<1x1x512xf32> to vector<1x512xf32>
    %644 = vector.shape_cast %643 : vector<1x512xf32> to vector<1x512xf32>
    %645 = vector.broadcast %644 : vector<1x512xf32> to vector<8x512xf32>
    %cst_273 = arith.constant 0.000000e+00 : f32
    %646 = vector.broadcast %cst_273 : f32 to vector<8x128xf32>
    %cst_274 = arith.constant 0.000000e+00 : f32
    %647 = vector.broadcast %cst_274 : f32 to vector<8x128xf32>
    %c0_275 = arith.constant 0 : index
    %c0_276 = arith.constant 0 : index
    %c0_277 = arith.constant 0 : index
    %648 = vector.load %arg4[%c0_275, %c0_276, %c0_277] : memref<8x8x128xf32, #tpu.memory_space<vmem>>, vector<1x8x128xf32>
    %649 = vector.shape_cast %648 : vector<1x8x128xf32> to vector<8x128xf32>
    %650 = arith.addf %649, %646 : vector<8x128xf32>
    %c3_278 = arith.constant 3 : index
    %c0_279 = arith.constant 0 : index
    %c0_280 = arith.constant 0 : index
    %651 = vector.load %arg2[%c3_278, %c0_279, %c0_280] : memref<4x128x512xf32, #tpu.memory_space<vmem>>, vector<1x128x512xf32>
    %652 = vector.shape_cast %651 : vector<1x128x512xf32> to vector<128x512xf32>
    %cst_281 = arith.constant dense<0.000000e+00> : vector<8x512xf32>
    %653 = tpu.matmul %650, %652, %cst_281 {dimension_numbers = #tpu.dot_dimension_numbers<[1], [0], [0], [1], [0, 0, 1, 1], [], []>} : vector<8x128xf32>, vector<128x512xf32>, vector<8x512xf32> -> vector<8x512xf32>
    %654 = arith.addf %653, %645 : vector<8x512xf32>
    %655 = vector.extract_strided_slice %654 {offsets = [0, 0], sizes = [8, 384], strides = [1, 1]} : vector<8x512xf32> to vector<8x384xf32>
    %656 = arith.negf %655 : vector<8x384xf32>
    %657 = math.exp %656 : vector<8x384xf32>
    %cst_282 = arith.constant 1.000000e+00 : f32
    %658 = vector.broadcast %cst_282 : f32 to vector<8x384xf32>
    %659 = arith.addf %658, %657 : vector<8x384xf32>
    %660 = arith.divf %658, %659 : vector<8x384xf32>
    %661 = vector.extract_strided_slice %660 {offsets = [0, 0], sizes = [8, 128], strides = [1, 1]} : vector<8x384xf32> to vector<8x128xf32>
    %662 = vector.extract_strided_slice %660 {offsets = [0, 128], sizes = [8, 128], strides = [1, 1]} : vector<8x384xf32> to vector<8x128xf32>
    %663 = vector.extract_strided_slice %660 {offsets = [0, 256], sizes = [8, 128], strides = [1, 1]} : vector<8x384xf32> to vector<8x128xf32>
    %664 = vector.extract_strided_slice %654 {offsets = [0, 384], sizes = [8, 128], strides = [1, 1]} : vector<8x512xf32> to vector<8x128xf32>
    %665 = math.tanh %664 : vector<8x128xf32>
    %666 = arith.mulf %662, %647 : vector<8x128xf32>
    %667 = arith.mulf %661, %665 : vector<8x128xf32>
    %668 = arith.addf %666, %667 : vector<8x128xf32>
    %669 = math.tanh %668 : vector<8x128xf32>
    %670 = arith.mulf %663, %669 : vector<8x128xf32>
    %c0_283 = arith.constant 0 : index
    %c0_284 = arith.constant 0 : index
    %c0_285 = arith.constant 0 : index
    %671 = vector.load %arg4[%c0_283, %c0_284, %c0_285] : memref<8x8x128xf32, #tpu.memory_space<vmem>>, vector<1x8x128xf32>
    %672 = vector.shape_cast %671 : vector<1x8x128xf32> to vector<8x128xf32>
    %673 = vector.shape_cast %670 : vector<8x128xf32> to vector<1x8x128xf32>
    tpu.vector_store %arg4[%c0_283, %c0_284, %c0_285], %673 {strides = array<i32>} : memref<8x8x128xf32, #tpu.memory_space<vmem>>, vector<1x8x128xf32>,
    %c1_286 = arith.constant 1 : index
    %c0_287 = arith.constant 0 : index
    %c0_288 = arith.constant 0 : index
    %674 = vector.load %arg4[%c1_286, %c0_287, %c0_288] : memref<8x8x128xf32, #tpu.memory_space<vmem>>, vector<1x8x128xf32>
    %675 = vector.shape_cast %674 : vector<1x8x128xf32> to vector<8x128xf32>
    %676 = arith.addf %675, %670 : vector<8x128xf32>
    %c3_289 = arith.constant 3 : index
    %c0_290 = arith.constant 0 : index
    %c0_291 = arith.constant 0 : index
    %677 = vector.load %arg2[%c3_289, %c0_290, %c0_291] : memref<4x128x512xf32, #tpu.memory_space<vmem>>, vector<1x128x512xf32>
    %678 = vector.shape_cast %677 : vector<1x128x512xf32> to vector<128x512xf32>
    %cst_292 = arith.constant dense<0.000000e+00> : vector<8x512xf32>
    %679 = tpu.matmul %676, %678, %cst_292 {dimension_numbers = #tpu.dot_dimension_numbers<[1], [0], [0], [1], [0, 0, 1, 1], [], []>} : vector<8x128xf32>, vector<128x512xf32>, vector<8x512xf32> -> vector<8x512xf32>
    %680 = arith.addf %679, %645 : vector<8x512xf32>
    %681 = vector.extract_strided_slice %680 {offsets = [0, 0], sizes = [8, 384], strides = [1, 1]} : vector<8x512xf32> to vector<8x384xf32>
    %682 = arith.negf %681 : vector<8x384xf32>
    %683 = math.exp %682 : vector<8x384xf32>
    %cst_293 = arith.constant 1.000000e+00 : f32
    %684 = vector.broadcast %cst_293 : f32 to vector<8x384xf32>
    %685 = arith.addf %684, %683 : vector<8x384xf32>
    %686 = arith.divf %684, %685 : vector<8x384xf32>
    %687 = vector.extract_strided_slice %686 {offsets = [0, 0], sizes = [8, 128], strides = [1, 1]} : vector<8x384xf32> to vector<8x128xf32>
    %688 = vector.extract_strided_slice %686 {offsets = [0, 128], sizes = [8, 128], strides = [1, 1]} : vector<8x384xf32> to vector<8x128xf32>
    %689 = vector.extract_strided_slice %686 {offsets = [0, 256], sizes = [8, 128], strides = [1, 1]} : vector<8x384xf32> to vector<8x128xf32>
    %690 = vector.extract_strided_slice %680 {offsets = [0, 384], sizes = [8, 128], strides = [1, 1]} : vector<8x512xf32> to vector<8x128xf32>
    %691 = math.tanh %690 : vector<8x128xf32>
    %692 = arith.mulf %688, %668 : vector<8x128xf32>
    %693 = arith.mulf %687, %691 : vector<8x128xf32>
    %694 = arith.addf %692, %693 : vector<8x128xf32>
    %695 = math.tanh %694 : vector<8x128xf32>
    %696 = arith.mulf %689, %695 : vector<8x128xf32>
    %c1_294 = arith.constant 1 : index
    %c0_295 = arith.constant 0 : index
    %c0_296 = arith.constant 0 : index
    %697 = vector.load %arg4[%c1_294, %c0_295, %c0_296] : memref<8x8x128xf32, #tpu.memory_space<vmem>>, vector<1x8x128xf32>
    %698 = vector.shape_cast %697 : vector<1x8x128xf32> to vector<8x128xf32>
    %699 = vector.shape_cast %696 : vector<8x128xf32> to vector<1x8x128xf32>
    tpu.vector_store %arg4[%c1_294, %c0_295, %c0_296], %699 {strides = array<i32>} : memref<8x8x128xf32, #tpu.memory_space<vmem>>, vector<1x8x128xf32>,
    %c2_297 = arith.constant 2 : index
    %c0_298 = arith.constant 0 : index
    %c0_299 = arith.constant 0 : index
    %700 = vector.load %arg4[%c2_297, %c0_298, %c0_299] : memref<8x8x128xf32, #tpu.memory_space<vmem>>, vector<1x8x128xf32>
    %701 = vector.shape_cast %700 : vector<1x8x128xf32> to vector<8x128xf32>
    %702 = arith.addf %701, %696 : vector<8x128xf32>
    %c3_300 = arith.constant 3 : index
    %c0_301 = arith.constant 0 : index
    %c0_302 = arith.constant 0 : index
    %703 = vector.load %arg2[%c3_300, %c0_301, %c0_302] : memref<4x128x512xf32, #tpu.memory_space<vmem>>, vector<1x128x512xf32>
    %704 = vector.shape_cast %703 : vector<1x128x512xf32> to vector<128x512xf32>
    %cst_303 = arith.constant dense<0.000000e+00> : vector<8x512xf32>
    %705 = tpu.matmul %702, %704, %cst_303 {dimension_numbers = #tpu.dot_dimension_numbers<[1], [0], [0], [1], [0, 0, 1, 1], [], []>} : vector<8x128xf32>, vector<128x512xf32>, vector<8x512xf32> -> vector<8x512xf32>
    %706 = arith.addf %705, %645 : vector<8x512xf32>
    %707 = vector.extract_strided_slice %706 {offsets = [0, 0], sizes = [8, 384], strides = [1, 1]} : vector<8x512xf32> to vector<8x384xf32>
    %708 = arith.negf %707 : vector<8x384xf32>
    %709 = math.exp %708 : vector<8x384xf32>
    %cst_304 = arith.constant 1.000000e+00 : f32
    %710 = vector.broadcast %cst_304 : f32 to vector<8x384xf32>
    %711 = arith.addf %710, %709 : vector<8x384xf32>
    %712 = arith.divf %710, %711 : vector<8x384xf32>
    %713 = vector.extract_strided_slice %712 {offsets = [0, 0], sizes = [8, 128], strides = [1, 1]} : vector<8x384xf32> to vector<8x128xf32>
    %714 = vector.extract_strided_slice %712 {offsets = [0, 128], sizes = [8, 128], strides = [1, 1]} : vector<8x384xf32> to vector<8x128xf32>
    %715 = vector.extract_strided_slice %712 {offsets = [0, 256], sizes = [8, 128], strides = [1, 1]} : vector<8x384xf32> to vector<8x128xf32>
    %716 = vector.extract_strided_slice %706 {offsets = [0, 384], sizes = [8, 128], strides = [1, 1]} : vector<8x512xf32> to vector<8x128xf32>
    %717 = math.tanh %716 : vector<8x128xf32>
    %718 = arith.mulf %714, %694 : vector<8x128xf32>
    %719 = arith.mulf %713, %717 : vector<8x128xf32>
    %720 = arith.addf %718, %719 : vector<8x128xf32>
    %721 = math.tanh %720 : vector<8x128xf32>
    %722 = arith.mulf %715, %721 : vector<8x128xf32>
    %c2_305 = arith.constant 2 : index
    %c0_306 = arith.constant 0 : index
    %c0_307 = arith.constant 0 : index
    %723 = vector.load %arg4[%c2_305, %c0_306, %c0_307] : memref<8x8x128xf32, #tpu.memory_space<vmem>>, vector<1x8x128xf32>
    %724 = vector.shape_cast %723 : vector<1x8x128xf32> to vector<8x128xf32>
    %725 = vector.shape_cast %722 : vector<8x128xf32> to vector<1x8x128xf32>
    tpu.vector_store %arg4[%c2_305, %c0_306, %c0_307], %725 {strides = array<i32>} : memref<8x8x128xf32, #tpu.memory_space<vmem>>, vector<1x8x128xf32>,
    %c3_308 = arith.constant 3 : index
    %c0_309 = arith.constant 0 : index
    %c0_310 = arith.constant 0 : index
    %726 = vector.load %arg4[%c3_308, %c0_309, %c0_310] : memref<8x8x128xf32, #tpu.memory_space<vmem>>, vector<1x8x128xf32>
    %727 = vector.shape_cast %726 : vector<1x8x128xf32> to vector<8x128xf32>
    %728 = arith.addf %727, %722 : vector<8x128xf32>
    %c3_311 = arith.constant 3 : index
    %c0_312 = arith.constant 0 : index
    %c0_313 = arith.constant 0 : index
    %729 = vector.load %arg2[%c3_311, %c0_312, %c0_313] : memref<4x128x512xf32, #tpu.memory_space<vmem>>, vector<1x128x512xf32>
    %730 = vector.shape_cast %729 : vector<1x128x512xf32> to vector<128x512xf32>
    %cst_314 = arith.constant dense<0.000000e+00> : vector<8x512xf32>
    %731 = tpu.matmul %728, %730, %cst_314 {dimension_numbers = #tpu.dot_dimension_numbers<[1], [0], [0], [1], [0, 0, 1, 1], [], []>} : vector<8x128xf32>, vector<128x512xf32>, vector<8x512xf32> -> vector<8x512xf32>
    %732 = arith.addf %731, %645 : vector<8x512xf32>
    %733 = vector.extract_strided_slice %732 {offsets = [0, 0], sizes = [8, 384], strides = [1, 1]} : vector<8x512xf32> to vector<8x384xf32>
    %734 = arith.negf %733 : vector<8x384xf32>
    %735 = math.exp %734 : vector<8x384xf32>
    %cst_315 = arith.constant 1.000000e+00 : f32
    %736 = vector.broadcast %cst_315 : f32 to vector<8x384xf32>
    %737 = arith.addf %736, %735 : vector<8x384xf32>
    %738 = arith.divf %736, %737 : vector<8x384xf32>
    %739 = vector.extract_strided_slice %738 {offsets = [0, 0], sizes = [8, 128], strides = [1, 1]} : vector<8x384xf32> to vector<8x128xf32>
    %740 = vector.extract_strided_slice %738 {offsets = [0, 128], sizes = [8, 128], strides = [1, 1]} : vector<8x384xf32> to vector<8x128xf32>
    %741 = vector.extract_strided_slice %738 {offsets = [0, 256], sizes = [8, 128], strides = [1, 1]} : vector<8x384xf32> to vector<8x128xf32>
    %742 = vector.extract_strided_slice %732 {offsets = [0, 384], sizes = [8, 128], strides = [1, 1]} : vector<8x512xf32> to vector<8x128xf32>
    %743 = math.tanh %742 : vector<8x128xf32>
    %744 = arith.mulf %740, %720 : vector<8x128xf32>
    %745 = arith.mulf %739, %743 : vector<8x128xf32>
    %746 = arith.addf %744, %745 : vector<8x128xf32>
    %747 = math.tanh %746 : vector<8x128xf32>
    %748 = arith.mulf %741, %747 : vector<8x128xf32>
    %c3_316 = arith.constant 3 : index
    %c0_317 = arith.constant 0 : index
    %c0_318 = arith.constant 0 : index
    %749 = vector.load %arg4[%c3_316, %c0_317, %c0_318] : memref<8x8x128xf32, #tpu.memory_space<vmem>>, vector<1x8x128xf32>
    %750 = vector.shape_cast %749 : vector<1x8x128xf32> to vector<8x128xf32>
    %751 = vector.shape_cast %748 : vector<8x128xf32> to vector<1x8x128xf32>
    tpu.vector_store %arg4[%c3_316, %c0_317, %c0_318], %751 {strides = array<i32>} : memref<8x8x128xf32, #tpu.memory_space<vmem>>, vector<1x8x128xf32>,
    %c4_319 = arith.constant 4 : index
    %c0_320 = arith.constant 0 : index
    %c0_321 = arith.constant 0 : index
    %752 = vector.load %arg4[%c4_319, %c0_320, %c0_321] : memref<8x8x128xf32, #tpu.memory_space<vmem>>, vector<1x8x128xf32>
    %753 = vector.shape_cast %752 : vector<1x8x128xf32> to vector<8x128xf32>
    %754 = arith.addf %753, %748 : vector<8x128xf32>
    %c3_322 = arith.constant 3 : index
    %c0_323 = arith.constant 0 : index
    %c0_324 = arith.constant 0 : index
    %755 = vector.load %arg2[%c3_322, %c0_323, %c0_324] : memref<4x128x512xf32, #tpu.memory_space<vmem>>, vector<1x128x512xf32>
    %756 = vector.shape_cast %755 : vector<1x128x512xf32> to vector<128x512xf32>
    %cst_325 = arith.constant dense<0.000000e+00> : vector<8x512xf32>
    %757 = tpu.matmul %754, %756, %cst_325 {dimension_numbers = #tpu.dot_dimension_numbers<[1], [0], [0], [1], [0, 0, 1, 1], [], []>} : vector<8x128xf32>, vector<128x512xf32>, vector<8x512xf32> -> vector<8x512xf32>
    %758 = arith.addf %757, %645 : vector<8x512xf32>
    %759 = vector.extract_strided_slice %758 {offsets = [0, 0], sizes = [8, 384], strides = [1, 1]} : vector<8x512xf32> to vector<8x384xf32>
    %760 = arith.negf %759 : vector<8x384xf32>
    %761 = math.exp %760 : vector<8x384xf32>
    %cst_326 = arith.constant 1.000000e+00 : f32
    %762 = vector.broadcast %cst_326 : f32 to vector<8x384xf32>
    %763 = arith.addf %762, %761 : vector<8x384xf32>
    %764 = arith.divf %762, %763 : vector<8x384xf32>
    %765 = vector.extract_strided_slice %764 {offsets = [0, 0], sizes = [8, 128], strides = [1, 1]} : vector<8x384xf32> to vector<8x128xf32>
    %766 = vector.extract_strided_slice %764 {offsets = [0, 128], sizes = [8, 128], strides = [1, 1]} : vector<8x384xf32> to vector<8x128xf32>
    %767 = vector.extract_strided_slice %764 {offsets = [0, 256], sizes = [8, 128], strides = [1, 1]} : vector<8x384xf32> to vector<8x128xf32>
    %768 = vector.extract_strided_slice %758 {offsets = [0, 384], sizes = [8, 128], strides = [1, 1]} : vector<8x512xf32> to vector<8x128xf32>
    %769 = math.tanh %768 : vector<8x128xf32>
    %770 = arith.mulf %766, %746 : vector<8x128xf32>
    %771 = arith.mulf %765, %769 : vector<8x128xf32>
    %772 = arith.addf %770, %771 : vector<8x128xf32>
    %773 = math.tanh %772 : vector<8x128xf32>
    %774 = arith.mulf %767, %773 : vector<8x128xf32>
    %c4_327 = arith.constant 4 : index
    %c0_328 = arith.constant 0 : index
    %c0_329 = arith.constant 0 : index
    %775 = vector.load %arg4[%c4_327, %c0_328, %c0_329] : memref<8x8x128xf32, #tpu.memory_space<vmem>>, vector<1x8x128xf32>
    %776 = vector.shape_cast %775 : vector<1x8x128xf32> to vector<8x128xf32>
    %777 = vector.shape_cast %774 : vector<8x128xf32> to vector<1x8x128xf32>
    tpu.vector_store %arg4[%c4_327, %c0_328, %c0_329], %777 {strides = array<i32>} : memref<8x8x128xf32, #tpu.memory_space<vmem>>, vector<1x8x128xf32>,
    %c5_330 = arith.constant 5 : index
    %c0_331 = arith.constant 0 : index
    %c0_332 = arith.constant 0 : index
    %778 = vector.load %arg4[%c5_330, %c0_331, %c0_332] : memref<8x8x128xf32, #tpu.memory_space<vmem>>, vector<1x8x128xf32>
    %779 = vector.shape_cast %778 : vector<1x8x128xf32> to vector<8x128xf32>
    %780 = arith.addf %779, %774 : vector<8x128xf32>
    %c3_333 = arith.constant 3 : index
    %c0_334 = arith.constant 0 : index
    %c0_335 = arith.constant 0 : index
    %781 = vector.load %arg2[%c3_333, %c0_334, %c0_335] : memref<4x128x512xf32, #tpu.memory_space<vmem>>, vector<1x128x512xf32>
    %782 = vector.shape_cast %781 : vector<1x128x512xf32> to vector<128x512xf32>
    %cst_336 = arith.constant dense<0.000000e+00> : vector<8x512xf32>
    %783 = tpu.matmul %780, %782, %cst_336 {dimension_numbers = #tpu.dot_dimension_numbers<[1], [0], [0], [1], [0, 0, 1, 1], [], []>} : vector<8x128xf32>, vector<128x512xf32>, vector<8x512xf32> -> vector<8x512xf32>
    %784 = arith.addf %783, %645 : vector<8x512xf32>
    %785 = vector.extract_strided_slice %784 {offsets = [0, 0], sizes = [8, 384], strides = [1, 1]} : vector<8x512xf32> to vector<8x384xf32>
    %786 = arith.negf %785 : vector<8x384xf32>
    %787 = math.exp %786 : vector<8x384xf32>
    %cst_337 = arith.constant 1.000000e+00 : f32
    %788 = vector.broadcast %cst_337 : f32 to vector<8x384xf32>
    %789 = arith.addf %788, %787 : vector<8x384xf32>
    %790 = arith.divf %788, %789 : vector<8x384xf32>
    %791 = vector.extract_strided_slice %790 {offsets = [0, 0], sizes = [8, 128], strides = [1, 1]} : vector<8x384xf32> to vector<8x128xf32>
    %792 = vector.extract_strided_slice %790 {offsets = [0, 128], sizes = [8, 128], strides = [1, 1]} : vector<8x384xf32> to vector<8x128xf32>
    %793 = vector.extract_strided_slice %790 {offsets = [0, 256], sizes = [8, 128], strides = [1, 1]} : vector<8x384xf32> to vector<8x128xf32>
    %794 = vector.extract_strided_slice %784 {offsets = [0, 384], sizes = [8, 128], strides = [1, 1]} : vector<8x512xf32> to vector<8x128xf32>
    %795 = math.tanh %794 : vector<8x128xf32>
    %796 = arith.mulf %792, %772 : vector<8x128xf32>
    %797 = arith.mulf %791, %795 : vector<8x128xf32>
    %798 = arith.addf %796, %797 : vector<8x128xf32>
    %799 = math.tanh %798 : vector<8x128xf32>
    %800 = arith.mulf %793, %799 : vector<8x128xf32>
    %c5_338 = arith.constant 5 : index
    %c0_339 = arith.constant 0 : index
    %c0_340 = arith.constant 0 : index
    %801 = vector.load %arg4[%c5_338, %c0_339, %c0_340] : memref<8x8x128xf32, #tpu.memory_space<vmem>>, vector<1x8x128xf32>
    %802 = vector.shape_cast %801 : vector<1x8x128xf32> to vector<8x128xf32>
    %803 = vector.shape_cast %800 : vector<8x128xf32> to vector<1x8x128xf32>
    tpu.vector_store %arg4[%c5_338, %c0_339, %c0_340], %803 {strides = array<i32>} : memref<8x8x128xf32, #tpu.memory_space<vmem>>, vector<1x8x128xf32>,
    %c6_341 = arith.constant 6 : index
    %c0_342 = arith.constant 0 : index
    %c0_343 = arith.constant 0 : index
    %804 = vector.load %arg4[%c6_341, %c0_342, %c0_343] : memref<8x8x128xf32, #tpu.memory_space<vmem>>, vector<1x8x128xf32>
    %805 = vector.shape_cast %804 : vector<1x8x128xf32> to vector<8x128xf32>
    %806 = arith.addf %805, %800 : vector<8x128xf32>
    %c3_344 = arith.constant 3 : index
    %c0_345 = arith.constant 0 : index
    %c0_346 = arith.constant 0 : index
    %807 = vector.load %arg2[%c3_344, %c0_345, %c0_346] : memref<4x128x512xf32, #tpu.memory_space<vmem>>, vector<1x128x512xf32>
    %808 = vector.shape_cast %807 : vector<1x128x512xf32> to vector<128x512xf32>
    %cst_347 = arith.constant dense<0.000000e+00> : vector<8x512xf32>
    %809 = tpu.matmul %806, %808, %cst_347 {dimension_numbers = #tpu.dot_dimension_numbers<[1], [0], [0], [1], [0, 0, 1, 1], [], []>} : vector<8x128xf32>, vector<128x512xf32>, vector<8x512xf32> -> vector<8x512xf32>
    %810 = arith.addf %809, %645 : vector<8x512xf32>
    %811 = vector.extract_strided_slice %810 {offsets = [0, 0], sizes = [8, 384], strides = [1, 1]} : vector<8x512xf32> to vector<8x384xf32>
    %812 = arith.negf %811 : vector<8x384xf32>
    %813 = math.exp %812 : vector<8x384xf32>
    %cst_348 = arith.constant 1.000000e+00 : f32
    %814 = vector.broadcast %cst_348 : f32 to vector<8x384xf32>
    %815 = arith.addf %814, %813 : vector<8x384xf32>
    %816 = arith.divf %814, %815 : vector<8x384xf32>
    %817 = vector.extract_strided_slice %816 {offsets = [0, 0], sizes = [8, 128], strides = [1, 1]} : vector<8x384xf32> to vector<8x128xf32>
    %818 = vector.extract_strided_slice %816 {offsets = [0, 128], sizes = [8, 128], strides = [1, 1]} : vector<8x384xf32> to vector<8x128xf32>
    %819 = vector.extract_strided_slice %816 {offsets = [0, 256], sizes = [8, 128], strides = [1, 1]} : vector<8x384xf32> to vector<8x128xf32>
    %820 = vector.extract_strided_slice %810 {offsets = [0, 384], sizes = [8, 128], strides = [1, 1]} : vector<8x512xf32> to vector<8x128xf32>
    %821 = math.tanh %820 : vector<8x128xf32>
    %822 = arith.mulf %818, %798 : vector<8x128xf32>
    %823 = arith.mulf %817, %821 : vector<8x128xf32>
    %824 = arith.addf %822, %823 : vector<8x128xf32>
    %825 = math.tanh %824 : vector<8x128xf32>
    %826 = arith.mulf %819, %825 : vector<8x128xf32>
    %c6_349 = arith.constant 6 : index
    %c0_350 = arith.constant 0 : index
    %c0_351 = arith.constant 0 : index
    %827 = vector.load %arg4[%c6_349, %c0_350, %c0_351] : memref<8x8x128xf32, #tpu.memory_space<vmem>>, vector<1x8x128xf32>
    %828 = vector.shape_cast %827 : vector<1x8x128xf32> to vector<8x128xf32>
    %829 = vector.shape_cast %826 : vector<8x128xf32> to vector<1x8x128xf32>
    tpu.vector_store %arg4[%c6_349, %c0_350, %c0_351], %829 {strides = array<i32>} : memref<8x8x128xf32, #tpu.memory_space<vmem>>, vector<1x8x128xf32>,
    %c7_352 = arith.constant 7 : index
    %c0_353 = arith.constant 0 : index
    %c0_354 = arith.constant 0 : index
    %830 = vector.load %arg4[%c7_352, %c0_353, %c0_354] : memref<8x8x128xf32, #tpu.memory_space<vmem>>, vector<1x8x128xf32>
    %831 = vector.shape_cast %830 : vector<1x8x128xf32> to vector<8x128xf32>
    %832 = arith.addf %831, %826 : vector<8x128xf32>
    %c3_355 = arith.constant 3 : index
    %c0_356 = arith.constant 0 : index
    %c0_357 = arith.constant 0 : index
    %833 = vector.load %arg2[%c3_355, %c0_356, %c0_357] : memref<4x128x512xf32, #tpu.memory_space<vmem>>, vector<1x128x512xf32>
    %834 = vector.shape_cast %833 : vector<1x128x512xf32> to vector<128x512xf32>
    %cst_358 = arith.constant dense<0.000000e+00> : vector<8x512xf32>
    %835 = tpu.matmul %832, %834, %cst_358 {dimension_numbers = #tpu.dot_dimension_numbers<[1], [0], [0], [1], [0, 0, 1, 1], [], []>} : vector<8x128xf32>, vector<128x512xf32>, vector<8x512xf32> -> vector<8x512xf32>
    %836 = arith.addf %835, %645 : vector<8x512xf32>
    %837 = vector.extract_strided_slice %836 {offsets = [0, 0], sizes = [8, 384], strides = [1, 1]} : vector<8x512xf32> to vector<8x384xf32>
    %838 = arith.negf %837 : vector<8x384xf32>
    %839 = math.exp %838 : vector<8x384xf32>
    %cst_359 = arith.constant 1.000000e+00 : f32
    %840 = vector.broadcast %cst_359 : f32 to vector<8x384xf32>
    %841 = arith.addf %840, %839 : vector<8x384xf32>
    %842 = arith.divf %840, %841 : vector<8x384xf32>
    %843 = vector.extract_strided_slice %842 {offsets = [0, 0], sizes = [8, 128], strides = [1, 1]} : vector<8x384xf32> to vector<8x128xf32>
    %844 = vector.extract_strided_slice %842 {offsets = [0, 128], sizes = [8, 128], strides = [1, 1]} : vector<8x384xf32> to vector<8x128xf32>
    %845 = vector.extract_strided_slice %842 {offsets = [0, 256], sizes = [8, 128], strides = [1, 1]} : vector<8x384xf32> to vector<8x128xf32>
    %846 = vector.extract_strided_slice %836 {offsets = [0, 384], sizes = [8, 128], strides = [1, 1]} : vector<8x512xf32> to vector<8x128xf32>
    %847 = math.tanh %846 : vector<8x128xf32>
    %848 = arith.mulf %844, %824 : vector<8x128xf32>
    %849 = arith.mulf %843, %847 : vector<8x128xf32>
    %850 = arith.addf %848, %849 : vector<8x128xf32>
    %851 = math.tanh %850 : vector<8x128xf32>
    %852 = arith.mulf %845, %851 : vector<8x128xf32>
    %c7_360 = arith.constant 7 : index
    %c0_361 = arith.constant 0 : index
    %c0_362 = arith.constant 0 : index
    %853 = vector.load %arg4[%c7_360, %c0_361, %c0_362] : memref<8x8x128xf32, #tpu.memory_space<vmem>>, vector<1x8x128xf32>
    %854 = vector.shape_cast %853 : vector<1x8x128xf32> to vector<8x128xf32>
    %855 = vector.shape_cast %852 : vector<8x128xf32> to vector<1x8x128xf32>
    tpu.vector_store %arg4[%c7_360, %c0_361, %c0_362], %855 {strides = array<i32>} : memref<8x8x128xf32, #tpu.memory_space<vmem>>, vector<1x8x128xf32>,
    return
  }
  func.func @transform_0(%arg0: i32) -> (i32, i32, i32) {
    %c0_i32 = arith.constant 0 : i32
    %c0_i32_0 = arith.constant 0 : i32
    %c0_i32_1 = arith.constant 0 : i32
    return %c0_i32, %arg0, %c0_i32_0 : i32, i32, i32
  }
  func.func @transform_1(%arg0: i32) -> (i32, i32, i32) {
    %c0_i32 = arith.constant 0 : i32
    %c0_i32_0 = arith.constant 0 : i32
    %c0_i32_1 = arith.constant 0 : i32
    %c0_i32_2 = arith.constant 0 : i32
    return %c0_i32, %c0_i32_0, %c0_i32_1 : i32, i32, i32
  }
  func.func @transform_2(%arg0: i32) -> (i32, i32, i32) {
    %c0_i32 = arith.constant 0 : i32
    %c0_i32_0 = arith.constant 0 : i32
    %c0_i32_1 = arith.constant 0 : i32
    %c0_i32_2 = arith.constant 0 : i32
    return %c0_i32, %c0_i32_0, %c0_i32_1 : i32, i32, i32
  }
  func.func @transform_3(%arg0: i32) -> (i32, i32, i32) {
    %c0_i32 = arith.constant 0 : i32
    %c0_i32_0 = arith.constant 0 : i32
    %c0_i32_1 = arith.constant 0 : i32
    return %c0_i32, %arg0, %c0_i32_0 : i32, i32, i32
  }
}

</mosaic_0001>

<bundles_post_ra>
// kernel: tpu_custom_call.1
= control target key start
LH: loop header
LB: loop body
LE: loop exit
PB: predicated region body
PF: predicated region fallthrough
CT: control target
= control target key end

     0   :  { %8 = vsyncpa [#allocation3], 0  ;;  %s13059_s0 = inlined_call_operand.hbm [shape: f32[8,16,128], index: 0, kind: input, shape index: {}]   ;;  %s13060_s1 = inlined_call_operand.hbm [shape: f32[4,128,512], index: 1, kind: input, shape index: {}]   ;;  %s13061_s2 = inlined_call_operand.hbm [shape: f32[4,1,512], index: 2, kind: input, shape index: {}]   ;;  %s13062_s3 = inlined_call_operand.hbm [shape: f32[8,16,128], index: 3, kind: output, shape index: {}]  }
   0x1   :  { %10 = vsyncpa [#allocation3 + $0x1], 0 }
   0x2   :  { %11 = vsyncpa [#allocation6], 0 }
   0x3   :  { %12 = vsyncpa [#allocation4], 0 }
   0x4   :  { %14 = vsyncpa [#allocation4 + $0x1], 0  ;;  %s10885_s12 = smov 0   ;;  %s10887_s13 = smov 0  }
   0x5   :  { %s10889_s14 = smov 0   ;;  %s10891_s15 = smov 0  }
   0x6 LB: > { %s10906_s16 = sadd.s32 4294967295, %s10848_s15   ;;  %s7886_s17 = sadd.s32 4294967294, %s10848_s15   ;;  %s10848_s15 = sphi %s10891_s15, %s13088_s15   ;;  %s10844_s14 = sphi %s10889_s14, %s13087_s14   ;;  %s10840_s13 = sphi %s10887_s13, %s13086_s13   ;;  %s10836_s12 = sphi %s10885_s12, %s13085_s12  }
   0x7   : > { %s10910_s18 = sadd.s32 1, %s10848_s15   ;;  %s27_s19 = sadd.s32 1, %s10844_s14 }
   0x8   : > { %s24_s20 = ssub.s32 %s10848_s15, %s10910_s18  ;;  %p34_p0 = scmp.ne.s32.totalorder %s10844_s14, %s10840_s13 }
   0x9   : > { %p25_p1 = scmp.eq.s32.totalorder %s24_s20, 0  ;;  %p35_p2 = scmp.eq.s32.totalorder %s10848_s15, 0 }
   0xa   : > { %p40_p3 = scmp.ne.s32.totalorder %s10840_s13, %s10836_s12  ;;  %p13063_p4 = scmp.eq.s32.totalorder %s10906_s16, 0 }
   0xb   : > { %s10922_s21 = scalar_select %p25_p1, %s10844_s14, %s27_s19  }
   0xc   : > { %p10924_p5 = por %p35_p2, %p34_p0  ;;  %p10930_p6 = por %p13063_p4, %p40_p3 }
   0xd   : > { %p106_p7 = scmp.eq.s32.totalorder %s10906_s16, 1  ;;  %p112_p8 = scmp.eq.s32.totalorder %s7886_s17, 1 }
   0xe   : > { %s13068_s22 = scalar_select %p10924_p5, 1, 0 }
   0xf   : > { %s13069_s23 = scalar_select %p10930_p6, 1, 0 }
  0x10   : > { %p7887_p9 = scmp.ge.s32.totalorder %s10848_s15, 1  ;;  %p119_p10 = scmp.lt.s32.totalorder %s10848_s15, 3 }
  0x11   : > { %p10937_p11 = por %p106_p7, %p34_p0  ;;  %p10941_p12 = por %p112_p8, %p40_p3 }
  0x12   : > { %p10945_p13 = pnand %p7887_p9, %p119_p10  ;;  %s10850_s27 = smov [#allocation5]  }
  0x13   : > { %s13070_s24 = scalar_select %p10937_p11, 1, 0 }
  0x14   : > { %s13071_s25 = scalar_select %p10941_p12, 1, 0 }
  0x15   : > { %s13072_s26 = scalar_select %p10945_p13, 1, 0 }
  0x16   : > { %p10114_p1 = pneg %p10945_p13  ;;  %s131_s28 = sshll.u32 %s10850_s27, 4  ;;  %s132_s28 = int_to_ptr.vmem [resolvable:$true] %s131_s28 }
  0x17   : > { %s10851_s30 = smov [#allocation7]   ;;  %s10692_s7 = scalar_lea.hbm %s13060_s1, 32768 }
  0x18   : > { %p10953_p2 = pnand %p10114_p1, %p13063_p4  ;;  %s144_s4 = sshll.u32 %s10851_s30, 4  ;;  %s145_s4 = int_to_ptr.vmem [resolvable:$true] %s144_s4 }
  0x19   : > { %p10693_p7 = scmp.ne.s32.totalorder %s13060_s1, %s10692_s7  ;;  %p10699_p1 = scmp.lt.u32.totalorder %s10692_s7, %s13060_s1 }
  0x1a   : > { %p10694_p8 = pneg %p10953_p2 }
  0x1c   : > { %p10695_p9 = pnand %p10694_p8, %p10693_p7 }
  0x1e   : > { %p10696_p10 = pneg %p10695_p9 }
  0x20   : > { %p10701_p0 = pnand %p10699_p1, %p10696_p10 }
  0x22   : > { %10704 = shalt.err (!%p10701_p0)
}
  0x23   : > { %s10705_s17 = scalar_lea.vmem %s132_s28, 32768  ;;  %p10713_p11 = scmp.lt.s32.totalorder %s132_s28, %s132_s28 }
  0x24   : > { %p10706_p4 = scmp.ne.s32.totalorder %s132_s28, %s10705_s17  ;;  %p10714_p6 = scmp.lt.s32.totalorder %s10705_s17, %s10705_s17 }
  0x26   : > { %p10708_p3 = pnand %p10706_p4, %p10694_p8  ;;  %p10715_p13 = por %p10714_p6, %p10713_p11 }
  0x28   : > { %p10709_p12 = pneg %p10708_p3 }
  0x2a   : > { %p10716_p5 = pnand %p10715_p13, %p10709_p12 }
  0x2c   : > { %10719 = shalt.err (!%p10716_p5)
}
  0x2d   : > { %s10852_s19 = smov 512   ;;  %s10853_s20 = smov 32  }
  0x2e   : > { %10117 = dma.hbm_to_vmem [thread:$0]  (!%p10953_p2), %s13060_s1, 32768, %s132_s28, [#allocation6], %s10852_s19, %s10852_s19, %s10853_s20  }
  0x2f   : > { %p13074_p0 = scmp.ne.s32.totalorder %s13068_s22, 0  ;;  %p13075_p4 = scmp.lt.s32.totalorder %s10848_s15, 2 }
  0x30   : > { %s158_s6 = sand.u32 1, %s10844_s14   ;;  %s10720_s9 = scalar_lea.hbm %s13061_s2, 256 }
  0x31   : > { %p10985_p3 = pnand %p13075_p4, %p13074_p0  ;;  %p10721_p5 = scmp.ne.s32.totalorder %s13061_s2, %s10720_s9 }
  0x32   : > { %p10727_p12 = scmp.lt.u32.totalorder %s10720_s9, %s13061_s2 }
  0x33   : > { %s13076_s5 = scalar_select %p10985_p3, 1, 0 }
  0x34   : > { %p10723_p6 = pnand %p10721_p5, %p10694_p8 }
  0x36   : > { %p10724_p11 = pneg %p10723_p6 }
  0x38   : > { %p10729_p13 = pnand %p10727_p12, %p10724_p11 }
  0x3a   : > { %10732 = shalt.err (!%p10729_p13)
}
  0x3b   : > { %s10733_s17 = scalar_lea.vmem %s145_s4, 256  ;;  %p10741_p1 = scmp.lt.s32.totalorder %s145_s4, %s145_s4 }
  0x3c   : > { %p10734_p7 = scmp.ne.s32.totalorder %s145_s4, %s10733_s17  ;;  %p10742_p0 = scmp.lt.s32.totalorder %s10733_s17, %s10733_s17 }
  0x3e   : > { %p10736_p9 = pnand %p10734_p7, %p10694_p8  ;;  %p10743_p4 = por %p10742_p0, %p10741_p1 }
  0x40   : > { %p10737_p10 = pneg %p10736_p9 }
  0x42   : > { %p10744_p3 = pnand %p10743_p4, %p10737_p10 }
  0x44   : > { %10747 = shalt.err (!%p10744_p3)
}
  0x45   : > { %s10854_s19 = smov 64   ;;  %s10855_s20 = smov 4  }
  0x46   : > { %10120 = dma.hbm_to_vmem [thread:$0]  (!%p10953_p2), %s13061_s2, 256, %s145_s4, [#allocation6], %s10854_s19, %s10854_s19, %s10855_s20  }
  0x47   : > { %s7891_s7 = sshll.u32 %s158_s6, 6  ;;  %s7892_s8 = sshll.u32 %s10848_s15, 7 }
  0x48   : > { %s11014_s11 = scalar_lea.hbm %s13059_s0, %s7892_s8  ;;  %s162_s22 = scalar_lea.vmem [#allocation2], %s7891_s7 }
  0x49   : > { %s168_s28 = sshll.u32 %s162_s22, 4  ;;  %s11018_s29 = scalar_lea.sflag [#allocation3], %s158_s6  ;;  %s11016_s28 = int_to_ptr.vmem [resolvable:$true] %s168_s28 }
  0x4a   : > { %s10748_s17 = scalar_lea.hbm %s11014_s11, 1024  ;;  %p13077_p2 = scmp.ne.s32.totalorder %s13076_s5, 0 }
  0x4b   : > { %p10749_p8 = scmp.ne.s32.totalorder %s11014_s11, %s10748_s17  ;;  %s10753_s20 = scalar_lea.hbm %s13059_s0, 2048 }
  0x4c   : > { %p10750_p3 = pneg %p13077_p2  ;;  %p10754_p11 = scmp.lt.u32.totalorder %s11014_s11, %s13059_s0 }
  0x4d   : > { %p10755_p12 = scmp.lt.u32.totalorder %s10753_s20, %s10748_s17  ;;  %p10757_p7 = scmp.lt.u32.totalorder %s10748_s17, %s11014_s11 }
  0x4e   : > { %p10751_p5 = pnand %p10750_p3, %p10749_p8 }
  0x4f   : > { %p10756_p13 = por %p10755_p12, %p10754_p11 }
  0x50   : > { %p10752_p6 = pneg %p10751_p5 }
  0x51   : > { %p10758_p9 = por %p10757_p7, %p10756_p13 }
  0x53   : > { %p10759_p10 = pnand %p10758_p9, %p10752_p6 }
  0x55   : > { %10762 = shalt.err (!%p10759_p10)
}
  0x56   : > { %s10763_s6 = scalar_lea.vmem %s11016_s28, 1024  ;;  %s10856_s7 = smov [#allocation2]  }
  0x57   : > { %p10764_p1 = scmp.ne.s32.totalorder %s11016_s28, %s10763_s6  ;;  %s10768_s8 = sshll.u32 %s10856_s7, 4  ;;  %s10769_s8 = int_to_ptr.vmem [resolvable:$false] %s10768_s8 }
  0x58   : > { %s10770_s9 = scalar_lea.vmem %s10769_s8, 2048  ;;  %p10771_p8 = scmp.lt.s32.totalorder %s11016_s28, %s10769_s8 }
  0x59   : > { %p10766_p0 = pnand %p10764_p1, %p10750_p3  ;;  %p10772_p5 = scmp.lt.s32.totalorder %s10770_s9, %s10763_s6 }
  0x5b   : > { %p10767_p4 = pneg %p10766_p0  ;;  %p10773_p11 = por %p10772_p5, %p10771_p8 }
  0x5d   : > { %p10774_p12 = pnand %p10773_p11, %p10767_p4 }
  0x5f   : > { %10777 = shalt.err (!%p10774_p12)
}
  0x60   : > { %s10857_s10 = smov 256   ;;  %s10858_s22 = smov 128  }
  0x61   : > { %s10859_s17 = smov 8   ;;  %p13078_p3 = scmp.ne.s32.totalorder %s13072_s26, 0 }
  0x62   : > { %10124 = dma.hbm_to_vmem [thread:$0]  (!%p13077_p2), %s11014_s11, 1024, %s11016_s28, %s11018_s29, %s10857_s10, %s10858_s22, %s10859_s17  }
  0x63   : > { %180 = sbr.rel (%p13078_p3) target bundleno = 7796 (0x1e74), region = 32  ;;  %s11049_s4 = sand.u32 (!%p13078_p3), 1, %s10840_s13  }
  0x64   : > { %s7894_s19 = sshll.u32 (!%p13078_p3), %s11049_s4, 6  ;;  %s183_s20 = scalar_lea.sflag (!%p13078_p3), [#allocation3], %s11049_s4 }
  0x65   : > { %s11055_s27 = scalar_lea.vmem (!%p13078_p3), [#allocation2], %s7894_s19  ;;  %p13079_p6 = scmp.ne.s32.totalorder (!%p13078_p3), %s13069_s23, 0 }
  0x6a   : > { %10823 = dma.done.wait (%p13079_p6), %s183_s20, 1024  }
  0x6b   : > { %10825 = vsyncadd (%p13079_p6), %s183_s20, 4294966272  ;;  %p13080_p2 = scmp.eq.s32.totalorder %s10906_s16, 0 }
  0x6d   : > { %10827 = dma.done.wait (%p13080_p2), [#allocation6], 33024   ;;  %p13081_p13 = pmov %p13080_p2 }
  0x6e   : > { %v10860_v0 = vmov 0.0   ;;  %v242_v1 = vld [vmem:[#allocation5 + $0x8] sm:$0xff]  ;;  %v241_v3 = vld [vmem:[#allocation5] sm:$0xff]  ;;  %v244_v19 = vld [vmem:[#allocation5 + $0x18] sm:$0xff]  ;;  %s11230_s23 = scalar_lea.vmem [#allocation8], %s7894_s19  ;;  %s8051_s26 = sshll.u32 %s10906_s16, 7 }
  0x6f   : > { %10829 = vsyncadd (%p13081_p13), [#allocation6], 4294934272  ;;  %369 = vmatprep.mubr.f32.mxu0 %v10860_v0  ;;  %440 = vmatprep.mubr.f32.mxu1 %v10860_v0  ;;  %v246_v2 = vld [vmem:[#allocation5 + $0x28] sm:$0xff]  ;;  %v245_v5 = vld [vmem:[#allocation5 + $0x20] sm:$0xff]  ;;  %s7794_s5 = sshll.u32 %s11230_s23, 4  ;;  %s13012_s29 = scalar_lea.hbm %s13062_s3, %s8051_s26  ;;  %s13014_s5 = int_to_ptr.vmem [resolvable:$true] %s7794_s5 }
  0x70   : > { %v11067_v4 = vpack.c.bf16 %v246_v2, %v242_v1  ;;  %v250_v6 = vld [vmem:[#allocation5 + $0x48] sm:$0xff]  ;;  %v11069_v8 = vpack.c.bf16 %v245_v5, %v241_v3  ;;  %v249_v10 = vld [vmem:[#allocation5 + $0x40] sm:$0xff]  ;;  %v248_v20 = vld [vmem:[#allocation5 + $0x38] sm:$0xff]  ;;  %s7782_s30 = scalar_lea.sflag [#allocation4], %s11049_s4  ;;  %s10778_s6 = scalar_lea.vmem %s13014_s5, 1024 }
  0x71   : > { %v254_v7 = vld [vmem:[#allocation5 + $0x68] sm:$0xff]  ;;  %v253_v11 = vld [vmem:[#allocation5 + $0x60] sm:$0xff]  ;;  %v11080_v22 = vpack.c.bf16 %v248_v20, %v244_v19  ;;  %v243_v23 = vld [vmem:[#allocation5 + $0x10] sm:$0xff]  ;;  %p10779_p7 = scmp.ne.s32.totalorder %s13014_s5, %s10778_s6  ;;  %p13082_p9 = scmp.ne.s32.totalorder %s13070_s24, 0 }
  0x72   : > { %v11071_v9 = vpack.c.bf16 %v254_v7, %v250_v6  ;;  %v258_v12 = vld [vmem:[#allocation5 + $0x88] sm:$0xff]  ;;  %8055 = vmatprep.subr.bf16.mxu0 %v11067_v4  ;;  %v11075_v14 = vpack.c.bf16 %v253_v11, %v249_v10  ;;  %v257_v15 = vld [vmem:[#allocation5 + $0x80] sm:$0xff]  ;;  %v247_v24 = vld [vmem:[#allocation5 + $0x30] sm:$0xff]  ;;  %s10861_s16 = smov [#allocation8]  }
  0x73   : > { %v262_v13 = vld [vmem:[#allocation5 + $0xa8] sm:$0xff]  ;;  %8057 = vmatpush1.bf16.msra.mxu0 %v11069_v8  ;;  %v261_v16 = vld [vmem:[#allocation5 + $0xa0] sm:$0xff]  ;;  %v11082_v25 = vpack.c.bf16 %v247_v24, %v243_v23  ;;  %8087 = vmatprep.subr.bf16.mxu1 %v11080_v22  ;;  %v252_v27 = vld [vmem:[#allocation5 + $0x58] sm:$0xff]  ;;  %p10780_p10 = pnand %p10779_p7, %p13082_p9  ;;  %s10782_s7 = sshll.u32 %s10861_s16, 4  ;;  %s10783_s7 = int_to_ptr.vmem [resolvable:$false] %s10782_s7 }
  0x74   : > { %8059 = vmatprep.subr.bf16.mxu0 %v11071_v9  ;;  %v11078_v17 = vpack.c.bf16 %v262_v13, %v258_v12  ;;  %v266_v18 = vld [vmem:[#allocation5 + $0xc8] sm:$0xff]  ;;  %v11085_v26 = vpack.c.bf16 %v261_v16, %v257_v15  ;;  %v256_v28 = vld [vmem:[#allocation5 + $0x78] sm:$0xff]  ;;  %v251_v29 = vld [vmem:[#allocation5 + $0x50] sm:$0xff]  ;;  %s10784_s8 = scalar_lea.vmem %s10783_s7, 2048  ;;  %p10785_p0 = scmp.lt.s32.totalorder %s13014_s5, %s10783_s7 }
  0x75   : > { %v270_v21 = vld [vmem:[#allocation5 + $0xe8] sm:$0xff]  ;;  %v265_v31 = vld [vmem:[#allocation5 + $0xc0] sm:$0xff]  ;;  %8089 = vmatpush1.bf16.msra.mxu1 %v11082_v25  ;;  %v11092_v33 = vpack.c.bf16 %v256_v28, %v252_v27  ;;  %v255_v34 = vld [vmem:[#allocation5 + $0x70] sm:$0xff]  ;;  %p10781_p1 = pneg %p10780_p10  ;;  %p10786_p4 = scmp.lt.s32.totalorder %s10784_s8, %s10778_s6 }
  0x76   : > { %v11089_v30 = vpack.c.bf16 %v270_v21, %v266_v18  ;;  %v269_v32 = vld [vmem:[#allocation5 + $0xe0] sm:$0xff]  ;;  %v274_v35 = vld [vmem:[#allocation5 + $0x108] sm:$0xff]  ;;  %v11094_v37 = vpack.c.bf16 %v255_v34, %v251_v29  ;;  %v260_v38 = vld [vmem:[#allocation5 + $0x98] sm:$0xff] }
  0x77   : > { %8061 = vmatpush1.bf16.msra.mxu0 %v11075_v14  ;;  %v278_v36 = vld [vmem:[#allocation5 + $0x128] sm:$0xff]  ;;  %8091 = vmatprep.subr.bf16.mxu1 %v11092_v33  ;;  %v264_v39 = vld [vmem:[#allocation5 + $0xb8] sm:$0xff]  ;;  %v259_v40 = vld [vmem:[#allocation5 + $0x90] sm:$0xff]  ;;  %v11098_v42 = vpack.c.bf16 %v269_v32, %v265_v31  ;;  %p10787_p8 = por %p10786_p4, %p10785_p0 }
  0x78   : > { %8063 = vmatprep.subr.bf16.mxu0 %v11078_v17  ;;  %v263_v41 = vld [vmem:[#allocation5 + $0xb0] sm:$0xff]  ;;  %v273_v43 = vld [vmem:[#allocation5 + $0x100] sm:$0xff]  ;;  %v11100_v45 = vpack.c.bf16 %v264_v39, %v260_v38  ;;  %v11103_v46 = vpack.c.bf16 %v278_v36, %v274_v35  ;;  %v282_v47 = vld [vmem:[#allocation5 + $0x148] sm:$0xff] }
  0x79   : > { %v277_v44 = vld [vmem:[#allocation5 + $0x120] sm:$0xff]  ;;  %8093 = vmatpush1.bf16.msra.mxu1 %v11094_v37  ;;  %v11106_v48 = vpack.c.bf16 %v263_v41, %v259_v40  ;;  %v268_v49 = vld [vmem:[#allocation5 + $0xd8] sm:$0xff]  ;;  %v286_v51 = vld [vmem:[#allocation5 + $0x168] sm:$0xff]  ;;  %p10788_p5 = pnand %p10787_p8, %p10781_p1 }
  0x7a   : > { %v272_v50 = vld [vmem:[#allocation5 + $0xf8] sm:$0xff]  ;;  %8095 = vmatprep.subr.bf16.mxu1 %v11100_v45  ;;  %v267_v53 = vld [vmem:[#allocation5 + $0xd0] sm:$0xff]  ;;  %v11112_v55 = vpack.c.bf16 %v277_v44, %v273_v43  ;;  %v11115_v58 = vpack.c.bf16 %v286_v51, %v282_v47  ;;  %v281_v59 = vld [vmem:[#allocation5 + $0x140] sm:$0xff] }
  0x7b   : > { %8065 = vmatpush1.bf16.msra.mxu0 %v11085_v26  ;;  %v11109_v52 = vpack.c.bf16 %v272_v50, %v268_v49  ;;  %v271_v54 = vld [vmem:[#allocation5 + $0xf0] sm:$0xff]  ;;  %v276_v56 = vld [vmem:[#allocation5 + $0x118] sm:$0xff]  ;;  %v285_v60 = vld [vmem:[#allocation5 + $0x160] sm:$0xff]  ;;  %v219_v50 = vlaneseq }
  0x7c   : > { %8067 = vmatprep.subr.bf16.mxu0 %v11089_v30  ;;  %v280_v57 = vld [vmem:[#allocation5 + $0x138] sm:$0xff]  ;;  %v290_v61 = vld [vmem:[#allocation5 + $0x188] sm:$0xff]  ;;  %v11118_v62 = vpack.c.bf16 %v271_v54, %v267_v53  ;;  %v275_v2 = vld [vmem:[#allocation5 + $0x110] sm:$0xff]  ;;  %v11124_v7 = vpack.c.bf16 %v285_v60, %v281_v59 }
  0x7d   : > { %8097 = vmatpush1.bf16.msra.mxu1 %v11106_v48  ;;  %v294_v63 = vld [vmem:[#allocation5 + $0x1a8] sm:$0xff]  ;;  %v11121_v1 = vpack.c.bf16 %v280_v57, %v276_v56  ;;  %v279_v3 = vld [vmem:[#allocation5 + $0x130] sm:$0xff]  ;;  %v284_v5 = vld [vmem:[#allocation5 + $0x158] sm:$0xff]  ;;  %v220_v51 = vshrl.u32 %v219_v50, 7 }
  0x7e   : > { %8099 = vmatprep.subr.bf16.mxu1 %v11109_v52  ;;  %v288_v6 = vld [vmem:[#allocation5 + $0x178] sm:$0xff]  ;;  %v11127_v10 = vpack.c.bf16 %v294_v63, %v290_v61  ;;  %v289_v11 = vld [vmem:[#allocation5 + $0x180] sm:$0xff]  ;;  %v298_v13 = vld [vmem:[#allocation5 + $0x1c8] sm:$0xff]  ;;  %v11130_v15 = vpack.c.bf16 %v279_v3, %v275_v2 }
  0x7f   : > { %8069 = vmatpush1.bf16.msra.mxu0 %v11098_v42  ;;  %v293_v12 = vld [vmem:[#allocation5 + $0x1a0] sm:$0xff]  ;;  %v302_v16 = vld [vmem:[#allocation5 + $0x1e8] sm:$0xff]  ;;  %v11133_v18 = vpack.c.bf16 %v288_v6, %v284_v5  ;;  %v283_v19 = vld [vmem:[#allocation5 + $0x150] sm:$0xff]  ;;  %v11200_v53 = vsub.s32 0, %v220_v51  ;;  %v11202_v56 = vsub.s32 1, %v220_v51  ;;  %v11210_v60 = vsub.s32 2, %v220_v51 }
  0x80   : > { %8071 = vmatprep.subr.bf16.mxu0 %v11103_v46  ;;  %v287_v20 = vld [vmem:[#allocation5 + $0x170] sm:$0xff]  ;;  %v292_v21 = vld [vmem:[#allocation5 + $0x198] sm:$0xff]  ;;  %v11136_v24 = vpack.c.bf16 %v293_v12, %v289_v11  ;;  %v11139_v27 = vpack.c.bf16 %v302_v16, %v298_v13  ;;  %v297_v28 = vld [vmem:[#allocation5 + $0x1c0] sm:$0xff]  ;;  %v11217_v12 = vsub.s32 3, %v220_v51 }
  0x81   : > { %8101 = vmatpush1.bf16.msra.mxu1 %v11118_v62  ;;  %v296_v23 = vld [vmem:[#allocation5 + $0x1b8] sm:$0xff]  ;;  %v301_v29 = vld [vmem:[#allocation5 + $0x1e0] sm:$0xff]  ;;  %v11142_v31 = vpack.c.bf16 %v287_v20, %v283_v19  ;;  %v291_v34 = vld [vmem:[#allocation5 + $0x190] sm:$0xff] }
  0x82   : > { %8103 = vmatprep.subr.bf16.mxu1 %v11121_v1  ;;  %v11145_v32 = vpack.c.bf16 %v296_v23, %v292_v21  ;;  %v295_v35 = vld [vmem:[#allocation5 + $0x1b0] sm:$0xff]  ;;  %v300_v36 = vld [vmem:[#allocation5 + $0x1d8] sm:$0xff]  ;;  %v11148_v39 = vpack.c.bf16 %v301_v29, %v297_v28  ;;  %v239_v47 = vld [vmem:[%s11055_s27] sm:$0xff] }
  0x83   : > { %8073 = vmatpush1.bf16.msra.mxu0 %v11112_v55  ;;  %v304_v38 = vld [vmem:[#allocation5 + $0x1f8] sm:$0xff]  ;;  %v11152_v40 = vpack.c.bf16 %v295_v35, %v291_v34  ;;  %v299_v43 = vld [vmem:[#allocation5 + $0x1d0] sm:$0xff]  ;;  %v217_v54 = vld [vmem:[#allocation7] sm:$0xf] }
  0x84   : > { %8075 = vmatprep.subr.bf16.mxu0 %v11115_v58  ;;  %v11155_v41 = vpack.c.bf16 %v304_v38, %v300_v36  ;;  %v303_v44 = vld [vmem:[#allocation5 + $0x1f0] sm:$0xff]  ;;  %v11205_v57 = vrot.slane %v217_v54, %v11200_v53  ;;  %v11208_v59 = vrot.slane %v217_v54, %v11202_v56  ;;  %v11215_v6 = vrot.slane %v217_v54, %v11210_v60 }
  0x85   : > { %8105 = vmatpush1.bf16.msra.mxu1 %v11130_v15  ;;  %v11160_v49 = vpack.c.bf16 %v303_v44, %v299_v43  ;;  %v11221_v20 = vrot.slane %v217_v54, %v11217_v12 }
  0x86   : > { %8107 = vmatprep.subr.bf16.mxu1 %v11133_v18 }
  0x87   : > { %8077 = vmatpush1.bf16.msra.mxu0 %v11124_v7 }
  0x88   : > { %8079 = vmatprep.subr.bf16.mxu0 %v11127_v10 }
  0x89   : > { %8109 = vmatpush1.bf16.msra.mxu1 %v11142_v31 }
  0x8a   : > { %8111 = vmatprep.subr.bf16.mxu1 %v11145_v32 }
  0x8b   : > { %8081 = vmatpush1.bf16.msra.mxu0 %v11136_v24 }
  0x8c   : > { %8083 = vmatprep.subr.bf16.mxu0 %v11139_v27 }
  0x8d   : > { %8113 = vmatpush1.bf16.msra.mxu1 %v11152_v40 }
  0x8e   : > { %8115 = vmatprep.subr.bf16.mxu1 %v11155_v41 }
  0x8f   : > { %8085 = vmatpush1.bf16.msra.mxu0 %v11148_v39 }
  0x90   : > { %8119 = vmatprep.subr.bf16.mxu0 %v11067_v4 }
  0x91   : > { %8117 = vmatpush1.bf16.msra.mxu1 %v11160_v49 }
  0x92   : > { %370 = vmatmul.mubr.f32.vlgmr.msra.gmra.mrb[0].mxu0 %v239_v47  ;;  %8151 = vmatprep.subr.bf16.mxu1 %v11080_v22 }
  0x93   : > { %8121 = vmatpush1.bf16.msra.mxu0 %v11069_v8  ;;  %603 = vmatprep.mubr.f32.mxu0 %v10860_v0 }
  0x94   : > { %8123 = vmatprep.subr.bf16.mxu0 %v11071_v9  ;;  %441 = vmatmul.mubr.f32.vlgmr.msra.gmra.mrb[0].mxu1 %v239_v47 }
  0x95   : > { %8153 = vmatpush1.bf16.msra.mxu1 %v11082_v25  ;;  %674 = vmatprep.mubr.f32.mxu1 %v10860_v0 }
  0x96   : > { %8155 = vmatprep.subr.bf16.mxu1 %v11092_v33 }
  0x97   : > { %8125 = vmatpush1.bf16.msra.mxu0 %v11075_v14 }
  0x98   : > { %8127 = vmatprep.subr.bf16.mxu0 %v11078_v17 }
  0x99   : > { %8157 = vmatpush1.bf16.msra.mxu1 %v11094_v37 }
  0x9a   : > { %8159 = vmatprep.subr.bf16.mxu1 %v11100_v45 }
  0x9b   : > { %8129 = vmatpush1.bf16.msra.mxu0 %v11085_v26 }
  0x9c   : > { %8131 = vmatprep.subr.bf16.mxu0 %v11089_v30 }
  0x9d   : > { %8161 = vmatpush1.bf16.msra.mxu1 %v11106_v48 }
  0x9e   : > { %8163 = vmatprep.subr.bf16.mxu1 %v11109_v52 }
  0x9f   : > { %8133 = vmatpush1.bf16.msra.mxu0 %v11098_v42 }
  0xa0   : > { %8135 = vmatprep.subr.bf16.mxu0 %v11103_v46 }
  0xa1   : > { %8165 = vmatpush1.bf16.msra.mxu1 %v11118_v62 }
  0xa2   : > { %8167 = vmatprep.subr.bf16.mxu1 %v11121_v1 }
  0xa3   : > { %8137 = vmatpush1.bf16.msra.mxu0 %v11112_v55 }
  0xa4   : > { %8139 = vmatprep.subr.bf16.mxu0 %v11115_v58 }
  0xa5   : > { %8169 = vmatpush1.bf16.msra.mxu1 %v11130_v15 }
  0xa6   : > { %8171 = vmatprep.subr.bf16.mxu1 %v11133_v18 }
  0xa7   : > { %8141 = vmatpush1.bf16.msra.mxu0 %v11124_v7 }
  0xa8   : > { %8143 = vmatprep.subr.bf16.mxu0 %v11127_v10 }
  0xa9   : > { %8173 = vmatpush1.bf16.msra.mxu1 %v11142_v31 }
  0xaa   : > { %8175 = vmatprep.subr.bf16.mxu1 %v11145_v32 }
  0xab   : > { %8145 = vmatpush1.bf16.msra.mxu0 %v11136_v24 }
  0xac   : > { %8147 = vmatprep.subr.bf16.mxu0 %v11139_v27 }
  0xad   : > { %8177 = vmatpush1.bf16.msra.mxu1 %v11152_v40 }
  0xae   : > { %8179 = vmatprep.subr.bf16.mxu1 %v11155_v41 }
  0xaf   : > { %8149 = vmatpush1.bf16.msra.mxu0 %v11148_v39 }
  0xb0   : > { %8183 = vmatprep.subr.bf16.mxu0 %v11067_v4 }
  0xb1   : > { %8181 = vmatpush1.bf16.msra.mxu1 %v11160_v49 }
  0xb2   : > { %8215 = vmatprep.subr.bf16.mxu1 %v11080_v22 }
 0x165   : > { %v371_v61 = vpop.f32.mrb[0].mxu0 }
 0x166   : > { %v372_v63 = vadd.f32 %v371_v61, %v11205_v57  ;;  %v373_v2 = vpop.f32.mrb[1].mxu0 }
 0x167   : > { %v374_v3 = vadd.f32 %v373_v2, %v11208_v59  ;;  %v442_v13 = vpop.f32.mrb[0].mxu1  ;;  %v7901_v2 = vld [vmem:[%s11055_s27 + $0x8] sm:$0xff] }
 0x168   : > { %v7898_v5 = vmul.f32 -1.442695, %v372_v63  ;;  %v444_v16 = vpop.f32.mrb[1].mxu1  ;;  %v443_v19 = vadd.f32 %v442_v13, %v11215_v6 }
 0x169   : > { %v7899_v11 = vmul.f32 -1.442695, %v374_v3  ;;  %v445_v23 = vadd.f32 %v444_v16, %v11221_v20 }
 0x16a   : > { %10180 = vpow2.f32 %v7898_v5  ;;  %v7900_v21 = vmul.f32 -1.442695, %v443_v19 }
 0x16b   : > { %10182 = vpow2.f32 %v7899_v11 }
 0x16c   : > { %10184 = vpow2.f32 %v7900_v21 }
 0x16d   : > { %10186 = vtanh.f32 %v445_v23 }
 0x174   : > { %v10181_v28 = vpop.eup %10180 }
 0x175   : > { %v10183_v29 = vpop.eup %10182  ;;  %v456_v34 = vadd.f32 1.0, %v10181_v28 }
 0x176   : > { %v457_v35 = vadd.f32 1.0, %v10183_v29  ;;  %v10185_v36 = vpop.eup %10184 }
 0x177   : > { %10188 = vrcp.f32 %v456_v34  ;;  %v10187_v38 = vpop.eup %10186  ;;  %v458_v44 = vadd.f32 1.0, %v10185_v36 }
 0x178   : > { %10190 = vrcp.f32 %v457_v35 }
 0x179   : > { %10192 = vrcp.f32 %v458_v44 }
 0x181   : > { %v10189_v43 = vpop.eup %10188 }
 0x182   : > { %v10191_v47 = vpop.eup %10190  ;;  %v467_v50 = vmul.f32 %v10189_v43, %v10187_v38  ;;  %v7906_v43 = vld [vmem:[%s11055_s27 + $0x10] sm:$0xff] }
 0x183   : > { %v466_v51 = vmul.f32 0.0, %v10191_v47  ;;  %v10193_v61 = vpop.eup %10192 }
 0x185   : > { %v11224_v54 = vadd.f32 %v467_v50, %v466_v51  ;;  %v989_v50 = vld [vmem:[#allocation5 + $0x160] sm:$0xff]  ;;  %v994_v51 = vld [vmem:[#allocation5 + $0x188] sm:$0xff] }
 0x187   : > { %10194 = vtanh.f32 %v11224_v54 }
 0x191   : > { %v10195_v63 = vpop.eup %10194 }
 0x192   : > { %v470_v3 = vmul.f32 %v10195_v63, %v10193_v61 }
 0x194   : > { %471 = vst [vmem:[%s11230_s23] sm:$0xff] %v470_v3  ;;  %v474_v5 = vadd.f32 %v7901_v2, %v470_v3  ;;  %v993_v2 = vld [vmem:[#allocation5 + $0x180] sm:$0xff] }
 0x195   : > { %v997_v3 = vld [vmem:[#allocation5 + $0x1a0] sm:$0xff] }
 0x196   : > { %604 = vmatmul.mubr.f32.vlgmr.msra.gmra.mrb[2].mxu0 %v474_v5  ;;  %675 = vmatmul.mubr.f32.vlgmr.msra.gmra.mrb[2].mxu1 %v474_v5  ;;  %v1002_v5 = vld [vmem:[#allocation5 + $0x1c8] sm:$0xff] }
 0x197   : > { %8185 = vmatpush1.bf16.msra.mxu0 %v11069_v8  ;;  %8217 = vmatpush1.bf16.msra.mxu1 %v11082_v25 }
 0x198   : > { %8187 = vmatprep.subr.bf16.mxu0 %v11071_v9  ;;  %8219 = vmatprep.subr.bf16.mxu1 %v11092_v33 }
 0x199   : > { %838 = vmatprep.mubr.f32.mxu0 %v10860_v0  ;;  %909 = vmatprep.mubr.f32.mxu1 %v10860_v0 }
 0x19b   : > { %8189 = vmatpush1.bf16.msra.mxu0 %v11075_v14  ;;  %8221 = vmatpush1.bf16.msra.mxu1 %v11094_v37 }
 0x19c   : > { %8191 = vmatprep.subr.bf16.mxu0 %v11078_v17  ;;  %8223 = vmatprep.subr.bf16.mxu1 %v11100_v45 }
 0x19f   : > { %8193 = vmatpush1.bf16.msra.mxu0 %v11085_v26  ;;  %8225 = vmatpush1.bf16.msra.mxu1 %v11106_v48 }
 0x1a0   : > { %8195 = vmatprep.subr.bf16.mxu0 %v11089_v30  ;;  %8227 = vmatprep.subr.bf16.mxu1 %v11109_v52 }
 0x1a3   : > { %8197 = vmatpush1.bf16.msra.mxu0 %v11098_v42  ;;  %8229 = vmatpush1.bf16.msra.mxu1 %v11118_v62 }
 0x1a4   : > { %8199 = vmatprep.subr.bf16.mxu0 %v11103_v46  ;;  %8231 = vmatprep.subr.bf16.mxu1 %v11121_v1 }
 0x1a7   : > { %8201 = vmatpush1.bf16.msra.mxu0 %v11112_v55  ;;  %8233 = vmatpush1.bf16.msra.mxu1 %v11130_v15 }
 0x1a8   : > { %8203 = vmatprep.subr.bf16.mxu0 %v11115_v58  ;;  %8235 = vmatprep.subr.bf16.mxu1 %v11133_v18 }
 0x1ab   : > { %8205 = vmatpush1.bf16.msra.mxu0 %v11124_v7  ;;  %8237 = vmatpush1.bf16.msra.mxu1 %v11142_v31 }
 0x1ac   : > { %8207 = vmatprep.subr.bf16.mxu0 %v11127_v10  ;;  %8239 = vmatprep.subr.bf16.mxu1 %v11145_v32 }
 0x1af   : > { %8209 = vmatpush1.bf16.msra.mxu0 %v11136_v24  ;;  %8241 = vmatpush1.bf16.msra.mxu1 %v11152_v40 }
 0x1b0   : > { %8211 = vmatprep.subr.bf16.mxu0 %v11139_v27  ;;  %8243 = vmatprep.subr.bf16.mxu1 %v11155_v41 }
 0x1b3   : > { %8213 = vmatpush1.bf16.msra.mxu0 %v11148_v39  ;;  %8245 = vmatpush1.bf16.msra.mxu1 %v11160_v49 }
 0x1b4   : > { %8247 = vmatprep.subr.bf16.mxu0 %v11067_v4  ;;  %8279 = vmatprep.subr.bf16.mxu1 %v11080_v22 }
 0x269   : > { %v605_v26 = vpop.f32.mrb[2].mxu0  ;;  %v676_v30 = vpop.f32.mrb[2].mxu1 }
 0x26a   : > { %v606_v42 = vadd.f32 %v605_v26, %v11205_v57  ;;  %v607_v46 = vpop.f32.mrb[3].mxu0  ;;  %v678_v55 = vpop.f32.mrb[3].mxu1  ;;  %v677_v24 = vadd.f32 %v676_v30, %v11215_v6  ;;  %v1006_v26 = vld [vmem:[#allocation5 + $0x1e8] sm:$0xff]  ;;  %v11321_v30 = vpack.c.bf16 %v997_v3, %v993_v2  ;;  %v1186_v2 = vld [vmem:[#allocation5 + $0x30] sm:$0xff] }
 0x26b   : > { %v608_v58 = vadd.f32 %v607_v46, %v11208_v59  ;;  %v679_v27 = vadd.f32 %v678_v55, %v11221_v20  ;;  %v1001_v46 = vld [vmem:[#allocation5 + $0x1c0] sm:$0xff] }
 0x26c   : > { %v7902_v7 = vmul.f32 -1.442695, %v606_v42  ;;  %v7904_v39 = vmul.f32 -1.442695, %v677_v24  ;;  %v11324_v42 = vpack.c.bf16 %v1006_v26, %v1002_v5  ;;  %v1005_v55 = vld [vmem:[#allocation5 + $0x1e0] sm:$0xff]  ;;  %v1189_v5 = vld [vmem:[#allocation5 + $0x48] sm:$0xff] }
 0x26d   : > { %v7903_v10 = vmul.f32 -1.442695, %v608_v58  ;;  %v11327_v58 = vpack.c.bf16 %v1005_v55, %v1001_v46  ;;  %v1193_v26 = vld [vmem:[#allocation5 + $0x68] sm:$0xff]  ;;  %v1191_v46 = vld [vmem:[#allocation5 + $0x58] sm:$0xff] }
 0x26e   : > { %10196 = vpow2.f32 %v7902_v7  ;;  %v11355_v55 = vpack.c.bf16 %v1193_v26, %v1189_v5  ;;  %v1235_v5 = vld [vmem:[#allocation5 + $0x1b8] sm:$0xff] }
 0x26f   : > { %10198 = vpow2.f32 %v7903_v10 }
 0x270   : > { %10200 = vtanh.f32 %v679_v27 }
 0x271   : > { %10202 = vpow2.f32 %v7904_v39 }
 0x278   : > { %v10197_v4 = vpop.eup %10196 }
 0x279   : > { %v690_v11 = vadd.f32 1.0, %v10197_v4  ;;  %v10199_v22 = vpop.eup %10198 }
 0x27a   : > { %v691_v13 = vadd.f32 1.0, %v10199_v22  ;;  %v10201_v16 = vpop.eup %10200 }
 0x27b   : > { %10204 = vrcp.f32 %v690_v11  ;;  %v10203_v19 = vpop.eup %10202 }
 0x27c   : > { %10206 = vrcp.f32 %v691_v13  ;;  %v692_v29 = vadd.f32 1.0, %v10203_v19 }
 0x27e   : > { %10208 = vrcp.f32 %v692_v29 }
 0x285   : > { %v10205_v21 = vpop.eup %10204 }
 0x286   : > { %v701_v23 = vmul.f32 %v10205_v21, %v10201_v16  ;;  %v10207_v28 = vpop.eup %10206 }
 0x287   : > { %v700_v34 = vmul.f32 %v10207_v28, %v11224_v54  ;;  %v998_v54 = vld [vmem:[#allocation5 + $0x1a8] sm:$0xff] }
 0x288   : > { %v10209_v36 = vpop.eup %10208  ;;  %v11317_v63 = vpack.c.bf16 %v998_v54, %v994_v51  ;;  %v1182_v54 = vld [vmem:[#allocation5 + $0x10] sm:$0xff] }
 0x289   : > { %v11272_v35 = vadd.f32 %v701_v23, %v700_v34  ;;  %v11350_v3 = vpack.c.bf16 %v1186_v2, %v1182_v54  ;;  %v1226_v54 = vld [vmem:[#allocation5 + $0x170] sm:$0xff]  ;;  %v1231_v2 = vld [vmem:[#allocation5 + $0x198] sm:$0xff] }
 0x28b   : > { %10210 = vtanh.f32 %v11272_v35 }
 0x295   : > { %v10211_v38 = vpop.eup %10210 }
 0x296   : > { %v704_v44 = vmul.f32 %v10211_v38, %v10209_v36 }
 0x298   : > { %7905 = vst [vmem:[%s11230_s23 + $0x8] sm:$0xff] %v704_v44  ;;  %v709_v47 = vadd.f32 %v7906_v43, %v704_v44 }
 0x29a   : > { %839 = vmatmul.mubr.f32.vlgmr.msra.gmra.mrb[4].mxu0 %v709_v47  ;;  %910 = vmatmul.mubr.f32.vlgmr.msra.gmra.mrb[4].mxu1 %v709_v47 }
 0x29b   : > { %8249 = vmatpush1.bf16.msra.mxu0 %v11069_v8  ;;  %8281 = vmatpush1.bf16.msra.mxu1 %v11082_v25  ;;  %v961_v8 = vld [vmem:[#allocation5 + $0x80] sm:$0xff]  ;;  %v974_v25 = vld [vmem:[#allocation5 + $0xe8] sm:$0xff] }
 0x29c   : > { %8251 = vmatprep.subr.bf16.mxu0 %v11071_v9  ;;  %8283 = vmatprep.subr.bf16.mxu1 %v11092_v33  ;;  %v965_v9 = vld [vmem:[#allocation5 + $0xa0] sm:$0xff] }
 0x29d   : > { %1073 = vmatprep.mubr.f32.mxu0 %v10860_v0  ;;  %1144 = vmatprep.mubr.f32.mxu1 %v10860_v0 }
 0x29f   : > { %8253 = vmatpush1.bf16.msra.mxu0 %v11075_v14  ;;  %8285 = vmatpush1.bf16.msra.mxu1 %v11094_v37  ;;  %v11298_v14 = vpack.c.bf16 %v965_v9, %v961_v8  ;;  %v969_v37 = vld [vmem:[#allocation5 + $0xc0] sm:$0xff] }
 0x2a0   : > { %8255 = vmatprep.subr.bf16.mxu0 %v11078_v17  ;;  %8287 = vmatprep.subr.bf16.mxu1 %v11100_v45  ;;  %v970_v17 = vld [vmem:[#allocation5 + $0xc8] sm:$0xff]  ;;  %v973_v45 = vld [vmem:[#allocation5 + $0xe0] sm:$0xff] }
 0x2a1   : > { %v11301_v33 = vpack.c.bf16 %v974_v25, %v970_v17 }
 0x2a3   : > { %8289 = vmatpush1.bf16.msra.mxu1 %v11106_v48  ;;  %8257 = vmatpush1.bf16.msra.mxu0 %v11298_v14  ;;  %v11303_v48 = vpack.c.bf16 %v973_v45, %v969_v37  ;;  %v7911_v37 = vld [vmem:[%s11055_s27 + $0x18] sm:$0xff] }
 0x2a4   : > { %8291 = vmatprep.subr.bf16.mxu1 %v11109_v52  ;;  %8259 = vmatprep.subr.bf16.mxu0 %v11301_v33  ;;  %v978_v52 = vld [vmem:[#allocation5 + $0x108] sm:$0xff] }
 0x2a7   : > { %8293 = vmatpush1.bf16.msra.mxu1 %v11118_v62  ;;  %8261 = vmatpush1.bf16.msra.mxu0 %v11303_v48  ;;  %v982_v62 = vld [vmem:[#allocation5 + $0x128] sm:$0xff] }
 0x2a8   : > { %8295 = vmatprep.subr.bf16.mxu1 %v11121_v1  ;;  %v11307_v1 = vpack.c.bf16 %v982_v62, %v978_v52  ;;  %v1181_v62 = vld [vmem:[#allocation5 + $0x8] sm:$0xff] }
 0x2aa   : > { %8263 = vmatprep.subr.bf16.mxu0 %v11307_v1 }
 0x2ab   : > { %8297 = vmatpush1.bf16.msra.mxu1 %v11130_v15  ;;  %v977_v15 = vld [vmem:[#allocation5 + $0x100] sm:$0xff] }
 0x2ac   : > { %8299 = vmatprep.subr.bf16.mxu1 %v11133_v18  ;;  %v981_v18 = vld [vmem:[#allocation5 + $0x120] sm:$0xff] }
 0x2af   : > { %8301 = vmatpush1.bf16.msra.mxu1 %v11142_v31  ;;  %v11309_v31 = vpack.c.bf16 %v981_v18, %v977_v15  ;;  %v1185_v15 = vld [vmem:[#allocation5 + $0x28] sm:$0xff] }
 0x2b0   : > { %8303 = vmatprep.subr.bf16.mxu1 %v11145_v32  ;;  %v986_v32 = vld [vmem:[#allocation5 + $0x148] sm:$0xff]  ;;  %v11343_v18 = vpack.c.bf16 %v1185_v15, %v1181_v62  ;;  %v1218_v62 = vld [vmem:[#allocation5 + $0x130] sm:$0xff] }
 0x2b1   : > { %8265 = vmatpush1.bf16.msra.mxu0 %v11309_v31 }
 0x2b3   : > { %8305 = vmatpush1.bf16.msra.mxu1 %v11152_v40  ;;  %v990_v40 = vld [vmem:[#allocation5 + $0x168] sm:$0xff] }
 0x2b4   : > { %8307 = vmatprep.subr.bf16.mxu1 %v11155_v41  ;;  %v985_v41 = vld [vmem:[#allocation5 + $0x140] sm:$0xff] }
 0x2b5   : > { %v11315_v61 = vpack.c.bf16 %v989_v50, %v985_v41  ;;  %v1184_v41 = vld [vmem:[#allocation5 + $0x20] sm:$0xff] }
 0x2b7   : > { %8309 = vmatpush1.bf16.msra.mxu1 %v11160_v49  ;;  %v11313_v49 = vpack.c.bf16 %v990_v40, %v986_v32  ;;  %v1187_v32 = vld [vmem:[#allocation5 + $0x38] sm:$0xff]  ;;  %v1180_v40 = vld [vmem:[#allocation5] sm:$0xff] }
 0x2b8   : > { %v11347_v51 = vpack.c.bf16 %v1184_v41, %v1180_v40  ;;  %v1222_v40 = vld [vmem:[#allocation5 + $0x150] sm:$0xff] }
 0x2b9   : > { %8267 = vmatprep.subr.bf16.mxu0 %v11313_v49  ;;  %v11396_v26 = vpack.c.bf16 %v1226_v54, %v1222_v40 }
 0x2ba   : > { %8269 = vmatpush1.bf16.msra.mxu0 %v11315_v61 }
 0x2bb   : > { %8271 = vmatprep.subr.bf16.mxu0 %v11317_v63 }
 0x2be   : > { %8273 = vmatpush1.bf16.msra.mxu0 %v11321_v30 }
 0x2bf   : > { %8275 = vmatprep.subr.bf16.mxu0 %v11324_v42 }
 0x2c2   : > { %8277 = vmatpush1.bf16.msra.mxu0 %v11327_v58 }
 0x2c3   : > { %8311 = vmatprep.subr.bf16.mxu0 %v11343_v18 }
 0x36d   : > { %v840_v7 = vpop.f32.mrb[4].mxu0  ;;  %v911_v10 = vpop.f32.mrb[4].mxu1 }
 0x36e   : > { %v841_v24 = vadd.f32 %v840_v7, %v11205_v57  ;;  %v842_v27 = vpop.f32.mrb[5].mxu0  ;;  %v913_v39 = vpop.f32.mrb[5].mxu1  ;;  %v912_v13 = vadd.f32 %v911_v10, %v11215_v6  ;;  %v1195_v7 = vld [vmem:[#allocation5 + $0x78] sm:$0xff]  ;;  %v1188_v10 = vld [vmem:[#allocation5 + $0x40] sm:$0xff] }
 0x36f   : > { %v843_v4 = vadd.f32 %v842_v27, %v11208_v59  ;;  %v914_v16 = vadd.f32 %v913_v39, %v11221_v20  ;;  %v11357_v27 = vpack.c.bf16 %v1195_v7, %v1191_v46  ;;  %v11398_v46 = vpack.c.bf16 %v1235_v5, %v1231_v2  ;;  %v1230_v7 = vld [vmem:[#allocation5 + $0x190] sm:$0xff] }
 0x370   : > { %v7907_v11 = vmul.f32 -1.442695, %v841_v24  ;;  %v7909_v19 = vmul.f32 -1.442695, %v912_v13  ;;  %v1192_v24 = vld [vmem:[#allocation5 + $0x60] sm:$0xff]  ;;  %v1197_v13 = vld [vmem:[#allocation5 + $0x88] sm:$0xff] }
 0x371   : > { %v7908_v22 = vmul.f32 -1.442695, %v843_v4  ;;  %v11359_v39 = vpack.c.bf16 %v1192_v24, %v1188_v10  ;;  %v1190_v4 = vld [vmem:[#allocation5 + $0x50] sm:$0xff]  ;;  %v1239_v24 = vld [vmem:[#allocation5 + $0x1d8] sm:$0xff] }
 0x372   : > { %10212 = vpow2.f32 %v7907_v11  ;;  %v1194_v11 = vld [vmem:[#allocation5 + $0x70] sm:$0xff] }
 0x373   : > { %10214 = vpow2.f32 %v7908_v22  ;;  %v11362_v22 = vpack.c.bf16 %v1194_v11, %v1190_v4  ;;  %v1234_v10 = vld [vmem:[#allocation5 + $0x1b0] sm:$0xff]  ;;  %v1243_v4 = vld [vmem:[#allocation5 + $0x1f8] sm:$0xff] }
 0x374   : > { %10216 = vtanh.f32 %v914_v16  ;;  %v1201_v16 = vld [vmem:[#allocation5 + $0xa8] sm:$0xff]  ;;  %v11404_v11 = vpack.c.bf16 %v1234_v10, %v1230_v7 }
 0x375   : > { %10218 = vpow2.f32 %v7909_v19  ;;  %v1199_v19 = vld [vmem:[#allocation5 + $0x98] sm:$0xff] }
 0x37c   : > { %v10213_v21 = vpop.eup %10212 }
 0x37d   : > { %v925_v23 = vadd.f32 1.0, %v10213_v21  ;;  %v10215_v28 = vpop.eup %10214  ;;  %v11367_v21 = vpack.c.bf16 %v1201_v16, %v1197_v13  ;;  %v11407_v13 = vpack.c.bf16 %v1243_v4, %v1239_v24  ;;  %v1238_v16 = vld [vmem:[#allocation5 + $0x1d0] sm:$0xff] }
 0x37e   : > { %v926_v29 = vadd.f32 1.0, %v10215_v28  ;;  %v10217_v34 = vpop.eup %10216  ;;  %v1198_v28 = vld [vmem:[#allocation5 + $0x90] sm:$0xff] }
 0x37f   : > { %10220 = vrcp.f32 %v925_v23  ;;  %v10219_v36 = vpop.eup %10218  ;;  %v1203_v23 = vld [vmem:[#allocation5 + $0xb8] sm:$0xff] }
 0x380   : > { %10222 = vrcp.f32 %v926_v29  ;;  %v927_v47 = vadd.f32 1.0, %v10219_v36  ;;  %v1202_v29 = vld [vmem:[#allocation5 + $0xb0] sm:$0xff] }
 0x381   : > { %v11371_v36 = vpack.c.bf16 %v1202_v29, %v1198_v28 }
 0x382   : > { %10224 = vrcp.f32 %v927_v47  ;;  %v1206_v47 = vld [vmem:[#allocation5 + $0xd0] sm:$0xff] }
 0x389   : > { %v10221_v38 = vpop.eup %10220 }
 0x38a   : > { %v936_v43 = vmul.f32 %v10221_v38, %v10217_v34  ;;  %v10223_v44 = vpop.eup %10222  ;;  %v11369_v34 = vpack.c.bf16 %v1203_v23, %v1199_v19  ;;  %v1207_v38 = vld [vmem:[#allocation5 + $0xd8] sm:$0xff]  ;;  %v1242_v19 = vld [vmem:[#allocation5 + $0x1f0] sm:$0xff] }
 0x38b   : > { %v935_v8 = vmul.f32 %v10223_v44, %v11272_v35  ;;  %v1183_v35 = vld [vmem:[#allocation5 + $0x18] sm:$0xff]  ;;  %v11412_v23 = vpack.c.bf16 %v1242_v19, %v1238_v16 }
 0x38c   : > { %v10225_v17 = vpop.eup %10224  ;;  %v11345_v50 = vpack.c.bf16 %v1187_v32, %v1183_v35  ;;  %v1223_v35 = vld [vmem:[#allocation5 + $0x158] sm:$0xff] }
 0x38d   : > { %v11336_v9 = vadd.f32 %v936_v43, %v935_v8  ;;  %v1211_v43 = vld [vmem:[#allocation5 + $0xf8] sm:$0xff]  ;;  %v1210_v8 = vld [vmem:[#allocation5 + $0xf0] sm:$0xff] }
 0x38e   : > { %8343 = vmatprep.subr.bf16.mxu1 %v11345_v50  ;;  %v11378_v44 = vpack.c.bf16 %v1211_v43, %v1207_v38  ;;  %v1227_v32 = vld [vmem:[#allocation5 + $0x178] sm:$0xff] }
 0x38f   : > { %10226 = vtanh.f32 %v11336_v9  ;;  %v11394_v41 = vpack.c.bf16 %v1227_v32, %v1223_v35 }
 0x399   : > { %v10227_v25 = vpop.eup %10226 }
 0x39a   : > { %v939_v45 = vmul.f32 %v10227_v25, %v10225_v17  ;;  %v11380_v17 = vpack.c.bf16 %v1210_v8, %v1206_v47  ;;  %v1215_v25 = vld [vmem:[#allocation5 + $0x118] sm:$0xff] }
 0x39c   : > { %7910 = vst [vmem:[%s11230_s23 + $0x10] sm:$0xff] %v939_v45  ;;  %v944_v52 = vadd.f32 %v7911_v37, %v939_v45  ;;  %v1219_v37 = vld [vmem:[#allocation5 + $0x138] sm:$0xff] }
 0x39d   : > { %v11386_v45 = vpack.c.bf16 %v1219_v37, %v1215_v25 }
 0x39e   : > { %1074 = vmatmul.mubr.f32.vlgmr.msra.gmra.mrb[6].mxu0 %v944_v52  ;;  %1145 = vmatmul.mubr.f32.vlgmr.msra.gmra.mrb[6].mxu1 %v944_v52  ;;  %v1214_v52 = vld [vmem:[#allocation5 + $0x110] sm:$0xff] }
 0x39f   : > { %1308 = vmatprep.mubr.f32.mxu0 %v10860_v0  ;;  %1379 = vmatprep.mubr.f32.mxu1 %v10860_v0  ;;  %v11388_v15 = vpack.c.bf16 %v1218_v62, %v1214_v52 }
 0x3a0   : > { %8313 = vmatpush1.bf16.msra.mxu0 %v11347_v51  ;;  %8345 = vmatpush1.bf16.msra.mxu1 %v11350_v3 }
 0x3a1   : > { %8315 = vmatprep.subr.bf16.mxu0 %v11355_v55  ;;  %8347 = vmatprep.subr.bf16.mxu1 %v11357_v27 }
 0x3a4   : > { %8317 = vmatpush1.bf16.msra.mxu0 %v11359_v39  ;;  %8349 = vmatpush1.bf16.msra.mxu1 %v11362_v22 }
 0x3a5   : > { %8319 = vmatprep.subr.bf16.mxu0 %v11367_v21  ;;  %8351 = vmatprep.subr.bf16.mxu1 %v11369_v34 }
 0x3a8   : > { %8321 = vmatpush1.bf16.msra.mxu0 %v11298_v14  ;;  %8353 = vmatpush1.bf16.msra.mxu1 %v11371_v36 }
 0x3a9   : > { %8323 = vmatprep.subr.bf16.mxu0 %v11301_v33  ;;  %8355 = vmatprep.subr.bf16.mxu1 %v11378_v44 }
 0x3ac   : > { %8325 = vmatpush1.bf16.msra.mxu0 %v11303_v48  ;;  %8357 = vmatpush1.bf16.msra.mxu1 %v11380_v17 }
 0x3ad   : > { %8327 = vmatprep.subr.bf16.mxu0 %v11307_v1  ;;  %8359 = vmatprep.subr.bf16.mxu1 %v11386_v45 }
 0x3b0   : > { %8329 = vmatpush1.bf16.msra.mxu0 %v11309_v31  ;;  %8361 = vmatpush1.bf16.msra.mxu1 %v11388_v15 }
 0x3b1   : > { %8331 = vmatprep.subr.bf16.mxu0 %v11313_v49  ;;  %8363 = vmatprep.subr.bf16.mxu1 %v11394_v41 }
 0x3b4   : > { %8333 = vmatpush1.bf16.msra.mxu0 %v11315_v61  ;;  %8365 = vmatpush1.bf16.msra.mxu1 %v11396_v26 }
 0x3b5   : > { %8335 = vmatprep.subr.bf16.mxu0 %v11317_v63  ;;  %8367 = vmatprep.subr.bf16.mxu1 %v11398_v46 }
 0x3b8   : > { %8337 = vmatpush1.bf16.msra.mxu0 %v11321_v30  ;;  %8369 = vmatpush1.bf16.msra.mxu1 %v11404_v11 }
 0x3b9   : > { %8339 = vmatprep.subr.bf16.mxu0 %v11324_v42  ;;  %8371 = vmatprep.subr.bf16.mxu1 %v11407_v13 }
 0x3bc   : > { %8341 = vmatpush1.bf16.msra.mxu0 %v11327_v58  ;;  %8373 = vmatpush1.bf16.msra.mxu1 %v11412_v23 }
 0x3bd   : > { %8375 = vmatprep.subr.bf16.mxu0 %v11343_v18  ;;  %8407 = vmatprep.subr.bf16.mxu1 %v11345_v50 }
 0x471   : > { %v1075_v28 = vpop.f32.mrb[6].mxu0  ;;  %v1146_v29 = vpop.f32.mrb[6].mxu1 }
 0x472   : > { %v1076_v38 = vadd.f32 %v1075_v28, %v11205_v57  ;;  %v1077_v43 = vpop.f32.mrb[7].mxu0  ;;  %v1148_v47 = vpop.f32.mrb[7].mxu1  ;;  %v1147_v52 = vadd.f32 %v1146_v29, %v11215_v6 }
 0x473   : > { %v1078_v8 = vadd.f32 %v1077_v43, %v11208_v59  ;;  %v1149_v62 = vadd.f32 %v1148_v47, %v11221_v20  ;;  %v7916_v43 = vld [vmem:[%s11055_s27 + $0x20] sm:$0xff] }
 0x474   : > { %v7912_v25 = vmul.f32 -1.442695, %v1076_v38  ;;  %v7914_v35 = vmul.f32 -1.442695, %v1147_v52 }
 0x475   : > { %v7913_v37 = vmul.f32 -1.442695, %v1078_v8 }
 0x476   : > { %10228 = vpow2.f32 %v7912_v25 }
 0x477   : > { %10230 = vpow2.f32 %v7913_v37 }
 0x478   : > { %10232 = vtanh.f32 %v1149_v62 }
 0x479   : > { %10234 = vpow2.f32 %v7914_v35 }
 0x480   : > { %v10229_v32 = vpop.eup %10228 }
 0x481   : > { %v1160_v40 = vadd.f32 1.0, %v10229_v32  ;;  %v10231_v54 = vpop.eup %10230 }
 0x482   : > { %v1161_v2 = vadd.f32 1.0, %v10231_v54  ;;  %v10233_v5 = vpop.eup %10232 }
 0x483   : > { %10236 = vrcp.f32 %v1160_v40  ;;  %v10235_v7 = vpop.eup %10234 }
 0x484   : > { %10238 = vrcp.f32 %v1161_v2  ;;  %v1162_v16 = vadd.f32 1.0, %v10235_v7 }
 0x486   : > { %10240 = vrcp.f32 %v1162_v16 }
 0x48d   : > { %v10237_v10 = vpop.eup %10236 }
 0x48e   : > { %v1171_v24 = vmul.f32 %v10237_v10, %v10233_v5  ;;  %v10239_v4 = vpop.eup %10238 }
 0x48f   : > { %v1170_v19 = vmul.f32 %v10239_v4, %v11336_v9 }
 0x490   : > { %v10241_v29 = vpop.eup %10240 }
 0x491   : > { %v11424_v28 = vadd.f32 %v1171_v24, %v1170_v19 }
 0x493   : > { %10242 = vtanh.f32 %v11424_v28 }
 0x49d   : > { %v10243_v38 = vpop.eup %10242 }
 0x49e   : > { %v1174_v47 = vmul.f32 %v10243_v38, %v10241_v29 }
 0x4a0   : > { %7915 = vst [vmem:[%s11230_s23 + $0x18] sm:$0xff] %v1174_v47  ;;  %v1179_v8 = vadd.f32 %v7916_v43, %v1174_v47 }
 0x4a2   : > { %1309 = vmatmul.mubr.f32.vlgmr.msra.gmra.mrb[8].mxu0 %v1179_v8  ;;  %1380 = vmatmul.mubr.f32.vlgmr.msra.gmra.mrb[8].mxu1 %v1179_v8 }
 0x4a3   : > { %8377 = vmatpush1.bf16.msra.mxu0 %v11347_v51  ;;  %8409 = vmatpush1.bf16.msra.mxu1 %v11350_v3 }
 0x4a4   : > { %8379 = vmatprep.subr.bf16.mxu0 %v11355_v55  ;;  %8411 = vmatprep.subr.bf16.mxu1 %v11357_v27 }
 0x4a5   : > { %1543 = vmatprep.mubr.f32.mxu0 %v10860_v0  ;;  %1614 = vmatprep.mubr.f32.mxu1 %v10860_v0 }
 0x4a7   : > { %8381 = vmatpush1.bf16.msra.mxu0 %v11359_v39  ;;  %8413 = vmatpush1.bf16.msra.mxu1 %v11362_v22 }
 0x4a8   : > { %8383 = vmatprep.subr.bf16.mxu0 %v11367_v21  ;;  %8415 = vmatprep.subr.bf16.mxu1 %v11369_v34 }
 0x4ab   : > { %8385 = vmatpush1.bf16.msra.mxu0 %v11298_v14  ;;  %8417 = vmatpush1.bf16.msra.mxu1 %v11371_v36 }
 0x4ac   : > { %8387 = vmatprep.subr.bf16.mxu0 %v11301_v33  ;;  %8419 = vmatprep.subr.bf16.mxu1 %v11378_v44 }
 0x4af   : > { %8389 = vmatpush1.bf16.msra.mxu0 %v11303_v48  ;;  %8421 = vmatpush1.bf16.msra.mxu1 %v11380_v17 }
 0x4b0   : > { %8391 = vmatprep.subr.bf16.mxu0 %v11307_v1  ;;  %8423 = vmatprep.subr.bf16.mxu1 %v11386_v45 }
 0x4b3   : > { %8393 = vmatpush1.bf16.msra.mxu0 %v11309_v31  ;;  %8425 = vmatpush1.bf16.msra.mxu1 %v11388_v15 }
 0x4b4   : > { %8395 = vmatprep.subr.bf16.mxu0 %v11313_v49  ;;  %8427 = vmatprep.subr.bf16.mxu1 %v11394_v41 }
 0x4b7   : > { %8397 = vmatpush1.bf16.msra.mxu0 %v11315_v61  ;;  %8429 = vmatpush1.bf16.msra.mxu1 %v11396_v26 }
 0x4b8   : > { %8399 = vmatprep.subr.bf16.mxu0 %v11317_v63  ;;  %8431 = vmatprep.subr.bf16.mxu1 %v11398_v46 }
 0x4bb   : > { %8401 = vmatpush1.bf16.msra.mxu0 %v11321_v30  ;;  %8433 = vmatpush1.bf16.msra.mxu1 %v11404_v11 }
 0x4bc   : > { %8403 = vmatprep.subr.bf16.mxu0 %v11324_v42  ;;  %8435 = vmatprep.subr.bf16.mxu1 %v11407_v13 }
 0x4bf   : > { %8405 = vmatpush1.bf16.msra.mxu0 %v11327_v58  ;;  %8437 = vmatpush1.bf16.msra.mxu1 %v11412_v23 }
 0x4c0   : > { %8439 = vmatprep.subr.bf16.mxu0 %v11343_v18  ;;  %8471 = vmatprep.subr.bf16.mxu1 %v11345_v50 }
 0x575   : > { %v1310_v9 = vpop.f32.mrb[8].mxu0  ;;  %v1381_v25 = vpop.f32.mrb[8].mxu1 }
 0x576   : > { %v1311_v37 = vadd.f32 %v1310_v9, %v11205_v57  ;;  %v1312_v52 = vpop.f32.mrb[9].mxu0  ;;  %v1383_v62 = vpop.f32.mrb[9].mxu1  ;;  %v1382_v54 = vadd.f32 %v1381_v25, %v11215_v6 }
 0x577   : > { %v1313_v35 = vadd.f32 %v1312_v52, %v11208_v59  ;;  %v1384_v2 = vadd.f32 %v1383_v62, %v11221_v20  ;;  %v7921_v52 = vld [vmem:[%s11055_s27 + $0x28] sm:$0xff] }
 0x578   : > { %v7917_v32 = vmul.f32 -1.442695, %v1311_v37  ;;  %v7919_v5 = vmul.f32 -1.442695, %v1382_v54 }
 0x579   : > { %v7918_v40 = vmul.f32 -1.442695, %v1313_v35 }
 0x57a   : > { %10244 = vpow2.f32 %v7917_v32 }
 0x57b   : > { %10246 = vpow2.f32 %v7918_v40 }
 0x57c   : > { %10248 = vtanh.f32 %v1384_v2 }
 0x57d   : > { %10250 = vpow2.f32 %v7919_v5 }
 0x584   : > { %v10245_v7 = vpop.eup %10244 }
 0x585   : > { %v1395_v10 = vadd.f32 1.0, %v10245_v7  ;;  %v10247_v24 = vpop.eup %10246 }
 0x586   : > { %v1396_v4 = vadd.f32 1.0, %v10247_v24  ;;  %v10249_v16 = vpop.eup %10248 }
 0x587   : > { %10252 = vrcp.f32 %v1395_v10  ;;  %v10251_v19 = vpop.eup %10250 }
 0x588   : > { %10254 = vrcp.f32 %v1396_v4  ;;  %v1397_v47 = vadd.f32 1.0, %v10251_v19 }
 0x58a   : > { %10256 = vrcp.f32 %v1397_v47  ;;  %v1929_v47 = vld [vmem:[#allocation5 + $0x160] sm:$0xff] }
 0x591   : > { %v10253_v29 = vpop.eup %10252 }
 0x592   : > { %v1406_v38 = vmul.f32 %v10253_v29, %v10249_v16  ;;  %v10255_v43 = vpop.eup %10254  ;;  %v7926_v29 = vld [vmem:[%s11055_s27 + $0x30] sm:$0xff] }
 0x593   : > { %v1405_v8 = vmul.f32 %v10255_v43, %v11424_v28 }
 0x594   : > { %v10257_v25 = vpop.eup %10256 }
 0x595   : > { %v11468_v9 = vadd.f32 %v1406_v38, %v1405_v8  ;;  %v1934_v8 = vld [vmem:[#allocation5 + $0x188] sm:$0xff] }
 0x597   : > { %10258 = vtanh.f32 %v11468_v9 }
 0x5a1   : > { %v10259_v37 = vpop.eup %10258 }
 0x5a2   : > { %v1409_v62 = vmul.f32 %v10259_v37, %v10257_v25  ;;  %v1938_v25 = vld [vmem:[#allocation5 + $0x1a8] sm:$0xff]  ;;  %v1933_v37 = vld [vmem:[#allocation5 + $0x180] sm:$0xff] }
 0x5a4   : > { %7920 = vst [vmem:[%s11230_s23 + $0x20] sm:$0xff] %v1409_v62  ;;  %v1414_v35 = vadd.f32 %v7921_v52, %v1409_v62  ;;  %v1937_v52 = vld [vmem:[#allocation5 + $0x1a0] sm:$0xff]  ;;  %v8526_v62 = vpack.c.bf16 %v1938_v25, %v1934_v8 }
 0x5a5   : > { %v2155_v25 = vld [vmem:[#allocation5 + $0x260] sm:$0xff] }
 0x5a6   : > { %1544 = vmatmul.mubr.f32.vlgmr.msra.gmra.mrb[10].mxu0 %v1414_v35  ;;  %1615 = vmatmul.mubr.f32.vlgmr.msra.gmra.mrb[10].mxu1 %v1414_v35  ;;  %v1942_v35 = vld [vmem:[#allocation5 + $0x1c8] sm:$0xff] }
 0x5a7   : > { %8441 = vmatpush1.bf16.msra.mxu0 %v11347_v51  ;;  %8473 = vmatpush1.bf16.msra.mxu1 %v11350_v3 }
 0x5a8   : > { %8443 = vmatprep.subr.bf16.mxu0 %v11355_v55  ;;  %8475 = vmatprep.subr.bf16.mxu1 %v11357_v27 }
 0x5a9   : > { %1778 = vmatprep.mubr.f32.mxu0 %v10860_v0  ;;  %1849 = vmatprep.mubr.f32.mxu1 %v10860_v0 }
 0x5ab   : > { %8445 = vmatpush1.bf16.msra.mxu0 %v11359_v39  ;;  %8477 = vmatpush1.bf16.msra.mxu1 %v11362_v22 }
 0x5ac   : > { %8447 = vmatprep.subr.bf16.mxu0 %v11367_v21  ;;  %8479 = vmatprep.subr.bf16.mxu1 %v11369_v34 }
 0x5af   : > { %8449 = vmatpush1.bf16.msra.mxu0 %v11298_v14  ;;  %8481 = vmatpush1.bf16.msra.mxu1 %v11371_v36 }
 0x5b0   : > { %8451 = vmatprep.subr.bf16.mxu0 %v11301_v33  ;;  %8483 = vmatprep.subr.bf16.mxu1 %v11378_v44 }
 0x5b3   : > { %8453 = vmatpush1.bf16.msra.mxu0 %v11303_v48  ;;  %8485 = vmatpush1.bf16.msra.mxu1 %v11380_v17 }
 0x5b4   : > { %8455 = vmatprep.subr.bf16.mxu0 %v11307_v1  ;;  %8487 = vmatprep.subr.bf16.mxu1 %v11386_v45 }
 0x5b7   : > { %8457 = vmatpush1.bf16.msra.mxu0 %v11309_v31  ;;  %8489 = vmatpush1.bf16.msra.mxu1 %v11388_v15 }
 0x5b8   : > { %8459 = vmatprep.subr.bf16.mxu0 %v11313_v49  ;;  %8491 = vmatprep.subr.bf16.mxu1 %v11394_v41 }
 0x5bb   : > { %8461 = vmatpush1.bf16.msra.mxu0 %v11315_v61  ;;  %8493 = vmatpush1.bf16.msra.mxu1 %v11396_v26 }
 0x5bc   : > { %8463 = vmatprep.subr.bf16.mxu0 %v11317_v63  ;;  %8495 = vmatprep.subr.bf16.mxu1 %v11398_v46 }
 0x5bf   : > { %8465 = vmatpush1.bf16.msra.mxu0 %v11321_v30  ;;  %8497 = vmatpush1.bf16.msra.mxu1 %v11404_v11 }
 0x5c0   : > { %8467 = vmatprep.subr.bf16.mxu0 %v11324_v42  ;;  %8499 = vmatprep.subr.bf16.mxu1 %v11407_v13 }
 0x5c3   : > { %8469 = vmatpush1.bf16.msra.mxu0 %v11327_v58  ;;  %8501 = vmatpush1.bf16.msra.mxu1 %v11412_v23 }
 0x5c4   : > { %8503 = vmatprep.subr.bf16.mxu0 %v11343_v18  ;;  %8535 = vmatprep.subr.bf16.mxu1 %v11345_v50 }
 0x679   : > { %v1545_v14 = vpop.f32.mrb[10].mxu0  ;;  %v1616_v33 = vpop.f32.mrb[10].mxu1 }
 0x67a   : > { %v1546_v48 = vadd.f32 %v1545_v14, %v11205_v57  ;;  %v1547_v1 = vpop.f32.mrb[11].mxu0  ;;  %v1618_v31 = vpop.f32.mrb[11].mxu1  ;;  %v1617_v30 = vadd.f32 %v1616_v33, %v11215_v6  ;;  %v1946_v14 = vld [vmem:[#allocation5 + $0x1e8] sm:$0xff]  ;;  %v8528_v33 = vpack.c.bf16 %v1937_v52, %v1933_v37 }
 0x67b   : > { %v1548_v49 = vadd.f32 %v1547_v1, %v11208_v59  ;;  %v1619_v42 = vadd.f32 %v1618_v31, %v11221_v20  ;;  %v8530_v1 = vpack.c.bf16 %v1946_v14, %v1942_v35  ;;  %v1945_v31 = vld [vmem:[#allocation5 + $0x1e0] sm:$0xff]  ;;  %v2153_v35 = vld [vmem:[#allocation5 + $0x250] sm:$0xff] }
 0x67c   : > { %v7922_v61 = vmul.f32 -1.442695, %v1546_v48  ;;  %v7924_v58 = vmul.f32 -1.442695, %v1617_v30  ;;  %v1941_v48 = vld [vmem:[#allocation5 + $0x1c0] sm:$0xff]  ;;  %v2148_v30 = vld [vmem:[#allocation5 + $0x228] sm:$0xff] }
 0x67d   : > { %v7923_v63 = vmul.f32 -1.442695, %v1548_v49  ;;  %v2146_v49 = vld [vmem:[#allocation5 + $0x218] sm:$0xff]  ;;  %v2157_v14 = vld [vmem:[#allocation5 + $0x270] sm:$0xff] }
 0x67e   : > { %10260 = vpow2.f32 %v7922_v61  ;;  %v2150_v61 = vld [vmem:[#allocation5 + $0x238] sm:$0xff] }
 0x67f   : > { %10262 = vpow2.f32 %v7923_v63  ;;  %v2144_v63 = vld [vmem:[#allocation5 + $0x208] sm:$0xff] }
 0x680   : > { %10264 = vtanh.f32 %v1619_v42  ;;  %v11538_v42 = vpack.c.bf16 %v2150_v61, %v2146_v49  ;;  %v11566_v61 = vpack.c.bf16 %v2157_v14, %v2153_v35  ;;  %v2185_v35 = vld [vmem:[#allocation5 + $0x350] sm:$0xff] }
 0x681   : > { %10266 = vpow2.f32 %v7924_v58  ;;  %v8532_v58 = vpack.c.bf16 %v1945_v31, %v1941_v48  ;;  %v2164_v48 = vld [vmem:[#allocation5 + $0x2a8] sm:$0xff]  ;;  %v2166_v31 = vld [vmem:[#allocation5 + $0x2b8] sm:$0xff]  ;;  %v2189_v14 = vld [vmem:[#allocation5 + $0x370] sm:$0xff] }
 0x688   : > { %v10261_v18 = vpop.eup %10260 }
 0x689   : > { %v1630_v28 = vadd.f32 1.0, %v10261_v18  ;;  %v10263_v50 = vpop.eup %10262  ;;  %v11541_v18 = vpack.c.bf16 %v2148_v30, %v2144_v63  ;;  %v2159_v63 = vld [vmem:[#allocation5 + $0x280] sm:$0xff] }
 0x68a   : > { %v1631_v32 = vadd.f32 1.0, %v10263_v50  ;;  %v10265_v40 = vpop.eup %10264  ;;  %v2163_v30 = vld [vmem:[#allocation5 + $0x2a0] sm:$0xff] }
 0x68b   : > { %10268 = vrcp.f32 %v1630_v28  ;;  %v10267_v54 = vpop.eup %10266 }
 0x68c   : > { %10270 = vrcp.f32 %v1631_v32  ;;  %v1632_v10 = vadd.f32 1.0, %v10267_v54 }
 0x68e   : > { %10272 = vrcp.f32 %v1632_v10 }
 0x695   : > { %v10269_v2 = vpop.eup %10268 }
 0x696   : > { %v1641_v5 = vmul.f32 %v10269_v2, %v10265_v40  ;;  %v10271_v7 = vpop.eup %10270 }
 0x697   : > { %v1640_v24 = vmul.f32 %v10271_v7, %v11468_v9 }
 0x698   : > { %v10273_v16 = vpop.eup %10272 }
 0x699   : > { %v11512_v4 = vadd.f32 %v1641_v5, %v1640_v24 }
 0x69b   : > { %10274 = vtanh.f32 %v11512_v4 }
 0x6a5   : > { %v10275_v19 = vpop.eup %10274 }
 0x6a6   : > { %v1644_v38 = vmul.f32 %v10275_v19, %v10273_v16 }
 0x6a8   : > { %7925 = vst [vmem:[%s11230_s23 + $0x28] sm:$0xff] %v1644_v38  ;;  %v1649_v43 = vadd.f32 %v7926_v29, %v1644_v38 }
 0x6aa   : > { %1779 = vmatmul.mubr.f32.vlgmr.msra.gmra.mrb[12].mxu0 %v1649_v43  ;;  %1850 = vmatmul.mubr.f32.vlgmr.msra.gmra.mrb[12].mxu1 %v1649_v43 }
 0x6ab   : > { %8505 = vmatpush1.bf16.msra.mxu0 %v11347_v51  ;;  %8537 = vmatpush1.bf16.msra.mxu1 %v11350_v3  ;;  %v1901_v51 = vld [vmem:[#allocation5 + $0x80] sm:$0xff] }
 0x6ac   : > { %8507 = vmatprep.subr.bf16.mxu0 %v11355_v55  ;;  %8539 = vmatprep.subr.bf16.mxu1 %v11357_v27  ;;  %v1905_v3 = vld [vmem:[#allocation5 + $0xa0] sm:$0xff]  ;;  %v1910_v27 = vld [vmem:[#allocation5 + $0xc8] sm:$0xff] }
 0x6ad   : > { %2013 = vmatprep.mubr.f32.mxu0 %v10860_v0  ;;  %2084 = vmatprep.mubr.f32.mxu1 %v10860_v0  ;;  %v8512_v55 = vpack.c.bf16 %v1905_v3, %v1901_v51 }
 0x6af   : > { %8509 = vmatpush1.bf16.msra.mxu0 %v11359_v39  ;;  %8541 = vmatpush1.bf16.msra.mxu1 %v11362_v22  ;;  %v1914_v39 = vld [vmem:[#allocation5 + $0xe8] sm:$0xff] }
 0x6b0   : > { %8511 = vmatprep.subr.bf16.mxu0 %v11367_v21  ;;  %8543 = vmatprep.subr.bf16.mxu1 %v11369_v34  ;;  %v8514_v22 = vpack.c.bf16 %v1914_v39, %v1910_v27  ;;  %v1909_v21 = vld [vmem:[#allocation5 + $0xc0] sm:$0xff] }
 0x6b1   : > { %v1913_v34 = vld [vmem:[#allocation5 + $0xe0] sm:$0xff] }
 0x6b3   : > { %8545 = vmatpush1.bf16.msra.mxu1 %v11371_v36  ;;  %8513 = vmatpush1.bf16.msra.mxu0 %v8512_v55  ;;  %v8516_v36 = vpack.c.bf16 %v1913_v34, %v1909_v21 }
 0x6b4   : > { %8547 = vmatprep.subr.bf16.mxu1 %v11378_v44  ;;  %8515 = vmatprep.subr.bf16.mxu0 %v8514_v22  ;;  %v1918_v44 = vld [vmem:[#allocation5 + $0x108] sm:$0xff] }
 0x6b7   : > { %8549 = vmatpush1.bf16.msra.mxu1 %v11380_v17  ;;  %8517 = vmatpush1.bf16.msra.mxu0 %v8516_v36  ;;  %v1922_v17 = vld [vmem:[#allocation5 + $0x128] sm:$0xff]  ;;  %v7931_v36 = vld [vmem:[%s11055_s27 + $0x38] sm:$0xff] }
 0x6b8   : > { %8551 = vmatprep.subr.bf16.mxu1 %v11386_v45  ;;  %v8518_v45 = vpack.c.bf16 %v1922_v17, %v1918_v44  ;;  %v2143_v44 = vld [vmem:[#allocation5 + $0x200] sm:$0xff] }
 0x6b9   : > { %v2147_v17 = vld [vmem:[#allocation5 + $0x220] sm:$0xff] }
 0x6ba   : > { %8519 = vmatprep.subr.bf16.mxu0 %v8518_v45  ;;  %v11553_v8 = vpack.c.bf16 %v2147_v17, %v2143_v44 }
 0x6bb   : > { %8553 = vmatpush1.bf16.msra.mxu1 %v11388_v15  ;;  %v1917_v15 = vld [vmem:[#allocation5 + $0x100] sm:$0xff] }
 0x6bc   : > { %8555 = vmatprep.subr.bf16.mxu1 %v11394_v41  ;;  %v1921_v41 = vld [vmem:[#allocation5 + $0x120] sm:$0xff] }
 0x6bf   : > { %8557 = vmatpush1.bf16.msra.mxu1 %v11396_v26  ;;  %v8520_v26 = vpack.c.bf16 %v1921_v41, %v1917_v15  ;;  %v2145_v15 = vld [vmem:[#allocation5 + $0x210] sm:$0xff] }
 0x6c0   : > { %8559 = vmatprep.subr.bf16.mxu1 %v11398_v46  ;;  %v1926_v46 = vld [vmem:[#allocation5 + $0x148] sm:$0xff]  ;;  %v2149_v41 = vld [vmem:[#allocation5 + $0x230] sm:$0xff] }
 0x6c1   : > { %8521 = vmatpush1.bf16.msra.mxu0 %v8520_v26  ;;  %v2152_v26 = vld [vmem:[#allocation5 + $0x248] sm:$0xff] }
 0x6c3   : > { %8561 = vmatpush1.bf16.msra.mxu1 %v11404_v11  ;;  %v1930_v11 = vld [vmem:[#allocation5 + $0x168] sm:$0xff] }
 0x6c4   : > { %8563 = vmatprep.subr.bf16.mxu1 %v11407_v13  ;;  %v8522_v13 = vpack.c.bf16 %v1930_v11, %v1926_v46  ;;  %v2156_v11 = vld [vmem:[#allocation5 + $0x268] sm:$0xff] }
 0x6c5   : > { %v11558_v52 = vpack.c.bf16 %v2156_v11, %v2152_v26  ;;  %v2188_v26 = vld [vmem:[#allocation5 + $0x368] sm:$0xff]  ;;  %v2190_v11 = vld [vmem:[#allocation5 + $0x378] sm:$0xff] }
 0x6c6   : > { %8523 = vmatprep.subr.bf16.mxu0 %v8522_v13  ;;  %v2154_v13 = vld [vmem:[#allocation5 + $0x258] sm:$0xff] }
 0x6c7   : > { %8565 = vmatpush1.bf16.msra.mxu1 %v11412_v23  ;;  %v1925_v23 = vld [vmem:[#allocation5 + $0x140] sm:$0xff] }
 0x6c8   : > { %v8524_v9 = vpack.c.bf16 %v1929_v47, %v1925_v23  ;;  %8599 = vmatprep.subr.bf16.mxu1 %v11538_v42  ;;  %v2158_v23 = vld [vmem:[#allocation5 + $0x278] sm:$0xff] }
 0x6ca   : > { %8525 = vmatpush1.bf16.msra.mxu0 %v8524_v9  ;;  %v2151_v9 = vld [vmem:[#allocation5 + $0x240] sm:$0xff] }
 0x6cb   : > { %8527 = vmatprep.subr.bf16.mxu0 %v8526_v62  ;;  %v11560_v62 = vpack.c.bf16 %v2158_v23, %v2154_v13  ;;  %v11564_v49 = vpack.c.bf16 %v2155_v25, %v2151_v9  ;;  %v2187_v9 = vld [vmem:[#allocation5 + $0x360] sm:$0xff] }
 0x6ce   : > { %8529 = vmatpush1.bf16.msra.mxu0 %v8528_v33  ;;  %v2160_v33 = vld [vmem:[#allocation5 + $0x288] sm:$0xff] }
 0x6cf   : > { %8531 = vmatprep.subr.bf16.mxu0 %v8530_v1  ;;  %v2162_v1 = vld [vmem:[#allocation5 + $0x298] sm:$0xff] }
 0x6d2   : > { %8533 = vmatpush1.bf16.msra.mxu0 %v8532_v58  ;;  %v11570_v58 = vpack.c.bf16 %v2164_v48, %v2160_v33  ;;  %v2192_v33 = vld [vmem:[#allocation5 + $0x388] sm:$0xff] }
 0x6d3   : > { %8567 = vmatprep.subr.bf16.mxu0 %v11541_v18  ;;  %v2196_v48 = vld [vmem:[#allocation5 + $0x3a8] sm:$0xff] }
 0x77d   : > { %v1780_v28 = vpop.f32.mrb[12].mxu0  ;;  %v1851_v50 = vpop.f32.mrb[12].mxu1 }
 0x77e   : > { %v1781_v32 = vadd.f32 %v1780_v28, %v11205_v57  ;;  %v1782_v40 = vpop.f32.mrb[13].mxu0  ;;  %v1853_v54 = vpop.f32.mrb[13].mxu1  ;;  %v1852_v10 = vadd.f32 %v1851_v50, %v11215_v6  ;;  %v11572_v28 = vpack.c.bf16 %v2166_v31, %v2162_v1  ;;  %v2161_v50 = vld [vmem:[#allocation5 + $0x290] sm:$0xff]  ;;  %v2194_v1 = vld [vmem:[#allocation5 + $0x398] sm:$0xff] }
 0x77f   : > { %v1783_v2 = vadd.f32 %v1782_v40, %v11208_v59  ;;  %v1854_v24 = vadd.f32 %v1853_v54, %v11221_v20  ;;  %v2168_v40 = vld [vmem:[#allocation5 + $0x2c8] sm:$0xff]  ;;  %v2198_v31 = vld [vmem:[#allocation5 + $0x3b8] sm:$0xff] }
 0x780   : > { %v7927_v5 = vmul.f32 -1.442695, %v1781_v32  ;;  %v7929_v16 = vmul.f32 -1.442695, %v1852_v10  ;;  %v2165_v32 = vld [vmem:[#allocation5 + $0x2b0] sm:$0xff]  ;;  %v2172_v54 = vld [vmem:[#allocation5 + $0x2e8] sm:$0xff] }
 0x781   : > { %v7928_v7 = vmul.f32 -1.442695, %v1783_v2  ;;  %v2170_v2 = vld [vmem:[#allocation5 + $0x2d8] sm:$0xff]  ;;  %v11580_v10 = vpack.c.bf16 %v2165_v32, %v2161_v50  ;;  %v2191_v50 = vld [vmem:[#allocation5 + $0x380] sm:$0xff] }
 0x782   : > { %10276 = vpow2.f32 %v7927_v5  ;;  %v2174_v5 = vld [vmem:[#allocation5 + $0x2f8] sm:$0xff]  ;;  %v2195_v32 = vld [vmem:[#allocation5 + $0x3a0] sm:$0xff] }
 0x783   : > { %10278 = vpow2.f32 %v7928_v7  ;;  %v11578_v7 = vpack.c.bf16 %v2163_v30, %v2159_v63  ;;  %v11616_v30 = vpack.c.bf16 %v2189_v14, %v2185_v35 }
 0x784   : > { %10280 = vtanh.f32 %v1854_v24  ;;  %v2167_v24 = vld [vmem:[#allocation5 + $0x2c0] sm:$0xff] }
 0x785   : > { %10282 = vpow2.f32 %v7929_v16  ;;  %v2171_v16 = vld [vmem:[#allocation5 + $0x2e0] sm:$0xff] }
 0x78c   : > { %v10277_v19 = vpop.eup %10276 }
 0x78d   : > { %v1865_v29 = vadd.f32 1.0, %v10277_v19  ;;  %v10279_v38 = vpop.eup %10278  ;;  %v11584_v19 = vpack.c.bf16 %v2172_v54, %v2168_v40  ;;  %v11620_v40 = vpack.c.bf16 %v2196_v48, %v2192_v33  ;;  %v11622_v54 = vpack.c.bf16 %v2198_v31, %v2194_v1 }
 0x78e   : > { %v1866_v43 = vadd.f32 1.0, %v10279_v38  ;;  %v10281_v51 = vpop.eup %10280  ;;  %v2169_v38 = vld [vmem:[#allocation5 + $0x2d0] sm:$0xff] }
 0x78f   : > { %10284 = vrcp.f32 %v1865_v29  ;;  %v10283_v3 = vpop.eup %10282  ;;  %v11586_v29 = vpack.c.bf16 %v2174_v5, %v2170_v2  ;;  %v2193_v2 = vld [vmem:[#allocation5 + $0x390] sm:$0xff] }
 0x790   : > { %10286 = vrcp.f32 %v1866_v43  ;;  %v1867_v22 = vadd.f32 1.0, %v10283_v3  ;;  %v2173_v43 = vld [vmem:[#allocation5 + $0x2f0] sm:$0xff]  ;;  %v2180_v3 = vld [vmem:[#allocation5 + $0x328] sm:$0xff] }
 0x791   : > { %v2197_v5 = vld [vmem:[#allocation5 + $0x3b0] sm:$0xff] }
 0x792   : > { %10288 = vrcp.f32 %v1867_v22  ;;  %v11592_v22 = vpack.c.bf16 %v2173_v43, %v2169_v38  ;;  %v2202_v38 = vld [vmem:[#allocation5 + $0x3d8] sm:$0xff] }
 0x793   : > { %v2206_v43 = vld [vmem:[#allocation5 + $0x3f8] sm:$0xff] }
 0x799   : > { %v10285_v55 = vpop.eup %10284 }
 0x79a   : > { %v1876_v27 = vmul.f32 %v10285_v55, %v10281_v51  ;;  %v10287_v39 = vpop.eup %10286  ;;  %v2176_v51 = vld [vmem:[#allocation5 + $0x308] sm:$0xff]  ;;  %v2178_v55 = vld [vmem:[#allocation5 + $0x318] sm:$0xff] }
 0x79b   : > { %v1875_v21 = vmul.f32 %v10287_v39, %v11512_v4  ;;  %v11555_v4 = vpack.c.bf16 %v2149_v41, %v2145_v15  ;;  %v11590_v39 = vpack.c.bf16 %v2171_v16, %v2167_v24  ;;  %v11596_v44 = vpack.c.bf16 %v2180_v3, %v2176_v51  ;;  %v2181_v15 = vld [vmem:[#allocation5 + $0x330] sm:$0xff]  ;;  %v2184_v41 = vld [vmem:[#allocation5 + $0x348] sm:$0xff] }
 0x79c   : > { %v10289_v45 = vpop.eup %10288  ;;  %v11608_v25 = vpack.c.bf16 %v2188_v26, %v2184_v41  ;;  %v2200_v24 = vld [vmem:[#allocation5 + $0x3c8] sm:$0xff]  ;;  %v11626_v51 = vpack.c.bf16 %v2195_v32, %v2191_v50  ;;  %v11628_v3 = vpack.c.bf16 %v2197_v5, %v2193_v2 }
 0x79d   : > { %v11549_v34 = vadd.f32 %v1876_v27, %v1875_v21  ;;  %v2182_v27 = vld [vmem:[#allocation5 + $0x338] sm:$0xff]  ;;  %v2175_v21 = vld [vmem:[#allocation5 + $0x300] sm:$0xff]  ;;  %v2204_v16 = vld [vmem:[#allocation5 + $0x3e8] sm:$0xff] }
 0x79e   : > { %v11598_v17 = vpack.c.bf16 %v2182_v27, %v2178_v55  ;;  %v2199_v55 = vld [vmem:[#allocation5 + $0x3c0] sm:$0xff]  ;;  %v11632_v27 = vpack.c.bf16 %v2204_v16, %v2200_v24 }
 0x79f   : > { %10290 = vtanh.f32 %v11549_v34  ;;  %v2118_v24 = vld [vmem:[#allocation7 + $0x4] sm:$0xf] }
 0x7a9   : > { %v10291_v46 = vpop.eup %10290 }
 0x7aa   : > { %v1879_v47 = vmul.f32 %v10291_v46, %v10289_v45  ;;  %v2177_v45 = vld [vmem:[#allocation5 + $0x310] sm:$0xff]  ;;  %v2186_v46 = vld [vmem:[#allocation5 + $0x358] sm:$0xff] }
 0x7ab   : > { %v11604_v23 = vpack.c.bf16 %v2181_v15, %v2177_v45  ;;  %v2201_v45 = vld [vmem:[#allocation5 + $0x3d0] sm:$0xff] }
 0x7ac   : > { %7930 = vst [vmem:[%s11230_s23 + $0x30] sm:$0xff] %v1879_v47  ;;  %v1884_v37 = vadd.f32 %v7931_v36, %v1879_v47  ;;  %v2179_v36 = vld [vmem:[#allocation5 + $0x320] sm:$0xff]  ;;  %v2205_v15 = vld [vmem:[#allocation5 + $0x3f0] sm:$0xff] }
 0x7ad   : > { %v11602_v13 = vpack.c.bf16 %v2179_v36, %v2175_v21  ;;  %v2183_v47 = vld [vmem:[#allocation5 + $0x340] sm:$0xff]  ;;  %v11634_v21 = vpack.c.bf16 %v2206_v43, %v2202_v38  ;;  %v11640_v26 = vpack.c.bf16 %v2205_v15, %v2201_v45  ;;  %v11688_v43 = vrot.slane %v2118_v24, %v11200_v53 }
 0x7ae   : > { %2014 = vmatmul.mubr.f32.vlgmr.msra.gmra.mrb[14].mxu0 %v1884_v37  ;;  %2085 = vmatmul.mubr.f32.vlgmr.msra.gmra.mrb[14].mxu1 %v1884_v37  ;;  %v11610_v37 = vpack.c.bf16 %v2190_v11, %v2186_v46  ;;  %v11614_v63 = vpack.c.bf16 %v2187_v9, %v2183_v47  ;;  %v2203_v36 = vld [vmem:[#allocation5 + $0x3e0] sm:$0xff]  ;;  %v2140_v46 = vld [vmem:[%s11230_s23] sm:$0xff] }
 0x7af   : > { %8569 = vmatpush1.bf16.msra.mxu0 %v11553_v8  ;;  %8601 = vmatpush1.bf16.msra.mxu1 %v11555_v4  ;;  %v11638_v41 = vpack.c.bf16 %v2203_v36, %v2199_v55 }
 0x7b0   : > { %8571 = vmatprep.subr.bf16.mxu0 %v11558_v52  ;;  %8603 = vmatprep.subr.bf16.mxu1 %v11560_v62 }
 0x7b1   : > { %2271 = vmatprep.mubr.f32.mxu0 %v10860_v0  ;;  %2342 = vmatprep.mubr.f32.mxu1 %v10860_v0 }
 0x7b3   : > { %8573 = vmatpush1.bf16.msra.mxu0 %v11564_v49  ;;  %8605 = vmatpush1.bf16.msra.mxu1 %v11566_v61 }
 0x7b4   : > { %8575 = vmatprep.subr.bf16.mxu0 %v11570_v58  ;;  %8607 = vmatprep.subr.bf16.mxu1 %v11572_v28 }
 0x7b7   : > { %8577 = vmatpush1.bf16.msra.mxu0 %v11578_v7  ;;  %8609 = vmatpush1.bf16.msra.mxu1 %v11580_v10 }
 0x7b8   : > { %8579 = vmatprep.subr.bf16.mxu0 %v11584_v19  ;;  %8611 = vmatprep.subr.bf16.mxu1 %v11586_v29 }
 0x7bb   : > { %8581 = vmatpush1.bf16.msra.mxu0 %v11590_v39  ;;  %8613 = vmatpush1.bf16.msra.mxu1 %v11592_v22 }
 0x7bc   : > { %8583 = vmatprep.subr.bf16.mxu0 %v11596_v44  ;;  %8615 = vmatprep.subr.bf16.mxu1 %v11598_v17 }
 0x7bf   : > { %8585 = vmatpush1.bf16.msra.mxu0 %v11602_v13  ;;  %8617 = vmatpush1.bf16.msra.mxu1 %v11604_v23 }
 0x7c0   : > { %8587 = vmatprep.subr.bf16.mxu0 %v11608_v25  ;;  %8619 = vmatprep.subr.bf16.mxu1 %v11610_v37 }
 0x7c3   : > { %8589 = vmatpush1.bf16.msra.mxu0 %v11614_v63  ;;  %8621 = vmatpush1.bf16.msra.mxu1 %v11616_v30 }
 0x7c4   : > { %8591 = vmatprep.subr.bf16.mxu0 %v11620_v40  ;;  %8623 = vmatprep.subr.bf16.mxu1 %v11622_v54 }
 0x7c7   : > { %8593 = vmatpush1.bf16.msra.mxu0 %v11626_v51  ;;  %8625 = vmatpush1.bf16.msra.mxu1 %v11628_v3 }
 0x7c8   : > { %8595 = vmatprep.subr.bf16.mxu0 %v11632_v27  ;;  %8627 = vmatprep.subr.bf16.mxu1 %v11634_v21 }
 0x7cb   : > { %8597 = vmatpush1.bf16.msra.mxu0 %v11638_v41  ;;  %8629 = vmatpush1.bf16.msra.mxu1 %v11640_v26 }
 0x7cc   : > { %8631 = vmatprep.subr.bf16.mxu0 %v11541_v18  ;;  %8663 = vmatprep.subr.bf16.mxu1 %v11538_v42 }
 0x7ce   : > { %2272 = vmatmul.mubr.f32.vlgmr.msra.gmra.mrb[16].mxu0 %v2140_v46  ;;  %2343 = vmatmul.mubr.f32.vlgmr.msra.gmra.mrb[16].mxu1 %v2140_v46 }
 0x7cf   : > { %8633 = vmatpush1.bf16.msra.mxu0 %v11553_v8  ;;  %8665 = vmatpush1.bf16.msra.mxu1 %v11555_v4 }
 0x7d0   : > { %8635 = vmatprep.subr.bf16.mxu0 %v11558_v52  ;;  %8667 = vmatprep.subr.bf16.mxu1 %v11560_v62 }
 0x7d1   : > { %2504 = vmatprep.mubr.f32.mxu0 %v10860_v0  ;;  %2575 = vmatprep.mubr.f32.mxu1 %v10860_v0 }
 0x7d3   : > { %8637 = vmatpush1.bf16.msra.mxu0 %v11564_v49  ;;  %8669 = vmatpush1.bf16.msra.mxu1 %v11566_v61 }
 0x7d4   : > { %8639 = vmatprep.subr.bf16.mxu0 %v11570_v58  ;;  %8671 = vmatprep.subr.bf16.mxu1 %v11572_v28 }
 0x7d7   : > { %8641 = vmatpush1.bf16.msra.mxu0 %v11578_v7  ;;  %8673 = vmatpush1.bf16.msra.mxu1 %v11580_v10 }
 0x7d8   : > { %8643 = vmatprep.subr.bf16.mxu0 %v11584_v19  ;;  %8675 = vmatprep.subr.bf16.mxu1 %v11586_v29 }
 0x7db   : > { %8645 = vmatpush1.bf16.msra.mxu0 %v11590_v39  ;;  %8677 = vmatpush1.bf16.msra.mxu1 %v11592_v22 }
 0x7dc   : > { %8647 = vmatprep.subr.bf16.mxu0 %v11596_v44  ;;  %8679 = vmatprep.subr.bf16.mxu1 %v11598_v17 }
 0x7df   : > { %8649 = vmatpush1.bf16.msra.mxu0 %v11602_v13  ;;  %8681 = vmatpush1.bf16.msra.mxu1 %v11604_v23 }
 0x7e0   : > { %8651 = vmatprep.subr.bf16.mxu0 %v11608_v25  ;;  %8683 = vmatprep.subr.bf16.mxu1 %v11610_v37 }
 0x7e3   : > { %8653 = vmatpush1.bf16.msra.mxu0 %v11614_v63  ;;  %8685 = vmatpush1.bf16.msra.mxu1 %v11616_v30 }
 0x7e4   : > { %8655 = vmatprep.subr.bf16.mxu0 %v11620_v40  ;;  %8687 = vmatprep.subr.bf16.mxu1 %v11622_v54 }
 0x7e7   : > { %8657 = vmatpush1.bf16.msra.mxu0 %v11626_v51  ;;  %8689 = vmatpush1.bf16.msra.mxu1 %v11628_v3 }
 0x7e8   : > { %8659 = vmatprep.subr.bf16.mxu0 %v11632_v27  ;;  %8691 = vmatprep.subr.bf16.mxu1 %v11634_v21 }
 0x7eb   : > { %8661 = vmatpush1.bf16.msra.mxu0 %v11638_v41  ;;  %8693 = vmatpush1.bf16.msra.mxu1 %v11640_v26 }
 0x7ec   : > { %8695 = vmatprep.subr.bf16.mxu0 %v11541_v18  ;;  %8727 = vmatprep.subr.bf16.mxu1 %v11538_v42 }
 0x881   : > { %v2015_v11 = vpop.f32.mrb[14].mxu0  ;;  %v2086_v47 = vpop.f32.mrb[14].mxu1 }
 0x882   : > { %v2016_v9 = vadd.f32 %v2015_v11, %v11205_v57  ;;  %v2017_v35 = vpop.f32.mrb[15].mxu0  ;;  %v2088_v14 = vpop.f32.mrb[15].mxu1  ;;  %v2087_v31 = vadd.f32 %v2086_v47, %v11215_v6 }
 0x883   : > { %v2018_v33 = vadd.f32 %v2017_v35, %v11208_v59  ;;  %v2089_v50 = vadd.f32 %v2088_v14, %v11221_v20  ;;  %v11691_v20 = vrot.slane %v2118_v24, %v11202_v56 }
 0x884   : > { %v7932_v48 = vmul.f32 -1.442695, %v2016_v9  ;;  %v7934_v32 = vmul.f32 -1.442695, %v2087_v31 }
 0x885   : > { %v7933_v1 = vmul.f32 -1.442695, %v2018_v33 }
 0x886   : > { %10292 = vpow2.f32 %v7932_v48  ;;  %v11697_v48 = vrot.slane %v2118_v24, %v11210_v60 }
 0x887   : > { %10294 = vpow2.f32 %v7933_v1 }
 0x888   : > { %10296 = vtanh.f32 %v2089_v50 }
 0x889   : > { %10298 = vpow2.f32 %v7934_v32 }
 0x890   : > { %v10293_v18 = vpop.eup %10292 }
 0x891   : > { %v2100_v2 = vadd.f32 1.0, %v10293_v18  ;;  %v10295_v42 = vpop.eup %10294 }
 0x892   : > { %v2101_v57 = vadd.f32 1.0, %v10295_v42  ;;  %v10297_v5 = vpop.eup %10296 }
 0x893   : > { %10300 = vrcp.f32 %v2100_v2  ;;  %v10299_v59 = vpop.eup %10298 }
 0x894   : > { %10302 = vrcp.f32 %v2101_v57  ;;  %v2102_v55 = vadd.f32 1.0, %v10299_v59 }
 0x896   : > { %10304 = vrcp.f32 %v2102_v55 }
 0x89d   : > { %v10301_v16 = vpop.eup %10300 }
 0x89e   : > { %v2111_v38 = vmul.f32 %v10301_v16, %v10297_v5  ;;  %v10303_v6 = vpop.eup %10302 }
 0x89f   : > { %v2110_v36 = vmul.f32 %v10303_v6, %v11549_v34  ;;  %v11700_v34 = vrot.slane %v2118_v24, %v11217_v12 }
 0x8a0   : > { %v10305_v31 = vpop.eup %10304 }
 0x8a1   : > { %v2273_v45 = vpop.f32.mrb[16].mxu0  ;;  %v2344_v15 = vpop.f32.mrb[16].mxu1  ;;  %v2112_v46 = vadd.f32 %v2111_v38, %v2110_v36 }
 0x8a2   : > { %v2274_v11 = vadd.f32 %v2273_v45, %v11688_v43  ;;  %v2275_v47 = vpop.f32.mrb[17].mxu0  ;;  %v2346_v9 = vpop.f32.mrb[17].mxu1  ;;  %v2345_v1 = vadd.f32 %v2344_v15, %v11697_v48 }
 0x8a3   : > { %v2276_v35 = vadd.f32 %v2275_v47, %v11691_v20  ;;  %10306 = vtanh.f32 %v2112_v46  ;;  %v2347_v50 = vadd.f32 %v2346_v9, %v11700_v34  ;;  %v7939_v9 = vld [vmem:[%s11230_s23 + $0x8] sm:$0xff] }
 0x8a4   : > { %v7936_v14 = vmul.f32 -1.442695, %v2274_v11  ;;  %v7938_v18 = vmul.f32 -1.442695, %v2345_v1 }
 0x8a5   : > { %v7937_v33 = vmul.f32 -1.442695, %v2276_v35 }
 0x8a6   : > { %10308 = vpow2.f32 %v7936_v14 }
 0x8a7   : > { %10310 = vpow2.f32 %v7937_v33 }
 0x8a8   : > { %10312 = vtanh.f32 %v2347_v50 }
 0x8a9   : > { %10314 = vpow2.f32 %v7938_v18 }
 0x8ad   : > { %v10307_v32 = vpop.eup %10306 }
 0x8ae   : > { %v2114_v2 = vmul.f32 %v10307_v32, %v10305_v31 }
 0x8b0   : > { %v10309_v42 = vpop.eup %10308  ;;  %7935 = vst [vmem:[%s11230_s23 + $0x38] sm:$0xff] %v2114_v2 }
 0x8b1   : > { %v2358_v57 = vadd.f32 1.0, %v10309_v42  ;;  %v10311_v5 = vpop.eup %10310 }
 0x8b2   : > { %v2359_v59 = vadd.f32 1.0, %v10311_v5  ;;  %v10313_v24 = vpop.eup %10312 }
 0x8b3   : > { %10316 = vrcp.f32 %v2358_v57  ;;  %v10315_v16 = vpop.eup %10314 }
 0x8b4   : > { %10318 = vrcp.f32 %v2359_v59  ;;  %v2360_v36 = vadd.f32 1.0, %v10315_v16 }
 0x8b6   : > { %10320 = vrcp.f32 %v2360_v36 }
 0x8bd   : > { %v10317_v38 = vpop.eup %10316 }
 0x8be   : > { %v2369_v6 = vmul.f32 %v10317_v38, %v10313_v24  ;;  %v10319_v55 = vpop.eup %10318 }
 0x8bf   : > { %v2368_v45 = vmul.f32 0.0, %v10319_v55 }
 0x8c0   : > { %v10321_v46 = vpop.eup %10320 }
 0x8c1   : > { %v11705_v15 = vadd.f32 %v2369_v6, %v2368_v45 }
 0x8c3   : > { %10322 = vtanh.f32 %v11705_v15 }
 0x8cd   : > { %v10323_v11 = vpop.eup %10322 }
 0x8ce   : > { %v2372_v47 = vmul.f32 %v10323_v11, %v10321_v46 }
 0x8d0   : > { %2373 = vst [vmem:[%s11230_s23] sm:$0xff] %v2372_v47  ;;  %v2375_v35 = vadd.f32 %v7939_v9, %v2372_v47 }
 0x8d2   : > { %2505 = vmatmul.mubr.f32.vlgmr.msra.gmra.mrb[18].mxu0 %v2375_v35  ;;  %2576 = vmatmul.mubr.f32.vlgmr.msra.gmra.mrb[18].mxu1 %v2375_v35 }
 0x8d3   : > { %8697 = vmatpush1.bf16.msra.mxu0 %v11553_v8  ;;  %8729 = vmatpush1.bf16.msra.mxu1 %v11555_v4 }
 0x8d4   : > { %8699 = vmatprep.subr.bf16.mxu0 %v11558_v52  ;;  %8731 = vmatprep.subr.bf16.mxu1 %v11560_v62 }
 0x8d5   : > { %2737 = vmatprep.mubr.f32.mxu0 %v10860_v0  ;;  %2808 = vmatprep.mubr.f32.mxu1 %v10860_v0 }
 0x8d7   : > { %8701 = vmatpush1.bf16.msra.mxu0 %v11564_v49  ;;  %8733 = vmatpush1.bf16.msra.mxu1 %v11566_v61 }
 0x8d8   : > { %8703 = vmatprep.subr.bf16.mxu0 %v11570_v58  ;;  %8735 = vmatprep.subr.bf16.mxu1 %v11572_v28 }
 0x8db   : > { %8705 = vmatpush1.bf16.msra.mxu0 %v11578_v7  ;;  %8737 = vmatpush1.bf16.msra.mxu1 %v11580_v10 }
 0x8dc   : > { %8707 = vmatprep.subr.bf16.mxu0 %v11584_v19  ;;  %8739 = vmatprep.subr.bf16.mxu1 %v11586_v29 }
 0x8df   : > { %8709 = vmatpush1.bf16.msra.mxu0 %v11590_v39  ;;  %8741 = vmatpush1.bf16.msra.mxu1 %v11592_v22 }
 0x8e0   : > { %8711 = vmatprep.subr.bf16.mxu0 %v11596_v44  ;;  %8743 = vmatprep.subr.bf16.mxu1 %v11598_v17 }
 0x8e3   : > { %8713 = vmatpush1.bf16.msra.mxu0 %v11602_v13  ;;  %8745 = vmatpush1.bf16.msra.mxu1 %v11604_v23 }
 0x8e4   : > { %8715 = vmatprep.subr.bf16.mxu0 %v11608_v25  ;;  %8747 = vmatprep.subr.bf16.mxu1 %v11610_v37 }
 0x8e7   : > { %8717 = vmatpush1.bf16.msra.mxu0 %v11614_v63  ;;  %8749 = vmatpush1.bf16.msra.mxu1 %v11616_v30 }
 0x8e8   : > { %8719 = vmatprep.subr.bf16.mxu0 %v11620_v40  ;;  %8751 = vmatprep.subr.bf16.mxu1 %v11622_v54 }
 0x8eb   : > { %8721 = vmatpush1.bf16.msra.mxu0 %v11626_v51  ;;  %8753 = vmatpush1.bf16.msra.mxu1 %v11628_v3 }
 0x8ec   : > { %8723 = vmatprep.subr.bf16.mxu0 %v11632_v27  ;;  %8755 = vmatprep.subr.bf16.mxu1 %v11634_v21 }
 0x8ef   : > { %8725 = vmatpush1.bf16.msra.mxu0 %v11638_v41  ;;  %8757 = vmatpush1.bf16.msra.mxu1 %v11640_v26 }
 0x9a5   : > { %v2506_v14 = vpop.f32.mrb[18].mxu0  ;;  %v2577_v33 = vpop.f32.mrb[18].mxu1 }
 0x9a6   : > { %v2507_v1 = vadd.f32 %v2506_v14, %v11688_v43  ;;  %v2508_v31 = vpop.f32.mrb[19].mxu0  ;;  %v2579_v50 = vpop.f32.mrb[19].mxu1  ;;  %v2578_v42 = vadd.f32 %v2577_v33, %v11697_v48 }
 0x9a7   : > { %v2509_v32 = vadd.f32 %v2508_v31, %v11691_v20  ;;  %v2580_v57 = vadd.f32 %v2579_v50, %v11700_v34  ;;  %v2843_v50 = vld [vmem:[#allocation5 + $0x208] sm:$0xff] }
 0x9a8   : > { %v7940_v18 = vmul.f32 -1.442695, %v2507_v1  ;;  %v7942_v5 = vmul.f32 -1.442695, %v2578_v42  ;;  %v7944_v1 = vld [vmem:[%s11230_s23 + $0x10] sm:$0xff] }
 0x9a9   : > { %v7941_v2 = vmul.f32 -1.442695, %v2509_v32  ;;  %v2847_v32 = vld [vmem:[#allocation5 + $0x228] sm:$0xff] }
 0x9aa   : > { %10324 = vpow2.f32 %v7940_v18  ;;  %v11754_v18 = vpack.c.bf16 %v2847_v32, %v2843_v50  ;;  %v3098_v32 = vld [vmem:[#allocation5 + $0x2b8] sm:$0xff] }
 0x9ab   : > { %10326 = vpow2.f32 %v7941_v2  ;;  %v2849_v2 = vld [vmem:[#allocation5 + $0x238] sm:$0xff] }
 0x9ac   : > { %10328 = vtanh.f32 %v2580_v57  ;;  %8759 = vmatprep.subr.bf16.mxu0 %v11754_v18  ;;  %v3077_v57 = vld [vmem:[#allocation5 + $0x210] sm:$0xff] }
 0x9ad   : > { %10330 = vpow2.f32 %v7942_v5 }
 0x9b4   : > { %v10325_v59 = vpop.eup %10324 }
 0x9b5   : > { %v2591_v24 = vadd.f32 1.0, %v10325_v59  ;;  %v10327_v16 = vpop.eup %10326  ;;  %v3081_v59 = vld [vmem:[#allocation5 + $0x230] sm:$0xff] }
 0x9b6   : > { %v2592_v38 = vadd.f32 1.0, %v10327_v16  ;;  %v10329_v6 = vpop.eup %10328  ;;  %v3084_v16 = vld [vmem:[#allocation5 + $0x248] sm:$0xff] }
 0x9b7   : > { %10332 = vrcp.f32 %v2591_v24  ;;  %v10331_v55 = vpop.eup %10330  ;;  %v11806_v24 = vpack.c.bf16 %v3081_v59, %v3077_v57  ;;  %v3116_v57 = vld [vmem:[#allocation5 + $0x348] sm:$0xff] }
 0x9b8   : > { %10334 = vrcp.f32 %v2592_v38  ;;  %v2593_v11 = vadd.f32 1.0, %v10331_v55  ;;  %v3088_v38 = vld [vmem:[#allocation5 + $0x268] sm:$0xff] }
 0x9b9   : > { %v11810_v55 = vpack.c.bf16 %v3088_v38, %v3084_v16  ;;  %v3120_v59 = vld [vmem:[#allocation5 + $0x368] sm:$0xff]  ;;  %v3118_v16 = vld [vmem:[#allocation5 + $0x358] sm:$0xff] }
 0x9ba   : > { %10336 = vrcp.f32 %v2593_v11  ;;  %v11858_v38 = vpack.c.bf16 %v3120_v59, %v3116_v57 }
 0x9c1   : > { %v10333_v36 = vpop.eup %10332 }
 0x9c2   : > { %v2602_v45 = vmul.f32 %v10333_v36, %v10329_v6  ;;  %v10335_v46 = vpop.eup %10334  ;;  %v3086_v6 = vld [vmem:[#allocation5 + $0x258] sm:$0xff] }
 0x9c3   : > { %v2601_v47 = vmul.f32 %v10335_v46, %v11705_v15  ;;  %v2845_v15 = vld [vmem:[#allocation5 + $0x218] sm:$0xff]  ;;  %v3087_v46 = vld [vmem:[#allocation5 + $0x260] sm:$0xff] }
 0x9c4   : > { %v10337_v35 = vpop.eup %10336  ;;  %v11756_v42 = vpack.c.bf16 %v2849_v2, %v2845_v15  ;;  %v3090_v36 = vld [vmem:[#allocation5 + $0x278] sm:$0xff]  ;;  %v3091_v15 = vld [vmem:[#allocation5 + $0x280] sm:$0xff] }
 0x9c5   : > { %v11747_v9 = vadd.f32 %v2602_v45, %v2601_v47  ;;  %v3083_v45 = vld [vmem:[#allocation5 + $0x240] sm:$0xff]  ;;  %v11812_v11 = vpack.c.bf16 %v3090_v36, %v3086_v6  ;;  %v3122_v6 = vld [vmem:[#allocation5 + $0x378] sm:$0xff] }
 0x9c6   : > { %8791 = vmatprep.subr.bf16.mxu1 %v11756_v42  ;;  %v11814_v47 = vpack.c.bf16 %v3087_v46, %v3083_v45  ;;  %v3095_v2 = vld [vmem:[#allocation5 + $0x2a0] sm:$0xff]  ;;  %v11860_v46 = vpack.c.bf16 %v3122_v6, %v3118_v16 }
 0x9c7   : > { %10338 = vtanh.f32 %v11747_v9  ;;  %v3115_v36 = vld [vmem:[#allocation5 + $0x340] sm:$0xff] }
 0x9c8   : > { %v3119_v45 = vld [vmem:[#allocation5 + $0x360] sm:$0xff] }
 0x9d1   : > { %v10339_v14 = vpop.eup %10338 }
 0x9d2   : > { %v2605_v33 = vmul.f32 %v10339_v14, %v10337_v35  ;;  %v3089_v35 = vld [vmem:[#allocation5 + $0x270] sm:$0xff] }
 0x9d4   : > { %7943 = vst [vmem:[%s11230_s23 + $0x8] sm:$0xff] %v2605_v33  ;;  %v2608_v31 = vadd.f32 %v7944_v1, %v2605_v33  ;;  %v3092_v33 = vld [vmem:[#allocation5 + $0x288] sm:$0xff] }
 0x9d5   : > { %v3096_v1 = vld [vmem:[#allocation5 + $0x2a8] sm:$0xff] }
 0x9d6   : > { %2738 = vmatmul.mubr.f32.vlgmr.msra.gmra.mrb[20].mxu0 %v2608_v31  ;;  %2809 = vmatmul.mubr.f32.vlgmr.msra.gmra.mrb[20].mxu1 %v2608_v31  ;;  %v3094_v31 = vld [vmem:[#allocation5 + $0x298] sm:$0xff]  ;;  %v11822_v50 = vpack.c.bf16 %v3096_v1, %v3092_v33  ;;  %v3121_v33 = vld [vmem:[#allocation5 + $0x370] sm:$0xff]  ;;  %v3124_v1 = vld [vmem:[#allocation5 + $0x388] sm:$0xff] }
 0x9d7   : > { %2970 = vmatprep.mubr.f32.mxu0 %v10860_v0  ;;  %3041 = vmatprep.mubr.f32.mxu1 %v10860_v0 }
 0x9d8   : > { %8761 = vmatpush1.bf16.msra.mxu0 %v11553_v8  ;;  %8793 = vmatpush1.bf16.msra.mxu1 %v11555_v4 }
 0x9d9   : > { %8763 = vmatprep.subr.bf16.mxu0 %v11558_v52  ;;  %8795 = vmatprep.subr.bf16.mxu1 %v11560_v62 }
 0x9dc   : > { %8765 = vmatpush1.bf16.msra.mxu0 %v11564_v49  ;;  %8797 = vmatpush1.bf16.msra.mxu1 %v11566_v61 }
 0x9dd   : > { %8767 = vmatprep.subr.bf16.mxu0 %v11570_v58  ;;  %8799 = vmatprep.subr.bf16.mxu1 %v11572_v28 }
 0x9e0   : > { %8769 = vmatpush1.bf16.msra.mxu0 %v11578_v7  ;;  %8801 = vmatpush1.bf16.msra.mxu1 %v11580_v10 }
 0x9e1   : > { %8771 = vmatprep.subr.bf16.mxu0 %v11584_v19  ;;  %8803 = vmatprep.subr.bf16.mxu1 %v11586_v29 }
 0x9e4   : > { %8773 = vmatpush1.bf16.msra.mxu0 %v11590_v39  ;;  %8805 = vmatpush1.bf16.msra.mxu1 %v11592_v22 }
 0x9e5   : > { %8775 = vmatprep.subr.bf16.mxu0 %v11596_v44  ;;  %8807 = vmatprep.subr.bf16.mxu1 %v11598_v17 }
 0x9e8   : > { %8777 = vmatpush1.bf16.msra.mxu0 %v11602_v13  ;;  %8809 = vmatpush1.bf16.msra.mxu1 %v11604_v23 }
 0x9e9   : > { %8779 = vmatprep.subr.bf16.mxu0 %v11608_v25  ;;  %8811 = vmatprep.subr.bf16.mxu1 %v11610_v37 }
 0x9ec   : > { %8781 = vmatpush1.bf16.msra.mxu0 %v11614_v63  ;;  %8813 = vmatpush1.bf16.msra.mxu1 %v11616_v30 }
 0x9ed   : > { %8783 = vmatprep.subr.bf16.mxu0 %v11620_v40  ;;  %8815 = vmatprep.subr.bf16.mxu1 %v11622_v54 }
 0x9f0   : > { %8785 = vmatpush1.bf16.msra.mxu0 %v11626_v51  ;;  %8817 = vmatpush1.bf16.msra.mxu1 %v11628_v3 }
 0x9f1   : > { %8787 = vmatprep.subr.bf16.mxu0 %v11632_v27  ;;  %8819 = vmatprep.subr.bf16.mxu1 %v11634_v21  ;;  %v7949_v27 = vld [vmem:[%s11230_s23 + $0x18] sm:$0xff] }
 0x9f4   : > { %8789 = vmatpush1.bf16.msra.mxu0 %v11638_v41  ;;  %8821 = vmatpush1.bf16.msra.mxu1 %v11640_v26  ;;  %v3075_v41 = vld [vmem:[#allocation5 + $0x200] sm:$0xff] }
 0x9f5   : > { %8823 = vmatprep.subr.bf16.mxu0 %v11754_v18  ;;  %8855 = vmatprep.subr.bf16.mxu1 %v11756_v42  ;;  %v3079_v26 = vld [vmem:[#allocation5 + $0x220] sm:$0xff] }
 0x9f6   : > { %v11804_v5 = vpack.c.bf16 %v3079_v26, %v3075_v41  ;;  %v3113_v41 = vld [vmem:[#allocation5 + $0x330] sm:$0xff] }
 0xaa9   : > { %v2739_v8 = vpop.f32.mrb[20].mxu0  ;;  %v2810_v4 = vpop.f32.mrb[20].mxu1 }
 0xaaa   : > { %v2740_v52 = vadd.f32 %v2739_v8, %v11688_v43  ;;  %v2741_v62 = vpop.f32.mrb[21].mxu0  ;;  %v2812_v49 = vpop.f32.mrb[21].mxu1  ;;  %v2811_v7 = vadd.f32 %v2810_v4, %v11697_v48  ;;  %v11824_v8 = vpack.c.bf16 %v3098_v32, %v3094_v31  ;;  %v11826_v4 = vpack.c.bf16 %v3095_v2, %v3091_v15  ;;  %v3128_v32 = vld [vmem:[#allocation5 + $0x3a8] sm:$0xff]  ;;  %v3126_v15 = vld [vmem:[#allocation5 + $0x398] sm:$0xff] }
 0xaab   : > { %v2742_v61 = vadd.f32 %v2741_v62, %v11691_v20  ;;  %v2813_v10 = vadd.f32 %v2812_v49, %v11700_v34  ;;  %v3097_v62 = vld [vmem:[#allocation5 + $0x2b0] sm:$0xff]  ;;  %v3130_v2 = vld [vmem:[#allocation5 + $0x3b8] sm:$0xff] }
 0xaac   : > { %v7945_v58 = vmul.f32 -1.442695, %v2740_v52  ;;  %v7947_v19 = vmul.f32 -1.442695, %v2811_v7  ;;  %v3093_v52 = vld [vmem:[#allocation5 + $0x290] sm:$0xff] }
 0xaad   : > { %v7946_v28 = vmul.f32 -1.442695, %v2742_v61  ;;  %v11829_v49 = vpack.c.bf16 %v3097_v62, %v3093_v52  ;;  %v3100_v61 = vld [vmem:[#allocation5 + $0x2c8] sm:$0xff]  ;;  %v11869_v52 = vpack.c.bf16 %v3128_v32, %v3124_v1  ;;  %v11871_v62 = vpack.c.bf16 %v3130_v2, %v3126_v15 }
 0xaae   : > { %10340 = vpow2.f32 %v7945_v58  ;;  %v3104_v58 = vld [vmem:[#allocation5 + $0x2e8] sm:$0xff] }
 0xaaf   : > { %10342 = vpow2.f32 %v7946_v28  ;;  %v3102_v28 = vld [vmem:[#allocation5 + $0x2d8] sm:$0xff]  ;;  %v11834_v7 = vpack.c.bf16 %v3104_v58, %v3100_v61  ;;  %v3123_v61 = vld [vmem:[#allocation5 + $0x380] sm:$0xff] }
 0xab0   : > { %10344 = vtanh.f32 %v2813_v10  ;;  %v3106_v10 = vld [vmem:[#allocation5 + $0x2f8] sm:$0xff]  ;;  %v3127_v58 = vld [vmem:[#allocation5 + $0x3a0] sm:$0xff] }
 0xab1   : > { %10346 = vpow2.f32 %v7947_v19  ;;  %v3099_v19 = vld [vmem:[#allocation5 + $0x2c0] sm:$0xff] }
 0xab8   : > { %v10341_v29 = vpop.eup %10340 }
 0xab9   : > { %v2824_v39 = vadd.f32 1.0, %v10341_v29  ;;  %v10343_v22 = vpop.eup %10342  ;;  %v3103_v29 = vld [vmem:[#allocation5 + $0x2e0] sm:$0xff] }
 0xaba   : > { %v2825_v44 = vadd.f32 1.0, %v10343_v22  ;;  %v10345_v17 = vpop.eup %10344  ;;  %v11838_v22 = vpack.c.bf16 %v3103_v29, %v3099_v19  ;;  %v3129_v19 = vld [vmem:[#allocation5 + $0x3b0] sm:$0xff]  ;;  %v3132_v29 = vld [vmem:[#allocation5 + $0x3c8] sm:$0xff] }
 0xabb   : > { %10348 = vrcp.f32 %v2824_v39  ;;  %v10347_v13 = vpop.eup %10346  ;;  %v11836_v39 = vpack.c.bf16 %v3106_v10, %v3102_v28  ;;  %v3125_v28 = vld [vmem:[#allocation5 + $0x390] sm:$0xff]  ;;  %v11874_v10 = vpack.c.bf16 %v3127_v58, %v3123_v61 }
 0xabc   : > { %10350 = vrcp.f32 %v2825_v44  ;;  %v2826_v63 = vadd.f32 1.0, %v10347_v13  ;;  %v3101_v44 = vld [vmem:[#allocation5 + $0x2d0] sm:$0xff] }
 0xabe   : > { %10352 = vrcp.f32 %v2826_v63 }
 0xac5   : > { %v10349_v23 = vpop.eup %10348 }
 0xac6   : > { %v2835_v25 = vmul.f32 %v10349_v23, %v10345_v17  ;;  %v10351_v37 = vpop.eup %10350  ;;  %v3105_v17 = vld [vmem:[#allocation5 + $0x2f0] sm:$0xff]  ;;  %v3108_v23 = vld [vmem:[#allocation5 + $0x308] sm:$0xff] }
 0xac7   : > { %v2834_v30 = vmul.f32 %v10351_v37, %v11747_v9  ;;  %v3085_v9 = vld [vmem:[#allocation5 + $0x250] sm:$0xff]  ;;  %v11841_v13 = vpack.c.bf16 %v3105_v17, %v3101_v44  ;;  %v3110_v37 = vld [vmem:[#allocation5 + $0x318] sm:$0xff]  ;;  %v3136_v44 = vld [vmem:[#allocation5 + $0x3e8] sm:$0xff]  ;;  %v11878_v17 = vpack.c.bf16 %v3129_v19, %v3125_v28 }
 0xac8   : > { %v10353_v54 = vpop.eup %10352  ;;  %v11817_v14 = vpack.c.bf16 %v3089_v35, %v3085_v9  ;;  %v11862_v9 = vpack.c.bf16 %v3119_v45, %v3115_v36  ;;  %v3117_v35 = vld [vmem:[#allocation5 + $0x350] sm:$0xff] }
 0xac9   : > { %v11797_v40 = vadd.f32 %v2835_v25, %v2834_v30  ;;  %v3112_v25 = vld [vmem:[#allocation5 + $0x328] sm:$0xff]  ;;  %v3114_v30 = vld [vmem:[#allocation5 + $0x338] sm:$0xff]  ;;  %v11865_v31 = vpack.c.bf16 %v3121_v33, %v3117_v35 }
 0xaca   : > { %v11846_v63 = vpack.c.bf16 %v3112_v25, %v3108_v23  ;;  %v11880_v23 = vpack.c.bf16 %v3136_v44, %v3132_v29  ;;  %v3134_v25 = vld [vmem:[#allocation5 + $0x3d8] sm:$0xff] }
 0xacb   : > { %10354 = vtanh.f32 %v11797_v40 }
 0xad5   : > { %v10355_v51 = vpop.eup %10354 }
 0xad6   : > { %v2838_v3 = vmul.f32 %v10355_v51, %v10353_v54  ;;  %v3107_v54 = vld [vmem:[#allocation5 + $0x300] sm:$0xff] }
 0xad7   : > { %v3111_v51 = vld [vmem:[#allocation5 + $0x320] sm:$0xff] }
 0xad8   : > { %7948 = vst [vmem:[%s11230_s23 + $0x10] sm:$0xff] %v2838_v3  ;;  %v2841_v21 = vadd.f32 %v7949_v27, %v2838_v3  ;;  %v11848_v3 = vpack.c.bf16 %v3114_v30, %v3110_v37  ;;  %v11850_v27 = vpack.c.bf16 %v3111_v51, %v3107_v54  ;;  %v3138_v37 = vld [vmem:[#allocation5 + $0x3f8] sm:$0xff]  ;;  %v3131_v30 = vld [vmem:[#allocation5 + $0x3c0] sm:$0xff] }
 0xad9   : > { %v11882_v54 = vpack.c.bf16 %v3138_v37, %v3134_v25  ;;  %v3135_v51 = vld [vmem:[#allocation5 + $0x3e0] sm:$0xff] }
 0xada   : > { %2971 = vmatmul.mubr.f32.vlgmr.msra.gmra.mrb[22].mxu0 %v2841_v21  ;;  %3042 = vmatmul.mubr.f32.vlgmr.msra.gmra.mrb[22].mxu1 %v2841_v21  ;;  %v3109_v21 = vld [vmem:[#allocation5 + $0x310] sm:$0xff]  ;;  %v11885_v57 = vpack.c.bf16 %v3135_v51, %v3131_v30 }
 0xadb   : > { %3203 = vmatprep.mubr.f32.mxu0 %v10860_v0  ;;  %3274 = vmatprep.mubr.f32.mxu1 %v10860_v0  ;;  %v11853_v26 = vpack.c.bf16 %v3113_v41, %v3109_v21  ;;  %v3133_v21 = vld [vmem:[#allocation5 + $0x3d0] sm:$0xff] }
 0xadc   : > { %8825 = vmatpush1.bf16.msra.mxu0 %v11804_v5  ;;  %8857 = vmatpush1.bf16.msra.mxu1 %v11806_v24  ;;  %v3137_v41 = vld [vmem:[#allocation5 + $0x3f0] sm:$0xff] }
 0xadd   : > { %8827 = vmatprep.subr.bf16.mxu0 %v11810_v55  ;;  %8859 = vmatprep.subr.bf16.mxu1 %v11812_v11  ;;  %v11889_v59 = vpack.c.bf16 %v3137_v41, %v3133_v21 }
 0xae0   : > { %8829 = vmatpush1.bf16.msra.mxu0 %v11814_v47  ;;  %8861 = vmatpush1.bf16.msra.mxu1 %v11817_v14 }
 0xae1   : > { %8831 = vmatprep.subr.bf16.mxu0 %v11822_v50  ;;  %8863 = vmatprep.subr.bf16.mxu1 %v11824_v8 }
 0xae4   : > { %8833 = vmatpush1.bf16.msra.mxu0 %v11826_v4  ;;  %8865 = vmatpush1.bf16.msra.mxu1 %v11829_v49 }
 0xae5   : > { %8835 = vmatprep.subr.bf16.mxu0 %v11834_v7  ;;  %8867 = vmatprep.subr.bf16.mxu1 %v11836_v39 }
 0xae8   : > { %8837 = vmatpush1.bf16.msra.mxu0 %v11838_v22  ;;  %8869 = vmatpush1.bf16.msra.mxu1 %v11841_v13 }
 0xae9   : > { %8839 = vmatprep.subr.bf16.mxu0 %v11846_v63  ;;  %8871 = vmatprep.subr.bf16.mxu1 %v11848_v3 }
 0xaec   : > { %8841 = vmatpush1.bf16.msra.mxu0 %v11850_v27  ;;  %8873 = vmatpush1.bf16.msra.mxu1 %v11853_v26 }
 0xaed   : > { %8843 = vmatprep.subr.bf16.mxu0 %v11858_v38  ;;  %8875 = vmatprep.subr.bf16.mxu1 %v11860_v46 }
 0xaf0   : > { %8845 = vmatpush1.bf16.msra.mxu0 %v11862_v9  ;;  %8877 = vmatpush1.bf16.msra.mxu1 %v11865_v31 }
 0xaf1   : > { %8847 = vmatprep.subr.bf16.mxu0 %v11869_v52  ;;  %8879 = vmatprep.subr.bf16.mxu1 %v11871_v62 }
 0xaf4   : > { %8849 = vmatpush1.bf16.msra.mxu0 %v11874_v10  ;;  %8881 = vmatpush1.bf16.msra.mxu1 %v11878_v17 }
 0xaf5   : > { %8851 = vmatprep.subr.bf16.mxu0 %v11880_v23  ;;  %8883 = vmatprep.subr.bf16.mxu1 %v11882_v54 }
 0xaf8   : > { %8853 = vmatpush1.bf16.msra.mxu0 %v11885_v57  ;;  %8885 = vmatpush1.bf16.msra.mxu1 %v11889_v59 }
 0xaf9   : > { %8887 = vmatprep.subr.bf16.mxu0 %v11754_v18  ;;  %8919 = vmatprep.subr.bf16.mxu1 %v11756_v42 }
 0xbad   : > { %v2972_v16 = vpop.f32.mrb[22].mxu0  ;;  %v3043_v6 = vpop.f32.mrb[22].mxu1 }
 0xbae   : > { %v2973_v36 = vadd.f32 %v2972_v16, %v11688_v43  ;;  %v2974_v45 = vpop.f32.mrb[23].mxu0  ;;  %v3045_v35 = vpop.f32.mrb[23].mxu1  ;;  %v3044_v15 = vadd.f32 %v3043_v6, %v11697_v48 }
 0xbaf   : > { %v2975_v33 = vadd.f32 %v2974_v45, %v11691_v20  ;;  %v3046_v2 = vadd.f32 %v3045_v35, %v11700_v34  ;;  %v7954_v35 = vld [vmem:[%s11230_s23 + $0x20] sm:$0xff] }
 0xbb0   : > { %v7950_v1 = vmul.f32 -1.442695, %v2973_v36  ;;  %v7952_v61 = vmul.f32 -1.442695, %v3044_v15 }
 0xbb1   : > { %v7951_v32 = vmul.f32 -1.442695, %v2975_v33 }
 0xbb2   : > { %10356 = vpow2.f32 %v7950_v1 }
 0xbb3   : > { %10358 = vpow2.f32 %v7951_v32 }
 0xbb4   : > { %10360 = vtanh.f32 %v3046_v2 }
 0xbb5   : > { %10362 = vpow2.f32 %v7952_v61 }
 0xbbc   : > { %v10357_v58 = vpop.eup %10356 }
 0xbbd   : > { %v3057_v28 = vadd.f32 1.0, %v10357_v58  ;;  %v10359_v19 = vpop.eup %10358 }
 0xbbe   : > { %v3058_v29 = vadd.f32 1.0, %v10359_v19  ;;  %v10361_v44 = vpop.eup %10360 }
 0xbbf   : > { %10364 = vrcp.f32 %v3057_v28  ;;  %v10363_v25 = vpop.eup %10362 }
 0xbc0   : > { %10366 = vrcp.f32 %v3058_v29  ;;  %v3059_v21 = vadd.f32 1.0, %v10363_v25 }
 0xbc2   : > { %10368 = vrcp.f32 %v3059_v21 }
 0xbc9   : > { %v10365_v37 = vpop.eup %10364 }
 0xbca   : > { %v3068_v30 = vmul.f32 %v10365_v37, %v10361_v44  ;;  %v10367_v51 = vpop.eup %10366 }
 0xbcb   : > { %v3067_v41 = vmul.f32 %v10367_v51, %v11797_v40 }
 0xbcc   : > { %v10369_v6 = vpop.eup %10368 }
 0xbcd   : > { %v11901_v16 = vadd.f32 %v3068_v30, %v3067_v41 }
 0xbcf   : > { %10370 = vtanh.f32 %v11901_v16 }
 0xbd9   : > { %v10371_v36 = vpop.eup %10370 }
 0xbda   : > { %v3071_v45 = vmul.f32 %v10371_v36, %v10369_v6 }
 0xbdc   : > { %7953 = vst [vmem:[%s11230_s23 + $0x18] sm:$0xff] %v3071_v45  ;;  %v3074_v33 = vadd.f32 %v7954_v35, %v3071_v45 }
 0xbde   : > { %3204 = vmatmul.mubr.f32.vlgmr.msra.gmra.mrb[24].mxu0 %v3074_v33  ;;  %3275 = vmatmul.mubr.f32.vlgmr.msra.gmra.mrb[24].mxu1 %v3074_v33 }
 0xbdf   : > { %8889 = vmatpush1.bf16.msra.mxu0 %v11804_v5  ;;  %8921 = vmatpush1.bf16.msra.mxu1 %v11806_v24 }
 0xbe0   : > { %8891 = vmatprep.subr.bf16.mxu0 %v11810_v55  ;;  %8923 = vmatprep.subr.bf16.mxu1 %v11812_v11 }
 0xbe1   : > { %3436 = vmatprep.mubr.f32.mxu0 %v10860_v0  ;;  %3507 = vmatprep.mubr.f32.mxu1 %v10860_v0 }
 0xbe3   : > { %8893 = vmatpush1.bf16.msra.mxu0 %v11814_v47  ;;  %8925 = vmatpush1.bf16.msra.mxu1 %v11817_v14 }
 0xbe4   : > { %8895 = vmatprep.subr.bf16.mxu0 %v11822_v50  ;;  %8927 = vmatprep.subr.bf16.mxu1 %v11824_v8 }
 0xbe7   : > { %8897 = vmatpush1.bf16.msra.mxu0 %v11826_v4  ;;  %8929 = vmatpush1.bf16.msra.mxu1 %v11829_v49 }
 0xbe8   : > { %8899 = vmatprep.subr.bf16.mxu0 %v11834_v7  ;;  %8931 = vmatprep.subr.bf16.mxu1 %v11836_v39 }
 0xbeb   : > { %8901 = vmatpush1.bf16.msra.mxu0 %v11838_v22  ;;  %8933 = vmatpush1.bf16.msra.mxu1 %v11841_v13 }
 0xbec   : > { %8903 = vmatprep.subr.bf16.mxu0 %v11846_v63  ;;  %8935 = vmatprep.subr.bf16.mxu1 %v11848_v3 }
 0xbef   : > { %8905 = vmatpush1.bf16.msra.mxu0 %v11850_v27  ;;  %8937 = vmatpush1.bf16.msra.mxu1 %v11853_v26 }
 0xbf0   : > { %8907 = vmatprep.subr.bf16.mxu0 %v11858_v38  ;;  %8939 = vmatprep.subr.bf16.mxu1 %v11860_v46 }
 0xbf3   : > { %8909 = vmatpush1.bf16.msra.mxu0 %v11862_v9  ;;  %8941 = vmatpush1.bf16.msra.mxu1 %v11865_v31 }
 0xbf4   : > { %8911 = vmatprep.subr.bf16.mxu0 %v11869_v52  ;;  %8943 = vmatprep.subr.bf16.mxu1 %v11871_v62 }
 0xbf7   : > { %8913 = vmatpush1.bf16.msra.mxu0 %v11874_v10  ;;  %8945 = vmatpush1.bf16.msra.mxu1 %v11878_v17 }
 0xbf8   : > { %8915 = vmatprep.subr.bf16.mxu0 %v11880_v23  ;;  %8947 = vmatprep.subr.bf16.mxu1 %v11882_v54 }
 0xbfb   : > { %8917 = vmatpush1.bf16.msra.mxu0 %v11885_v57  ;;  %8949 = vmatpush1.bf16.msra.mxu1 %v11889_v59 }
 0xbfc   : > { %8951 = vmatprep.subr.bf16.mxu0 %v11754_v18  ;;  %8983 = vmatprep.subr.bf16.mxu1 %v11756_v42 }
 0xcb1   : > { %v3205_v40 = vpop.f32.mrb[24].mxu0  ;;  %v3276_v1 = vpop.f32.mrb[24].mxu1 }
 0xcb2   : > { %v3206_v32 = vadd.f32 %v3205_v40, %v11688_v43  ;;  %v3207_v15 = vpop.f32.mrb[25].mxu0  ;;  %v3278_v2 = vpop.f32.mrb[25].mxu1  ;;  %v3277_v19 = vadd.f32 %v3276_v1, %v11697_v48 }
 0xcb3   : > { %v3208_v61 = vadd.f32 %v3207_v15, %v11691_v20  ;;  %v3279_v29 = vadd.f32 %v3278_v2, %v11700_v34 }
 0xcb4   : > { %v7955_v58 = vmul.f32 -1.442695, %v3206_v32  ;;  %v7957_v44 = vmul.f32 -1.442695, %v3277_v19  ;;  %v7959_v32 = vld [vmem:[%s11230_s23 + $0x28] sm:$0xff] }
 0xcb5   : > { %v7956_v28 = vmul.f32 -1.442695, %v3208_v61 }
 0xcb6   : > { %10372 = vpow2.f32 %v7955_v58 }
 0xcb7   : > { %10374 = vpow2.f32 %v7956_v28 }
 0xcb8   : > { %10376 = vtanh.f32 %v3279_v29 }
 0xcb9   : > { %10378 = vpow2.f32 %v7957_v44 }
 0xcc0   : > { %v10373_v18 = vpop.eup %10372 }
 0xcc1   : > { %v3290_v25 = vadd.f32 1.0, %v10373_v18  ;;  %v10375_v42 = vpop.eup %10374 }
 0xcc2   : > { %v3291_v37 = vadd.f32 1.0, %v10375_v42  ;;  %v10377_v30 = vpop.eup %10376 }
 0xcc3   : > { %10380 = vrcp.f32 %v3290_v25  ;;  %v10379_v51 = vpop.eup %10378 }
 0xcc4   : > { %10382 = vrcp.f32 %v3291_v37  ;;  %v3292_v36 = vadd.f32 1.0, %v10379_v51 }
 0xcc6   : > { %10384 = vrcp.f32 %v3292_v36 }
 0xccd   : > { %v10381_v21 = vpop.eup %10380 }
 0xcce   : > { %v3301_v41 = vmul.f32 %v10381_v21, %v10377_v30  ;;  %v10383_v6 = vpop.eup %10382 }
 0xccf   : > { %v3300_v45 = vmul.f32 %v10383_v6, %v11901_v16 }
 0xcd0   : > { %v10385_v33 = vpop.eup %10384 }
 0xcd1   : > { %v11945_v35 = vadd.f32 %v3301_v41, %v3300_v45 }
 0xcd3   : > { %10386 = vtanh.f32 %v11945_v35 }
 0xcdd   : > { %v10387_v40 = vpop.eup %10386 }
 0xcde   : > { %v3304_v1 = vmul.f32 %v10387_v40, %v10385_v33 }
 0xce0   : > { %7958 = vst [vmem:[%s11230_s23 + $0x20] sm:$0xff] %v3304_v1  ;;  %v3307_v15 = vadd.f32 %v7959_v32, %v3304_v1 }
 0xce2   : > { %3437 = vmatmul.mubr.f32.vlgmr.msra.gmra.mrb[26].mxu0 %v3307_v15  ;;  %3508 = vmatmul.mubr.f32.vlgmr.msra.gmra.mrb[26].mxu1 %v3307_v15 }
 0xce3   : > { %8953 = vmatpush1.bf16.msra.mxu0 %v11804_v5  ;;  %8985 = vmatpush1.bf16.msra.mxu1 %v11806_v24 }
 0xce4   : > { %8955 = vmatprep.subr.bf16.mxu0 %v11810_v55  ;;  %8987 = vmatprep.subr.bf16.mxu1 %v11812_v11 }
 0xce5   : > { %3669 = vmatprep.mubr.f32.mxu0 %v10860_v0  ;;  %3740 = vmatprep.mubr.f32.mxu1 %v10860_v0 }
 0xce7   : > { %8957 = vmatpush1.bf16.msra.mxu0 %v11814_v47  ;;  %8989 = vmatpush1.bf16.msra.mxu1 %v11817_v14 }
 0xce8   : > { %8959 = vmatprep.subr.bf16.mxu0 %v11822_v50  ;;  %8991 = vmatprep.subr.bf16.mxu1 %v11824_v8 }
 0xceb   : > { %8961 = vmatpush1.bf16.msra.mxu0 %v11826_v4  ;;  %8993 = vmatpush1.bf16.msra.mxu1 %v11829_v49 }
 0xcec   : > { %8963 = vmatprep.subr.bf16.mxu0 %v11834_v7  ;;  %8995 = vmatprep.subr.bf16.mxu1 %v11836_v39 }
 0xcef   : > { %8965 = vmatpush1.bf16.msra.mxu0 %v11838_v22  ;;  %8997 = vmatpush1.bf16.msra.mxu1 %v11841_v13 }
 0xcf0   : > { %8967 = vmatprep.subr.bf16.mxu0 %v11846_v63  ;;  %8999 = vmatprep.subr.bf16.mxu1 %v11848_v3 }
 0xcf3   : > { %8969 = vmatpush1.bf16.msra.mxu0 %v11850_v27  ;;  %9001 = vmatpush1.bf16.msra.mxu1 %v11853_v26 }
 0xcf4   : > { %8971 = vmatprep.subr.bf16.mxu0 %v11858_v38  ;;  %9003 = vmatprep.subr.bf16.mxu1 %v11860_v46 }
 0xcf7   : > { %8973 = vmatpush1.bf16.msra.mxu0 %v11862_v9  ;;  %9005 = vmatpush1.bf16.msra.mxu1 %v11865_v31 }
 0xcf8   : > { %8975 = vmatprep.subr.bf16.mxu0 %v11869_v52  ;;  %9007 = vmatprep.subr.bf16.mxu1 %v11871_v62 }
 0xcfb   : > { %8977 = vmatpush1.bf16.msra.mxu0 %v11874_v10  ;;  %9009 = vmatpush1.bf16.msra.mxu1 %v11878_v17 }
 0xcfc   : > { %8979 = vmatprep.subr.bf16.mxu0 %v11880_v23  ;;  %9011 = vmatprep.subr.bf16.mxu1 %v11882_v54 }
 0xcff   : > { %8981 = vmatpush1.bf16.msra.mxu0 %v11885_v57  ;;  %9013 = vmatpush1.bf16.msra.mxu1 %v11889_v59 }
 0xdb5   : > { %v3438_v16 = vpop.f32.mrb[26].mxu0  ;;  %v3509_v2 = vpop.f32.mrb[26].mxu1 }
 0xdb6   : > { %v3439_v61 = vadd.f32 %v3438_v16, %v11688_v43  ;;  %v3440_v58 = vpop.f32.mrb[27].mxu0  ;;  %v3511_v28 = vpop.f32.mrb[27].mxu1  ;;  %v3510_v18 = vadd.f32 %v3509_v2, %v11697_v48 }
 0xdb7   : > { %v3441_v19 = vadd.f32 %v3440_v58, %v11691_v20  ;;  %v3512_v25 = vadd.f32 %v3511_v28, %v11700_v34  ;;  %v3775_v28 = vld [vmem:[#allocation5 + $0x208] sm:$0xff] }
 0xdb8   : > { %v7960_v29 = vmul.f32 -1.442695, %v3439_v61  ;;  %v7962_v42 = vmul.f32 -1.442695, %v3510_v18  ;;  %v7964_v61 = vld [vmem:[%s11230_s23 + $0x30] sm:$0xff] }
 0xdb9   : > { %v7961_v44 = vmul.f32 -1.442695, %v3441_v19  ;;  %v3779_v19 = vld [vmem:[#allocation5 + $0x228] sm:$0xff] }
 0xdba   : > { %10388 = vpow2.f32 %v7960_v29  ;;  %v9014_v29 = vpack.c.bf16 %v3779_v19, %v3775_v28  ;;  %v4045_v28 = vld [vmem:[#allocation5 + $0x470] sm:$0xff]  ;;  %v4048_v19 = vld [vmem:[#allocation5 + $0x488] sm:$0xff] }
 0xdbb   : > { %10390 = vpow2.f32 %v7961_v44  ;;  %v3781_v44 = vld [vmem:[#allocation5 + $0x238] sm:$0xff] }
 0xdbc   : > { %10392 = vtanh.f32 %v3512_v25  ;;  %9015 = vmatprep.subr.bf16.mxu0 %v9014_v29  ;;  %v4035_v25 = vld [vmem:[#allocation5 + $0x420] sm:$0xff]  ;;  %v4050_v29 = vld [vmem:[#allocation5 + $0x498] sm:$0xff] }
 0xdbd   : > { %10394 = vpow2.f32 %v7962_v42 }
 0xdc4   : > { %v10389_v37 = vpop.eup %10388 }
 0xdc5   : > { %v3523_v30 = vadd.f32 1.0, %v10389_v37  ;;  %v10391_v51 = vpop.eup %10390  ;;  %v4033_v37 = vld [vmem:[#allocation5 + $0x410] sm:$0xff] }
 0xdc6   : > { %v3524_v21 = vadd.f32 1.0, %v10391_v51  ;;  %v10393_v41 = vpop.eup %10392  ;;  %v4040_v51 = vld [vmem:[#allocation5 + $0x448] sm:$0xff] }
 0xdc7   : > { %10396 = vrcp.f32 %v3523_v30  ;;  %v10395_v6 = vpop.eup %10394  ;;  %v4037_v30 = vld [vmem:[#allocation5 + $0x430] sm:$0xff] }
 0xdc8   : > { %10398 = vrcp.f32 %v3524_v21  ;;  %v3525_v40 = vadd.f32 1.0, %v10395_v6  ;;  %v4042_v6 = vld [vmem:[#allocation5 + $0x458] sm:$0xff] }
 0xdca   : > { %10400 = vrcp.f32 %v3525_v40 }
 0xdd1   : > { %v10397_v36 = vpop.eup %10396 }
 0xdd2   : > { %v3534_v45 = vmul.f32 %v10397_v36, %v10393_v41  ;;  %v10399_v33 = vpop.eup %10398  ;;  %v4044_v41 = vld [vmem:[#allocation5 + $0x468] sm:$0xff]  ;;  %v4046_v36 = vld [vmem:[#allocation5 + $0x478] sm:$0xff] }
 0xdd3   : > { %v3533_v1 = vmul.f32 %v10399_v33, %v11945_v35  ;;  %v3777_v35 = vld [vmem:[#allocation5 + $0x218] sm:$0xff]  ;;  %v7969_v33 = vld [vmem:[%s11230_s23 + $0x38] sm:$0xff] }
 0xdd4   : > { %v10401_v15 = vpop.eup %10400  ;;  %v9046_v18 = vpack.c.bf16 %v3781_v44, %v3777_v35  ;;  %v4052_v35 = vld [vmem:[#allocation5 + $0x4a8] sm:$0xff]  ;;  %v4054_v44 = vld [vmem:[#allocation5 + $0x4b8] sm:$0xff] }
 0xdd5   : > { %v11987_v32 = vadd.f32 %v3534_v45, %v3533_v1  ;;  %v12041_v1 = vpack.c.bf16 %v4037_v30, %v4033_v37  ;;  %v4065_v37 = vld [vmem:[#allocation5 + $0x510] sm:$0xff] }
 0xdd6   : > { %9047 = vmatprep.subr.bf16.mxu1 %v9046_v18  ;;  %v4069_v30 = vld [vmem:[#allocation5 + $0x530] sm:$0xff] }
 0xdd7   : > { %10402 = vtanh.f32 %v11987_v32 }
 0xde1   : > { %v10403_v16 = vpop.eup %10402 }
 0xde2   : > { %v3537_v2 = vmul.f32 %v10403_v16, %v10401_v15  ;;  %v4043_v15 = vld [vmem:[#allocation5 + $0x460] sm:$0xff] }
 0xde4   : > { %7963 = vst [vmem:[%s11230_s23 + $0x28] sm:$0xff] %v3537_v2  ;;  %v3540_v58 = vadd.f32 %v7964_v61, %v3537_v2  ;;  %v12044_v2 = vpack.c.bf16 %v4044_v41, %v4040_v51  ;;  %v12046_v61 = vpack.c.bf16 %v4046_v36, %v4042_v6  ;;  %v4072_v51 = vld [vmem:[#allocation5 + $0x548] sm:$0xff]  ;;  %v4074_v41 = vld [vmem:[#allocation5 + $0x558] sm:$0xff] }
 0xde5   : > { %v4078_v6 = vld [vmem:[#allocation5 + $0x578] sm:$0xff] }
 0xde6   : > { %3670 = vmatmul.mubr.f32.vlgmr.msra.gmra.mrb[28].mxu0 %v3540_v58  ;;  %3741 = vmatmul.mubr.f32.vlgmr.msra.gmra.mrb[28].mxu1 %v3540_v58  ;;  %v4041_v58 = vld [vmem:[#allocation5 + $0x450] sm:$0xff] }
 0xde7   : > { %3902 = vmatprep.mubr.f32.mxu0 %v10860_v0  ;;  %3973 = vmatprep.mubr.f32.mxu1 %v10860_v0 }
 0xde8   : > { %9017 = vmatpush1.bf16.msra.mxu0 %v11804_v5  ;;  %9049 = vmatpush1.bf16.msra.mxu1 %v11806_v24  ;;  %v4032_v5 = vld [vmem:[#allocation5 + $0x408] sm:$0xff] }
 0xde9   : > { %9019 = vmatprep.subr.bf16.mxu0 %v11810_v55  ;;  %9051 = vmatprep.subr.bf16.mxu1 %v11812_v11  ;;  %v4036_v24 = vld [vmem:[#allocation5 + $0x428] sm:$0xff]  ;;  %v4034_v55 = vld [vmem:[#allocation5 + $0x418] sm:$0xff] }
 0xdea   : > { %v4038_v11 = vld [vmem:[#allocation5 + $0x438] sm:$0xff] }
 0xdec   : > { %9021 = vmatpush1.bf16.msra.mxu0 %v11814_v47  ;;  %9053 = vmatpush1.bf16.msra.mxu1 %v11817_v14  ;;  %v12021_v47 = vpack.c.bf16 %v4036_v24, %v4032_v5  ;;  %v12024_v14 = vpack.c.bf16 %v4038_v11, %v4034_v55  ;;  %v12052_v5 = vpack.c.bf16 %v4045_v28, %v4041_v58  ;;  %v4047_v24 = vld [vmem:[#allocation5 + $0x480] sm:$0xff]  ;;  %v4073_v58 = vld [vmem:[#allocation5 + $0x550] sm:$0xff] }
 0xded   : > { %9023 = vmatprep.subr.bf16.mxu0 %v11822_v50  ;;  %9055 = vmatprep.subr.bf16.mxu1 %v11824_v8  ;;  %v4051_v55 = vld [vmem:[#allocation5 + $0x4a0] sm:$0xff]  ;;  %v12056_v11 = vpack.c.bf16 %v4052_v35, %v4048_v19  ;;  %v4077_v28 = vld [vmem:[#allocation5 + $0x570] sm:$0xff]  ;;  %v4080_v19 = vld [vmem:[#allocation5 + $0x588] sm:$0xff] }
 0xdee   : > { %v4084_v35 = vld [vmem:[#allocation5 + $0x5a8] sm:$0xff] }
 0xdf0   : > { %9025 = vmatpush1.bf16.msra.mxu0 %v11826_v4  ;;  %9057 = vmatpush1.bf16.msra.mxu1 %v11829_v49 }
 0xdf1   : > { %9027 = vmatprep.subr.bf16.mxu0 %v11834_v7  ;;  %9059 = vmatprep.subr.bf16.mxu1 %v11836_v39 }
 0xdf4   : > { %9029 = vmatpush1.bf16.msra.mxu0 %v11838_v22  ;;  %9061 = vmatpush1.bf16.msra.mxu1 %v11841_v13 }
 0xdf5   : > { %9031 = vmatprep.subr.bf16.mxu0 %v11846_v63  ;;  %9063 = vmatprep.subr.bf16.mxu1 %v11848_v3 }
 0xdf8   : > { %9033 = vmatpush1.bf16.msra.mxu0 %v11850_v27  ;;  %9065 = vmatpush1.bf16.msra.mxu1 %v11853_v26 }
 0xdf9   : > { %9035 = vmatprep.subr.bf16.mxu0 %v11858_v38  ;;  %9067 = vmatprep.subr.bf16.mxu1 %v11860_v46 }
 0xdfc   : > { %9037 = vmatpush1.bf16.msra.mxu0 %v11862_v9  ;;  %9069 = vmatpush1.bf16.msra.mxu1 %v11865_v31 }
 0xdfd   : > { %9039 = vmatprep.subr.bf16.mxu0 %v11869_v52  ;;  %9071 = vmatprep.subr.bf16.mxu1 %v11871_v62 }
 0xe00   : > { %9041 = vmatpush1.bf16.msra.mxu0 %v11874_v10  ;;  %9073 = vmatpush1.bf16.msra.mxu1 %v11878_v17 }
 0xe01   : > { %9043 = vmatprep.subr.bf16.mxu0 %v11880_v23  ;;  %9075 = vmatprep.subr.bf16.mxu1 %v11882_v54 }
 0xe04   : > { %9045 = vmatpush1.bf16.msra.mxu0 %v11885_v57  ;;  %9077 = vmatpush1.bf16.msra.mxu1 %v11889_v59  ;;  %v4031_v59 = vld [vmem:[#allocation5 + $0x400] sm:$0xff] }
 0xe05   : > { %9079 = vmatprep.subr.bf16.mxu0 %v12021_v47  ;;  %9111 = vmatprep.subr.bf16.mxu1 %v12024_v14  ;;  %v12039_v40 = vpack.c.bf16 %v4035_v25, %v4031_v59  ;;  %v4067_v59 = vld [vmem:[#allocation5 + $0x520] sm:$0xff] }
 0xeb9   : > { %v3671_v50 = vpop.f32.mrb[28].mxu0  ;;  %v3742_v8 = vpop.f32.mrb[28].mxu1 }
 0xeba   : > { %v3672_v4 = vadd.f32 %v3671_v50, %v11688_v43  ;;  %v3673_v49 = vpop.f32.mrb[29].mxu0  ;;  %v3744_v7 = vpop.f32.mrb[29].mxu1  ;;  %v3743_v63 = vadd.f32 %v3742_v8, %v11697_v48  ;;  %v12058_v50 = vpack.c.bf16 %v4054_v44, %v4050_v29  ;;  %v4049_v8 = vld [vmem:[#allocation5 + $0x490] sm:$0xff]  ;;  %v4082_v29 = vld [vmem:[#allocation5 + $0x598] sm:$0xff] }
 0xebb   : > { %v3674_v39 = vadd.f32 %v3673_v49, %v11691_v20  ;;  %v3745_v3 = vadd.f32 %v3744_v7, %v11700_v34  ;;  %v4056_v49 = vld [vmem:[#allocation5 + $0x4c8] sm:$0xff]  ;;  %v4086_v44 = vld [vmem:[#allocation5 + $0x5b8] sm:$0xff] }
 0xebc   : > { %v7965_v22 = vmul.f32 -1.442695, %v3672_v4  ;;  %v7967_v27 = vmul.f32 -1.442695, %v3743_v63  ;;  %v4053_v4 = vld [vmem:[#allocation5 + $0x4b0] sm:$0xff]  ;;  %v4060_v7 = vld [vmem:[#allocation5 + $0x4e8] sm:$0xff] }
 0xebd   : > { %v7966_v13 = vmul.f32 -1.442695, %v3674_v39  ;;  %v4058_v39 = vld [vmem:[#allocation5 + $0x4d8] sm:$0xff]  ;;  %v12066_v63 = vpack.c.bf16 %v4053_v4, %v4049_v8  ;;  %v4079_v8 = vld [vmem:[#allocation5 + $0x580] sm:$0xff] }
 0xebe   : > { %10404 = vpow2.f32 %v7965_v22  ;;  %v4062_v22 = vld [vmem:[#allocation5 + $0x4f8] sm:$0xff]  ;;  %v4083_v4 = vld [vmem:[#allocation5 + $0x5a0] sm:$0xff] }
 0xebf   : > { %10406 = vpow2.f32 %v7966_v13  ;;  %v12064_v13 = vpack.c.bf16 %v4051_v55, %v4047_v24  ;;  %v12102_v55 = vpack.c.bf16 %v4077_v28, %v4073_v58 }
 0xec0   : > { %10408 = vtanh.f32 %v3745_v3  ;;  %v4055_v3 = vld [vmem:[#allocation5 + $0x4c0] sm:$0xff] }
 0xec1   : > { %10410 = vpow2.f32 %v7967_v27  ;;  %v4059_v27 = vld [vmem:[#allocation5 + $0x4e0] sm:$0xff] }
 0xec8   : > { %v10405_v26 = vpop.eup %10404 }
 0xec9   : > { %v3756_v38 = vadd.f32 1.0, %v10405_v26  ;;  %v10407_v46 = vpop.eup %10406  ;;  %v12070_v26 = vpack.c.bf16 %v4060_v7, %v4056_v49  ;;  %v12106_v49 = vpack.c.bf16 %v4084_v35, %v4080_v19  ;;  %v12108_v7 = vpack.c.bf16 %v4086_v44, %v4082_v29 }
 0xeca   : > { %v3757_v9 = vadd.f32 1.0, %v10407_v46  ;;  %v10409_v31 = vpop.eup %10408  ;;  %v4057_v46 = vld [vmem:[#allocation5 + $0x4d0] sm:$0xff] }
 0xecb   : > { %10412 = vrcp.f32 %v3756_v38  ;;  %v10411_v52 = vpop.eup %10410  ;;  %v12072_v38 = vpack.c.bf16 %v4062_v22, %v4058_v39  ;;  %v4081_v39 = vld [vmem:[#allocation5 + $0x590] sm:$0xff] }
 0xecc   : > { %10414 = vrcp.f32 %v3757_v9  ;;  %v3758_v23 = vadd.f32 1.0, %v10411_v52  ;;  %v4061_v9 = vld [vmem:[#allocation5 + $0x4f0] sm:$0xff]  ;;  %v4068_v52 = vld [vmem:[#allocation5 + $0x528] sm:$0xff] }
 0xecd   : > { %v4085_v22 = vld [vmem:[#allocation5 + $0x5b0] sm:$0xff] }
 0xece   : > { %10416 = vrcp.f32 %v3758_v23  ;;  %v12078_v23 = vpack.c.bf16 %v4061_v9, %v4057_v46  ;;  %v4090_v46 = vld [vmem:[#allocation5 + $0x5d8] sm:$0xff] }
 0xecf   : > { %v4094_v9 = vld [vmem:[#allocation5 + $0x5f8] sm:$0xff] }
 0xed5   : > { %v10413_v62 = vpop.eup %10412 }
 0xed6   : > { %v3767_v10 = vmul.f32 %v10413_v62, %v10409_v31  ;;  %v10415_v17 = vpop.eup %10414  ;;  %v4064_v31 = vld [vmem:[#allocation5 + $0x508] sm:$0xff]  ;;  %v4066_v62 = vld [vmem:[#allocation5 + $0x518] sm:$0xff] }
 0xed7   : > { %v3766_v54 = vmul.f32 %v10415_v17, %v11987_v32  ;;  %v4039_v32 = vld [vmem:[#allocation5 + $0x440] sm:$0xff]  ;;  %v12076_v17 = vpack.c.bf16 %v4059_v27, %v4055_v3  ;;  %v12082_v25 = vpack.c.bf16 %v4068_v52, %v4064_v31  ;;  %v4088_v3 = vld [vmem:[#allocation5 + $0x5c8] sm:$0xff]  ;;  %v12112_v31 = vpack.c.bf16 %v4083_v4, %v4079_v8 }
 0xed8   : > { %v10417_v42 = vpop.eup %10416  ;;  %v12050_v18 = vpack.c.bf16 %v4043_v15, %v4039_v32  ;;  %v4075_v32 = vld [vmem:[#allocation5 + $0x560] sm:$0xff]  ;;  %v4092_v27 = vld [vmem:[#allocation5 + $0x5e8] sm:$0xff]  ;;  %v12114_v52 = vpack.c.bf16 %v4085_v22, %v4081_v39 }
 0xed9   : > { %v12035_v57 = vadd.f32 %v3767_v10, %v3766_v54  ;;  %v4070_v10 = vld [vmem:[#allocation5 + $0x538] sm:$0xff]  ;;  %v4063_v54 = vld [vmem:[#allocation5 + $0x500] sm:$0xff] }
 0xeda   : > { %v12088_v36 = vpack.c.bf16 %v4067_v59, %v4063_v54  ;;  %v12120_v54 = vpack.c.bf16 %v4094_v9, %v4090_v46  ;;  %v4091_v59 = vld [vmem:[#allocation5 + $0x5e0] sm:$0xff] }
 0xedb   : > { %10418 = vtanh.f32 %v12035_v57 }
 0xee5   : > { %v10419_v21 = vpop.eup %10418 }
 0xee6   : > { %v3770_v45 = vmul.f32 %v10419_v21, %v10417_v42  ;;  %v12084_v42 = vpack.c.bf16 %v4070_v10, %v4066_v62  ;;  %v4076_v21 = vld [vmem:[#allocation5 + $0x568] sm:$0xff]  ;;  %v4087_v62 = vld [vmem:[#allocation5 + $0x5c0] sm:$0xff]  ;;  %v12118_v10 = vpack.c.bf16 %v4092_v27, %v4088_v3 }
 0xee7   : > { %v12094_v15 = vpack.c.bf16 %v4076_v21, %v4072_v51  ;;  %v12124_v51 = vpack.c.bf16 %v4091_v59, %v4087_v62  ;;  %v4006_v3 = vld [vmem:[#allocation7 + $0x8] sm:$0xf] }
 0xee8   : > { %7968 = vst [vmem:[%s11230_s23 + $0x30] sm:$0xff] %v3770_v45  ;;  %v3773_v16 = vadd.f32 %v7969_v33, %v3770_v45  ;;  %v12090_v45 = vpack.c.bf16 %v4069_v30, %v4065_v37  ;;  %v4071_v33 = vld [vmem:[#allocation5 + $0x540] sm:$0xff]  ;;  %v4089_v37 = vld [vmem:[#allocation5 + $0x5d0] sm:$0xff]  ;;  %v12174_v9 = vrot.slane %v4006_v3, %v11200_v53 }
 0xee9   : > { %v12100_v24 = vpack.c.bf16 %v4075_v32, %v4071_v33  ;;  %v4093_v30 = vld [vmem:[#allocation5 + $0x5f0] sm:$0xff] }
 0xeea   : > { %3903 = vmatmul.mubr.f32.vlgmr.msra.gmra.mrb[30].mxu0 %v3773_v16  ;;  %3974 = vmatmul.mubr.f32.vlgmr.msra.gmra.mrb[30].mxu1 %v3773_v16  ;;  %v12096_v16 = vpack.c.bf16 %v4078_v6, %v4074_v41  ;;  %v12126_v21 = vpack.c.bf16 %v4093_v30, %v4089_v37  ;;  %v4028_v41 = vld [vmem:[%s11230_s23] sm:$0xff] }
 0xeeb   : > { %9081 = vmatpush1.bf16.msra.mxu0 %v12039_v40  ;;  %9113 = vmatpush1.bf16.msra.mxu1 %v12041_v1 }
 0xeec   : > { %9083 = vmatprep.subr.bf16.mxu0 %v12044_v2  ;;  %9115 = vmatprep.subr.bf16.mxu1 %v12046_v61 }
 0xeed   : > { %4159 = vmatprep.mubr.f32.mxu0 %v10860_v0  ;;  %4230 = vmatprep.mubr.f32.mxu1 %v10860_v0 }
 0xeef   : > { %9085 = vmatpush1.bf16.msra.mxu0 %v12050_v18  ;;  %9117 = vmatpush1.bf16.msra.mxu1 %v12052_v5 }
 0xef0   : > { %9087 = vmatprep.subr.bf16.mxu0 %v12056_v11  ;;  %9119 = vmatprep.subr.bf16.mxu1 %v12058_v50 }
 0xef3   : > { %9089 = vmatpush1.bf16.msra.mxu0 %v12064_v13  ;;  %9121 = vmatpush1.bf16.msra.mxu1 %v12066_v63 }
 0xef4   : > { %9091 = vmatprep.subr.bf16.mxu0 %v12070_v26  ;;  %9123 = vmatprep.subr.bf16.mxu1 %v12072_v38 }
 0xef7   : > { %9093 = vmatpush1.bf16.msra.mxu0 %v12076_v17  ;;  %9125 = vmatpush1.bf16.msra.mxu1 %v12078_v23 }
 0xef8   : > { %9095 = vmatprep.subr.bf16.mxu0 %v12082_v25  ;;  %9127 = vmatprep.subr.bf16.mxu1 %v12084_v42 }
 0xefb   : > { %9097 = vmatpush1.bf16.msra.mxu0 %v12088_v36  ;;  %9129 = vmatpush1.bf16.msra.mxu1 %v12090_v45 }
 0xefc   : > { %9099 = vmatprep.subr.bf16.mxu0 %v12094_v15  ;;  %9131 = vmatprep.subr.bf16.mxu1 %v12096_v16 }
 0xeff   : > { %9101 = vmatpush1.bf16.msra.mxu0 %v12100_v24  ;;  %9133 = vmatpush1.bf16.msra.mxu1 %v12102_v55 }
 0xf00   : > { %9103 = vmatprep.subr.bf16.mxu0 %v12106_v49  ;;  %9135 = vmatprep.subr.bf16.mxu1 %v12108_v7 }
 0xf03   : > { %9105 = vmatpush1.bf16.msra.mxu0 %v12112_v31  ;;  %9137 = vmatpush1.bf16.msra.mxu1 %v12114_v52 }
 0xf04   : > { %9107 = vmatprep.subr.bf16.mxu0 %v12118_v10  ;;  %9139 = vmatprep.subr.bf16.mxu1 %v12120_v54 }
 0xf07   : > { %9109 = vmatpush1.bf16.msra.mxu0 %v12124_v51  ;;  %9141 = vmatpush1.bf16.msra.mxu1 %v12126_v21 }
 0xf08   : > { %9143 = vmatprep.subr.bf16.mxu0 %v12021_v47  ;;  %9175 = vmatprep.subr.bf16.mxu1 %v12024_v14 }
 0xf0a   : > { %4160 = vmatmul.mubr.f32.vlgmr.msra.gmra.mrb[32].mxu0 %v4028_v41  ;;  %4231 = vmatmul.mubr.f32.vlgmr.msra.gmra.mrb[32].mxu1 %v4028_v41 }
 0xf0b   : > { %9145 = vmatpush1.bf16.msra.mxu0 %v12039_v40  ;;  %9177 = vmatpush1.bf16.msra.mxu1 %v12041_v1 }
 0xf0c   : > { %9147 = vmatprep.subr.bf16.mxu0 %v12044_v2  ;;  %9179 = vmatprep.subr.bf16.mxu1 %v12046_v61 }
 0xf0d   : > { %4392 = vmatprep.mubr.f32.mxu0 %v10860_v0  ;;  %4463 = vmatprep.mubr.f32.mxu1 %v10860_v0 }
 0xf0f   : > { %9149 = vmatpush1.bf16.msra.mxu0 %v12050_v18  ;;  %9181 = vmatpush1.bf16.msra.mxu1 %v12052_v5 }
 0xf10   : > { %9151 = vmatprep.subr.bf16.mxu0 %v12056_v11  ;;  %9183 = vmatprep.subr.bf16.mxu1 %v12058_v50 }
 0xf13   : > { %9153 = vmatpush1.bf16.msra.mxu0 %v12064_v13  ;;  %9185 = vmatpush1.bf16.msra.mxu1 %v12066_v63 }
 0xf14   : > { %9155 = vmatprep.subr.bf16.mxu0 %v12070_v26  ;;  %9187 = vmatprep.subr.bf16.mxu1 %v12072_v38 }
 0xf17   : > { %9157 = vmatpush1.bf16.msra.mxu0 %v12076_v17  ;;  %9189 = vmatpush1.bf16.msra.mxu1 %v12078_v23 }
 0xf18   : > { %9159 = vmatprep.subr.bf16.mxu0 %v12082_v25  ;;  %9191 = vmatprep.subr.bf16.mxu1 %v12084_v42 }
 0xf1b   : > { %9161 = vmatpush1.bf16.msra.mxu0 %v12088_v36  ;;  %9193 = vmatpush1.bf16.msra.mxu1 %v12090_v45 }
 0xf1c   : > { %9163 = vmatprep.subr.bf16.mxu0 %v12094_v15  ;;  %9195 = vmatprep.subr.bf16.mxu1 %v12096_v16 }
 0xf1f   : > { %9165 = vmatpush1.bf16.msra.mxu0 %v12100_v24  ;;  %9197 = vmatpush1.bf16.msra.mxu1 %v12102_v55 }
 0xf20   : > { %9167 = vmatprep.subr.bf16.mxu0 %v12106_v49  ;;  %9199 = vmatprep.subr.bf16.mxu1 %v12108_v7 }
 0xf23   : > { %9169 = vmatpush1.bf16.msra.mxu0 %v12112_v31  ;;  %9201 = vmatpush1.bf16.msra.mxu1 %v12114_v52 }
 0xf24   : > { %9171 = vmatprep.subr.bf16.mxu0 %v12118_v10  ;;  %9203 = vmatprep.subr.bf16.mxu1 %v12120_v54 }
 0xf27   : > { %9173 = vmatpush1.bf16.msra.mxu0 %v12124_v51  ;;  %9205 = vmatpush1.bf16.msra.mxu1 %v12126_v21 }
 0xf28   : > { %9207 = vmatprep.subr.bf16.mxu0 %v12021_v47  ;;  %9239 = vmatprep.subr.bf16.mxu1 %v12024_v14 }
 0xfbd   : > { %v3904_v6 = vpop.f32.mrb[30].mxu0  ;;  %v3975_v33 = vpop.f32.mrb[30].mxu1 }
 0xfbe   : > { %v3905_v32 = vadd.f32 %v3904_v6, %v11688_v43  ;;  %v3906_v58 = vpop.f32.mrb[31].mxu0  ;;  %v3977_v28 = vpop.f32.mrb[31].mxu1  ;;  %v3976_v44 = vadd.f32 %v3975_v33, %v11697_v48 }
 0xfbf   : > { %v3907_v19 = vadd.f32 %v3906_v58, %v11691_v20  ;;  %v3978_v8 = vadd.f32 %v3977_v28, %v11700_v34  ;;  %v12177_v34 = vrot.slane %v4006_v3, %v11202_v56 }
 0xfc0   : > { %v7970_v35 = vmul.f32 -1.442695, %v3905_v32  ;;  %v7972_v4 = vmul.f32 -1.442695, %v3976_v44 }
 0xfc1   : > { %v7971_v29 = vmul.f32 -1.442695, %v3907_v19 }
 0xfc2   : > { %10420 = vpow2.f32 %v7970_v35  ;;  %v12183_v35 = vrot.slane %v4006_v3, %v11210_v60 }
 0xfc3   : > { %10422 = vpow2.f32 %v7971_v29 }
 0xfc4   : > { %10424 = vtanh.f32 %v3978_v8 }
 0xfc5   : > { %10426 = vpow2.f32 %v7972_v4 }
 0xfcc   : > { %v10421_v47 = vpop.eup %10420 }
 0xfcd   : > { %v3989_v39 = vadd.f32 1.0, %v10421_v47  ;;  %v10423_v14 = vpop.eup %10422 }
 0xfce   : > { %v3990_v43 = vadd.f32 1.0, %v10423_v14  ;;  %v10425_v22 = vpop.eup %10424 }
 0xfcf   : > { %10428 = vrcp.f32 %v3989_v39  ;;  %v10427_v20 = vpop.eup %10426 }
 0xfd0   : > { %10430 = vrcp.f32 %v3990_v43  ;;  %v3991_v62 = vadd.f32 1.0, %v10427_v20 }
 0xfd2   : > { %10432 = vrcp.f32 %v3991_v62 }
 0xfd9   : > { %v10429_v27 = vpop.eup %10428 }
 0xfda   : > { %v4000_v46 = vmul.f32 %v10429_v27, %v10425_v22  ;;  %v10431_v48 = vpop.eup %10430 }
 0xfdb   : > { %v3999_v59 = vmul.f32 %v10431_v48, %v12035_v57  ;;  %v12186_v57 = vrot.slane %v4006_v3, %v11217_v12 }
 0xfdc   : > { %v10433_v44 = vpop.eup %10432 }
 0xfdd   : > { %v4161_v37 = vpop.f32.mrb[32].mxu0  ;;  %v4232_v30 = vpop.f32.mrb[32].mxu1  ;;  %v4001_v41 = vadd.f32 %v4000_v46, %v3999_v59 }
 0xfde   : > { %v4162_v6 = vadd.f32 %v4161_v37, %v12174_v9  ;;  %v4163_v33 = vpop.f32.mrb[33].mxu0  ;;  %v4234_v32 = vpop.f32.mrb[33].mxu1  ;;  %v4233_v29 = vadd.f32 %v4232_v30, %v12183_v35 }
 0xfdf   : > { %v4164_v58 = vadd.f32 %v4163_v33, %v12177_v34  ;;  %10434 = vtanh.f32 %v4001_v41  ;;  %v4235_v8 = vadd.f32 %v4234_v32, %v12186_v57  ;;  %v7977_v32 = vld [vmem:[%s11230_s23 + $0x8] sm:$0xff] }
 0xfe0   : > { %v7974_v28 = vmul.f32 -1.442695, %v4162_v6  ;;  %v7976_v47 = vmul.f32 -1.442695, %v4233_v29 }
 0xfe1   : > { %v7975_v19 = vmul.f32 -1.442695, %v4164_v58 }
 0xfe2   : > { %10436 = vpow2.f32 %v7974_v28 }
 0xfe3   : > { %10438 = vpow2.f32 %v7975_v19 }
 0xfe4   : > { %10440 = vtanh.f32 %v4235_v8 }
 0xfe5   : > { %10442 = vpow2.f32 %v7976_v47 }
 0xfe9   : > { %v10435_v4 = vpop.eup %10434 }
 0xfea   : > { %v4003_v39 = vmul.f32 %v10435_v4, %v10433_v44 }
 0xfec   : > { %v10437_v14 = vpop.eup %10436  ;;  %7973 = vst [vmem:[%s11230_s23 + $0x38] sm:$0xff] %v4003_v39 }
 0xfed   : > { %v4246_v43 = vadd.f32 1.0, %v10437_v14  ;;  %v10439_v22 = vpop.eup %10438 }
 0xfee   : > { %v4247_v20 = vadd.f32 1.0, %v10439_v22  ;;  %v10441_v3 = vpop.eup %10440 }
 0xfef   : > { %10444 = vrcp.f32 %v4246_v43  ;;  %v10443_v27 = vpop.eup %10442 }
 0xff0   : > { %10446 = vrcp.f32 %v4247_v20  ;;  %v4248_v59 = vadd.f32 1.0, %v10443_v27 }
 0xff2   : > { %10448 = vrcp.f32 %v4248_v59 }
 0xff9   : > { %v10445_v46 = vpop.eup %10444 }
 0xffa   : > { %v4257_v48 = vmul.f32 %v10445_v46, %v10441_v3  ;;  %v10447_v62 = vpop.eup %10446 }
 0xffb   : > { %v4256_v37 = vmul.f32 0.0, %v10447_v62 }
 0xffc   : > { %v10449_v41 = vpop.eup %10448 }
 0xffd   : > { %v12191_v30 = vadd.f32 %v4257_v48, %v4256_v37 }
 0xfff   : > { %10450 = vtanh.f32 %v12191_v30 }
0x1009   : > { %v10451_v6 = vpop.eup %10450 }
0x100a   : > { %v4260_v33 = vmul.f32 %v10451_v6, %v10449_v41 }
0x100c   : > { %4261 = vst [vmem:[%s11230_s23] sm:$0xff] %v4260_v33  ;;  %v4263_v58 = vadd.f32 %v7977_v32, %v4260_v33 }
0x100e   : > { %4393 = vmatmul.mubr.f32.vlgmr.msra.gmra.mrb[34].mxu0 %v4263_v58  ;;  %4464 = vmatmul.mubr.f32.vlgmr.msra.gmra.mrb[34].mxu1 %v4263_v58 }
0x100f   : > { %9209 = vmatpush1.bf16.msra.mxu0 %v12039_v40  ;;  %9241 = vmatpush1.bf16.msra.mxu1 %v12041_v1 }
0x1010   : > { %9211 = vmatprep.subr.bf16.mxu0 %v12044_v2  ;;  %9243 = vmatprep.subr.bf16.mxu1 %v12046_v61 }
0x1011   : > { %4625 = vmatprep.mubr.f32.mxu0 %v10860_v0  ;;  %4696 = vmatprep.mubr.f32.mxu1 %v10860_v0 }
0x1013   : > { %9213 = vmatpush1.bf16.msra.mxu0 %v12050_v18  ;;  %9245 = vmatpush1.bf16.msra.mxu1 %v12052_v5 }
0x1014   : > { %9215 = vmatprep.subr.bf16.mxu0 %v12056_v11  ;;  %9247 = vmatprep.subr.bf16.mxu1 %v12058_v50 }
0x1017   : > { %9217 = vmatpush1.bf16.msra.mxu0 %v12064_v13  ;;  %9249 = vmatpush1.bf16.msra.mxu1 %v12066_v63 }
0x1018   : > { %9219 = vmatprep.subr.bf16.mxu0 %v12070_v26  ;;  %9251 = vmatprep.subr.bf16.mxu1 %v12072_v38 }
0x101b   : > { %9221 = vmatpush1.bf16.msra.mxu0 %v12076_v17  ;;  %9253 = vmatpush1.bf16.msra.mxu1 %v12078_v23 }
0x101c   : > { %9223 = vmatprep.subr.bf16.mxu0 %v12082_v25  ;;  %9255 = vmatprep.subr.bf16.mxu1 %v12084_v42 }
0x101f   : > { %9225 = vmatpush1.bf16.msra.mxu0 %v12088_v36  ;;  %9257 = vmatpush1.bf16.msra.mxu1 %v12090_v45 }
0x1020   : > { %9227 = vmatprep.subr.bf16.mxu0 %v12094_v15  ;;  %9259 = vmatprep.subr.bf16.mxu1 %v12096_v16 }
0x1023   : > { %9229 = vmatpush1.bf16.msra.mxu0 %v12100_v24  ;;  %9261 = vmatpush1.bf16.msra.mxu1 %v12102_v55 }
0x1024   : > { %9231 = vmatprep.subr.bf16.mxu0 %v12106_v49  ;;  %9263 = vmatprep.subr.bf16.mxu1 %v12108_v7 }
0x1027   : > { %9233 = vmatpush1.bf16.msra.mxu0 %v12112_v31  ;;  %9265 = vmatpush1.bf16.msra.mxu1 %v12114_v52 }
0x1028   : > { %9235 = vmatprep.subr.bf16.mxu0 %v12118_v10  ;;  %9267 = vmatprep.subr.bf16.mxu1 %v12120_v54 }
0x102b   : > { %9237 = vmatpush1.bf16.msra.mxu0 %v12124_v51  ;;  %9269 = vmatpush1.bf16.msra.mxu1 %v12126_v21 }
0x10e1   : > { %v4394_v28 = vpop.f32.mrb[34].mxu0  ;;  %v4465_v19 = vpop.f32.mrb[34].mxu1 }
0x10e2   : > { %v4395_v29 = vadd.f32 %v4394_v28, %v12174_v9  ;;  %v4396_v44 = vpop.f32.mrb[35].mxu0  ;;  %v4467_v8 = vpop.f32.mrb[35].mxu1  ;;  %v4466_v14 = vadd.f32 %v4465_v19, %v12183_v35 }
0x10e3   : > { %v4397_v4 = vadd.f32 %v4396_v44, %v12177_v34  ;;  %v4468_v43 = vadd.f32 %v4467_v8, %v12186_v57  ;;  %v4731_v8 = vld [vmem:[#allocation5 + $0x408] sm:$0xff] }
0x10e4   : > { %v7978_v47 = vmul.f32 -1.442695, %v4395_v29  ;;  %v7980_v22 = vmul.f32 -1.442695, %v4466_v14  ;;  %v7982_v29 = vld [vmem:[%s11230_s23 + $0x10] sm:$0xff] }
0x10e5   : > { %v7979_v39 = vmul.f32 -1.442695, %v4397_v4  ;;  %v4735_v4 = vld [vmem:[#allocation5 + $0x428] sm:$0xff] }
0x10e6   : > { %10452 = vpow2.f32 %v7978_v47  ;;  %v12240_v47 = vpack.c.bf16 %v4735_v4, %v4731_v8  ;;  %v4986_v4 = vld [vmem:[#allocation5 + $0x4b8] sm:$0xff] }
0x10e7   : > { %10454 = vpow2.f32 %v7979_v39  ;;  %v4737_v39 = vld [vmem:[#allocation5 + $0x438] sm:$0xff] }
0x10e8   : > { %10456 = vtanh.f32 %v4468_v43  ;;  %9271 = vmatprep.subr.bf16.mxu0 %v12240_v47  ;;  %v4965_v43 = vld [vmem:[#allocation5 + $0x410] sm:$0xff] }
0x10e9   : > { %10458 = vpow2.f32 %v7980_v22 }
0x10f0   : > { %v10453_v20 = vpop.eup %10452 }
0x10f1   : > { %v4479_v3 = vadd.f32 1.0, %v10453_v20  ;;  %v10455_v27 = vpop.eup %10454  ;;  %v4969_v20 = vld [vmem:[#allocation5 + $0x430] sm:$0xff] }
0x10f2   : > { %v4480_v46 = vadd.f32 1.0, %v10455_v27  ;;  %v10457_v48 = vpop.eup %10456  ;;  %v4972_v27 = vld [vmem:[#allocation5 + $0x448] sm:$0xff] }
0x10f3   : > { %10460 = vrcp.f32 %v4479_v3  ;;  %v10459_v62 = vpop.eup %10458  ;;  %v12292_v3 = vpack.c.bf16 %v4969_v20, %v4965_v43  ;;  %v5004_v43 = vld [vmem:[#allocation5 + $0x548] sm:$0xff] }
0x10f4   : > { %10462 = vrcp.f32 %v4480_v46  ;;  %v4481_v6 = vadd.f32 1.0, %v10459_v62  ;;  %v4976_v46 = vld [vmem:[#allocation5 + $0x468] sm:$0xff] }
0x10f5   : > { %v12296_v62 = vpack.c.bf16 %v4976_v46, %v4972_v27  ;;  %v5008_v20 = vld [vmem:[#allocation5 + $0x568] sm:$0xff]  ;;  %v5006_v27 = vld [vmem:[#allocation5 + $0x558] sm:$0xff] }
0x10f6   : > { %10464 = vrcp.f32 %v4481_v6  ;;  %v12344_v46 = vpack.c.bf16 %v5008_v20, %v5004_v43 }
0x10fd   : > { %v10461_v59 = vpop.eup %10460 }
0x10fe   : > { %v4490_v37 = vmul.f32 %v10461_v59, %v10457_v48  ;;  %v10463_v41 = vpop.eup %10462  ;;  %v4974_v48 = vld [vmem:[#allocation5 + $0x458] sm:$0xff] }
0x10ff   : > { %v4489_v33 = vmul.f32 %v10463_v41, %v12191_v30  ;;  %v4733_v30 = vld [vmem:[#allocation5 + $0x418] sm:$0xff]  ;;  %v4975_v41 = vld [vmem:[#allocation5 + $0x460] sm:$0xff] }
0x1100   : > { %v10465_v58 = vpop.eup %10464  ;;  %v12242_v14 = vpack.c.bf16 %v4737_v39, %v4733_v30  ;;  %v4978_v59 = vld [vmem:[#allocation5 + $0x478] sm:$0xff]  ;;  %v4979_v30 = vld [vmem:[#allocation5 + $0x480] sm:$0xff] }
0x1101   : > { %v12233_v32 = vadd.f32 %v4490_v37, %v4489_v33  ;;  %v4971_v37 = vld [vmem:[#allocation5 + $0x440] sm:$0xff]  ;;  %v12298_v6 = vpack.c.bf16 %v4978_v59, %v4974_v48  ;;  %v5010_v48 = vld [vmem:[#allocation5 + $0x578] sm:$0xff] }
0x1102   : > { %9303 = vmatprep.subr.bf16.mxu1 %v12242_v14  ;;  %v12300_v33 = vpack.c.bf16 %v4975_v41, %v4971_v37  ;;  %v4983_v39 = vld [vmem:[#allocation5 + $0x4a0] sm:$0xff]  ;;  %v12346_v41 = vpack.c.bf16 %v5010_v48, %v5006_v27 }
0x1103   : > { %10466 = vtanh.f32 %v12233_v32  ;;  %v5003_v59 = vld [vmem:[#allocation5 + $0x540] sm:$0xff] }
0x1104   : > { %v5007_v37 = vld [vmem:[#allocation5 + $0x560] sm:$0xff] }
0x110d   : > { %v10467_v28 = vpop.eup %10466 }
0x110e   : > { %v4493_v19 = vmul.f32 %v10467_v28, %v10465_v58  ;;  %v4977_v58 = vld [vmem:[#allocation5 + $0x470] sm:$0xff] }
0x1110   : > { %7981 = vst [vmem:[%s11230_s23 + $0x8] sm:$0xff] %v4493_v19  ;;  %v4496_v44 = vadd.f32 %v7982_v29, %v4493_v19  ;;  %v4980_v19 = vld [vmem:[#allocation5 + $0x488] sm:$0xff] }
0x1111   : > { %v4984_v29 = vld [vmem:[#allocation5 + $0x4a8] sm:$0xff] }
0x1112   : > { %4626 = vmatmul.mubr.f32.vlgmr.msra.gmra.mrb[36].mxu0 %v4496_v44  ;;  %4697 = vmatmul.mubr.f32.vlgmr.msra.gmra.mrb[36].mxu1 %v4496_v44  ;;  %v4982_v44 = vld [vmem:[#allocation5 + $0x498] sm:$0xff]  ;;  %v12308_v8 = vpack.c.bf16 %v4984_v29, %v4980_v19  ;;  %v5009_v19 = vld [vmem:[#allocation5 + $0x570] sm:$0xff]  ;;  %v5012_v29 = vld [vmem:[#allocation5 + $0x588] sm:$0xff] }
0x1113   : > { %4858 = vmatprep.mubr.f32.mxu0 %v10860_v0  ;;  %4929 = vmatprep.mubr.f32.mxu1 %v10860_v0 }
0x1114   : > { %9273 = vmatpush1.bf16.msra.mxu0 %v12039_v40  ;;  %9305 = vmatpush1.bf16.msra.mxu1 %v12041_v1 }
0x1115   : > { %9275 = vmatprep.subr.bf16.mxu0 %v12044_v2  ;;  %9307 = vmatprep.subr.bf16.mxu1 %v12046_v61 }
0x1118   : > { %9277 = vmatpush1.bf16.msra.mxu0 %v12050_v18  ;;  %9309 = vmatpush1.bf16.msra.mxu1 %v12052_v5 }
0x1119   : > { %9279 = vmatprep.subr.bf16.mxu0 %v12056_v11  ;;  %9311 = vmatprep.subr.bf16.mxu1 %v12058_v50 }
0x111c   : > { %9281 = vmatpush1.bf16.msra.mxu0 %v12064_v13  ;;  %9313 = vmatpush1.bf16.msra.mxu1 %v12066_v63 }
0x111d   : > { %9283 = vmatprep.subr.bf16.mxu0 %v12070_v26  ;;  %9315 = vmatprep.subr.bf16.mxu1 %v12072_v38 }
0x1120   : > { %9285 = vmatpush1.bf16.msra.mxu0 %v12076_v17  ;;  %9317 = vmatpush1.bf16.msra.mxu1 %v12078_v23 }
0x1121   : > { %9287 = vmatprep.subr.bf16.mxu0 %v12082_v25  ;;  %9319 = vmatprep.subr.bf16.mxu1 %v12084_v42 }
0x1124   : > { %9289 = vmatpush1.bf16.msra.mxu0 %v12088_v36  ;;  %9321 = vmatpush1.bf16.msra.mxu1 %v12090_v45 }
0x1125   : > { %9291 = vmatprep.subr.bf16.mxu0 %v12094_v15  ;;  %9323 = vmatprep.subr.bf16.mxu1 %v12096_v16 }
0x1128   : > { %9293 = vmatpush1.bf16.msra.mxu0 %v12100_v24  ;;  %9325 = vmatpush1.bf16.msra.mxu1 %v12102_v55 }
0x1129   : > { %9295 = vmatprep.subr.bf16.mxu0 %v12106_v49  ;;  %9327 = vmatprep.subr.bf16.mxu1 %v12108_v7 }
0x112c   : > { %9297 = vmatpush1.bf16.msra.mxu0 %v12112_v31  ;;  %9329 = vmatpush1.bf16.msra.mxu1 %v12114_v52 }
0x112d   : > { %9299 = vmatprep.subr.bf16.mxu0 %v12118_v10  ;;  %9331 = vmatprep.subr.bf16.mxu1 %v12120_v54  ;;  %v7987_v10 = vld [vmem:[%s11230_s23 + $0x18] sm:$0xff] }
0x1130   : > { %9301 = vmatpush1.bf16.msra.mxu0 %v12124_v51  ;;  %9333 = vmatpush1.bf16.msra.mxu1 %v12126_v21  ;;  %v4963_v51 = vld [vmem:[#allocation5 + $0x400] sm:$0xff] }
0x1131   : > { %9335 = vmatprep.subr.bf16.mxu0 %v12240_v47  ;;  %9367 = vmatprep.subr.bf16.mxu1 %v12242_v14  ;;  %v4967_v21 = vld [vmem:[#allocation5 + $0x420] sm:$0xff] }
0x1132   : > { %v12290_v22 = vpack.c.bf16 %v4967_v21, %v4963_v51  ;;  %v5001_v51 = vld [vmem:[#allocation5 + $0x530] sm:$0xff] }
0x11e5   : > { %v4627_v40 = vpop.f32.mrb[36].mxu0  ;;  %v4698_v1 = vpop.f32.mrb[36].mxu1 }
0x11e6   : > { %v4628_v2 = vadd.f32 %v4627_v40, %v12174_v9  ;;  %v4629_v61 = vpop.f32.mrb[37].mxu0  ;;  %v4700_v18 = vpop.f32.mrb[37].mxu1  ;;  %v4699_v13 = vadd.f32 %v4698_v1, %v12183_v35  ;;  %v12310_v40 = vpack.c.bf16 %v4986_v4, %v4982_v44  ;;  %v12312_v1 = vpack.c.bf16 %v4983_v39, %v4979_v30  ;;  %v5016_v4 = vld [vmem:[#allocation5 + $0x5a8] sm:$0xff]  ;;  %v5014_v30 = vld [vmem:[#allocation5 + $0x598] sm:$0xff] }
0x11e7   : > { %v4630_v5 = vadd.f32 %v4629_v61, %v12177_v34  ;;  %v4701_v63 = vadd.f32 %v4700_v18, %v12186_v57  ;;  %v4985_v61 = vld [vmem:[#allocation5 + $0x4b0] sm:$0xff]  ;;  %v5018_v39 = vld [vmem:[#allocation5 + $0x5b8] sm:$0xff] }
0x11e8   : > { %v7983_v11 = vmul.f32 -1.442695, %v4628_v2  ;;  %v7985_v26 = vmul.f32 -1.442695, %v4699_v13  ;;  %v4981_v2 = vld [vmem:[#allocation5 + $0x490] sm:$0xff] }
0x11e9   : > { %v7984_v50 = vmul.f32 -1.442695, %v4630_v5  ;;  %v12315_v18 = vpack.c.bf16 %v4985_v61, %v4981_v2  ;;  %v4988_v5 = vld [vmem:[#allocation5 + $0x4c8] sm:$0xff]  ;;  %v12355_v2 = vpack.c.bf16 %v5016_v4, %v5012_v29  ;;  %v12357_v61 = vpack.c.bf16 %v5018_v39, %v5014_v30 }
0x11ea   : > { %10468 = vpow2.f32 %v7983_v11  ;;  %v4992_v11 = vld [vmem:[#allocation5 + $0x4e8] sm:$0xff] }
0x11eb   : > { %10470 = vpow2.f32 %v7984_v50  ;;  %v4990_v50 = vld [vmem:[#allocation5 + $0x4d8] sm:$0xff]  ;;  %v12320_v13 = vpack.c.bf16 %v4992_v11, %v4988_v5  ;;  %v5011_v5 = vld [vmem:[#allocation5 + $0x580] sm:$0xff] }
0x11ec   : > { %10472 = vtanh.f32 %v4701_v63  ;;  %v4994_v63 = vld [vmem:[#allocation5 + $0x4f8] sm:$0xff]  ;;  %v5015_v11 = vld [vmem:[#allocation5 + $0x5a0] sm:$0xff] }
0x11ed   : > { %10474 = vpow2.f32 %v7985_v26  ;;  %v4987_v26 = vld [vmem:[#allocation5 + $0x4c0] sm:$0xff] }
0x11f4   : > { %v10469_v38 = vpop.eup %10468 }
0x11f5   : > { %v4712_v17 = vadd.f32 1.0, %v10469_v38  ;;  %v10471_v23 = vpop.eup %10470  ;;  %v4991_v38 = vld [vmem:[#allocation5 + $0x4e0] sm:$0xff] }
0x11f6   : > { %v4713_v25 = vadd.f32 1.0, %v10471_v23  ;;  %v10473_v42 = vpop.eup %10472  ;;  %v12324_v23 = vpack.c.bf16 %v4991_v38, %v4987_v26  ;;  %v5017_v26 = vld [vmem:[#allocation5 + $0x5b0] sm:$0xff]  ;;  %v5020_v38 = vld [vmem:[#allocation5 + $0x5c8] sm:$0xff] }
0x11f7   : > { %10476 = vrcp.f32 %v4712_v17  ;;  %v10475_v36 = vpop.eup %10474  ;;  %v12322_v17 = vpack.c.bf16 %v4994_v63, %v4990_v50  ;;  %v5013_v50 = vld [vmem:[#allocation5 + $0x590] sm:$0xff]  ;;  %v12360_v63 = vpack.c.bf16 %v5015_v11, %v5011_v5 }
0x11f8   : > { %10478 = vrcp.f32 %v4713_v25  ;;  %v4714_v24 = vadd.f32 1.0, %v10475_v36  ;;  %v4989_v25 = vld [vmem:[#allocation5 + $0x4d0] sm:$0xff] }
0x11fa   : > { %10480 = vrcp.f32 %v4714_v24 }
0x1201   : > { %v10477_v45 = vpop.eup %10476 }
0x1202   : > { %v4723_v15 = vmul.f32 %v10477_v45, %v10473_v42  ;;  %v10479_v16 = vpop.eup %10478  ;;  %v4993_v42 = vld [vmem:[#allocation5 + $0x4f0] sm:$0xff]  ;;  %v4996_v45 = vld [vmem:[#allocation5 + $0x508] sm:$0xff] }
0x1203   : > { %v4722_v55 = vmul.f32 %v10479_v16, %v12233_v32  ;;  %v4973_v32 = vld [vmem:[#allocation5 + $0x450] sm:$0xff]  ;;  %v12327_v36 = vpack.c.bf16 %v4993_v42, %v4989_v25  ;;  %v4998_v16 = vld [vmem:[#allocation5 + $0x518] sm:$0xff]  ;;  %v5024_v25 = vld [vmem:[#allocation5 + $0x5e8] sm:$0xff]  ;;  %v12364_v42 = vpack.c.bf16 %v5017_v26, %v5013_v50 }
0x1204   : > { %v10481_v7 = vpop.eup %10480  ;;  %v12303_v28 = vpack.c.bf16 %v4977_v58, %v4973_v32  ;;  %v12348_v32 = vpack.c.bf16 %v5007_v37, %v5003_v59  ;;  %v5005_v58 = vld [vmem:[#allocation5 + $0x550] sm:$0xff] }
0x1205   : > { %v12283_v49 = vadd.f32 %v4723_v15, %v4722_v55  ;;  %v5000_v15 = vld [vmem:[#allocation5 + $0x528] sm:$0xff]  ;;  %v5002_v55 = vld [vmem:[#allocation5 + $0x538] sm:$0xff]  ;;  %v12351_v44 = vpack.c.bf16 %v5009_v19, %v5005_v58 }
0x1206   : > { %v12332_v24 = vpack.c.bf16 %v5000_v15, %v4996_v45  ;;  %v12366_v45 = vpack.c.bf16 %v5024_v25, %v5020_v38  ;;  %v5022_v15 = vld [vmem:[#allocation5 + $0x5d8] sm:$0xff] }
0x1207   : > { %10482 = vtanh.f32 %v12283_v49 }
0x1211   : > { %v10483_v31 = vpop.eup %10482 }
0x1212   : > { %v4726_v52 = vmul.f32 %v10483_v31, %v10481_v7  ;;  %v4995_v7 = vld [vmem:[#allocation5 + $0x500] sm:$0xff] }
0x1213   : > { %v4999_v31 = vld [vmem:[#allocation5 + $0x520] sm:$0xff] }
0x1214   : > { %7986 = vst [vmem:[%s11230_s23 + $0x10] sm:$0xff] %v4726_v52  ;;  %v4729_v54 = vadd.f32 %v7987_v10, %v4726_v52  ;;  %v12334_v52 = vpack.c.bf16 %v5002_v55, %v4998_v16  ;;  %v12336_v10 = vpack.c.bf16 %v4999_v31, %v4995_v7  ;;  %v5026_v16 = vld [vmem:[#allocation5 + $0x5f8] sm:$0xff]  ;;  %v5019_v55 = vld [vmem:[#allocation5 + $0x5c0] sm:$0xff] }
0x1215   : > { %v12368_v7 = vpack.c.bf16 %v5026_v16, %v5022_v15  ;;  %v5023_v31 = vld [vmem:[#allocation5 + $0x5e0] sm:$0xff] }
0x1216   : > { %4859 = vmatmul.mubr.f32.vlgmr.msra.gmra.mrb[38].mxu0 %v4729_v54  ;;  %4930 = vmatmul.mubr.f32.vlgmr.msra.gmra.mrb[38].mxu1 %v4729_v54  ;;  %v4997_v54 = vld [vmem:[#allocation5 + $0x510] sm:$0xff]  ;;  %v12371_v43 = vpack.c.bf16 %v5023_v31, %v5019_v55 }
0x1217   : > { %5091 = vmatprep.mubr.f32.mxu0 %v10860_v0  ;;  %5162 = vmatprep.mubr.f32.mxu1 %v10860_v0  ;;  %v12339_v21 = vpack.c.bf16 %v5001_v51, %v4997_v54  ;;  %v5021_v54 = vld [vmem:[#allocation5 + $0x5d0] sm:$0xff] }
0x1218   : > { %9337 = vmatpush1.bf16.msra.mxu0 %v12290_v22  ;;  %9369 = vmatpush1.bf16.msra.mxu1 %v12292_v3  ;;  %v5025_v51 = vld [vmem:[#allocation5 + $0x5f0] sm:$0xff] }
0x1219   : > { %9339 = vmatprep.subr.bf16.mxu0 %v12296_v62  ;;  %9371 = vmatprep.subr.bf16.mxu1 %v12298_v6  ;;  %v12375_v20 = vpack.c.bf16 %v5025_v51, %v5021_v54 }
0x121c   : > { %9341 = vmatpush1.bf16.msra.mxu0 %v12300_v33  ;;  %9373 = vmatpush1.bf16.msra.mxu1 %v12303_v28 }
0x121d   : > { %9343 = vmatprep.subr.bf16.mxu0 %v12308_v8  ;;  %9375 = vmatprep.subr.bf16.mxu1 %v12310_v40 }
0x1220   : > { %9345 = vmatpush1.bf16.msra.mxu0 %v12312_v1  ;;  %9377 = vmatpush1.bf16.msra.mxu1 %v12315_v18 }
0x1221   : > { %9347 = vmatprep.subr.bf16.mxu0 %v12320_v13  ;;  %9379 = vmatprep.subr.bf16.mxu1 %v12322_v17 }
0x1224   : > { %9349 = vmatpush1.bf16.msra.mxu0 %v12324_v23  ;;  %9381 = vmatpush1.bf16.msra.mxu1 %v12327_v36 }
0x1225   : > { %9351 = vmatprep.subr.bf16.mxu0 %v12332_v24  ;;  %9383 = vmatprep.subr.bf16.mxu1 %v12334_v52 }
0x1228   : > { %9353 = vmatpush1.bf16.msra.mxu0 %v12336_v10  ;;  %9385 = vmatpush1.bf16.msra.mxu1 %v12339_v21 }
0x1229   : > { %9355 = vmatprep.subr.bf16.mxu0 %v12344_v46  ;;  %9387 = vmatprep.subr.bf16.mxu1 %v12346_v41 }
0x122c   : > { %9357 = vmatpush1.bf16.msra.mxu0 %v12348_v32  ;;  %9389 = vmatpush1.bf16.msra.mxu1 %v12351_v44 }
0x122d   : > { %9359 = vmatprep.subr.bf16.mxu0 %v12355_v2  ;;  %9391 = vmatprep.subr.bf16.mxu1 %v12357_v61 }
0x1230   : > { %9361 = vmatpush1.bf16.msra.mxu0 %v12360_v63  ;;  %9393 = vmatpush1.bf16.msra.mxu1 %v12364_v42 }
0x1231   : > { %9363 = vmatprep.subr.bf16.mxu0 %v12366_v45  ;;  %9395 = vmatprep.subr.bf16.mxu1 %v12368_v7 }
0x1234   : > { %9365 = vmatpush1.bf16.msra.mxu0 %v12371_v43  ;;  %9397 = vmatpush1.bf16.msra.mxu1 %v12375_v20 }
0x1235   : > { %9399 = vmatprep.subr.bf16.mxu0 %v12240_v47  ;;  %9431 = vmatprep.subr.bf16.mxu1 %v12242_v14 }
0x12e9   : > { %v4860_v27 = vpop.f32.mrb[38].mxu0  ;;  %v4931_v48 = vpop.f32.mrb[38].mxu1 }
0x12ea   : > { %v4861_v59 = vadd.f32 %v4860_v27, %v12174_v9  ;;  %v4862_v37 = vpop.f32.mrb[39].mxu0  ;;  %v4933_v58 = vpop.f32.mrb[39].mxu1  ;;  %v4932_v30 = vadd.f32 %v4931_v48, %v12183_v35 }
0x12eb   : > { %v4863_v19 = vadd.f32 %v4862_v37, %v12177_v34  ;;  %v4934_v39 = vadd.f32 %v4933_v58, %v12186_v57  ;;  %v7992_v58 = vld [vmem:[%s11230_s23 + $0x20] sm:$0xff] }
0x12ec   : > { %v7988_v29 = vmul.f32 -1.442695, %v4861_v59  ;;  %v7990_v5 = vmul.f32 -1.442695, %v4932_v30 }
0x12ed   : > { %v7989_v4 = vmul.f32 -1.442695, %v4863_v19 }
0x12ee   : > { %10484 = vpow2.f32 %v7988_v29 }
0x12ef   : > { %10486 = vpow2.f32 %v7989_v4 }
0x12f0   : > { %10488 = vtanh.f32 %v4934_v39 }
0x12f1   : > { %10490 = vpow2.f32 %v7990_v5 }
0x12f8   : > { %v10485_v11 = vpop.eup %10484 }
0x12f9   : > { %v4945_v50 = vadd.f32 1.0, %v10485_v11  ;;  %v10487_v26 = vpop.eup %10486 }
0x12fa   : > { %v4946_v38 = vadd.f32 1.0, %v10487_v26  ;;  %v10489_v25 = vpop.eup %10488 }
0x12fb   : > { %10492 = vrcp.f32 %v4945_v50  ;;  %v10491_v15 = vpop.eup %10490 }
0x12fc   : > { %10494 = vrcp.f32 %v4946_v38  ;;  %v4947_v54 = vadd.f32 1.0, %v10491_v15 }
0x12fe   : > { %10496 = vrcp.f32 %v4947_v54 }
0x1305   : > { %v10493_v16 = vpop.eup %10492 }
0x1306   : > { %v4956_v55 = vmul.f32 %v10493_v16, %v10489_v25  ;;  %v10495_v31 = vpop.eup %10494 }
0x1307   : > { %v4955_v51 = vmul.f32 %v10495_v31, %v12283_v49 }
0x1308   : > { %v10497_v48 = vpop.eup %10496 }
0x1309   : > { %v12387_v27 = vadd.f32 %v4956_v55, %v4955_v51 }
0x130b   : > { %10498 = vtanh.f32 %v12387_v27 }
0x1315   : > { %v10499_v59 = vpop.eup %10498 }
0x1316   : > { %v4959_v37 = vmul.f32 %v10499_v59, %v10497_v48 }
0x1318   : > { %7991 = vst [vmem:[%s11230_s23 + $0x18] sm:$0xff] %v4959_v37  ;;  %v4962_v19 = vadd.f32 %v7992_v58, %v4959_v37 }
0x131a   : > { %5092 = vmatmul.mubr.f32.vlgmr.msra.gmra.mrb[40].mxu0 %v4962_v19  ;;  %5163 = vmatmul.mubr.f32.vlgmr.msra.gmra.mrb[40].mxu1 %v4962_v19 }
0x131b   : > { %9401 = vmatpush1.bf16.msra.mxu0 %v12290_v22  ;;  %9433 = vmatpush1.bf16.msra.mxu1 %v12292_v3 }
0x131c   : > { %9403 = vmatprep.subr.bf16.mxu0 %v12296_v62  ;;  %9435 = vmatprep.subr.bf16.mxu1 %v12298_v6 }
0x131d   : > { %5324 = vmatprep.mubr.f32.mxu0 %v10860_v0  ;;  %5395 = vmatprep.mubr.f32.mxu1 %v10860_v0 }
0x131f   : > { %9405 = vmatpush1.bf16.msra.mxu0 %v12300_v33  ;;  %9437 = vmatpush1.bf16.msra.mxu1 %v12303_v28 }
0x1320   : > { %9407 = vmatprep.subr.bf16.mxu0 %v12308_v8  ;;  %9439 = vmatprep.subr.bf16.mxu1 %v12310_v40 }
0x1323   : > { %9409 = vmatpush1.bf16.msra.mxu0 %v12312_v1  ;;  %9441 = vmatpush1.bf16.msra.mxu1 %v12315_v18 }
0x1324   : > { %9411 = vmatprep.subr.bf16.mxu0 %v12320_v13  ;;  %9443 = vmatprep.subr.bf16.mxu1 %v12322_v17 }
0x1327   : > { %9413 = vmatpush1.bf16.msra.mxu0 %v12324_v23  ;;  %9445 = vmatpush1.bf16.msra.mxu1 %v12327_v36 }
0x1328   : > { %9415 = vmatprep.subr.bf16.mxu0 %v12332_v24  ;;  %9447 = vmatprep.subr.bf16.mxu1 %v12334_v52 }
0x132b   : > { %9417 = vmatpush1.bf16.msra.mxu0 %v12336_v10  ;;  %9449 = vmatpush1.bf16.msra.mxu1 %v12339_v21 }
0x132c   : > { %9419 = vmatprep.subr.bf16.mxu0 %v12344_v46  ;;  %9451 = vmatprep.subr.bf16.mxu1 %v12346_v41 }
0x132f   : > { %9421 = vmatpush1.bf16.msra.mxu0 %v12348_v32  ;;  %9453 = vmatpush1.bf16.msra.mxu1 %v12351_v44 }
0x1330   : > { %9423 = vmatprep.subr.bf16.mxu0 %v12355_v2  ;;  %9455 = vmatprep.subr.bf16.mxu1 %v12357_v61 }
0x1333   : > { %9425 = vmatpush1.bf16.msra.mxu0 %v12360_v63  ;;  %9457 = vmatpush1.bf16.msra.mxu1 %v12364_v42 }
0x1334   : > { %9427 = vmatprep.subr.bf16.mxu0 %v12366_v45  ;;  %9459 = vmatprep.subr.bf16.mxu1 %v12368_v7 }
0x1337   : > { %9429 = vmatpush1.bf16.msra.mxu0 %v12371_v43  ;;  %9461 = vmatpush1.bf16.msra.mxu1 %v12375_v20 }
0x1338   : > { %9463 = vmatprep.subr.bf16.mxu0 %v12240_v47  ;;  %9495 = vmatprep.subr.bf16.mxu1 %v12242_v14 }
0x13ed   : > { %v5093_v49 = vpop.f32.mrb[40].mxu0  ;;  %v5164_v29 = vpop.f32.mrb[40].mxu1 }
0x13ee   : > { %v5094_v4 = vadd.f32 %v5093_v49, %v12174_v9  ;;  %v5095_v30 = vpop.f32.mrb[41].mxu0  ;;  %v5166_v39 = vpop.f32.mrb[41].mxu1  ;;  %v5165_v26 = vadd.f32 %v5164_v29, %v12183_v35 }
0x13ef   : > { %v5096_v5 = vadd.f32 %v5095_v30, %v12177_v34  ;;  %v5167_v38 = vadd.f32 %v5166_v39, %v12186_v57 }
0x13f0   : > { %v7993_v11 = vmul.f32 -1.442695, %v5094_v4  ;;  %v7995_v25 = vmul.f32 -1.442695, %v5165_v26  ;;  %v7997_v4 = vld [vmem:[%s11230_s23 + $0x28] sm:$0xff] }
0x13f1   : > { %v7994_v50 = vmul.f32 -1.442695, %v5096_v5 }
0x13f2   : > { %10500 = vpow2.f32 %v7993_v11 }
0x13f3   : > { %10502 = vpow2.f32 %v7994_v50 }
0x13f4   : > { %10504 = vtanh.f32 %v5167_v38 }
0x13f5   : > { %10506 = vpow2.f32 %v7995_v25 }
0x13fc   : > { %v10501_v47 = vpop.eup %10500 }
0x13fd   : > { %v5178_v15 = vadd.f32 1.0, %v10501_v47  ;;  %v10503_v14 = vpop.eup %10502 }
0x13fe   : > { %v5179_v16 = vadd.f32 1.0, %v10503_v14  ;;  %v10505_v55 = vpop.eup %10504 }
0x13ff   : > { %10508 = vrcp.f32 %v5178_v15  ;;  %v10507_v31 = vpop.eup %10506 }
0x1400   : > { %10510 = vrcp.f32 %v5179_v16  ;;  %v5180_v59 = vadd.f32 1.0, %v10507_v31 }
0x1402   : > { %10512 = vrcp.f32 %v5180_v59 }
0x1409   : > { %v10509_v54 = vpop.eup %10508 }
0x140a   : > { %v5189_v51 = vmul.f32 %v10509_v54, %v10505_v55  ;;  %v10511_v48 = vpop.eup %10510 }
0x140b   : > { %v5188_v37 = vmul.f32 %v10511_v48, %v12387_v27 }
0x140c   : > { %v10513_v19 = vpop.eup %10512 }
0x140d   : > { %v12431_v58 = vadd.f32 %v5189_v51, %v5188_v37 }
0x140f   : > { %10514 = vtanh.f32 %v12431_v58 }
0x1419   : > { %v10515_v49 = vpop.eup %10514 }
0x141a   : > { %v5192_v29 = vmul.f32 %v10515_v49, %v10513_v19 }
0x141c   : > { %7996 = vst [vmem:[%s11230_s23 + $0x20] sm:$0xff] %v5192_v29  ;;  %v5195_v30 = vadd.f32 %v7997_v4, %v5192_v29 }
0x141e   : > { %5325 = vmatmul.mubr.f32.vlgmr.msra.gmra.mrb[42].mxu0 %v5195_v30  ;;  %5396 = vmatmul.mubr.f32.vlgmr.msra.gmra.mrb[42].mxu1 %v5195_v30 }
0x141f   : > { %9465 = vmatpush1.bf16.msra.mxu0 %v12290_v22  ;;  %9497 = vmatpush1.bf16.msra.mxu1 %v12292_v3 }
0x1420   : > { %9467 = vmatprep.subr.bf16.mxu0 %v12296_v62  ;;  %9499 = vmatprep.subr.bf16.mxu1 %v12298_v6 }
0x1421   : > { %5557 = vmatprep.mubr.f32.mxu0 %v10860_v0  ;;  %5628 = vmatprep.mubr.f32.mxu1 %v10860_v0 }
0x1423   : > { %9469 = vmatpush1.bf16.msra.mxu0 %v12300_v33  ;;  %9501 = vmatpush1.bf16.msra.mxu1 %v12303_v28 }
0x1424   : > { %9471 = vmatprep.subr.bf16.mxu0 %v12308_v8  ;;  %9503 = vmatprep.subr.bf16.mxu1 %v12310_v40 }
0x1427   : > { %9473 = vmatpush1.bf16.msra.mxu0 %v12312_v1  ;;  %9505 = vmatpush1.bf16.msra.mxu1 %v12315_v18 }
0x1428   : > { %9475 = vmatprep.subr.bf16.mxu0 %v12320_v13  ;;  %9507 = vmatprep.subr.bf16.mxu1 %v12322_v17 }
0x142b   : > { %9477 = vmatpush1.bf16.msra.mxu0 %v12324_v23  ;;  %9509 = vmatpush1.bf16.msra.mxu1 %v12327_v36 }
0x142c   : > { %9479 = vmatprep.subr.bf16.mxu0 %v12332_v24  ;;  %9511 = vmatprep.subr.bf16.mxu1 %v12334_v52 }
0x142f   : > { %9481 = vmatpush1.bf16.msra.mxu0 %v12336_v10  ;;  %9513 = vmatpush1.bf16.msra.mxu1 %v12339_v21 }
0x1430   : > { %9483 = vmatprep.subr.bf16.mxu0 %v12344_v46  ;;  %9515 = vmatprep.subr.bf16.mxu1 %v12346_v41 }
0x1433   : > { %9485 = vmatpush1.bf16.msra.mxu0 %v12348_v32  ;;  %9517 = vmatpush1.bf16.msra.mxu1 %v12351_v44 }
0x1434   : > { %9487 = vmatprep.subr.bf16.mxu0 %v12355_v2  ;;  %9519 = vmatprep.subr.bf16.mxu1 %v12357_v61 }
0x1437   : > { %9489 = vmatpush1.bf16.msra.mxu0 %v12360_v63  ;;  %9521 = vmatpush1.bf16.msra.mxu1 %v12364_v42 }
0x1438   : > { %9491 = vmatprep.subr.bf16.mxu0 %v12366_v45  ;;  %9523 = vmatprep.subr.bf16.mxu1 %v12368_v7 }
0x143b   : > { %9493 = vmatpush1.bf16.msra.mxu0 %v12371_v43  ;;  %9525 = vmatpush1.bf16.msra.mxu1 %v12375_v20 }
0x14f1   : > { %v5326_v27 = vpop.f32.mrb[42].mxu0  ;;  %v5397_v39 = vpop.f32.mrb[42].mxu1 }
0x14f2   : > { %v5327_v5 = vadd.f32 %v5326_v27, %v12174_v9  ;;  %v5328_v11 = vpop.f32.mrb[43].mxu0  ;;  %v5399_v50 = vpop.f32.mrb[43].mxu1  ;;  %v5398_v47 = vadd.f32 %v5397_v39, %v12183_v35 }
0x14f3   : > { %v5329_v26 = vadd.f32 %v5328_v11, %v12177_v34  ;;  %v5400_v15 = vadd.f32 %v5399_v50, %v12186_v57  ;;  %v5663_v50 = vld [vmem:[#allocation5 + $0x408] sm:$0xff] }
0x14f4   : > { %v7998_v38 = vmul.f32 -1.442695, %v5327_v5  ;;  %v8000_v14 = vmul.f32 -1.442695, %v5398_v47  ;;  %v8002_v5 = vld [vmem:[%s11230_s23 + $0x30] sm:$0xff] }
0x14f5   : > { %v7999_v25 = vmul.f32 -1.442695, %v5329_v26  ;;  %v5667_v26 = vld [vmem:[#allocation5 + $0x428] sm:$0xff] }
0x14f6   : > { %10516 = vpow2.f32 %v7998_v38  ;;  %v9526_v38 = vpack.c.bf16 %v5667_v26, %v5663_v50  ;;  %v5933_v50 = vld [vmem:[#allocation5 + $0x670] sm:$0xff]  ;;  %v5936_v26 = vld [vmem:[#allocation5 + $0x688] sm:$0xff] }
0x14f7   : > { %10518 = vpow2.f32 %v7999_v25  ;;  %v5669_v25 = vld [vmem:[#allocation5 + $0x438] sm:$0xff] }
0x14f8   : > { %10520 = vtanh.f32 %v5400_v15  ;;  %9527 = vmatprep.subr.bf16.mxu0 %v9526_v38  ;;  %v5923_v15 = vld [vmem:[#allocation5 + $0x620] sm:$0xff]  ;;  %v5938_v38 = vld [vmem:[#allocation5 + $0x698] sm:$0xff] }
0x14f9   : > { %10522 = vpow2.f32 %v8000_v14 }
0x1500   : > { %v10517_v16 = vpop.eup %10516 }
0x1501   : > { %v5411_v55 = vadd.f32 1.0, %v10517_v16  ;;  %v10519_v31 = vpop.eup %10518  ;;  %v5921_v16 = vld [vmem:[#allocation5 + $0x610] sm:$0xff] }
0x1502   : > { %v5412_v54 = vadd.f32 1.0, %v10519_v31  ;;  %v10521_v51 = vpop.eup %10520  ;;  %v5928_v31 = vld [vmem:[#allocation5 + $0x648] sm:$0xff] }
0x1503   : > { %10524 = vrcp.f32 %v5411_v55  ;;  %v10523_v48 = vpop.eup %10522  ;;  %v5925_v55 = vld [vmem:[#allocation5 + $0x630] sm:$0xff] }
0x1504   : > { %10526 = vrcp.f32 %v5412_v54  ;;  %v5413_v49 = vadd.f32 1.0, %v10523_v48  ;;  %v5930_v48 = vld [vmem:[#allocation5 + $0x658] sm:$0xff] }
0x1506   : > { %10528 = vrcp.f32 %v5413_v49 }
0x150d   : > { %v10525_v59 = vpop.eup %10524 }
0x150e   : > { %v5422_v37 = vmul.f32 %v10525_v59, %v10521_v51  ;;  %v10527_v19 = vpop.eup %10526  ;;  %v5932_v51 = vld [vmem:[#allocation5 + $0x668] sm:$0xff]  ;;  %v5934_v59 = vld [vmem:[#allocation5 + $0x678] sm:$0xff] }
0x150f   : > { %v5421_v29 = vmul.f32 %v10527_v19, %v12431_v58  ;;  %v5665_v58 = vld [vmem:[#allocation5 + $0x418] sm:$0xff]  ;;  %v8007_v19 = vld [vmem:[%s11230_s23 + $0x38] sm:$0xff] }
0x1510   : > { %v10529_v30 = vpop.eup %10528  ;;  %v9558_v47 = vpack.c.bf16 %v5669_v25, %v5665_v58  ;;  %v5940_v58 = vld [vmem:[#allocation5 + $0x6a8] sm:$0xff]  ;;  %v5942_v25 = vld [vmem:[#allocation5 + $0x6b8] sm:$0xff] }
0x1511   : > { %v12473_v4 = vadd.f32 %v5422_v37, %v5421_v29  ;;  %v12527_v29 = vpack.c.bf16 %v5925_v55, %v5921_v16  ;;  %v5953_v16 = vld [vmem:[#allocation5 + $0x710] sm:$0xff] }
0x1512   : > { %9559 = vmatprep.subr.bf16.mxu1 %v9558_v47  ;;  %v5957_v55 = vld [vmem:[#allocation5 + $0x730] sm:$0xff] }
0x1513   : > { %10530 = vtanh.f32 %v12473_v4 }
0x151d   : > { %v10531_v27 = vpop.eup %10530 }
0x151e   : > { %v5425_v39 = vmul.f32 %v10531_v27, %v10529_v30  ;;  %v5931_v30 = vld [vmem:[#allocation5 + $0x660] sm:$0xff] }
0x1520   : > { %8001 = vst [vmem:[%s11230_s23 + $0x28] sm:$0xff] %v5425_v39  ;;  %v5428_v11 = vadd.f32 %v8002_v5, %v5425_v39  ;;  %v12530_v39 = vpack.c.bf16 %v5932_v51, %v5928_v31  ;;  %v12532_v5 = vpack.c.bf16 %v5934_v59, %v5930_v48  ;;  %v5960_v31 = vld [vmem:[#allocation5 + $0x748] sm:$0xff]  ;;  %v5962_v51 = vld [vmem:[#allocation5 + $0x758] sm:$0xff] }
0x1521   : > { %v5966_v48 = vld [vmem:[#allocation5 + $0x778] sm:$0xff] }
0x1522   : > { %5558 = vmatmul.mubr.f32.vlgmr.msra.gmra.mrb[44].mxu0 %v5428_v11  ;;  %5629 = vmatmul.mubr.f32.vlgmr.msra.gmra.mrb[44].mxu1 %v5428_v11  ;;  %v5929_v11 = vld [vmem:[#allocation5 + $0x650] sm:$0xff] }
0x1523   : > { %5790 = vmatprep.mubr.f32.mxu0 %v10860_v0  ;;  %5861 = vmatprep.mubr.f32.mxu1 %v10860_v0 }
0x1524   : > { %9529 = vmatpush1.bf16.msra.mxu0 %v12290_v22  ;;  %9561 = vmatpush1.bf16.msra.mxu1 %v12292_v3  ;;  %v5920_v22 = vld [vmem:[#allocation5 + $0x608] sm:$0xff] }
0x1525   : > { %9531 = vmatprep.subr.bf16.mxu0 %v12296_v62  ;;  %9563 = vmatprep.subr.bf16.mxu1 %v12298_v6  ;;  %v5924_v3 = vld [vmem:[#allocation5 + $0x628] sm:$0xff]  ;;  %v5922_v62 = vld [vmem:[#allocation5 + $0x618] sm:$0xff] }
0x1526   : > { %v5926_v6 = vld [vmem:[#allocation5 + $0x638] sm:$0xff] }
0x1528   : > { %9533 = vmatpush1.bf16.msra.mxu0 %v12300_v33  ;;  %9565 = vmatpush1.bf16.msra.mxu1 %v12303_v28  ;;  %v12507_v33 = vpack.c.bf16 %v5924_v3, %v5920_v22  ;;  %v12510_v28 = vpack.c.bf16 %v5926_v6, %v5922_v62  ;;  %v12538_v22 = vpack.c.bf16 %v5933_v50, %v5929_v11  ;;  %v5935_v3 = vld [vmem:[#allocation5 + $0x680] sm:$0xff]  ;;  %v5961_v11 = vld [vmem:[#allocation5 + $0x750] sm:$0xff] }
0x1529   : > { %9535 = vmatprep.subr.bf16.mxu0 %v12308_v8  ;;  %9567 = vmatprep.subr.bf16.mxu1 %v12310_v40  ;;  %v5939_v62 = vld [vmem:[#allocation5 + $0x6a0] sm:$0xff]  ;;  %v12542_v6 = vpack.c.bf16 %v5940_v58, %v5936_v26  ;;  %v5965_v50 = vld [vmem:[#allocation5 + $0x770] sm:$0xff]  ;;  %v5968_v26 = vld [vmem:[#allocation5 + $0x788] sm:$0xff] }
0x152a   : > { %v5972_v58 = vld [vmem:[#allocation5 + $0x7a8] sm:$0xff] }
0x152c   : > { %9537 = vmatpush1.bf16.msra.mxu0 %v12312_v1  ;;  %9569 = vmatpush1.bf16.msra.mxu1 %v12315_v18 }
0x152d   : > { %9539 = vmatprep.subr.bf16.mxu0 %v12320_v13  ;;  %9571 = vmatprep.subr.bf16.mxu1 %v12322_v17 }
0x1530   : > { %9541 = vmatpush1.bf16.msra.mxu0 %v12324_v23  ;;  %9573 = vmatpush1.bf16.msra.mxu1 %v12327_v36 }
0x1531   : > { %9543 = vmatprep.subr.bf16.mxu0 %v12332_v24  ;;  %9575 = vmatprep.subr.bf16.mxu1 %v12334_v52 }
0x1534   : > { %9545 = vmatpush1.bf16.msra.mxu0 %v12336_v10  ;;  %9577 = vmatpush1.bf16.msra.mxu1 %v12339_v21 }
0x1535   : > { %9547 = vmatprep.subr.bf16.mxu0 %v12344_v46  ;;  %9579 = vmatprep.subr.bf16.mxu1 %v12346_v41 }
0x1538   : > { %9549 = vmatpush1.bf16.msra.mxu0 %v12348_v32  ;;  %9581 = vmatpush1.bf16.msra.mxu1 %v12351_v44 }
0x1539   : > { %9551 = vmatprep.subr.bf16.mxu0 %v12355_v2  ;;  %9583 = vmatprep.subr.bf16.mxu1 %v12357_v61 }
0x153c   : > { %9553 = vmatpush1.bf16.msra.mxu0 %v12360_v63  ;;  %9585 = vmatpush1.bf16.msra.mxu1 %v12364_v42 }
0x153d   : > { %9555 = vmatprep.subr.bf16.mxu0 %v12366_v45  ;;  %9587 = vmatprep.subr.bf16.mxu1 %v12368_v7 }
0x1540   : > { %9557 = vmatpush1.bf16.msra.mxu0 %v12371_v43  ;;  %9589 = vmatpush1.bf16.msra.mxu1 %v12375_v20  ;;  %v5919_v20 = vld [vmem:[#allocation5 + $0x600] sm:$0xff] }
0x1541   : > { %9591 = vmatprep.subr.bf16.mxu0 %v12507_v33  ;;  %9623 = vmatprep.subr.bf16.mxu1 %v12510_v28  ;;  %v12525_v49 = vpack.c.bf16 %v5923_v15, %v5919_v20  ;;  %v5955_v20 = vld [vmem:[#allocation5 + $0x720] sm:$0xff] }
0x15f5   : > { %v5559_v8 = vpop.f32.mrb[44].mxu0  ;;  %v5630_v40 = vpop.f32.mrb[44].mxu1 }
0x15f6   : > { %v5560_v1 = vadd.f32 %v5559_v8, %v12174_v9  ;;  %v5561_v18 = vpop.f32.mrb[45].mxu0  ;;  %v5632_v13 = vpop.f32.mrb[45].mxu1  ;;  %v5631_v24 = vadd.f32 %v5630_v40, %v12183_v35  ;;  %v12544_v8 = vpack.c.bf16 %v5942_v25, %v5938_v38  ;;  %v5937_v40 = vld [vmem:[#allocation5 + $0x690] sm:$0xff]  ;;  %v5970_v38 = vld [vmem:[#allocation5 + $0x798] sm:$0xff] }
0x15f7   : > { %v5562_v17 = vadd.f32 %v5561_v18, %v12177_v34  ;;  %v5633_v52 = vadd.f32 %v5632_v13, %v12186_v57  ;;  %v5944_v18 = vld [vmem:[#allocation5 + $0x6c8] sm:$0xff]  ;;  %v5974_v25 = vld [vmem:[#allocation5 + $0x7b8] sm:$0xff] }
0x15f8   : > { %v8003_v23 = vmul.f32 -1.442695, %v5560_v1  ;;  %v8005_v10 = vmul.f32 -1.442695, %v5631_v24  ;;  %v5941_v1 = vld [vmem:[#allocation5 + $0x6b0] sm:$0xff]  ;;  %v5948_v13 = vld [vmem:[#allocation5 + $0x6e8] sm:$0xff] }
0x15f9   : > { %v8004_v36 = vmul.f32 -1.442695, %v5562_v17  ;;  %v5946_v17 = vld [vmem:[#allocation5 + $0x6d8] sm:$0xff]  ;;  %v12552_v24 = vpack.c.bf16 %v5941_v1, %v5937_v40  ;;  %v5967_v40 = vld [vmem:[#allocation5 + $0x780] sm:$0xff] }
0x15fa   : > { %10532 = vpow2.f32 %v8003_v23  ;;  %v5950_v23 = vld [vmem:[#allocation5 + $0x6f8] sm:$0xff]  ;;  %v5971_v1 = vld [vmem:[#allocation5 + $0x7a0] sm:$0xff] }
0x15fb   : > { %10534 = vpow2.f32 %v8004_v36  ;;  %v12550_v36 = vpack.c.bf16 %v5939_v62, %v5935_v3  ;;  %v12588_v62 = vpack.c.bf16 %v5965_v50, %v5961_v11 }
0x15fc   : > { %10536 = vtanh.f32 %v5633_v52  ;;  %v5943_v52 = vld [vmem:[#allocation5 + $0x6c0] sm:$0xff] }
0x15fd   : > { %10538 = vpow2.f32 %v8005_v10  ;;  %v5947_v10 = vld [vmem:[#allocation5 + $0x6e0] sm:$0xff] }
0x1604   : > { %v10533_v21 = vpop.eup %10532 }
0x1605   : > { %v5644_v46 = vadd.f32 1.0, %v10533_v21  ;;  %v10535_v41 = vpop.eup %10534  ;;  %v12556_v21 = vpack.c.bf16 %v5948_v13, %v5944_v18  ;;  %v12592_v18 = vpack.c.bf16 %v5972_v58, %v5968_v26  ;;  %v12594_v13 = vpack.c.bf16 %v5974_v25, %v5970_v38 }
0x1606   : > { %v5645_v32 = vadd.f32 1.0, %v10535_v41  ;;  %v10537_v44 = vpop.eup %10536  ;;  %v5945_v41 = vld [vmem:[#allocation5 + $0x6d0] sm:$0xff] }
0x1607   : > { %10540 = vrcp.f32 %v5644_v46  ;;  %v10539_v2 = vpop.eup %10538  ;;  %v12558_v46 = vpack.c.bf16 %v5950_v23, %v5946_v17  ;;  %v5969_v17 = vld [vmem:[#allocation5 + $0x790] sm:$0xff] }
0x1608   : > { %10542 = vrcp.f32 %v5645_v32  ;;  %v5646_v45 = vadd.f32 1.0, %v10539_v2  ;;  %v5949_v32 = vld [vmem:[#allocation5 + $0x6f0] sm:$0xff]  ;;  %v5956_v2 = vld [vmem:[#allocation5 + $0x728] sm:$0xff] }
0x1609   : > { %v5973_v23 = vld [vmem:[#allocation5 + $0x7b0] sm:$0xff] }
0x160a   : > { %10544 = vrcp.f32 %v5646_v45  ;;  %v12564_v45 = vpack.c.bf16 %v5949_v32, %v5945_v41  ;;  %v5978_v41 = vld [vmem:[#allocation5 + $0x7d8] sm:$0xff] }
0x160b   : > { %v5982_v32 = vld [vmem:[#allocation5 + $0x7f8] sm:$0xff] }
0x1611   : > { %v10541_v61 = vpop.eup %10540 }
0x1612   : > { %v5655_v63 = vmul.f32 %v10541_v61, %v10537_v44  ;;  %v10543_v42 = vpop.eup %10542  ;;  %v5952_v44 = vld [vmem:[#allocation5 + $0x708] sm:$0xff]  ;;  %v5954_v61 = vld [vmem:[#allocation5 + $0x718] sm:$0xff] }
0x1613   : > { %v5654_v7 = vmul.f32 %v10543_v42, %v12473_v4  ;;  %v5927_v4 = vld [vmem:[#allocation5 + $0x640] sm:$0xff]  ;;  %v12562_v42 = vpack.c.bf16 %v5947_v10, %v5943_v52  ;;  %v12568_v15 = vpack.c.bf16 %v5956_v2, %v5952_v44  ;;  %v5976_v52 = vld [vmem:[#allocation5 + $0x7c8] sm:$0xff]  ;;  %v12598_v44 = vpack.c.bf16 %v5971_v1, %v5967_v40 }
0x1614   : > { %v10545_v14 = vpop.eup %10544  ;;  %v12536_v47 = vpack.c.bf16 %v5931_v30, %v5927_v4  ;;  %v5963_v4 = vld [vmem:[#allocation5 + $0x760] sm:$0xff]  ;;  %v5980_v10 = vld [vmem:[#allocation5 + $0x7e8] sm:$0xff]  ;;  %v12600_v2 = vpack.c.bf16 %v5973_v23, %v5969_v17 }
0x1615   : > { %v12521_v43 = vadd.f32 %v5655_v63, %v5654_v7  ;;  %v5958_v63 = vld [vmem:[#allocation5 + $0x738] sm:$0xff]  ;;  %v5951_v7 = vld [vmem:[#allocation5 + $0x700] sm:$0xff] }
0x1616   : > { %v12574_v59 = vpack.c.bf16 %v5955_v20, %v5951_v7  ;;  %v12606_v7 = vpack.c.bf16 %v5982_v32, %v5978_v41  ;;  %v5979_v20 = vld [vmem:[#allocation5 + $0x7e0] sm:$0xff] }
0x1617   : > { %10546 = vtanh.f32 %v12521_v43 }
0x1621   : > { %v10547_v54 = vpop.eup %10546 }
0x1622   : > { %v5658_v37 = vmul.f32 %v10547_v54, %v10545_v14  ;;  %v12570_v14 = vpack.c.bf16 %v5958_v63, %v5954_v61  ;;  %v5964_v54 = vld [vmem:[#allocation5 + $0x768] sm:$0xff]  ;;  %v5975_v61 = vld [vmem:[#allocation5 + $0x7c0] sm:$0xff]  ;;  %v12604_v63 = vpack.c.bf16 %v5980_v10, %v5976_v52 }
0x1623   : > { %v12580_v30 = vpack.c.bf16 %v5964_v54, %v5960_v31  ;;  %v12610_v31 = vpack.c.bf16 %v5979_v20, %v5975_v61  ;;  %v5894_v52 = vld [vmem:[#allocation7 + $0xc] sm:$0xf] }
0x1624   : > { %8006 = vst [vmem:[%s11230_s23 + $0x30] sm:$0xff] %v5658_v37  ;;  %v5661_v27 = vadd.f32 %v8007_v19, %v5658_v37  ;;  %v12576_v37 = vpack.c.bf16 %v5957_v55, %v5953_v16  ;;  %v5959_v19 = vld [vmem:[#allocation5 + $0x740] sm:$0xff]  ;;  %v5977_v16 = vld [vmem:[#allocation5 + $0x7d0] sm:$0xff]  ;;  %v12660_v32 = vrot.slane %v5894_v52, %v11200_v53 }
0x1625   : > { %v12586_v3 = vpack.c.bf16 %v5963_v4, %v5959_v19  ;;  %v5981_v55 = vld [vmem:[#allocation5 + $0x7f0] sm:$0xff] }
0x1626   : > { %5791 = vmatmul.mubr.f32.vlgmr.msra.gmra.mrb[46].mxu0 %v5661_v27  ;;  %5862 = vmatmul.mubr.f32.vlgmr.msra.gmra.mrb[46].mxu1 %v5661_v27  ;;  %v12582_v27 = vpack.c.bf16 %v5966_v48, %v5962_v51  ;;  %v12612_v54 = vpack.c.bf16 %v5981_v55, %v5977_v16  ;;  %v5916_v51 = vld [vmem:[%s11230_s23] sm:$0xff] }
0x1627   : > { %9593 = vmatpush1.bf16.msra.mxu0 %v12525_v49  ;;  %9625 = vmatpush1.bf16.msra.mxu1 %v12527_v29 }
0x1628   : > { %9595 = vmatprep.subr.bf16.mxu0 %v12530_v39  ;;  %9627 = vmatprep.subr.bf16.mxu1 %v12532_v5 }
0x1629   : > { %6047 = vmatprep.mubr.f32.mxu0 %v10860_v0  ;;  %6118 = vmatprep.mubr.f32.mxu1 %v10860_v0 }
0x162b   : > { %9597 = vmatpush1.bf16.msra.mxu0 %v12536_v47  ;;  %9629 = vmatpush1.bf16.msra.mxu1 %v12538_v22 }
0x162c   : > { %9599 = vmatprep.subr.bf16.mxu0 %v12542_v6  ;;  %9631 = vmatprep.subr.bf16.mxu1 %v12544_v8 }
0x162f   : > { %9601 = vmatpush1.bf16.msra.mxu0 %v12550_v36  ;;  %9633 = vmatpush1.bf16.msra.mxu1 %v12552_v24 }
0x1630   : > { %9603 = vmatprep.subr.bf16.mxu0 %v12556_v21  ;;  %9635 = vmatprep.subr.bf16.mxu1 %v12558_v46 }
0x1633   : > { %9605 = vmatpush1.bf16.msra.mxu0 %v12562_v42  ;;  %9637 = vmatpush1.bf16.msra.mxu1 %v12564_v45 }
0x1634   : > { %9607 = vmatprep.subr.bf16.mxu0 %v12568_v15  ;;  %9639 = vmatprep.subr.bf16.mxu1 %v12570_v14 }
0x1637   : > { %9609 = vmatpush1.bf16.msra.mxu0 %v12574_v59  ;;  %9641 = vmatpush1.bf16.msra.mxu1 %v12576_v37 }
0x1638   : > { %9611 = vmatprep.subr.bf16.mxu0 %v12580_v30  ;;  %9643 = vmatprep.subr.bf16.mxu1 %v12582_v27 }
0x163b   : > { %9613 = vmatpush1.bf16.msra.mxu0 %v12586_v3  ;;  %9645 = vmatpush1.bf16.msra.mxu1 %v12588_v62 }
0x163c   : > { %9615 = vmatprep.subr.bf16.mxu0 %v12592_v18  ;;  %9647 = vmatprep.subr.bf16.mxu1 %v12594_v13 }
0x163f   : > { %9617 = vmatpush1.bf16.msra.mxu0 %v12598_v44  ;;  %9649 = vmatpush1.bf16.msra.mxu1 %v12600_v2 }
0x1640   : > { %9619 = vmatprep.subr.bf16.mxu0 %v12604_v63  ;;  %9651 = vmatprep.subr.bf16.mxu1 %v12606_v7 }
0x1643   : > { %9621 = vmatpush1.bf16.msra.mxu0 %v12610_v31  ;;  %9653 = vmatpush1.bf16.msra.mxu1 %v12612_v54 }
0x1644   : > { %9655 = vmatprep.subr.bf16.mxu0 %v12507_v33  ;;  %9687 = vmatprep.subr.bf16.mxu1 %v12510_v28 }
0x1646   : > { %6048 = vmatmul.mubr.f32.vlgmr.msra.gmra.mrb[48].mxu0 %v5916_v51  ;;  %6119 = vmatmul.mubr.f32.vlgmr.msra.gmra.mrb[48].mxu1 %v5916_v51 }
0x1647   : > { %9657 = vmatpush1.bf16.msra.mxu0 %v12525_v49  ;;  %9689 = vmatpush1.bf16.msra.mxu1 %v12527_v29 }
0x1648   : > { %9659 = vmatprep.subr.bf16.mxu0 %v12530_v39  ;;  %9691 = vmatprep.subr.bf16.mxu1 %v12532_v5 }
0x1649   : > { %6280 = vmatprep.mubr.f32.mxu0 %v10860_v0  ;;  %6351 = vmatprep.mubr.f32.mxu1 %v10860_v0 }
0x164b   : > { %9661 = vmatpush1.bf16.msra.mxu0 %v12536_v47  ;;  %9693 = vmatpush1.bf16.msra.mxu1 %v12538_v22 }
0x164c   : > { %9663 = vmatprep.subr.bf16.mxu0 %v12542_v6  ;;  %9695 = vmatprep.subr.bf16.mxu1 %v12544_v8 }
0x164f   : > { %9665 = vmatpush1.bf16.msra.mxu0 %v12550_v36  ;;  %9697 = vmatpush1.bf16.msra.mxu1 %v12552_v24 }
0x1650   : > { %9667 = vmatprep.subr.bf16.mxu0 %v12556_v21  ;;  %9699 = vmatprep.subr.bf16.mxu1 %v12558_v46 }
0x1653   : > { %9669 = vmatpush1.bf16.msra.mxu0 %v12562_v42  ;;  %9701 = vmatpush1.bf16.msra.mxu1 %v12564_v45 }
0x1654   : > { %9671 = vmatprep.subr.bf16.mxu0 %v12568_v15  ;;  %9703 = vmatprep.subr.bf16.mxu1 %v12570_v14 }
0x1657   : > { %9673 = vmatpush1.bf16.msra.mxu0 %v12574_v59  ;;  %9705 = vmatpush1.bf16.msra.mxu1 %v12576_v37 }
0x1658   : > { %9675 = vmatprep.subr.bf16.mxu0 %v12580_v30  ;;  %9707 = vmatprep.subr.bf16.mxu1 %v12582_v27 }
0x165b   : > { %9677 = vmatpush1.bf16.msra.mxu0 %v12586_v3  ;;  %9709 = vmatpush1.bf16.msra.mxu1 %v12588_v62 }
0x165c   : > { %9679 = vmatprep.subr.bf16.mxu0 %v12592_v18  ;;  %9711 = vmatprep.subr.bf16.mxu1 %v12594_v13 }
0x165f   : > { %9681 = vmatpush1.bf16.msra.mxu0 %v12598_v44  ;;  %9713 = vmatpush1.bf16.msra.mxu1 %v12600_v2 }
0x1660   : > { %9683 = vmatprep.subr.bf16.mxu0 %v12604_v63  ;;  %9715 = vmatprep.subr.bf16.mxu1 %v12606_v7 }
0x1663   : > { %9685 = vmatpush1.bf16.msra.mxu0 %v12610_v31  ;;  %9717 = vmatpush1.bf16.msra.mxu1 %v12612_v54 }
0x1664   : > { %9719 = vmatprep.subr.bf16.mxu0 %v12507_v33  ;;  %9751 = vmatprep.subr.bf16.mxu1 %v12510_v28 }
0x16f9   : > { %v5792_v48 = vpop.f32.mrb[46].mxu0  ;;  %v5863_v19 = vpop.f32.mrb[46].mxu1 }
0x16fa   : > { %v5793_v4 = vadd.f32 %v5792_v48, %v12174_v9  ;;  %v5794_v11 = vpop.f32.mrb[47].mxu0  ;;  %v5865_v50 = vpop.f32.mrb[47].mxu1  ;;  %v5864_v25 = vadd.f32 %v5863_v19, %v12183_v35 }
0x16fb   : > { %v5795_v26 = vadd.f32 %v5794_v11, %v12177_v34  ;;  %v5866_v40 = vadd.f32 %v5865_v50, %v12186_v57  ;;  %v12663_v57 = vrot.slane %v5894_v52, %v11202_v56  ;;  %v12669_v56 = vrot.slane %v5894_v52, %v11210_v60 }
0x16fc   : > { %v8008_v58 = vmul.f32 -1.442695, %v5793_v4  ;;  %v8010_v1 = vmul.f32 -1.442695, %v5864_v25 }
0x16fd   : > { %v8009_v38 = vmul.f32 -1.442695, %v5795_v26 }
0x16fe   : > { %10548 = vpow2.f32 %v8008_v58 }
0x16ff   : > { %10550 = vpow2.f32 %v8009_v38 }
0x1700   : > { %10552 = vtanh.f32 %v5866_v40 }
0x1701   : > { %10554 = vpow2.f32 %v8010_v1 }
0x1708   : > { %v10549_v33 = vpop.eup %10548 }
0x1709   : > { %v5877_v17 = vadd.f32 1.0, %v10549_v33  ;;  %v10551_v28 = vpop.eup %10550 }
0x170a   : > { %v5878_v9 = vadd.f32 1.0, %v10551_v28  ;;  %v10553_v23 = vpop.eup %10552 }
0x170b   : > { %10556 = vrcp.f32 %v5877_v17  ;;  %v10555_v34 = vpop.eup %10554 }
0x170c   : > { %10558 = vrcp.f32 %v5878_v9  ;;  %v5879_v61 = vadd.f32 1.0, %v10555_v34 }
0x170e   : > { %10560 = vrcp.f32 %v5879_v61 }
0x1715   : > { %v10557_v10 = vpop.eup %10556 }
0x1716   : > { %v5888_v41 = vmul.f32 %v10557_v10, %v10553_v23  ;;  %v10559_v35 = vpop.eup %10558 }
0x1717   : > { %v5887_v20 = vmul.f32 %v10559_v35, %v12521_v43  ;;  %v12672_v43 = vrot.slane %v5894_v52, %v11217_v12 }
0x1718   : > { %v10561_v58 = vpop.eup %10560 }
0x1719   : > { %v6049_v16 = vpop.f32.mrb[48].mxu0  ;;  %v6120_v55 = vpop.f32.mrb[48].mxu1  ;;  %v5889_v51 = vadd.f32 %v5888_v41, %v5887_v20 }
0x171a   : > { %v6050_v48 = vadd.f32 %v6049_v16, %v12660_v32  ;;  %v6051_v19 = vpop.f32.mrb[49].mxu0  ;;  %v6122_v4 = vpop.f32.mrb[49].mxu1  ;;  %v6121_v26 = vadd.f32 %v6120_v55, %v12669_v56  ;;  %v8015_v55 = vld [vmem:[%s11230_s23 + $0x8] sm:$0xff] }
0x171b   : > { %v6052_v11 = vadd.f32 %v6051_v19, %v12663_v57  ;;  %10562 = vtanh.f32 %v5889_v51  ;;  %v6123_v38 = vadd.f32 %v6122_v4, %v12672_v43 }
0x171c   : > { %v8012_v53 = vmul.f32 -1.442695, %v6050_v48  ;;  %v8014_v40 = vmul.f32 -1.442695, %v6121_v26 }
0x171d   : > { %v8013_v50 = vmul.f32 -1.442695, %v6052_v11 }
0x171e   : > { %10564 = vpow2.f32 %v8012_v53 }
0x171f   : > { %10566 = vpow2.f32 %v8013_v50 }
0x1720   : > { %10568 = vtanh.f32 %v6123_v38 }
0x1721   : > { %10570 = vpow2.f32 %v8014_v40 }
0x1725   : > { %v10563_v25 = vpop.eup %10562 }
0x1726   : > { %v5891_v1 = vmul.f32 %v10563_v25, %v10561_v58 }
0x1728   : > { %v10565_v33 = vpop.eup %10564  ;;  %8011 = vst [vmem:[%s11230_s23 + $0x38] sm:$0xff] %v5891_v1 }
0x1729   : > { %v6134_v17 = vadd.f32 1.0, %v10565_v33  ;;  %v10567_v28 = vpop.eup %10566 }
0x172a   : > { %v6135_v60 = vadd.f32 1.0, %v10567_v28  ;;  %v10569_v12 = vpop.eup %10568 }
0x172b   : > { %10572 = vrcp.f32 %v6134_v17  ;;  %v10571_v9 = vpop.eup %10570 }
0x172c   : > { %10574 = vrcp.f32 %v6135_v60  ;;  %v6136_v10 = vadd.f32 1.0, %v10571_v9 }
0x172e   : > { %10576 = vrcp.f32 %v6136_v10 }
0x1735   : > { %v10573_v23 = vpop.eup %10572 }
0x1736   : > { %v6145_v52 = vmul.f32 %v10573_v23, %v10569_v12  ;;  %v10575_v34 = vpop.eup %10574 }
0x1737   : > { %v6144_v41 = vmul.f32 0.0, %v10575_v34 }
0x1738   : > { %v10577_v61 = vpop.eup %10576 }
0x1739   : > { %v12677_v35 = vadd.f32 %v6145_v52, %v6144_v41 }
0x173b   : > { %10578 = vtanh.f32 %v12677_v35 }
0x1745   : > { %v10579_v20 = vpop.eup %10578 }
0x1746   : > { %v6148_v16 = vmul.f32 %v10579_v20, %v10577_v61 }
0x1748   : > { %6149 = vst [vmem:[%s11230_s23] sm:$0xff] %v6148_v16  ;;  %v6151_v51 = vadd.f32 %v8015_v55, %v6148_v16  ;;  %v8020_v55 = vld [vmem:[%s11230_s23 + $0x10] sm:$0xff] }
0x174a   : > { %6281 = vmatmul.mubr.f32.vlgmr.msra.gmra.mrb[50].mxu0 %v6151_v51  ;;  %6352 = vmatmul.mubr.f32.vlgmr.msra.gmra.mrb[50].mxu1 %v6151_v51 }
0x174b   : > { %9721 = vmatpush1.bf16.msra.mxu0 %v12525_v49  ;;  %9753 = vmatpush1.bf16.msra.mxu1 %v12527_v29 }
0x174c   : > { %9723 = vmatprep.subr.bf16.mxu0 %v12530_v39  ;;  %9755 = vmatprep.subr.bf16.mxu1 %v12532_v5 }
0x174d   : > { %6513 = vmatprep.mubr.f32.mxu0 %v10860_v0  ;;  %6584 = vmatprep.mubr.f32.mxu1 %v10860_v0 }
0x174f   : > { %9725 = vmatpush1.bf16.msra.mxu0 %v12536_v47  ;;  %9757 = vmatpush1.bf16.msra.mxu1 %v12538_v22 }
0x1750   : > { %9727 = vmatprep.subr.bf16.mxu0 %v12542_v6  ;;  %9759 = vmatprep.subr.bf16.mxu1 %v12544_v8 }
0x1753   : > { %9729 = vmatpush1.bf16.msra.mxu0 %v12550_v36  ;;  %9761 = vmatpush1.bf16.msra.mxu1 %v12552_v24 }
0x1754   : > { %9731 = vmatprep.subr.bf16.mxu0 %v12556_v21  ;;  %9763 = vmatprep.subr.bf16.mxu1 %v12558_v46 }
0x1757   : > { %9733 = vmatpush1.bf16.msra.mxu0 %v12562_v42  ;;  %9765 = vmatpush1.bf16.msra.mxu1 %v12564_v45 }
0x1758   : > { %9735 = vmatprep.subr.bf16.mxu0 %v12568_v15  ;;  %9767 = vmatprep.subr.bf16.mxu1 %v12570_v14 }
0x175b   : > { %9737 = vmatpush1.bf16.msra.mxu0 %v12574_v59  ;;  %9769 = vmatpush1.bf16.msra.mxu1 %v12576_v37 }
0x175c   : > { %9739 = vmatprep.subr.bf16.mxu0 %v12580_v30  ;;  %9771 = vmatprep.subr.bf16.mxu1 %v12582_v27 }
0x175f   : > { %9741 = vmatpush1.bf16.msra.mxu0 %v12586_v3  ;;  %9773 = vmatpush1.bf16.msra.mxu1 %v12588_v62 }
0x1760   : > { %9743 = vmatprep.subr.bf16.mxu0 %v12592_v18  ;;  %9775 = vmatprep.subr.bf16.mxu1 %v12594_v13 }
0x1763   : > { %9745 = vmatpush1.bf16.msra.mxu0 %v12598_v44  ;;  %9777 = vmatpush1.bf16.msra.mxu1 %v12600_v2 }
0x1764   : > { %9747 = vmatprep.subr.bf16.mxu0 %v12604_v63  ;;  %9779 = vmatprep.subr.bf16.mxu1 %v12606_v7 }
0x1767   : > { %9749 = vmatpush1.bf16.msra.mxu0 %v12610_v31  ;;  %9781 = vmatpush1.bf16.msra.mxu1 %v12612_v54 }
0x181d   : > { %v6282_v48 = vpop.f32.mrb[50].mxu0  ;;  %v6353_v19 = vpop.f32.mrb[50].mxu1 }
0x181e   : > { %v6283_v4 = vadd.f32 %v6282_v48, %v12660_v32  ;;  %v6284_v11 = vpop.f32.mrb[51].mxu0  ;;  %v6355_v53 = vpop.f32.mrb[51].mxu1  ;;  %v6354_v38 = vadd.f32 %v6353_v19, %v12669_v56  ;;  %v6619_v48 = vld [vmem:[#allocation5 + $0x608] sm:$0xff] }
0x181f   : > { %v6285_v50 = vadd.f32 %v6284_v11, %v12663_v57  ;;  %v6356_v25 = vadd.f32 %v6355_v53, %v12672_v43  ;;  %v6623_v19 = vld [vmem:[#allocation5 + $0x628] sm:$0xff]  ;;  %v6625_v11 = vld [vmem:[#allocation5 + $0x638] sm:$0xff] }
0x1820   : > { %v8016_v26 = vmul.f32 -1.442695, %v6283_v4  ;;  %v8018_v40 = vmul.f32 -1.442695, %v6354_v38  ;;  %v12726_v4 = vpack.c.bf16 %v6623_v19, %v6619_v48 }
0x1821   : > { %v8017_v58 = vmul.f32 -1.442695, %v6285_v50  ;;  %v6853_v50 = vld [vmem:[#allocation5 + $0x610] sm:$0xff] }
0x1822   : > { %10580 = vpow2.f32 %v8016_v26  ;;  %9783 = vmatprep.subr.bf16.mxu0 %v12726_v4 }
0x1823   : > { %10582 = vpow2.f32 %v8017_v58  ;;  %v6857_v58 = vld [vmem:[#allocation5 + $0x630] sm:$0xff] }
0x1824   : > { %10584 = vtanh.f32 %v6356_v25  ;;  %v12778_v38 = vpack.c.bf16 %v6857_v58, %v6853_v50  ;;  %v6860_v25 = vld [vmem:[#allocation5 + $0x648] sm:$0xff]  ;;  %v6898_v50 = vld [vmem:[#allocation5 + $0x778] sm:$0xff]  ;;  %v6891_v58 = vld [vmem:[#allocation5 + $0x740] sm:$0xff] }
0x1825   : > { %10586 = vpow2.f32 %v8018_v40  ;;  %v6864_v40 = vld [vmem:[#allocation5 + $0x668] sm:$0xff] }
0x182c   : > { %v10581_v1 = vpop.eup %10580 }
0x182d   : > { %v6367_v33 = vadd.f32 1.0, %v10581_v1  ;;  %v10583_v17 = vpop.eup %10582  ;;  %v6862_v1 = vld [vmem:[#allocation5 + $0x658] sm:$0xff] }
0x182e   : > { %v6368_v28 = vadd.f32 1.0, %v10583_v17  ;;  %v10585_v60 = vpop.eup %10584  ;;  %v6866_v17 = vld [vmem:[#allocation5 + $0x678] sm:$0xff] }
0x182f   : > { %10588 = vrcp.f32 %v6367_v33  ;;  %v10587_v12 = vpop.eup %10586  ;;  %v12782_v33 = vpack.c.bf16 %v6864_v40, %v6860_v25  ;;  %v6895_v25 = vld [vmem:[#allocation5 + $0x760] sm:$0xff] }
0x1830   : > { %10590 = vrcp.f32 %v6368_v28  ;;  %v6369_v34 = vadd.f32 1.0, %v10587_v12  ;;  %v6859_v28 = vld [vmem:[#allocation5 + $0x640] sm:$0xff]  ;;  %v12784_v12 = vpack.c.bf16 %v6866_v17, %v6862_v1  ;;  %v12834_v1 = vpack.c.bf16 %v6895_v25, %v6891_v58  ;;  %v6893_v17 = vld [vmem:[#allocation5 + $0x750] sm:$0xff] }
0x1832   : > { %10592 = vrcp.f32 %v6369_v34 }
0x1839   : > { %v10589_v9 = vpop.eup %10588 }
0x183a   : > { %v6378_v23 = vmul.f32 %v10589_v9, %v10585_v60  ;;  %v10591_v52 = vpop.eup %10590  ;;  %v6863_v60 = vld [vmem:[#allocation5 + $0x660] sm:$0xff] }
0x183b   : > { %v6377_v10 = vmul.f32 %v10591_v52, %v12677_v35  ;;  %v6621_v35 = vld [vmem:[#allocation5 + $0x618] sm:$0xff]  ;;  %v12786_v9 = vpack.c.bf16 %v6863_v60, %v6859_v28  ;;  %v6865_v52 = vld [vmem:[#allocation5 + $0x670] sm:$0xff]  ;;  %v6900_v60 = vld [vmem:[#allocation5 + $0x788] sm:$0xff] }
0x183c   : > { %v10593_v61 = vpop.eup %10592  ;;  %v12728_v53 = vpack.c.bf16 %v6625_v11, %v6621_v35  ;;  %v6869_v35 = vld [vmem:[#allocation5 + $0x690] sm:$0xff] }
0x183d   : > { %v12719_v41 = vadd.f32 %v6378_v23, %v6377_v10  ;;  %v6861_v23 = vld [vmem:[#allocation5 + $0x650] sm:$0xff]  ;;  %v6868_v10 = vld [vmem:[#allocation5 + $0x688] sm:$0xff] }
0x183e   : > { %9815 = vmatprep.subr.bf16.mxu1 %v12728_v53  ;;  %v12789_v34 = vpack.c.bf16 %v6865_v52, %v6861_v23  ;;  %v6873_v11 = vld [vmem:[#allocation5 + $0x6b0] sm:$0xff]  ;;  %v6904_v52 = vld [vmem:[#allocation5 + $0x7a8] sm:$0xff] }
0x183f   : > { %10594 = vtanh.f32 %v12719_v41  ;;  %v6897_v28 = vld [vmem:[#allocation5 + $0x770] sm:$0xff] }
0x1840   : > { %v12837_v23 = vpack.c.bf16 %v6897_v28, %v6893_v17 }
0x1849   : > { %v10595_v20 = vpop.eup %10594 }
0x184a   : > { %v6381_v16 = vmul.f32 %v10595_v20, %v10593_v61  ;;  %v6870_v61 = vld [vmem:[#allocation5 + $0x698] sm:$0xff] }
0x184c   : > { %8019 = vst [vmem:[%s11230_s23 + $0x8] sm:$0xff] %v6381_v16  ;;  %v6384_v51 = vadd.f32 %v8020_v55, %v6381_v16  ;;  %v6874_v16 = vld [vmem:[#allocation5 + $0x6b8] sm:$0xff]  ;;  %v6867_v55 = vld [vmem:[#allocation5 + $0x680] sm:$0xff] }
0x184d   : > { %v12796_v48 = vpack.c.bf16 %v6874_v16, %v6870_v61  ;;  %v12841_v61 = vpack.c.bf16 %v6904_v52, %v6900_v60 }
0x184e   : > { %6514 = vmatmul.mubr.f32.vlgmr.msra.gmra.mrb[52].mxu0 %v6384_v51  ;;  %6585 = vmatmul.mubr.f32.vlgmr.msra.gmra.mrb[52].mxu1 %v6384_v51  ;;  %v6871_v51 = vld [vmem:[#allocation5 + $0x6a0] sm:$0xff] }
0x184f   : > { %6746 = vmatprep.mubr.f32.mxu0 %v10860_v0  ;;  %6817 = vmatprep.mubr.f32.mxu1 %v10860_v0  ;;  %v12798_v19 = vpack.c.bf16 %v6871_v51, %v6867_v55  ;;  %v6899_v55 = vld [vmem:[#allocation5 + $0x780] sm:$0xff] }
0x1850   : > { %9785 = vmatpush1.bf16.msra.mxu0 %v12525_v49  ;;  %9817 = vmatpush1.bf16.msra.mxu1 %v12527_v29  ;;  %v6903_v51 = vld [vmem:[#allocation5 + $0x7a0] sm:$0xff] }
0x1851   : > { %9787 = vmatprep.subr.bf16.mxu0 %v12530_v39  ;;  %9819 = vmatprep.subr.bf16.mxu1 %v12532_v5 }
0x1854   : > { %9789 = vmatpush1.bf16.msra.mxu0 %v12536_v47  ;;  %9821 = vmatpush1.bf16.msra.mxu1 %v12538_v22 }
0x1855   : > { %9791 = vmatprep.subr.bf16.mxu0 %v12542_v6  ;;  %9823 = vmatprep.subr.bf16.mxu1 %v12544_v8 }
0x1858   : > { %9793 = vmatpush1.bf16.msra.mxu0 %v12550_v36  ;;  %9825 = vmatpush1.bf16.msra.mxu1 %v12552_v24 }
0x1859   : > { %9795 = vmatprep.subr.bf16.mxu0 %v12556_v21  ;;  %9827 = vmatprep.subr.bf16.mxu1 %v12558_v46 }
0x185c   : > { %9797 = vmatpush1.bf16.msra.mxu0 %v12562_v42  ;;  %9829 = vmatpush1.bf16.msra.mxu1 %v12564_v45 }
0x185d   : > { %9799 = vmatprep.subr.bf16.mxu0 %v12568_v15  ;;  %9831 = vmatprep.subr.bf16.mxu1 %v12570_v14 }
0x1860   : > { %9801 = vmatpush1.bf16.msra.mxu0 %v12574_v59  ;;  %9833 = vmatpush1.bf16.msra.mxu1 %v12576_v37 }
0x1861   : > { %9803 = vmatprep.subr.bf16.mxu0 %v12580_v30  ;;  %9835 = vmatprep.subr.bf16.mxu1 %v12582_v27 }
0x1864   : > { %9805 = vmatpush1.bf16.msra.mxu0 %v12586_v3  ;;  %9837 = vmatpush1.bf16.msra.mxu1 %v12588_v62 }
0x1865   : > { %9807 = vmatprep.subr.bf16.mxu0 %v12592_v18  ;;  %9839 = vmatprep.subr.bf16.mxu1 %v12594_v13 }
0x1868   : > { %9809 = vmatpush1.bf16.msra.mxu0 %v12598_v44  ;;  %9841 = vmatpush1.bf16.msra.mxu1 %v12600_v2 }
0x1869   : > { %9811 = vmatprep.subr.bf16.mxu0 %v12604_v63  ;;  %9843 = vmatprep.subr.bf16.mxu1 %v12606_v7  ;;  %v8025_v63 = vld [vmem:[%s11230_s23 + $0x18] sm:$0xff] }
0x186c   : > { %9813 = vmatpush1.bf16.msra.mxu0 %v12610_v31  ;;  %9845 = vmatpush1.bf16.msra.mxu1 %v12612_v54  ;;  %v6851_v31 = vld [vmem:[#allocation5 + $0x600] sm:$0xff] }
0x186d   : > { %9847 = vmatprep.subr.bf16.mxu0 %v12726_v4  ;;  %9879 = vmatprep.subr.bf16.mxu1 %v12728_v53  ;;  %v6855_v54 = vld [vmem:[#allocation5 + $0x620] sm:$0xff] }
0x186e   : > { %v12776_v26 = vpack.c.bf16 %v6855_v54, %v6851_v31  ;;  %v6894_v31 = vld [vmem:[#allocation5 + $0x758] sm:$0xff] }
0x186f   : > { %v12832_v40 = vpack.c.bf16 %v6898_v50, %v6894_v31 }
0x1921   : > { %v6515_v49 = vpop.f32.mrb[52].mxu0  ;;  %v6586_v29 = vpop.f32.mrb[52].mxu1 }
0x1922   : > { %v6516_v39 = vadd.f32 %v6515_v49, %v12660_v32  ;;  %v6517_v5 = vpop.f32.mrb[53].mxu0  ;;  %v6588_v47 = vpop.f32.mrb[53].mxu1  ;;  %v6587_v36 = vadd.f32 %v6586_v29, %v12669_v56  ;;  %v12801_v49 = vpack.c.bf16 %v6873_v11, %v6869_v35  ;;  %v6876_v29 = vld [vmem:[#allocation5 + $0x6c8] sm:$0xff]  ;;  %v6901_v35 = vld [vmem:[#allocation5 + $0x790] sm:$0xff]  ;;  %v12846_v11 = vpack.c.bf16 %v6903_v51, %v6899_v55 }
0x1923   : > { %v6518_v22 = vadd.f32 %v6517_v5, %v12663_v57  ;;  %v6589_v24 = vadd.f32 %v6588_v47, %v12672_v43  ;;  %v6878_v5 = vld [vmem:[#allocation5 + $0x6d8] sm:$0xff] }
0x1924   : > { %v8021_v6 = vmul.f32 -1.442695, %v6516_v39  ;;  %v8023_v21 = vmul.f32 -1.442695, %v6587_v36  ;;  %v6880_v39 = vld [vmem:[#allocation5 + $0x6e8] sm:$0xff] }
0x1925   : > { %v8022_v8 = vmul.f32 -1.442695, %v6518_v22  ;;  %v12806_v47 = vpack.c.bf16 %v6880_v39, %v6876_v29  ;;  %v6882_v22 = vld [vmem:[#allocation5 + $0x6f8] sm:$0xff]  ;;  %v6905_v29 = vld [vmem:[#allocation5 + $0x7b0] sm:$0xff]  ;;  %v6908_v39 = vld [vmem:[#allocation5 + $0x7c8] sm:$0xff] }
0x1926   : > { %10596 = vpow2.f32 %v8021_v6  ;;  %v6875_v6 = vld [vmem:[#allocation5 + $0x6c0] sm:$0xff]  ;;  %v12808_v36 = vpack.c.bf16 %v6882_v22, %v6878_v5  ;;  %v6912_v5 = vld [vmem:[#allocation5 + $0x7e8] sm:$0xff]  ;;  %v12850_v22 = vpack.c.bf16 %v6905_v29, %v6901_v35 }
0x1927   : > { %10598 = vpow2.f32 %v8022_v8  ;;  %v6879_v8 = vld [vmem:[#allocation5 + $0x6e0] sm:$0xff] }
0x1928   : > { %10600 = vtanh.f32 %v6589_v24  ;;  %v12810_v24 = vpack.c.bf16 %v6879_v8, %v6875_v6  ;;  %v12852_v6 = vpack.c.bf16 %v6912_v5, %v6908_v39  ;;  %v6910_v8 = vld [vmem:[#allocation5 + $0x7d8] sm:$0xff] }
0x1929   : > { %10602 = vpow2.f32 %v8023_v21  ;;  %v6877_v21 = vld [vmem:[#allocation5 + $0x6d0] sm:$0xff] }
0x1930   : > { %v10597_v46 = vpop.eup %10596 }
0x1931   : > { %v6600_v42 = vadd.f32 1.0, %v10597_v46  ;;  %v10599_v45 = vpop.eup %10598  ;;  %v6881_v46 = vld [vmem:[#allocation5 + $0x6f0] sm:$0xff] }
0x1932   : > { %v6601_v15 = vadd.f32 1.0, %v10599_v45  ;;  %v10601_v14 = vpop.eup %10600  ;;  %v6884_v45 = vld [vmem:[#allocation5 + $0x708] sm:$0xff] }
0x1933   : > { %10604 = vrcp.f32 %v6600_v42  ;;  %v10603_v59 = vpop.eup %10602  ;;  %v12813_v42 = vpack.c.bf16 %v6881_v46, %v6877_v21  ;;  %v6914_v21 = vld [vmem:[#allocation5 + $0x7f8] sm:$0xff]  ;;  %v6907_v46 = vld [vmem:[#allocation5 + $0x7c0] sm:$0xff] }
0x1934   : > { %10606 = vrcp.f32 %v6601_v15  ;;  %v6602_v3 = vadd.f32 1.0, %v10603_v59  ;;  %v6888_v15 = vld [vmem:[#allocation5 + $0x728] sm:$0xff] }
0x1935   : > { %v12818_v59 = vpack.c.bf16 %v6888_v15, %v6884_v45  ;;  %v12854_v45 = vpack.c.bf16 %v6914_v21, %v6910_v8  ;;  %v6911_v15 = vld [vmem:[#allocation5 + $0x7e0] sm:$0xff] }
0x1936   : > { %10608 = vrcp.f32 %v6602_v3 }
0x193d   : > { %v10605_v37 = vpop.eup %10604 }
0x193e   : > { %v6611_v30 = vmul.f32 %v10605_v37, %v10601_v14  ;;  %v10607_v27 = vpop.eup %10606  ;;  %v6886_v14 = vld [vmem:[#allocation5 + $0x718] sm:$0xff] }
0x193f   : > { %v6610_v62 = vmul.f32 %v10607_v27, %v12719_v41  ;;  %v6872_v41 = vld [vmem:[#allocation5 + $0x6a8] sm:$0xff]  ;;  %v6890_v37 = vld [vmem:[#allocation5 + $0x738] sm:$0xff]  ;;  %v6887_v27 = vld [vmem:[#allocation5 + $0x720] sm:$0xff] }
0x1940   : > { %v10609_v13 = vpop.eup %10608  ;;  %v12794_v20 = vpack.c.bf16 %v6872_v41, %v6868_v10  ;;  %v12820_v3 = vpack.c.bf16 %v6890_v37, %v6886_v14  ;;  %v6902_v10 = vld [vmem:[#allocation5 + $0x798] sm:$0xff]  ;;  %v6909_v14 = vld [vmem:[#allocation5 + $0x7d0] sm:$0xff] }
0x1941   : > { %v12769_v18 = vadd.f32 %v6611_v30, %v6610_v62  ;;  %v6883_v30 = vld [vmem:[#allocation5 + $0x700] sm:$0xff]  ;;  %v6906_v41 = vld [vmem:[#allocation5 + $0x7b8] sm:$0xff]  ;;  %v6913_v37 = vld [vmem:[#allocation5 + $0x7f0] sm:$0xff] }
0x1942   : > { %v12822_v62 = vpack.c.bf16 %v6887_v27, %v6883_v30  ;;  %v12843_v16 = vpack.c.bf16 %v6906_v41, %v6902_v10  ;;  %v12857_v30 = vpack.c.bf16 %v6911_v15, %v6907_v46  ;;  %v12861_v27 = vpack.c.bf16 %v6913_v37, %v6909_v14 }
0x1943   : > { %10610 = vtanh.f32 %v12769_v18 }
0x194d   : > { %v10611_v44 = vpop.eup %10610 }
0x194e   : > { %v6614_v2 = vmul.f32 %v10611_v44, %v10609_v13  ;;  %v6885_v13 = vld [vmem:[#allocation5 + $0x710] sm:$0xff] }
0x194f   : > { %v6889_v44 = vld [vmem:[#allocation5 + $0x730] sm:$0xff] }
0x1950   : > { %8024 = vst [vmem:[%s11230_s23 + $0x10] sm:$0xff] %v6614_v2  ;;  %v6617_v7 = vadd.f32 %v8025_v63, %v6614_v2  ;;  %v12825_v2 = vpack.c.bf16 %v6889_v44, %v6885_v13  ;;  %v6892_v63 = vld [vmem:[#allocation5 + $0x748] sm:$0xff] }
0x1952   : > { %6747 = vmatmul.mubr.f32.vlgmr.msra.gmra.mrb[54].mxu0 %v6617_v7  ;;  %6818 = vmatmul.mubr.f32.vlgmr.msra.gmra.mrb[54].mxu1 %v6617_v7  ;;  %v6896_v7 = vld [vmem:[#allocation5 + $0x768] sm:$0xff] }
0x1953   : > { %6979 = vmatprep.mubr.f32.mxu0 %v10860_v0  ;;  %7050 = vmatprep.mubr.f32.mxu1 %v10860_v0  ;;  %v12830_v54 = vpack.c.bf16 %v6896_v7, %v6892_v63 }
0x1954   : > { %9849 = vmatpush1.bf16.msra.mxu0 %v12776_v26  ;;  %9881 = vmatpush1.bf16.msra.mxu1 %v12778_v38 }
0x1955   : > { %9851 = vmatprep.subr.bf16.mxu0 %v12782_v33  ;;  %9883 = vmatprep.subr.bf16.mxu1 %v12784_v12 }
0x1958   : > { %9853 = vmatpush1.bf16.msra.mxu0 %v12786_v9  ;;  %9885 = vmatpush1.bf16.msra.mxu1 %v12789_v34 }
0x1959   : > { %9855 = vmatprep.subr.bf16.mxu0 %v12794_v20  ;;  %9887 = vmatprep.subr.bf16.mxu1 %v12796_v48 }
0x195c   : > { %9857 = vmatpush1.bf16.msra.mxu0 %v12798_v19  ;;  %9889 = vmatpush1.bf16.msra.mxu1 %v12801_v49 }
0x195d   : > { %9859 = vmatprep.subr.bf16.mxu0 %v12806_v47  ;;  %9891 = vmatprep.subr.bf16.mxu1 %v12808_v36 }
0x1960   : > { %9861 = vmatpush1.bf16.msra.mxu0 %v12810_v24  ;;  %9893 = vmatpush1.bf16.msra.mxu1 %v12813_v42 }
0x1961   : > { %9863 = vmatprep.subr.bf16.mxu0 %v12818_v59  ;;  %9895 = vmatprep.subr.bf16.mxu1 %v12820_v3 }
0x1964   : > { %9865 = vmatpush1.bf16.msra.mxu0 %v12822_v62  ;;  %9897 = vmatpush1.bf16.msra.mxu1 %v12825_v2 }
0x1965   : > { %9867 = vmatprep.subr.bf16.mxu0 %v12830_v54  ;;  %9899 = vmatprep.subr.bf16.mxu1 %v12832_v40 }
0x1968   : > { %9869 = vmatpush1.bf16.msra.mxu0 %v12834_v1  ;;  %9901 = vmatpush1.bf16.msra.mxu1 %v12837_v23 }
0x1969   : > { %9871 = vmatprep.subr.bf16.mxu0 %v12841_v61  ;;  %9903 = vmatprep.subr.bf16.mxu1 %v12843_v16 }
0x196c   : > { %9873 = vmatpush1.bf16.msra.mxu0 %v12846_v11  ;;  %9905 = vmatpush1.bf16.msra.mxu1 %v12850_v22 }
0x196d   : > { %9875 = vmatprep.subr.bf16.mxu0 %v12852_v6  ;;  %9907 = vmatprep.subr.bf16.mxu1 %v12854_v45 }
0x1970   : > { %9877 = vmatpush1.bf16.msra.mxu0 %v12857_v30  ;;  %9909 = vmatpush1.bf16.msra.mxu1 %v12861_v27 }
0x1971   : > { %9911 = vmatprep.subr.bf16.mxu0 %v12726_v4  ;;  %9943 = vmatprep.subr.bf16.mxu1 %v12728_v53 }
0x1a25   : > { %v6748_v13 = vpop.f32.mrb[54].mxu0  ;;  %v6819_v44 = vpop.f32.mrb[54].mxu1 }
0x1a26   : > { %v6749_v63 = vadd.f32 %v6748_v13, %v12660_v32  ;;  %v6750_v7 = vpop.f32.mrb[55].mxu0  ;;  %v6821_v31 = vpop.f32.mrb[55].mxu1  ;;  %v6820_v17 = vadd.f32 %v6819_v44, %v12669_v56  ;;  %v8030_v13 = vld [vmem:[%s11230_s23 + $0x20] sm:$0xff] }
0x1a27   : > { %v6751_v50 = vadd.f32 %v6750_v7, %v12663_v57  ;;  %v6822_v28 = vadd.f32 %v6821_v31, %v12672_v43 }
0x1a28   : > { %v8026_v58 = vmul.f32 -1.442695, %v6749_v63  ;;  %v8028_v60 = vmul.f32 -1.442695, %v6820_v17 }
0x1a29   : > { %v8027_v25 = vmul.f32 -1.442695, %v6751_v50 }
0x1a2a   : > { %10612 = vpow2.f32 %v8026_v58 }
0x1a2b   : > { %10614 = vpow2.f32 %v8027_v25 }
0x1a2c   : > { %10616 = vtanh.f32 %v6822_v28 }
0x1a2d   : > { %10618 = vpow2.f32 %v8028_v60 }
0x1a34   : > { %v10613_v52 = vpop.eup %10612 }
0x1a35   : > { %v6833_v10 = vadd.f32 1.0, %v10613_v52  ;;  %v10615_v41 = vpop.eup %10614 }
0x1a36   : > { %v6834_v55 = vadd.f32 1.0, %v10615_v41  ;;  %v10617_v51 = vpop.eup %10616 }
0x1a37   : > { %10620 = vrcp.f32 %v6833_v10  ;;  %v10619_v35 = vpop.eup %10618 }
0x1a38   : > { %10622 = vrcp.f32 %v6834_v55  ;;  %v6835_v8 = vadd.f32 1.0, %v10619_v35 }
0x1a3a   : > { %10624 = vrcp.f32 %v6835_v8 }
0x1a41   : > { %v10621_v29 = vpop.eup %10620 }
0x1a42   : > { %v6844_v39 = vmul.f32 %v10621_v29, %v10617_v51  ;;  %v10623_v5 = vpop.eup %10622 }
0x1a43   : > { %v6843_v21 = vmul.f32 %v10623_v5, %v12769_v18 }
0x1a44   : > { %v10625_v15 = vpop.eup %10624 }
0x1a45   : > { %v12873_v46 = vadd.f32 %v6844_v39, %v6843_v21 }
0x1a47   : > { %10626 = vtanh.f32 %v12873_v46 }
0x1a51   : > { %v10627_v14 = vpop.eup %10626 }
0x1a52   : > { %v6847_v37 = vmul.f32 %v10627_v14, %v10625_v15 }
0x1a54   : > { %8029 = vst [vmem:[%s11230_s23 + $0x18] sm:$0xff] %v6847_v37  ;;  %v6850_v44 = vadd.f32 %v8030_v13, %v6847_v37  ;;  %v8035_v13 = vld [vmem:[%s11230_s23 + $0x28] sm:$0xff] }
0x1a56   : > { %6980 = vmatmul.mubr.f32.vlgmr.msra.gmra.mrb[56].mxu0 %v6850_v44  ;;  %7051 = vmatmul.mubr.f32.vlgmr.msra.gmra.mrb[56].mxu1 %v6850_v44 }
0x1a57   : > { %9913 = vmatpush1.bf16.msra.mxu0 %v12776_v26  ;;  %9945 = vmatpush1.bf16.msra.mxu1 %v12778_v38 }
0x1a58   : > { %9915 = vmatprep.subr.bf16.mxu0 %v12782_v33  ;;  %9947 = vmatprep.subr.bf16.mxu1 %v12784_v12 }
0x1a59   : > { %7212 = vmatprep.mubr.f32.mxu0 %v10860_v0  ;;  %7283 = vmatprep.mubr.f32.mxu1 %v10860_v0 }
0x1a5b   : > { %9917 = vmatpush1.bf16.msra.mxu0 %v12786_v9  ;;  %9949 = vmatpush1.bf16.msra.mxu1 %v12789_v34 }
0x1a5c   : > { %9919 = vmatprep.subr.bf16.mxu0 %v12794_v20  ;;  %9951 = vmatprep.subr.bf16.mxu1 %v12796_v48 }
0x1a5f   : > { %9921 = vmatpush1.bf16.msra.mxu0 %v12798_v19  ;;  %9953 = vmatpush1.bf16.msra.mxu1 %v12801_v49 }
0x1a60   : > { %9923 = vmatprep.subr.bf16.mxu0 %v12806_v47  ;;  %9955 = vmatprep.subr.bf16.mxu1 %v12808_v36 }
0x1a63   : > { %9925 = vmatpush1.bf16.msra.mxu0 %v12810_v24  ;;  %9957 = vmatpush1.bf16.msra.mxu1 %v12813_v42 }
0x1a64   : > { %9927 = vmatprep.subr.bf16.mxu0 %v12818_v59  ;;  %9959 = vmatprep.subr.bf16.mxu1 %v12820_v3 }
0x1a67   : > { %9929 = vmatpush1.bf16.msra.mxu0 %v12822_v62  ;;  %9961 = vmatpush1.bf16.msra.mxu1 %v12825_v2 }
0x1a68   : > { %9931 = vmatprep.subr.bf16.mxu0 %v12830_v54  ;;  %9963 = vmatprep.subr.bf16.mxu1 %v12832_v40 }
0x1a6b   : > { %9933 = vmatpush1.bf16.msra.mxu0 %v12834_v1  ;;  %9965 = vmatpush1.bf16.msra.mxu1 %v12837_v23 }
0x1a6c   : > { %9935 = vmatprep.subr.bf16.mxu0 %v12841_v61  ;;  %9967 = vmatprep.subr.bf16.mxu1 %v12843_v16 }
0x1a6f   : > { %9937 = vmatpush1.bf16.msra.mxu0 %v12846_v11  ;;  %9969 = vmatpush1.bf16.msra.mxu1 %v12850_v22 }
0x1a70   : > { %9939 = vmatprep.subr.bf16.mxu0 %v12852_v6  ;;  %9971 = vmatprep.subr.bf16.mxu1 %v12854_v45 }
0x1a73   : > { %9941 = vmatpush1.bf16.msra.mxu0 %v12857_v30  ;;  %9973 = vmatpush1.bf16.msra.mxu1 %v12861_v27 }
0x1a74   : > { %9975 = vmatprep.subr.bf16.mxu0 %v12726_v4  ;;  %10007 = vmatprep.subr.bf16.mxu1 %v12728_v53 }
0x1b29   : > { %v6981_v18 = vpop.f32.mrb[56].mxu0  ;;  %v7052_v63 = vpop.f32.mrb[56].mxu1 }
0x1b2a   : > { %v6982_v7 = vadd.f32 %v6981_v18, %v12660_v32  ;;  %v6983_v31 = vpop.f32.mrb[57].mxu0  ;;  %v7054_v50 = vpop.f32.mrb[57].mxu1  ;;  %v7053_v28 = vadd.f32 %v7052_v63, %v12669_v56 }
0x1b2b   : > { %v6984_v58 = vadd.f32 %v6983_v31, %v12663_v57  ;;  %v7055_v60 = vadd.f32 %v7054_v50, %v12672_v43 }
0x1b2c   : > { %v8031_v25 = vmul.f32 -1.442695, %v6982_v7  ;;  %v8033_v52 = vmul.f32 -1.442695, %v7053_v28 }
0x1b2d   : > { %v8032_v17 = vmul.f32 -1.442695, %v6984_v58 }
0x1b2e   : > { %10628 = vpow2.f32 %v8031_v25 }
0x1b2f   : > { %10630 = vpow2.f32 %v8032_v17 }
0x1b30   : > { %10632 = vtanh.f32 %v7055_v60 }
0x1b31   : > { %10634 = vpow2.f32 %v8033_v52 }
0x1b38   : > { %v10629_v4 = vpop.eup %10628 }
0x1b39   : > { %v7066_v10 = vadd.f32 1.0, %v10629_v4  ;;  %v10631_v53 = vpop.eup %10630 }
0x1b3a   : > { %v7067_v41 = vadd.f32 1.0, %v10631_v53  ;;  %v10633_v55 = vpop.eup %10632 }
0x1b3b   : > { %10636 = vrcp.f32 %v7066_v10  ;;  %v10635_v51 = vpop.eup %10634 }
0x1b3c   : > { %10638 = vrcp.f32 %v7067_v41  ;;  %v7068_v5 = vadd.f32 1.0, %v10635_v51 }
0x1b3e   : > { %10640 = vrcp.f32 %v7068_v5 }
0x1b45   : > { %v10637_v35 = vpop.eup %10636 }
0x1b46   : > { %v7077_v29 = vmul.f32 %v10637_v35, %v10633_v55  ;;  %v10639_v39 = vpop.eup %10638 }
0x1b47   : > { %v7076_v8 = vmul.f32 %v10639_v39, %v12873_v46 }
0x1b48   : > { %v10641_v15 = vpop.eup %10640 }
0x1b49   : > { %v12917_v21 = vadd.f32 %v7077_v29, %v7076_v8 }
0x1b4b   : > { %10642 = vtanh.f32 %v12917_v21 }
0x1b55   : > { %v10643_v14 = vpop.eup %10642 }
0x1b56   : > { %v7080_v37 = vmul.f32 %v10643_v14, %v10641_v15 }
0x1b58   : > { %8034 = vst [vmem:[%s11230_s23 + $0x20] sm:$0xff] %v7080_v37  ;;  %v7083_v44 = vadd.f32 %v8035_v13, %v7080_v37  ;;  %v8040_v13 = vld [vmem:[%s11230_s23 + $0x30] sm:$0xff] }
0x1b5a   : > { %7213 = vmatmul.mubr.f32.vlgmr.msra.gmra.mrb[58].mxu0 %v7083_v44  ;;  %7284 = vmatmul.mubr.f32.vlgmr.msra.gmra.mrb[58].mxu1 %v7083_v44 }
0x1b5b   : > { %9977 = vmatpush1.bf16.msra.mxu0 %v12776_v26  ;;  %10009 = vmatpush1.bf16.msra.mxu1 %v12778_v38 }
0x1b5c   : > { %9979 = vmatprep.subr.bf16.mxu0 %v12782_v33  ;;  %10011 = vmatprep.subr.bf16.mxu1 %v12784_v12 }
0x1b5d   : > { %7445 = vmatprep.mubr.f32.mxu0 %v10860_v0  ;;  %7516 = vmatprep.mubr.f32.mxu1 %v10860_v0 }
0x1b5f   : > { %9981 = vmatpush1.bf16.msra.mxu0 %v12786_v9  ;;  %10013 = vmatpush1.bf16.msra.mxu1 %v12789_v34 }
0x1b60   : > { %9983 = vmatprep.subr.bf16.mxu0 %v12794_v20  ;;  %10015 = vmatprep.subr.bf16.mxu1 %v12796_v48 }
0x1b63   : > { %9985 = vmatpush1.bf16.msra.mxu0 %v12798_v19  ;;  %10017 = vmatpush1.bf16.msra.mxu1 %v12801_v49 }
0x1b64   : > { %9987 = vmatprep.subr.bf16.mxu0 %v12806_v47  ;;  %10019 = vmatprep.subr.bf16.mxu1 %v12808_v36 }
0x1b67   : > { %9989 = vmatpush1.bf16.msra.mxu0 %v12810_v24  ;;  %10021 = vmatpush1.bf16.msra.mxu1 %v12813_v42 }
0x1b68   : > { %9991 = vmatprep.subr.bf16.mxu0 %v12818_v59  ;;  %10023 = vmatprep.subr.bf16.mxu1 %v12820_v3 }
0x1b6b   : > { %9993 = vmatpush1.bf16.msra.mxu0 %v12822_v62  ;;  %10025 = vmatpush1.bf16.msra.mxu1 %v12825_v2 }
0x1b6c   : > { %9995 = vmatprep.subr.bf16.mxu0 %v12830_v54  ;;  %10027 = vmatprep.subr.bf16.mxu1 %v12832_v40 }
0x1b6f   : > { %9997 = vmatpush1.bf16.msra.mxu0 %v12834_v1  ;;  %10029 = vmatpush1.bf16.msra.mxu1 %v12837_v23 }
0x1b70   : > { %9999 = vmatprep.subr.bf16.mxu0 %v12841_v61  ;;  %10031 = vmatprep.subr.bf16.mxu1 %v12843_v16 }
0x1b73   : > { %10001 = vmatpush1.bf16.msra.mxu0 %v12846_v11  ;;  %10033 = vmatpush1.bf16.msra.mxu1 %v12850_v22 }
0x1b74   : > { %10003 = vmatprep.subr.bf16.mxu0 %v12852_v6  ;;  %10035 = vmatprep.subr.bf16.mxu1 %v12854_v45 }
0x1b77   : > { %10005 = vmatpush1.bf16.msra.mxu0 %v12857_v30  ;;  %10037 = vmatpush1.bf16.msra.mxu1 %v12861_v27 }
0x1c2d   : > { %v7214_v46 = vpop.f32.mrb[58].mxu0  ;;  %v7285_v18 = vpop.f32.mrb[58].mxu1 }
0x1c2e   : > { %v7215_v63 = vadd.f32 %v7214_v46, %v12660_v32  ;;  %v7216_v7 = vpop.f32.mrb[59].mxu0  ;;  %v7287_v31 = vpop.f32.mrb[59].mxu1  ;;  %v7286_v17 = vadd.f32 %v7285_v18, %v12669_v56  ;;  %v7551_v46 = vld [vmem:[#allocation5 + $0x608] sm:$0xff] }
0x1c2f   : > { %v7217_v50 = vadd.f32 %v7216_v7, %v12663_v57  ;;  %v7288_v28 = vadd.f32 %v7287_v31, %v12672_v43  ;;  %v7555_v18 = vld [vmem:[#allocation5 + $0x628] sm:$0xff]  ;;  %v7557_v7 = vld [vmem:[#allocation5 + $0x638] sm:$0xff] }
0x1c30   : > { %v8036_v58 = vmul.f32 -1.442695, %v7215_v63  ;;  %v8038_v60 = vmul.f32 -1.442695, %v7286_v17  ;;  %v10038_v63 = vpack.c.bf16 %v7555_v18, %v7551_v46 }
0x1c31   : > { %v8037_v25 = vmul.f32 -1.442695, %v7217_v50 }
0x1c32   : > { %10644 = vpow2.f32 %v8036_v58  ;;  %10039 = vmatprep.subr.bf16.mxu0 %v10038_v63 }
0x1c33   : > { %10646 = vpow2.f32 %v8037_v25 }
0x1c34   : > { %10648 = vtanh.f32 %v7288_v28 }
0x1c35   : > { %10650 = vpow2.f32 %v8038_v60 }
0x1c3c   : > { %v10645_v52 = vpop.eup %10644 }
0x1c3d   : > { %v7299_v4 = vadd.f32 1.0, %v10645_v52  ;;  %v10647_v10 = vpop.eup %10646 }
0x1c3e   : > { %v7300_v53 = vadd.f32 1.0, %v10647_v10  ;;  %v10649_v41 = vpop.eup %10648 }
0x1c3f   : > { %10652 = vrcp.f32 %v7299_v4  ;;  %v10651_v55 = vpop.eup %10650 }
0x1c40   : > { %10654 = vrcp.f32 %v7300_v53  ;;  %v7301_v39 = vadd.f32 1.0, %v10651_v55 }
0x1c42   : > { %10656 = vrcp.f32 %v7301_v39 }
0x1c49   : > { %v10653_v51 = vpop.eup %10652 }
0x1c4a   : > { %v7310_v35 = vmul.f32 %v10653_v51, %v10649_v41  ;;  %v10655_v29 = vpop.eup %10654 }
0x1c4b   : > { %v7309_v5 = vmul.f32 %v10655_v29, %v12917_v21  ;;  %v7553_v21 = vld [vmem:[#allocation5 + $0x618] sm:$0xff] }
0x1c4c   : > { %v10657_v15 = vpop.eup %10656  ;;  %v10070_v31 = vpack.c.bf16 %v7557_v7, %v7553_v21 }
0x1c4d   : > { %v12959_v8 = vadd.f32 %v7310_v35, %v7309_v5 }
0x1c4e   : > { %10071 = vmatprep.subr.bf16.mxu1 %v10070_v31 }
0x1c4f   : > { %10658 = vtanh.f32 %v12959_v8 }
0x1c59   : > { %v10659_v14 = vpop.eup %10658 }
0x1c5a   : > { %v7313_v37 = vmul.f32 %v10659_v14, %v10657_v15 }
0x1c5c   : > { %8039 = vst [vmem:[%s11230_s23 + $0x28] sm:$0xff] %v7313_v37  ;;  %v7316_v44 = vadd.f32 %v8040_v13, %v7313_v37 }
0x1c5e   : > { %7446 = vmatmul.mubr.f32.vlgmr.msra.gmra.mrb[60].mxu0 %v7316_v44  ;;  %7517 = vmatmul.mubr.f32.vlgmr.msra.gmra.mrb[60].mxu1 %v7316_v44 }
0x1c5f   : > { %7678 = vmatprep.mubr.f32.mxu0 %v10860_v0  ;;  %7749 = vmatprep.mubr.f32.mxu1 %v10860_v0 }
0x1c60   : > { %10041 = vmatpush1.bf16.msra.mxu0 %v12776_v26  ;;  %10073 = vmatpush1.bf16.msra.mxu1 %v12778_v38 }
0x1c61   : > { %10043 = vmatprep.subr.bf16.mxu0 %v12782_v33  ;;  %10075 = vmatprep.subr.bf16.mxu1 %v12784_v12 }
0x1c64   : > { %10045 = vmatpush1.bf16.msra.mxu0 %v12786_v9  ;;  %10077 = vmatpush1.bf16.msra.mxu1 %v12789_v34 }
0x1c65   : > { %10047 = vmatprep.subr.bf16.mxu0 %v12794_v20  ;;  %10079 = vmatprep.subr.bf16.mxu1 %v12796_v48 }
0x1c68   : > { %10049 = vmatpush1.bf16.msra.mxu0 %v12798_v19  ;;  %10081 = vmatpush1.bf16.msra.mxu1 %v12801_v49 }
0x1c69   : > { %10051 = vmatprep.subr.bf16.mxu0 %v12806_v47  ;;  %10083 = vmatprep.subr.bf16.mxu1 %v12808_v36 }
0x1c6c   : > { %10053 = vmatpush1.bf16.msra.mxu0 %v12810_v24  ;;  %10085 = vmatpush1.bf16.msra.mxu1 %v12813_v42 }
0x1c6d   : > { %10055 = vmatprep.subr.bf16.mxu0 %v12818_v59  ;;  %10087 = vmatprep.subr.bf16.mxu1 %v12820_v3 }
0x1c70   : > { %10057 = vmatpush1.bf16.msra.mxu0 %v12822_v62  ;;  %10089 = vmatpush1.bf16.msra.mxu1 %v12825_v2 }
0x1c71   : > { %10059 = vmatprep.subr.bf16.mxu0 %v12830_v54  ;;  %10091 = vmatprep.subr.bf16.mxu1 %v12832_v40 }
0x1c74   : > { %10061 = vmatpush1.bf16.msra.mxu0 %v12834_v1  ;;  %10093 = vmatpush1.bf16.msra.mxu1 %v12837_v23 }
0x1c75   : > { %10063 = vmatprep.subr.bf16.mxu0 %v12841_v61  ;;  %10095 = vmatprep.subr.bf16.mxu1 %v12843_v16 }
0x1c78   : > { %10065 = vmatpush1.bf16.msra.mxu0 %v12846_v11  ;;  %10097 = vmatpush1.bf16.msra.mxu1 %v12850_v22  ;;  %v8045_v22 = vld [vmem:[%s11230_s23 + $0x38] sm:$0xff] }
0x1c79   : > { %10067 = vmatprep.subr.bf16.mxu0 %v12852_v6  ;;  %10099 = vmatprep.subr.bf16.mxu1 %v12854_v45 }
0x1c7c   : > { %10069 = vmatpush1.bf16.msra.mxu0 %v12857_v30  ;;  %10101 = vmatpush1.bf16.msra.mxu1 %v12861_v27 }
0x1d31   : > { %v7447_v0 = vpop.f32.mrb[60].mxu0  ;;  %v7518_v26 = vpop.f32.mrb[60].mxu1 }
0x1d32   : > { %v7448_v38 = vadd.f32 %v7447_v0, %v12660_v32  ;;  %v7449_v33 = vpop.f32.mrb[61].mxu0  ;;  %v7520_v12 = vpop.f32.mrb[61].mxu1  ;;  %v7519_v48 = vadd.f32 %v7518_v26, %v12669_v56 }
0x1d33   : > { %v7450_v9 = vadd.f32 %v7449_v33, %v12663_v57  ;;  %v7521_v19 = vadd.f32 %v7520_v12, %v12672_v43 }
0x1d34   : > { %v8041_v34 = vmul.f32 -1.442695, %v7448_v38  ;;  %v8043_v49 = vmul.f32 -1.442695, %v7519_v48 }
0x1d35   : > { %v8042_v20 = vmul.f32 -1.442695, %v7450_v9 }
0x1d36   : > { %10660 = vpow2.f32 %v8041_v34 }
0x1d37   : > { %10662 = vpow2.f32 %v8042_v20 }
0x1d38   : > { %10664 = vtanh.f32 %v7521_v19 }
0x1d39   : > { %10666 = vpow2.f32 %v8043_v49 }
0x1d40   : > { %v10661_v47 = vpop.eup %10660 }
0x1d41   : > { %v7532_v36 = vadd.f32 1.0, %v10661_v47  ;;  %v10663_v24 = vpop.eup %10662 }
0x1d42   : > { %v7533_v42 = vadd.f32 1.0, %v10663_v24  ;;  %v10665_v59 = vpop.eup %10664 }
0x1d43   : > { %10668 = vrcp.f32 %v7532_v36  ;;  %v10667_v3 = vpop.eup %10666 }
0x1d44   : > { %10670 = vrcp.f32 %v7533_v42  ;;  %v7534_v40 = vadd.f32 1.0, %v10667_v3 }
0x1d46   : > { %10672 = vrcp.f32 %v7534_v40 }
0x1d4d   : > { %v10669_v62 = vpop.eup %10668 }
0x1d4e   : > { %v7543_v2 = vmul.f32 %v10669_v62, %v10665_v59  ;;  %v10671_v54 = vpop.eup %10670 }
0x1d4f   : > { %v7542_v1 = vmul.f32 %v10671_v54, %v12959_v8 }
0x1d50   : > { %v10673_v61 = vpop.eup %10672 }
0x1d51   : > { %v7544_v23 = vadd.f32 %v7543_v2, %v7542_v1 }
0x1d53   : > { %10674 = vtanh.f32 %v7544_v23 }
0x1d5d   : > { %v10675_v16 = vpop.eup %10674 }
0x1d5e   : > { %v7546_v11 = vmul.f32 %v10675_v16, %v10673_v61 }
0x1d60   : > { %8044 = vst [vmem:[%s11230_s23 + $0x30] sm:$0xff] %v7546_v11  ;;  %v7549_v6 = vadd.f32 %v8045_v22, %v7546_v11 }
0x1d62   : > { %7679 = vmatmul.mubr.f32.vlgmr.msra.gmra.mrb[62].mxu0 %v7549_v6  ;;  %7750 = vmatmul.mubr.f32.vlgmr.msra.gmra.mrb[62].mxu1 %v7549_v6 }
0x1e35   : > { %v7680_v45 = vpop.f32.mrb[62].mxu0  ;;  %v7751_v30 = vpop.f32.mrb[62].mxu1 }
0x1e36   : > { %v7681_v27 = vadd.f32 %v7680_v45, %v12660_v32  ;;  %v7682_v50 = vpop.f32.mrb[63].mxu0  ;;  %v7753_v58 = vpop.f32.mrb[63].mxu1  ;;  %v7752_v60 = vadd.f32 %v7751_v30, %v12669_v56 }
0x1e37   : > { %v7683_v25 = vadd.f32 %v7682_v50, %v12663_v57  ;;  %v7754_v52 = vadd.f32 %v7753_v58, %v12672_v43 }
0x1e38   : > { %v8046_v17 = vmul.f32 -1.442695, %v7681_v27  ;;  %v8048_v4 = vmul.f32 -1.442695, %v7752_v60 }
0x1e39   : > { %v8047_v28 = vmul.f32 -1.442695, %v7683_v25 }
0x1e3a   : > { %10676 = vpow2.f32 %v8046_v17 }
0x1e3b   : > { %10678 = vpow2.f32 %v8047_v28 }
0x1e3c   : > { %10680 = vtanh.f32 %v7754_v52 }
0x1e3d   : > { %10682 = vpow2.f32 %v8048_v4 }
0x1e44   : > { %v10677_v10 = vpop.eup %10676 }
0x1e45   : > { %v7765_v53 = vadd.f32 1.0, %v10677_v10  ;;  %v10679_v41 = vpop.eup %10678 }
0x1e46   : > { %v7766_v32 = vadd.f32 1.0, %v10679_v41  ;;  %v10681_v57 = vpop.eup %10680 }
0x1e47   : > { %10684 = vrcp.f32 %v7765_v53  ;;  %v10683_v55 = vpop.eup %10682 }
0x1e48   : > { %10686 = vrcp.f32 %v7766_v32  ;;  %v7767_v29 = vadd.f32 1.0, %v10683_v55 }
0x1e4a   : > { %10688 = vrcp.f32 %v7767_v29 }
0x1e51   : > { %v10685_v51 = vpop.eup %10684 }
0x1e52   : > { %v7776_v35 = vmul.f32 %v10685_v51, %v10681_v57  ;;  %v10687_v56 = vpop.eup %10686 }
0x1e53   : > { %v7775_v43 = vmul.f32 %v10687_v56, %v7544_v23 }
0x1e54   : > { %v10689_v5 = vpop.eup %10688 }
0x1e55   : > { %v7777_v39 = vadd.f32 %v7776_v35, %v7775_v43 }
0x1e57   : > { %10690 = vtanh.f32 %v7777_v39 }
0x1e61   : > { %v10691_v8 = vpop.eup %10690 }
0x1e62   : > { %v7779_v15 = vmul.f32 %v10691_v8, %v10689_v5 }
0x1e64   : > { %8049 = vst [vmem:[%s11230_s23 + $0x38] sm:$0xff] %v7779_v15 }
0x1e65   : > { %10791 = shalt.err (!%p10788_p5)
}
0x1e66   : > { %s10792_s9 = scalar_lea.hbm %s13012_s29, 1024  ;;  %s10796_s17 = scalar_lea.hbm %s13062_s3, 2048 }
0x1e67   : > { %p10793_p11 = scmp.ne.s32.totalorder %s13012_s29, %s10792_s9  ;;  %p10797_p6 = scmp.lt.u32.totalorder %s13012_s29, %s13062_s3 }
0x1e68   : > { %p10798_p2 = scmp.lt.u32.totalorder %s10796_s17, %s10792_s9  ;;  %p10800_p7 = scmp.lt.u32.totalorder %s10792_s9, %s13012_s29 }
0x1e69   : > { %p10794_p12 = pnand %p10793_p11, %p13082_p9 }
0x1e6a   : > { %p10799_p13 = por %p10798_p2, %p10797_p6 }
0x1e6b   : > { %p10795_p3 = pneg %p10794_p12 }
0x1e6c   : > { %p10801_p10 = por %p10800_p7, %p10799_p13 }
0x1e6e   : > { %p10802_p1 = pnand %p10801_p10, %p10795_p3 }
0x1e70   : > { %10805 = shalt.err (!%p10802_p1)
}
0x1e71   : > { %s10862_s27 = smov 128   ;;  %s10863_s23 = smov 256  }
0x1e72   : > { %s10864_s26 = smov 8  }
0x1e73   : > { %10112 = dma.vmem_to_hbm [thread:$0]  (%p13082_p9), %s13014_s5, 1024, %s13012_s29, %s7782_s30, %s10862_s27, %s10863_s23, %s10864_s26  }
0x1e74 PF: > { %s7809_s11 = sand.u32 1, %s10836_s12   ;;  %p13083_p0 = scmp.ne.s32.totalorder %s13071_s25, 0 }
0x1e75   : > { %p13084_p4 = scmp.ge.s32.totalorder %s10848_s15, 2  ;;  %s7810_s28 = scalar_lea.sflag [#allocation4], %s7809_s11 }
0x1e77   : > { %p10126_p8 = pnand %p13084_p4, %p13083_p0 }
0x1e79   : > { %10831 = dma.done.wait (!%p10126_p8), %s7810_s28, 1024  }
0x1e7a   : > { %10833 = vsyncadd (!%p10126_p8), %s7810_s28, 4294966272  ;;  %p17_p5 = scmp.ge.s32.totalorder %s10910_s18, 4   ;;  %s13085_s12 = smov %s10840_s13 }
0x1e7b   : > { %s13086_s13 = smov %s10844_s14  ;;  %s13087_s14 = smov %s10922_s21 }
0x1e7c   : > { %s13088_s15 = smov %s10910_s18  ;;  %19 = sbr.rel (!%p17_p5) target bundleno = 6 (0x6), region = 105 }
0x1e83   :  { %7815 = vsyncpa [#allocation3], 1 }
0x1e84   :  { %7817 = vsyncpa [#allocation3 + $0x1], 1 }
0x1e85   :  { %7818 = vsyncpa [#allocation6], 1 }
0x1e86   :  { %7819 = vsyncpa [#allocation4], 1 }
0x1e87   :  { %7821 = vsyncpa [#allocation4 + $0x1], 1 }

</bundles_post_ra>
